<compile_context>
chip_gen: v5e
topology: v5e:2x2
jax: 0.10.0
libtpu: 0.0.40
codegen_flags: <defaults>
</compile_context>

<pallas_src>
import functools

import jax
import jax.numpy as jnp
from jax.experimental import pallas as pl
from jax.experimental.pallas import tpu as pltpu

LANE = 128


def dcdr_kernel(p_ref, w_ref, a_ref, o_ref):
    # p_ref: (TM, PACK*K_PAD)  packed im2col patches (PACK pixels per row)
    # w_ref: (PACK*K_PAD, C_LANE) block-diagonal, BN-scale-folded conv weights
    # a_ref: (TM, C_LANE)      additive term: folded BN offsets + affine skip
    # o_ref: (TM, C_LANE)      packed output (PACK pixels x c_grp channels)
    conv = jnp.dot(p_ref[...], w_ref[...],
                   preferred_element_type=jnp.float32,
                   precision=jax.lax.Precision.HIGHEST)
    # TODO(synk): Dropout2d(p=0.5) is implemented as eval-mode identity;
    # training-mode channel dropout is stochastic and not implemented.
    o_ref[...] = jnp.maximum(conv + a_ref[...], 0.0)


def dcdr_forward(x1, x2, weight_ct, conv_bias, gamma, beta, run_mean, run_var,
                 *, stride=2, padding=2, out_pad=0, eps=1e-5, tm=128):
    """DCDR forward: ConvTranspose2d + concat + BatchNorm2d(eval) + ReLU."""
    n, c_in, h, w = x1.shape
    ci_w, c_out, kh, kw = weight_ct.shape
    assert ci_w == c_in
    c_cat = 2 * c_out
    h_out = (h - 1) * stride - 2 * padding + kh + out_pad
    w_out = (w - 1) * stride - 2 * padding + kw + out_pad
    assert x2.shape == (n, c_out, h_out, w_out), (x2.shape,)
    assert kh - 1 - padding >= 0 and kw - 1 - padding >= 0

    f32 = jnp.float32

    # ---- pixel packing geometry: c_grp lanes per pixel, PACK pixels / row ----
    if c_cat <= LANE:
        c_grp = next(d for d in (1, 2, 4, 8, 16, 32, 64, 128) if d >= c_cat)
        pack = LANE // c_grp
    else:
        c_grp = ((c_cat + LANE - 1) // LANE) * LANE
        pack = 1
    c_lane = pack * c_grp                       # output lane width (>= 128)

    # ---- conv-transpose == stride-1 conv over dilated, edge-padded input ----
    pad_lo = kh - 1 - padding
    pad_hi = kh - 1 - padding + out_pad
    x_nhwc = jnp.transpose(x1, (0, 2, 3, 1)).astype(f32)
    h_dil, w_dil = (h - 1) * stride + 1, (w - 1) * stride + 1
    x_dil = jnp.zeros((n, h_dil, w_dil, c_in), f32)
    x_dil = x_dil.at[:, ::stride, ::stride, :].set(x_nhwc)
    x_dp = jnp.pad(x_dil, ((0, 0), (pad_lo, pad_hi), (pad_lo, pad_hi), (0, 0)))

    # im2col, tap-major (ki, kj, ci); batch folded into M.
    # TODO(synk): for large production shapes this HBM patches slab could be
    # assembled in-kernel from x_dp slices instead; kept in the wrapper here
    # where it is only ~1 MiB and robust.
    cols = [x_dp[:, ki:ki + h_out, kj:kj + w_out, :]
            for ki in range(kh) for kj in range(kw)]
    k_eff = kh * kw * c_in
    k_pad = max(LANE, ((k_eff + LANE - 1) // LANE) * LANE)
    m = n * h_out * w_out
    m8 = ((m + pack - 1) // pack) * pack        # pixels, padded to pack
    m_pk = m8 // pack                           # packed rows

    # Tile size: multiple of 8 sublanes; keep >= 2 grid steps when possible so
    # dimension_semantics=("parallel",) can shard across both v7x TensorCores.
    tm = max(8, (tm // 8) * 8)
    tm = min(tm, ((m_pk + 7) // 8) * 8)
    if m_pk >= 16:
        half = ((((m_pk + 1) // 2) + 7) // 8) * 8
        tm = min(tm, half)
    m_pk_pad = ((m_pk + tm - 1) // tm) * tm

    patches = jnp.concatenate(cols, axis=-1).reshape(m, k_eff)
    patches = jnp.pad(patches, ((0, m8 - m), (0, k_pad - k_eff)))
    patches = patches.reshape(m_pk, pack * k_pad)
    patches = jnp.pad(patches, ((0, m_pk_pad - m_pk), (0, 0)))

    # ---- weights: flip spatially, swap in/out channels, fold BN scale ----
    w_hwio = jnp.transpose(weight_ct[:, :, ::-1, ::-1], (2, 3, 0, 1)).astype(f32)
    w2 = w_hwio.reshape(k_eff, c_out)

    scale = gamma.astype(f32) / jnp.sqrt(run_var.astype(f32) + eps)
    sc_conv, sc_x2 = scale[:c_out], scale[c_out:]
    off_conv = ((conv_bias.astype(f32) - run_mean[:c_out].astype(f32)) * sc_conv
                + beta[:c_out].astype(f32))
    off_x2 = (-run_mean[c_out:].astype(f32)) * sc_x2 + beta[c_out:].astype(f32)

    w2s = w2 * sc_conv[None, :]                              # (k_eff, c_out)
    w_grp = jnp.pad(w2s, ((0, k_pad - k_eff), (0, c_grp - c_out)))
    # Block-diagonal replicate: pixel p's patch block only feeds pixel p's lanes.
    eye = jnp.eye(pack, dtype=f32)
    w_blk = (eye[:, None, :, None] * w_grp[None, :, None, :]).reshape(
        pack * k_pad, c_lane)

    # ---- additive tensor: BN offsets on conv lanes, affine skip on x2 lanes --
    x2_flat = jnp.transpose(x2, (0, 2, 3, 1)).astype(f32).reshape(m, c_out)
    add_full = jnp.concatenate(
        [jnp.broadcast_to(off_conv[None, :], (m, c_out)),
         x2_flat * sc_x2[None, :] + off_x2[None, :]], axis=-1)   # (m, c_cat)
    add_full = jnp.pad(add_full, ((0, m8 - m), (0, c_grp - c_cat)))
    add_pk = add_full.reshape(m_pk, c_lane)
    add_pk = jnp.pad(add_pk, ((0, m_pk_pad - m_pk), (0, 0)))

    # ---- pallas call ----
    grid = (m_pk_pad // tm,)
    # Double-buffered working set; only raise the scoped-VMEM limit if needed
    # (v5e's default is 16 MiB; v7x physical VMEM is 64 MiB, so cap headroom).
    vmem_bytes = 2 * 4 * (tm * pack * k_pad + pack * k_pad * c_lane
                          + 2 * tm * c_lane)
    cp_kwargs = dict(dimension_semantics=("parallel",))
    if vmem_bytes > (16 << 20):
        cp_kwargs["vmem_limit_bytes"] = min(vmem_bytes + (4 << 20), 48 << 20)

    out = pl.pallas_call(
        dcdr_kernel,
        out_shape=jax.ShapeDtypeStruct((m_pk_pad, c_lane), f32),
        grid_spec=pl.GridSpec(
            grid=grid,
            in_specs=[
                pl.BlockSpec((tm, pack * k_pad), lambda i: (i, 0)),
                pl.BlockSpec((pack * k_pad, c_lane), lambda i: (0, 0)),
                pl.BlockSpec((tm, c_lane), lambda i: (i, 0)),
            ],
            out_specs=pl.BlockSpec((tm, c_lane), lambda i: (i, 0)),
        ),
        compiler_params=pltpu.CompilerParams(**cp_kwargs),
    )(patches, w_blk, add_pk)

    # Unpack: (m_pk, pack*c_grp) -> (pixels, channels) -> NCHW.
    out = out[:m_pk].reshape(m8, c_grp)[:m, :c_cat]
    out = out.reshape(n, h_out, w_out, c_cat)
    return jnp.transpose(out, (0, 3, 1, 2))


def reference_forward(x1, x2, weight_ct, conv_bias, gamma, beta, run_mean,
                      run_var, *, stride=2, padding=2, out_pad=0, eps=1e-5):
    c_in, c_out, kh, kw = weight_ct.shape
    w_conv = jnp.transpose(weight_ct[:, :, ::-1, ::-1], (1, 0, 2, 3))
    pad_lo = kh - 1 - padding
    pad_hi = kh - 1 - padding + out_pad
    conv = jax.lax.conv_general_dilated(
        x1.astype(jnp.float32), w_conv.astype(jnp.float32),
        window_strides=(1, 1),
        padding=((pad_lo, pad_hi), (pad_lo, pad_hi)),
        lhs_dilation=(stride, stride),
        dimension_numbers=("NCHW", "OIHW", "NCHW"),
        precision=jax.lax.Precision.HIGHEST)
    conv = conv + conv_bias.reshape(1, -1, 1, 1)
    cat = jnp.concatenate([conv, x2.astype(jnp.float32)], axis=1)
    scale = (gamma / jnp.sqrt(run_var + eps)).reshape(1, -1, 1, 1)
    y = (cat - run_mean.reshape(1, -1, 1, 1)) * scale + beta.reshape(1, -1, 1, 1)
    return jnp.maximum(y, 0.0)


if __name__ == "__main__":
    # DCDR(in_channels=4, out_channels=8, kernel_size=5, out_pad=1):
    # x1 (2,4,16,16) -> conv_transpose (2,8,32,32); x2 skip (2,8,32,32).
    N, C_IN, H, W = 2, 4, 16, 16
    C_OUT, K, OUT_PAD = 8, 5, 1
    H_OUT = (H - 1) * 2 - 2 * 2 + K + OUT_PAD
    W_OUT = (W - 1) * 2 - 2 * 2 + K + OUT_PAD
    C_CAT = 2 * C_OUT

    key = jax.random.PRNGKey(0)
    k1, k2, kw_, kb, kg, kbe, km, kv = jax.random.split(key, 8)
    x1 = jax.random.normal(k1, (N, C_IN, H, W), dtype=jnp.float32)
    x2 = jax.random.normal(k2, (N, C_OUT, H_OUT, W_OUT), dtype=jnp.float32)
    fan = C_IN * K * K
    weight = jax.random.uniform(
        kw_, (C_IN, C_OUT, K, K), dtype=jnp.float32,
        minval=-1.0 / jnp.sqrt(fan), maxval=1.0 / jnp.sqrt(fan))
    bias = jax.random.uniform(
        kb, (C_OUT,), dtype=jnp.float32,
        minval=-1.0 / jnp.sqrt(fan), maxval=1.0 / jnp.sqrt(fan))
    gamma = jax.random.uniform(kg, (C_CAT,), jnp.float32, 0.5, 1.5)
    beta = 0.1 * jax.random.normal(kbe, (C_CAT,), jnp.float32)
    run_mean = 0.1 * jax.random.normal(km, (C_CAT,), jnp.float32)
    run_var = jax.random.uniform(kv, (C_CAT,), jnp.float32, 0.5, 1.5)

    fwd = jax.jit(functools.partial(
        dcdr_forward, stride=2, padding=2, out_pad=OUT_PAD))
    out = fwd(x1, x2, weight, bias, gamma, beta, run_mean, run_var)
    out = jax.block_until_ready(out)

    ref = reference_forward(x1, x2, weight, bias, gamma, beta, run_mean,
                            run_var, stride=2, padding=2, out_pad=OUT_PAD)
    assert out.shape == ref.shape, (out.shape, ref.shape)
    max_err = float(jnp.max(jnp.abs(out - ref)))
    assert jnp.allclose(out, ref, atol=1e-3, rtol=1e-3), max_err

    print("KERNEL_OK")
</pallas_src>

<mosaic_0001>
module attributes {stable_mosaic.version = 11 : i64} {
  func.func @dcdr_kernel(%arg0: i32, %arg1: memref<128x1024xf32, #tpu.memory_space<vmem>>, %arg2: memref<1024x128xf32, #tpu.memory_space<vmem>>, %arg3: memref<128x128xf32, #tpu.memory_space<vmem>>, %arg4: memref<128x128xf32, #tpu.memory_space<vmem>>) attributes {dimension_semantics = [#tpu.dimension_semantics<parallel>], iteration_bounds = array<i64: 2>, scalar_prefetch = 0 : i64, scratch_operands = 0 : i64, tpu.core_type = #tpu.core_type<tc>, window_params = [{transform_indices = @transform_0, window_bounds = array<i64: 128, 1024>}, {pipeline_mode = #tpu.pipeline_mode<synchronous>, transform_indices = @transform_1, window_bounds = array<i64: 1024, 128>}, {transform_indices = @transform_2, window_bounds = array<i64: 128, 128>}, {transform_indices = @transform_3, window_bounds = array<i64: 128, 128>}]} {
    %c0 = arith.constant 0 : index
    %c0_0 = arith.constant 0 : index
    %0 = vector.load %arg1[%c0, %c0_0] : memref<128x1024xf32, #tpu.memory_space<vmem>>, vector<128x1024xf32>
    %c0_1 = arith.constant 0 : index
    %c0_2 = arith.constant 0 : index
    %1 = vector.load %arg2[%c0_1, %c0_2] : memref<1024x128xf32, #tpu.memory_space<vmem>>, vector<1024x128xf32>
    %cst = arith.constant dense<0.000000e+00> : vector<128x128xf32>
    %2 = tpu.matmul %0, %1, %cst {dimension_numbers = #tpu.dot_dimension_numbers<[1], [0], [0], [1], [0, 0, 1, 1], [], []>, precision = #tpu.contract_precision<fp32>} : vector<128x1024xf32>, vector<1024x128xf32>, vector<128x128xf32> -> vector<128x128xf32>
    %c0_3 = arith.constant 0 : index
    %c0_4 = arith.constant 0 : index
    %3 = vector.load %arg3[%c0_3, %c0_4] : memref<128x128xf32, #tpu.memory_space<vmem>>, vector<128x128xf32>
    %4 = arith.addf %2, %3 : vector<128x128xf32>
    %cst_5 = arith.constant 0.000000e+00 : f32
    %5 = vector.broadcast %cst_5 : f32 to vector<128x128xf32>
    %6 = arith.maximumf %4, %5 : vector<128x128xf32>
    %c0_6 = arith.constant 0 : index
    %c0_7 = arith.constant 0 : index
    %7 = vector.load %arg4[%c0_6, %c0_7] : memref<128x128xf32, #tpu.memory_space<vmem>>, vector<128x128xf32>
    tpu.vector_store %arg4[%c0_6, %c0_7], %6 {strides = array<i32>} : memref<128x128xf32, #tpu.memory_space<vmem>>, vector<128x128xf32>,
    return
  }
  func.func @transform_0(%arg0: i32) -> (i32, i32) {
    %c0_i32 = arith.constant 0 : i32
    %c0_i32_0 = arith.constant 0 : i32
    return %arg0, %c0_i32 : i32, i32
  }
  func.func @transform_1(%arg0: i32) -> (i32, i32) {
    %c0_i32 = arith.constant 0 : i32
    %c0_i32_0 = arith.constant 0 : i32
    %c0_i32_1 = arith.constant 0 : i32
    return %c0_i32, %c0_i32_0 : i32, i32
  }
  func.func @transform_2(%arg0: i32) -> (i32, i32) {
    %c0_i32 = arith.constant 0 : i32
    %c0_i32_0 = arith.constant 0 : i32
    return %arg0, %c0_i32 : i32, i32
  }
  func.func @transform_3(%arg0: i32) -> (i32, i32) {
    %c0_i32 = arith.constant 0 : i32
    %c0_i32_0 = arith.constant 0 : i32
    return %arg0, %c0_i32 : i32, i32
  }
}

</mosaic_0001>

<bundles_post_ra>
// kernel: dcdr_forward.1
= control target key start
LH: loop header
LB: loop body
LE: loop exit
PB: predicated region body
PF: predicated region fallthrough
CT: control target
= control target key end

     0   :  { %s7070_s12 = smov 0   ;;  %s11670_s0 = inlined_call_operand.vmem [shape: f32[256,1024], index: 0, kind: input, shape index: {}]   ;;  %s11671_s1 = inlined_call_operand.vmem [shape: f32[1024,128], index: 1, kind: input, shape index: {}]   ;;  %s11672_s2 = inlined_call_operand.vmem [shape: f32[256,128], index: 2, kind: input, shape index: {}]   ;;  %s11673_s3 = inlined_call_operand.vmem [shape: f32[256,128], index: 3, kind: output, shape index: {}]  }
   0x1 LB: > { %s7019_s13 = sadd.s32 4294967295, %s7048_s12   ;;  %p7023_p0 = scmp.ge.s32.totalorder %s7048_s12, 1  ;;  %s7048_s12 = sphi %s7070_s12, %s13_s12  }
   0x2   : > { %p150_p1 = scmp.lt.s32.totalorder %s7048_s12, 3 }
   0x4   : > { %p151_p2 = pnand %p7023_p0, %p150_p1 }
   0x6   : > { %154 = sbr.rel (%p151_p2) target bundleno = 1717 (0x6b5), region = 32 }
   0xb   : > { %v342_v0 = vld [vmem:[%s11671_s1 + $0x78] sm:$0xff]  ;;  %v341_v1 = vld [vmem:[%s11671_s1 + $0x70] sm:$0xff]  ;;  %v340_v2 = vld [vmem:[%s11671_s1 + $0x68] sm:$0xff]  ;;  %s7087_s20 = sshll.u32 %s7019_s13, 4 }
   0xc   : > { %v7089_v3 = vand.u32 4294901760, %v342_v0  ;;  %v7091_v4 = vand.u32 4294901760, %v341_v1  ;;  %v7093_v5 = vand.u32 4294901760, %v340_v2  ;;  %v339_v6 = vld [vmem:[%s11671_s1 + $0x60] sm:$0xff]  ;;  %v338_v7 = vld [vmem:[%s11671_s1 + $0x58] sm:$0xff]  ;;  %v337_v8 = vld [vmem:[%s11671_s1 + $0x50] sm:$0xff] }
   0xd   : > { %v7104_v9 = vand.u32 4294901760, %v339_v6  ;;  %v7106_v10 = vand.u32 4294901760, %v338_v7  ;;  %v7108_v11 = vand.u32 4294901760, %v337_v8  ;;  %v336_v12 = vld [vmem:[%s11671_s1 + $0x48] sm:$0xff]  ;;  %v335_v13 = vld [vmem:[%s11671_s1 + $0x40] sm:$0xff]  ;;  %v334_v18 = vld [vmem:[%s11671_s1 + $0x38] sm:$0xff] }
   0xe   : > { %472 = vmatpush.msra.mxu0 %v7089_v3  ;;  %v7118_v14 = vsub.f32 %v342_v0, %v7089_v3  ;;  %v7121_v15 = vsub.f32 %v341_v1, %v7091_v4  ;;  %923 = vmatpush.msra.mxu3 %v7089_v3  ;;  %v7125_v16 = vsub.f32 %v340_v2, %v7093_v5  ;;  %v7127_v17 = vand.u32 4294901760, %v336_v12  ;;  %p181_p3 = scmp.lt.s32.totalorder %s7087_s20, 31  ;;  %v333_v26 = vld [vmem:[%s11671_s1 + $0x30] sm:$0xff]  ;;  %v332_v36 = vld [vmem:[%s11671_s1 + $0x28] sm:$0xff]  ;;  %v331_v41 = vld [vmem:[%s11671_s1 + $0x20] sm:$0xff] }
   0xf   : > { %v7134_v19 = vsub.f32 %v339_v6, %v7104_v9  ;;  %v7137_v20 = vsub.f32 %v338_v7, %v7106_v10  ;;  %v7140_v21 = vsub.f32 %v337_v8, %v7108_v11  ;;  %v7147_v25 = vand.u32 4294901760, %v335_v13  ;;  %v330_v49 = vld [vmem:[%s11671_s1 + $0x18] sm:$0xff]  ;;  %v329_v55 = vld [vmem:[%s11671_s1 + $0x10] sm:$0xff]  ;;  %v328_v60 = vld [vmem:[%s11671_s1 + $0x8] sm:$0xff] }
  0x10   : > { %474 = vmatpush.msra.mxu0 %v7091_v4  ;;  %795 = vmatpush.msra.mxu2 %v7118_v14  ;;  %v634_v22 = vand.u32 4294901760, %v7118_v14  ;;  %v11690_v23 = vand.u32 4294901760, %v7121_v15  ;;  %v11687_v24 = vand.u32 4294901760, %v7125_v16  ;;  %s12257_s20 = smov (!%p181_p3, %s7087_s20), 31  ;;  %v7157_v28 = vand.u32 4294901760, %v334_v18  ;;  %v358_v63 = vld [vmem:[%s11671_s1 + $0xf8] sm:$0xff] }
  0x11   : > { %925 = vmatpush.msra.mxu3 %v7091_v4  ;;  %v11684_v27 = vand.u32 4294901760, %v7134_v19  ;;  %v7160_v29 = vsub.f32 %v336_v12, %v7127_v17  ;;  %v11683_v33 = vand.u32 4294901760, %v7137_v20  ;;  %v7175_v34 = vand.u32 4294901760, %v333_v26  ;;  %s7033_s10 = sshll.u32 %s12257_s20, 6  ;;  %s7028_s7 = sshll.u32 %s12257_s20, 3 }
  0x12   : > { %476 = vmatpush.msra.mxu0 %v7093_v5  ;;  %798 = vmatpush.msra.mxu2 %v7121_v15  ;;  %v635_v30 = vsub.f32 %v7118_v14, %v634_v22  ;;  %v641_v31 = vsub.f32 %v7121_v15, %v11690_v23  ;;  %v647_v32 = vsub.f32 %v7125_v16, %v11687_v24  ;;  %v11681_v35 = vand.u32 4294901760, %v7140_v21  ;;  %s7207_s16 = scalar_lea.vmem %s11670_s0, %s7033_s10  ;;  %s7771_s10 = scalar_lea.vmem %s11672_s2, %s7028_s7 }
  0x13   : > { %927 = vmatpush.msra.mxu3 %v7093_v5  ;;  %v653_v39 = vsub.f32 %v7134_v19, %v11684_v27  ;;  %v7188_v40 = vsub.f32 %v335_v13, %v7147_v25  ;;  %v11680_v42 = vand.u32 4294901760, %v7160_v29  ;;  %v7196_v43 = vsub.f32 %v334_v18, %v7157_v28  ;;  %v199_v56 = vld [vmem:[%s7207_s16] sm:$0xff]  ;;  %s11634_s23 = scalar_lea.vmem %s11673_s3, %s7028_s7 }
  0x14   : > { %478 = vmatpush.msra.mxu0 %v7104_v9  ;;  %v636_v37 = vand.u32 4294901760, %v635_v30  ;;  %801 = vmatpush.msra.mxu2 %v7125_v16  ;;  %v642_v38 = vand.u32 4294901760, %v641_v31  ;;  %v648_v44 = vand.u32 4294901760, %v647_v32  ;;  %v659_v45 = vsub.f32 %v7137_v20, %v11683_v33  ;;  %v327_v13 = vld [vmem:[%s11671_s1] sm:$0xff] }
  0x15   : > { %929 = vmatpush.msra.mxu3 %v7104_v9  ;;  %v7202_v46 = vand.u32 4294901760, %v332_v36  ;;  %v665_v47 = vsub.f32 %v7140_v21, %v11681_v35  ;;  %v7214_v48 = vand.u32 4294901760, %v331_v41  ;;  %v654_v50 = vand.u32 4294901760, %v653_v39  ;;  %v207_v32 = vld [vmem:[%s7207_s16 + $0x40] sm:$0xff] }
  0x16   : > { %480 = vmatpush.msra.mxu0 %v7106_v10  ;;  %637 = vmatpush.msra.mxu1 %v636_v37  ;;  %v11678_v51 = vand.u32 4294901760, %v7188_v40  ;;  %v7222_v52 = vsub.f32 %v333_v26, %v7175_v34  ;;  %v671_v53 = vsub.f32 %v7160_v29, %v11680_v42  ;;  %v11677_v54 = vand.u32 4294901760, %v7196_v43  ;;  %v355_v42 = vld [vmem:[%s11671_s1 + $0xe0] sm:$0xff] }
  0x17   : > { %804 = vmatpush.msra.mxu2 %v7134_v19  ;;  %931 = vmatpush.msra.mxu3 %v7106_v10  ;;  %v660_v57 = vand.u32 4294901760, %v659_v45  ;;  %v7235_v58 = vand.u32 4294901760, %v330_v49  ;;  %v7238_v59 = vsub.f32 %v332_v36, %v7202_v46  ;;  %v666_v61 = vand.u32 4294901760, %v665_v47  ;;  %v357_v36 = vld [vmem:[%s11671_s1 + $0xf0] sm:$0xff] }
  0x18   : > { %482 = vmatpush.msra.mxu0 %v7108_v11  ;;  %643 = vmatpush.msra.mxu1 %v642_v38  ;;  %v7246_v62 = vsub.f32 %v331_v41, %v7214_v48  ;;  %v677_v0 = vsub.f32 %v7188_v40, %v11678_v51  ;;  %v7255_v1 = vand.u32 4294901760, %v329_v55  ;;  %v11676_v2 = vand.u32 4294901760, %v7222_v52 }
  0x19   : > { %807 = vmatpush.msra.mxu2 %v7137_v20  ;;  %933 = vmatpush.msra.mxu3 %v7108_v11  ;;  %v7258_v6 = vand.u32 4294901760, %v199_v56  ;;  %v672_v7 = vand.u32 4294901760, %v671_v53  ;;  %v683_v8 = vsub.f32 %v7196_v43, %v11677_v54  ;;  %v7265_v12 = vand.u32 4294901760, %v328_v60 }
  0x1a   : > { %484 = vmatpush.msra.mxu0 %v7127_v17  ;;  %649 = vmatpush.msra.mxu1 %v648_v44  ;;  %v11675_v18 = vand.u32 4294901760, %v7238_v59  ;;  %v7273_v26 = vsub.f32 %v330_v49, %v7235_v58  ;;  %v7278_v31 = vand.u32 4294901760, %v358_v63  ;;  %v11674_v37 = vand.u32 4294901760, %v7246_v62 }
  0x1b   : > { %810 = vmatpush.msra.mxu2 %v7140_v21  ;;  %935 = vmatpush.msra.mxu3 %v7127_v17  ;;  %v7276_v30 = vsub.f32 %v199_v56, %v7258_v6  ;;  %v678_v38 = vand.u32 4294901760, %v677_v0  ;;  %v689_v39 = vsub.f32 %v7222_v52, %v11676_v2  ;;  %v7291_v41 = vand.u32 4294901760, %v327_v13 }
  0x1c   : > { %486 = vmatpush.msra.mxu0 %v7147_v25  ;;  %655 = vmatpush.msra.mxu1 %v654_v50  ;;  %v7294_v44 = vsub.f32 %v329_v55, %v7255_v1  ;;  %v684_v45 = vand.u32 4294901760, %v683_v8  ;;  %v7299_v49 = vand.u32 4294901760, %v207_v32  ;;  %v7301_v50 = vand.u32 4294901760, %v357_v36 }
  0x1d   : > { %813 = vmatpush.msra.mxu2 %v7160_v29  ;;  %937 = vmatpush.msra.mxu3 %v7147_v25  ;;  %v505_v47 = vand.u32 4294901760, %v7276_v30  ;;  %v695_v53 = vsub.f32 %v7238_v59, %v11675_v18  ;;  %v11679_v55 = vand.u32 4294901760, %v7273_v26  ;;  %v7309_v56 = vsub.f32 %v328_v60, %v7265_v12 }
  0x1e   : > { %488 = vmatpush.msra.mxu0 %v7157_v28  ;;  %661 = vmatpush.msra.mxu1 %v660_v57  ;;  %v7312_v57 = vsub.f32 %v358_v63, %v7278_v31  ;;  %v701_v0 = vsub.f32 %v7246_v62, %v11674_v37  ;;  %v690_v60 = vand.u32 4294901760, %v689_v39  ;;  %v7325_v63 = vsub.f32 %v327_v13, %v7291_v41 }
  0x1f   : > { %816 = vmatpush.msra.mxu2 %v7188_v40  ;;  %939 = vmatpush.msra.mxu3 %v7157_v28  ;;  %v7328_v8 = vsub.f32 %v357_v36, %v7301_v50  ;;  %v506_v37 = vsub.f32 %v7276_v30, %v505_v47  ;;  %v7336_v18 = vsub.f32 %v207_v32, %v7299_v49  ;;  %v696_v13 = vand.u32 4294901760, %v695_v53 }
  0x20   : > { %490 = vmatpush.msra.mxu0 %v7175_v34  ;;  %667 = vmatpush.msra.mxu1 %v666_v61  ;;  %v356_v61 = vld [vmem:[%s11671_s1 + $0xe8] sm:$0xff]  ;;  %v707_v36 = vsub.f32 %v7273_v26, %v11679_v55  ;;  %v11685_v2 = vand.u32 4294901760, %v7309_v56  ;;  %v11686_v54 = vand.u32 4294901760, %v7312_v57  ;;  %v702_v51 = vand.u32 4294901760, %v701_v0 }
  0x21   : > { %819 = vmatpush.msra.mxu2 %v7196_v43  ;;  %941 = vmatpush.msra.mxu3 %v7175_v34  ;;  %v7339_v39 = vand.u32 4294901760, %v356_v61  ;;  %v11689_v53 = vand.u32 4294901760, %v7328_v8  ;;  %v507_v0 = vand.u32 4294901760, %v506_v37 }
  0x22   : > { %492 = vmatpush.msra.mxu0 %v7202_v46  ;;  %673 = vmatpush.msra.mxu1 %v672_v7  ;;  %v11682_v7 = vand.u32 4294901760, %v7294_v44  ;;  %v708_v33 = vand.u32 4294901760, %v707_v36  ;;  %v719_v27 = vsub.f32 %v7309_v56, %v11685_v2  ;;  %v1441_v37 = vsub.f32 %v7312_v57, %v11686_v54 }
  0x23   : > { %822 = vmatpush.msra.mxu2 %v7222_v52  ;;  %943 = vmatpush.msra.mxu3 %v7202_v46  ;;  %v7364_v35 = vsub.f32 %v356_v61, %v7339_v39  ;;  %v1447_v2 = vsub.f32 %v7328_v8, %v11689_v53 }
  0x24   : > { %494 = vmatpush.msra.mxu0 %v7214_v48  ;;  %679 = vmatpush.msra.mxu1 %v678_v38  ;;  %v215_v38 = vld [vmem:[%s7207_s16 + $0x80] sm:$0xff]  ;;  %v713_v32 = vsub.f32 %v7294_v44, %v11682_v7  ;;  %v7366_v7 = vand.u32 4294901760, %v355_v42 }
  0x25   : > { %825 = vmatpush.msra.mxu2 %v7238_v59  ;;  %945 = vmatpush.msra.mxu3 %v7214_v48  ;;  %v7355_v55 = vand.u32 4294901760, %v215_v38  ;;  %v1452_v24 = vand.u32 4294901760, %v7364_v35  ;;  %v1448_v53 = vand.u32 4294901760, %v1447_v2  ;;  %v11935_v2 = vand.u32 4294901760, %v7121_v15 }
  0x26   : > { %496 = vmatpush.msra.mxu0 %v7235_v58  ;;  %685 = vmatpush.msra.mxu1 %v684_v45  ;;  %v11688_v45 = vand.u32 4294901760, %v7325_v63  ;;  %v7378_v61 = vsub.f32 %v355_v42, %v7366_v7 }
  0x27   : > { %828 = vmatpush.msra.mxu2 %v7246_v62  ;;  %947 = vmatpush.msra.mxu3 %v7235_v58  ;;  %v7390_v42 = vsub.f32 %v215_v38, %v7355_v55 }
  0x28   : > { %498 = vmatpush.msra.mxu0 %v7255_v1  ;;  %691 = vmatpush.msra.mxu1 %v690_v60  ;;  %v513_v60 = vand.u32 4294901760, %v7336_v18  ;;  %v725_v36 = vsub.f32 %v7325_v63, %v11688_v45  ;;  %v1442_v45 = vand.u32 4294901760, %v1441_v37 }
  0x29   : > { %831 = vmatpush.msra.mxu2 %v7273_v26  ;;  %949 = vmatpush.msra.mxu3 %v7255_v1 }
  0x2a   : > { %500 = vmatpush.msra.mxu0 %v7265_v12  ;;  %697 = vmatpush.msra.mxu1 %v696_v13  ;;  %v714_v13 = vand.u32 4294901760, %v713_v32  ;;  %v514_v54 = vsub.f32 %v7336_v18, %v513_v60  ;;  %v720_v32 = vand.u32 4294901760, %v719_v27  ;;  %v726_v38 = vand.u32 4294901760, %v725_v36  ;;  %v354_v27 = vld [vmem:[%s11671_s1 + $0xd8] sm:$0xff]  ;;  %v231_v36 = vld [vmem:[%s7207_s16 + $0x100] sm:$0xff] }
  0x2b   : > { %834 = vmatpush.msra.mxu2 %v7294_v44  ;;  %951 = vmatpush.msra.mxu3 %v7265_v12  ;;  %v7412_v37 = vand.u32 4294901760, %v354_v27 }
  0x2c   : > { %502 = vmatpush.msra.mxu0 %v7291_v41  ;;  %703 = vmatpush.msra.mxu1 %v702_v51  ;;  %v223_v51 = vld [vmem:[%s7207_s16 + $0xc0] sm:$0xff] }
  0x2d   : > { %508 = vmatmul.f32.vlgmr.msra.gmra.mxu0 %v507_v0  ;;  %837 = vmatpush.msra.mxu2 %v7309_v56  ;;  %v1458_v0 = vand.u32 4294901760, %v7378_v61  ;;  %v7400_v23 = vand.u32 4294901760, %v223_v51 }
  0x2e   : > { %709 = vmatpush.msra.mxu1 %v708_v33  ;;  %953 = vmatpush.msra.mxu3 %v7291_v41  ;;  %v515_v33 = vand.u32 4294901760, %v514_v54 }
  0x2f   : > { %840 = vmatpush.msra.mxu2 %v7325_v63  ;;  %957 = vmatmul.f32.vlgmr.msra.gmra.mxu3 %v505_v47  ;;  %v521_v47 = vand.u32 4294901760, %v7390_v42  ;;  %v1459_v14 = vsub.f32 %v7378_v61, %v1458_v0 }
  0x30   : > { %715 = vmatpush.msra.mxu1 %v714_v13  ;;  %843 = vmatmul.f32.vlgmr.msra.gmra.mxu2 %v7276_v30  ;;  %v1453_v30 = vsub.f32 %v7364_v35, %v1452_v24  ;;  %v528_v13 = vsub.f32 %v223_v51, %v7400_v23 }
  0x31   : > { %1278 = vmatpush.msrb.mxu2 %v7278_v31  ;;  %1054 = vmatpush.msrb.mxu0 %v634_v22  ;;  %v7421_v22 = vsub.f32 %v354_v27, %v7412_v37  ;;  %v522_v54 = vsub.f32 %v7390_v42, %v521_v47 }
  0x32   : > { %721 = vmatpush.msra.mxu1 %v720_v32  ;;  %1443 = vmatpush.msrb.mxu3 %v1442_v45  ;;  %v1454_v45 = vand.u32 4294901760, %v1453_v30  ;;  %v11936_v32 = vand.u32 4294901760, %v7125_v16  ;;  %v529_v27 = vand.u32 4294901760, %v528_v13  ;;  %v7441_v16 = vand.u32 4294901760, %v231_v36 }
  0x33   : > { %1280 = vmatpush.msrb.mxu2 %v7301_v50  ;;  %1058 = vmatpush.msrb.mxu0 %v11935_v2  ;;  %v11701_v15 = vand.u32 4294901760, %v7421_v22  ;;  %v523_v51 = vand.u32 4294901760, %v522_v54  ;;  %v11938_v30 = vand.u32 4294901760, %v7137_v20  ;;  %v11939_v54 = vand.u32 4294901760, %v7140_v21 }
  0x34   : > { %727 = vmatpush.msra.mxu1 %v726_v38  ;;  %1449 = vmatpush.msrb.mxu3 %v1448_v53  ;;  %v1460_v53 = vand.u32 4294901760, %v1459_v14  ;;  %v530_v2 = vsub.f32 %v528_v13, %v529_v27 }
  0x35   : > { %516 = vmatmul.f32.gmra.mxu0 %v515_v33  ;;  %729 = vmatmul.f32.vlgmr.msra.gmra.mxu1 %v7258_v6  ;;  %v1465_v38 = vsub.f32 %v7421_v22, %v11701_v15 }
  0x36   : > { %1181 = vmatpush.msrb.mxu1 %v7089_v3  ;;  %1282 = vmatpush.msrb.mxu2 %v7339_v39  ;;  %v353_v3 = vld [vmem:[%s11671_s1 + $0xd0] sm:$0xff] }
  0x37   : > { %963 = vmatmul.f32.gmra.mxu3 %v513_v60  ;;  %1062 = vmatpush.msrb.mxu0 %v11936_v32  ;;  %v7443_v60 = vand.u32 4294901760, %v353_v3 }
  0x38   : > { %848 = vmatmul.f32.gmra.mxu2 %v7336_v18  ;;  %1183 = vmatpush.msrb.mxu1 %v7091_v4  ;;  %v11937_v18 = vand.u32 4294901760, %v7134_v19  ;;  %v1466_v4 = vand.u32 4294901760, %v1465_v38  ;;  %v239_v19 = vld [vmem:[%s7207_s16 + $0x140] sm:$0xff]  ;;  %v11941_v38 = vand.u32 4294901760, %v7188_v40 }
  0x39   : > { %1455 = vmatpush.msrb.mxu3 %v1454_v45  ;;  %1284 = vmatpush.msrb.mxu2 %v7366_v7  ;;  %v7450_v33 = vsub.f32 %v353_v3, %v7443_v60  ;;  %v7465_v20 = vand.u32 4294901760, %v239_v19  ;;  %v352_v45 = vld [vmem:[%s11671_s1 + $0xc8] sm:$0xff]  ;;  %v247_v3 = vld [vmem:[%s7207_s16 + $0x180] sm:$0xff] }
  0x3a   : > { %1185 = vmatpush.msrb.mxu1 %v7093_v5  ;;  %1066 = vmatpush.msrb.mxu0 %v11937_v18  ;;  %v536_v5 = vsub.f32 %v231_v36, %v7441_v16  ;;  %v531_v36 = vand.u32 4294901760, %v530_v2  ;;  %v7473_v32 = vand.u32 4294901760, %v352_v45  ;;  %v351_v18 = vld [vmem:[%s11671_s1 + $0xc0] sm:$0xff] }
  0x3b   : > { %1461 = vmatpush.msrb.mxu3 %v1460_v53  ;;  %1286 = vmatpush.msrb.mxu2 %v7412_v37  ;;  %v11700_v14 = vand.u32 4294901760, %v7450_v33  ;;  %v11940_v53 = vand.u32 4294901760, %v7160_v29 }
  0x3c   : > { %1187 = vmatpush.msrb.mxu1 %v7104_v9  ;;  %1070 = vmatpush.msrb.mxu0 %v11938_v30  ;;  %v7479_v21 = vsub.f32 %v352_v45, %v7473_v32  ;;  %v7498_v30 = vand.u32 4294901760, %v247_v3  ;;  %v11946_v45 = vand.u32 4294901760, %v7273_v26  ;;  %v11948_v26 = vand.u32 4294901760, %v7309_v56 }
  0x3d   : > { %524 = vmatmul.f32.gmra.mxu0 %v523_v51  ;;  %733 = vmatmul.f32.gmra.mxu1 %v7299_v49  ;;  %v1471_v9 = vsub.f32 %v7450_v33, %v11700_v14  ;;  %v11942_v51 = vand.u32 4294901760, %v7196_v43  ;;  %v7500_v43 = vand.u32 4294901760, %v351_v18 }
  0x3e   : > { %1467 = vmatpush.msrb.mxu3 %v1466_v4  ;;  %1189 = vmatpush.msrb.mxu1 %v7106_v10  ;;  %v537_v10 = vand.u32 4294901760, %v536_v5  ;;  %v11699_v29 = vand.u32 4294901760, %v7479_v21 }
  0x3f   : > { %969 = vmatmul.f32.gmra.mxu3 %v521_v47  ;;  %1288 = vmatpush.msrb.mxu2 %v7443_v60  ;;  %v1472_v47 = vand.u32 4294901760, %v1471_v9  ;;  %v11945_v9 = vand.u32 4294901760, %v7246_v62 }
  0x40   : > { %853 = vmatmul.f32.gmra.mxu2 %v7390_v42  ;;  %1074 = vmatpush.msrb.mxu0 %v11939_v54  ;;  %v544_v42 = vsub.f32 %v239_v19, %v7465_v20  ;;  %v350_v54 = vld [vmem:[%s11671_s1 + $0xb8] sm:$0xff] }
  0x41   : > { %1191 = vmatpush.msrb.mxu1 %v7108_v11  ;;  %1473 = vmatpush.msrb.mxu3 %v1472_v47  ;;  %v538_v11 = vsub.f32 %v536_v5, %v537_v10 }
  0x42   : > { %1078 = vmatpush.msrb.mxu0 %v11940_v53  ;;  %1290 = vmatpush.msrb.mxu2 %v7473_v32  ;;  %v545_v40 = vand.u32 4294901760, %v544_v42 }
  0x43   : > { %1193 = vmatpush.msrb.mxu1 %v7127_v17  ;;  %v1477_v17 = vsub.f32 %v7479_v21, %v11699_v29  ;;  %v539_v4 = vand.u32 4294901760, %v538_v11  ;;  %v11949_v11 = vand.u32 4294901760, %v7325_v63  ;;  %v319_v29 = vld [vmem:[%s7207_s16 + $0x3c0] sm:$0xff] }
  0x44   : > { %1082 = vmatpush.msrb.mxu0 %v11941_v38  ;;  %1292 = vmatpush.msrb.mxu2 %v7500_v43  ;;  %v546_v2 = vsub.f32 %v544_v42, %v545_v40  ;;  %v263_v38 = vld [vmem:[%s7207_s16 + $0x200] sm:$0xff]  ;;  %v7714_v15 = vand.u32 4294901760, %v319_v29 }
  0x45   : > { %532 = vmatmul.f32.gmra.mxu0 %v531_v36  ;;  %737 = vmatmul.f32.gmra.mxu1 %v7355_v55  ;;  %v7552_v56 = vand.u32 4294901760, %v263_v38 }
  0x46   : > { %1195 = vmatpush.msrb.mxu1 %v7147_v25  ;;  %1086 = vmatpush.msrb.mxu0 %v11942_v51  ;;  %v1478_v25 = vand.u32 4294901760, %v1477_v17 }
  0x47   : > { %975 = vmatmul.f32.gmra.mxu3 %v529_v27  ;;  %v11943_v27 = vand.u32 4294901760, %v7222_v52  ;;  %v552_v52 = vsub.f32 %v247_v3, %v7498_v30  ;;  %v349_v3 = vld [vmem:[%s11671_s1 + $0xb0] sm:$0xff] }
  0x48   : > { %858 = vmatmul.f32.gmra.mxu2 %v528_v13  ;;  %1197 = vmatpush.msrb.mxu1 %v7157_v28  ;;  %v7507_v13 = vsub.f32 %v351_v18, %v7500_v43  ;;  %v11944_v28 = vand.u32 4294901760, %v7238_v59  ;;  %v7558_v17 = vand.u32 4294901760, %v349_v3 }
  0x49   : > { %1090 = vmatpush.msrb.mxu0 %v11943_v27  ;;  %1479 = vmatpush.msrb.mxu3 %v1478_v25  ;;  %v553_v36 = vand.u32 4294901760, %v552_v52 }
  0x4a   : > { %1199 = vmatpush.msrb.mxu1 %v7175_v34  ;;  %v11697_v19 = vand.u32 4294901760, %v7507_v13  ;;  %v255_v34 = vld [vmem:[%s7207_s16 + $0x1c0] sm:$0xff] }
  0x4b   : > { %1094 = vmatpush.msrb.mxu0 %v11944_v28  ;;  %v7527_v62 = vand.u32 4294901760, %v255_v34  ;;  %v554_v53 = vsub.f32 %v552_v52, %v553_v36 }
  0x4c   : > { %1201 = vmatpush.msrb.mxu1 %v7202_v46  ;;  %v1483_v59 = vsub.f32 %v7507_v13, %v11697_v19  ;;  %v547_v46 = vand.u32 4294901760, %v546_v2  ;;  %v348_v2 = vld [vmem:[%s11671_s1 + $0xa8] sm:$0xff] }
  0x4d   : > { %540 = vmatmul.f32.gmra.mxu0 %v539_v4  ;;  %741 = vmatmul.f32.gmra.mxu1 %v7400_v23  ;;  %v271_v4 = vld [vmem:[%s7207_s16 + $0x240] sm:$0xff] }
  0x4e   : > { %1098 = vmatpush.msrb.mxu0 %v11945_v9  ;;  %1203 = vmatpush.msrb.mxu1 %v7214_v48  ;;  %v1484_v47 = vand.u32 4294901760, %v1483_v59  ;;  %v7529_v48 = vand.u32 4294901760, %v350_v54  ;;  %v7583_v59 = vand.u32 4294901760, %v348_v2 }
  0x4f   : > { %981 = vmatmul.f32.gmra.mxu3 %v537_v10  ;;  %v11947_v10 = vand.u32 4294901760, %v7294_v44 }
  0x50   : > { %863 = vmatmul.f32.gmra.mxu2 %v536_v5  ;;  %1102 = vmatpush.msrb.mxu0 %v11946_v45  ;;  %v7536_v5 = vsub.f32 %v350_v54, %v7529_v48 }
  0x51   : > { %1205 = vmatpush.msrb.mxu1 %v7235_v58  ;;  %1485 = vmatpush.msrb.mxu3 %v1484_v47  ;;  %v560_v58 = vsub.f32 %v255_v34, %v7527_v62  ;;  %v7581_v34 = vand.u32 4294901760, %v271_v4 }
  0x52   : > { %1106 = vmatpush.msrb.mxu0 %v11947_v10  ;;  %1294 = vmatpush.msrb.mxu2 %v7529_v48  ;;  %v11696_v44 = vand.u32 4294901760, %v7536_v5 }
  0x53   : > { %1207 = vmatpush.msrb.mxu1 %v7255_v1  ;;  %v561_v63 = vand.u32 4294901760, %v560_v58  ;;  %v576_v54 = vsub.f32 %v271_v4, %v7581_v34 }
  0x54   : > { %1110 = vmatpush.msrb.mxu0 %v11948_v26  ;;  %v1489_v1 = vsub.f32 %v7536_v5, %v11696_v44  ;;  %1296 = vmatpush.msrb.mxu2 %v7558_v17  ;;  %v347_v26 = vld [vmem:[%s11671_s1 + $0xa0] sm:$0xff] }
  0x55   : > { %548 = vmatmul.f32.gmra.mxu0 %v547_v46  ;;  %745 = vmatmul.f32.gmra.mxu1 %v7441_v16 }
  0x56   : > { %1209 = vmatpush.msrb.mxu1 %v7265_v12  ;;  %1114 = vmatpush.msrb.mxu0 %v11949_v11  ;;  %v555_v12 = vand.u32 4294901760, %v554_v53  ;;  %v1490_v51 = vand.u32 4294901760, %v1489_v1  ;;  %v577_v53 = vand.u32 4294901760, %v576_v54  ;;  %v7608_v1 = vand.u32 4294901760, %v347_v26 }
  0x57   : > { %987 = vmatmul.f32.gmra.mxu3 %v545_v40  ;;  %v568_v40 = vsub.f32 %v263_v38, %v7552_v56  ;;  %1298 = vmatpush.msrb.mxu2 %v7583_v59 }
  0x58   : > { %1601 = vmatpush.msra.mxu0 %v7312_v57  ;;  %868 = vmatmul.f32.gmra.mxu2 %v544_v42  ;;  %v7564_v42 = vsub.f32 %v349_v3, %v7558_v17  ;;  %v578_v3 = vsub.f32 %v576_v54, %v577_v53 }
  0x59   : > { %1211 = vmatpush.msrb.mxu1 %v7291_v41  ;;  %1491 = vmatpush.msrb.mxu3 %v1490_v51  ;;  %v562_v41 = vsub.f32 %v560_v58, %v561_v63  ;;  %v569_v27 = vand.u32 4294901760, %v568_v40 }
  0x5a   : > { %1604 = vmatpush.msra.mxu0 %v7328_v8  ;;  %v11695_v18 = vand.u32 4294901760, %v7564_v42  ;;  %1300 = vmatpush.msrb.mxu2 %v7608_v1 }
  0x5b   : > { %1729 = vmatpush.msra.mxu1 %v7278_v31  ;;  %v563_v28 = vand.u32 4294901760, %v562_v41  ;;  %v570_v46 = vsub.f32 %v568_v40, %v569_v27 }
  0x5c   : > { %1607 = vmatpush.msra.mxu0 %v7364_v35  ;;  %v1495_v25 = vsub.f32 %v7564_v42, %v11695_v18  ;;  %v311_v18 = vld [vmem:[%s7207_s16 + $0x380] sm:$0xff] }
  0x5d   : > { %1731 = vmatpush.msra.mxu1 %v7301_v50  ;;  %556 = vmatmul.f32.gmra.mxu0 %v555_v12  ;;  %v571_v10 = vand.u32 4294901760, %v570_v46  ;;  %v7695_v44 = vand.u32 4294901760, %v311_v18 }
  0x5e   : > { %749 = vmatmul.f32.gmra.mxu1 %v7465_v20  ;;  %1610 = vmatpush.msra.mxu0 %v7378_v61  ;;  %v1496_v9 = vand.u32 4294901760, %v1495_v25  ;;  %v346_v25 = vld [vmem:[%s11671_s1 + $0x98] sm:$0xff]  ;;  %v11953_v61 = vand.u32 4294901760, %v7450_v33 }
  0x5f   : > { %1733 = vmatpush.msra.mxu1 %v7339_v39  ;;  %993 = vmatmul.f32.gmra.mxu3 %v553_v36  ;;  %v279_v36 = vld [vmem:[%s7207_s16 + $0x280] sm:$0xff]  ;;  %v7633_v46 = vand.u32 4294901760, %v346_v25 }
  0x60   : > { %873 = vmatmul.f32.gmra.mxu2 %v552_v52  ;;  %1613 = vmatpush.msra.mxu0 %v7421_v22  ;;  %v7589_v52 = vsub.f32 %v348_v2, %v7583_v59  ;;  %v7606_v38 = vand.u32 4294901760, %v279_v36  ;;  %v579_v2 = vand.u32 4294901760, %v578_v3  ;;  %v345_v3 = vld [vmem:[%s11671_s1 + $0x90] sm:$0xff] }
  0x61   : > { %1735 = vmatpush.msra.mxu1 %v7366_v7  ;;  %1497 = vmatpush.msrb.mxu3 %v1496_v9 }
  0x62   : > { %1616 = vmatpush.msra.mxu0 %v7450_v33  ;;  %v11693_v45 = vand.u32 4294901760, %v7589_v52  ;;  %v584_v12 = vsub.f32 %v279_v36, %v7606_v38  ;;  %1302 = vmatpush.msrb.mxu2 %v7633_v46 }
  0x63   : > { %1737 = vmatpush.msra.mxu1 %v7412_v37 }
  0x64   : > { %1619 = vmatpush.msra.mxu0 %v7479_v21  ;;  %v1501_v47 = vsub.f32 %v7589_v52, %v11693_v45 }
  0x65   : > { %1739 = vmatpush.msra.mxu1 %v7443_v60  ;;  %564 = vmatmul.f32.gmra.mxu0 %v563_v28  ;;  %v585_v28 = vand.u32 4294901760, %v584_v12 }
  0x66   : > { %753 = vmatmul.f32.gmra.mxu1 %v7498_v30  ;;  %1622 = vmatpush.msra.mxu0 %v7507_v13  ;;  %v1502_v11 = vand.u32 4294901760, %v1501_v47 }
  0x67   : > { %1741 = vmatpush.msra.mxu1 %v7473_v32  ;;  %999 = vmatmul.f32.gmra.mxu3 %v561_v63  ;;  %v287_v63 = vld [vmem:[%s7207_s16 + $0x2c0] sm:$0xff]  ;;  %v586_v36 = vsub.f32 %v584_v12, %v585_v28 }
  0x68   : > { %878 = vmatmul.f32.gmra.mxu2 %v560_v58  ;;  %1625 = vmatpush.msra.mxu0 %v7536_v5  ;;  %v7614_v58 = vsub.f32 %v347_v26, %v7608_v1  ;;  %v7627_v4 = vand.u32 4294901760, %v287_v63 }
  0x69   : > { %1743 = vmatpush.msra.mxu1 %v7500_v43  ;;  %1503 = vmatpush.msrb.mxu3 %v1502_v11 }
  0x6a   : > { %1628 = vmatpush.msra.mxu0 %v7564_v42  ;;  %v11692_v51 = vand.u32 4294901760, %v7614_v58 }
  0x6b   : > { %1745 = vmatpush.msra.mxu1 %v7529_v48 }
  0x6c   : > { %1631 = vmatpush.msra.mxu0 %v7589_v52  ;;  %v1507_v41 = vsub.f32 %v7614_v58, %v11692_v51 }
  0x6d   : > { %572 = vmatmul.f32.gmra.mxu0 %v571_v10  ;;  %1747 = vmatpush.msra.mxu1 %v7558_v17  ;;  %v295_v10 = vld [vmem:[%s7207_s16 + $0x300] sm:$0xff] }
  0x6e   : > { %757 = vmatmul.f32.gmra.mxu1 %v7527_v62  ;;  %v1508_v9 = vand.u32 4294901760, %v1507_v41  ;;  %1634 = vmatpush.msra.mxu0 %v7614_v58  ;;  %v7653_v41 = vand.u32 4294901760, %v295_v10 }
  0x6f   : > { %1005 = vmatmul.f32.gmra.mxu3 %v569_v27  ;;  %1749 = vmatpush.msra.mxu1 %v7583_v59  ;;  %v592_v27 = vsub.f32 %v287_v63, %v7627_v4  ;;  %v587_v63 = vand.u32 4294901760, %v586_v36 }
  0x70   : > { %883 = vmatmul.f32.gmra.mxu2 %v568_v40  ;;  %1509 = vmatpush.msrb.mxu3 %v1508_v9  ;;  %v7639_v40 = vsub.f32 %v346_v25, %v7633_v46 }
  0x71   : > { %1751 = vmatpush.msra.mxu1 %v7608_v1  ;;  %v593_v11 = vand.u32 4294901760, %v592_v27 }
  0x72   : > { %v11691_v47 = vand.u32 4294901760, %v7639_v40  ;;  %1637 = vmatpush.msra.mxu0 %v7639_v40 }
  0x73   : > { %1753 = vmatpush.msra.mxu1 %v7633_v46  ;;  %v594_v9 = vsub.f32 %v592_v27, %v593_v11 }
  0x74   : > { %v1513_v26 = vsub.f32 %v7639_v40, %v11691_v47  ;;  %v303_v47 = vld [vmem:[%s7207_s16 + $0x340] sm:$0xff] }
  0x75   : > { %580 = vmatmul.f32.gmra.mxu0 %v579_v2  ;;  %v7655_v2 = vand.u32 4294901760, %v345_v3  ;;  %v7673_v51 = vand.u32 4294901760, %v303_v47 }
  0x76   : > { %761 = vmatmul.f32.gmra.mxu1 %v7552_v56  ;;  %v1514_v25 = vand.u32 4294901760, %v1513_v26 }
  0x77   : > { %1011 = vmatmul.f32.gmra.mxu3 %v577_v53  ;;  %1304 = vmatpush.msrb.mxu2 %v7655_v2  ;;  %v7659_v53 = vsub.f32 %v345_v3, %v7655_v2  ;;  %v595_v3 = vand.u32 4294901760, %v594_v9  ;;  %v608_v9 = vsub.f32 %v303_v47, %v7673_v51 }
  0x78   : > { %888 = vmatmul.f32.gmra.mxu2 %v576_v54  ;;  %1515 = vmatpush.msrb.mxu3 %v1514_v25  ;;  %v600_v54 = vsub.f32 %v295_v10, %v7653_v41 }
  0x79   : > { %1755 = vmatpush.msra.mxu1 %v7655_v2  ;;  %v11694_v36 = vand.u32 4294901760, %v7659_v53  ;;  %1640 = vmatpush.msra.mxu0 %v7659_v53  ;;  %v609_v47 = vand.u32 4294901760, %v608_v9 }
  0x7a   : > { %v601_v25 = vand.u32 4294901760, %v600_v54 }
  0x7b   : > { %v1519_v26 = vsub.f32 %v7659_v53, %v11694_v36 }
  0x7d   : > { %588 = vmatmul.f32.gmra.mxu0 %v587_v63  ;;  %v344_v63 = vld [vmem:[%s11671_s1 + $0x88] sm:$0xff]  ;;  %v1520_v10 = vand.u32 4294901760, %v1519_v26 }
  0x7e   : > { %765 = vmatmul.f32.gmra.mxu1 %v7581_v34  ;;  %v7675_v45 = vand.u32 4294901760, %v344_v63 }
  0x7f   : > { %1017 = vmatmul.f32.gmra.mxu3 %v585_v28 }
  0x80   : > { %893 = vmatmul.f32.gmra.mxu2 %v584_v12  ;;  %1521 = vmatpush.msrb.mxu3 %v1520_v10  ;;  %v7679_v28 = vsub.f32 %v344_v63, %v7675_v45  ;;  %v602_v12 = vsub.f32 %v600_v54, %v601_v25  ;;  %v343_v63 = vld [vmem:[%s11671_s1 + $0x80] sm:$0xff] }
  0x81   : > { %1306 = vmatpush.msrb.mxu2 %v7675_v45  ;;  %1757 = vmatpush.msra.mxu1 %v7675_v45 }
  0x82   : > { %v11698_v36 = vand.u32 4294901760, %v7679_v28  ;;  %1643 = vmatpush.msra.mxu0 %v7679_v28  ;;  %v603_v10 = vand.u32 4294901760, %v602_v12  ;;  %v610_v12 = vsub.f32 %v608_v9, %v609_v47 }
  0x84   : > { %v1525_v26 = vsub.f32 %v7679_v28, %v11698_v36  ;;  %v11950_v36 = vand.u32 4294901760, %v7312_v57 }
  0x85   : > { %596 = vmatmul.f32.gmra.mxu0 %v595_v3  ;;  %v7693_v3 = vand.u32 4294901760, %v343_v63 }
  0x86   : > { %769 = vmatmul.f32.gmra.mxu1 %v7606_v38  ;;  %v1526_v19 = vand.u32 4294901760, %v1525_v26  ;;  %v616_v26 = vsub.f32 %v311_v18, %v7695_v44  ;;  %v624_v18 = vsub.f32 %v319_v29, %v7714_v15 }
  0x87   : > { %1023 = vmatmul.f32.gmra.mxu3 %v593_v11  ;;  %1308 = vmatpush.msrb.mxu2 %v7693_v3  ;;  %v7699_v11 = vsub.f32 %v343_v63, %v7693_v3 }
  0x88   : > { %898 = vmatmul.f32.gmra.mxu2 %v592_v27  ;;  %1759 = vmatpush.msra.mxu1 %v7693_v3  ;;  %v617_v14 = vand.u32 4294901760, %v616_v26  ;;  %v625_v35 = vand.u32 4294901760, %v624_v18 }
  0x89   : > { %1527 = vmatpush.msrb.mxu3 %v1526_v19  ;;  %1860 = vmatpush.msra.mxu2 %v11950_v36  ;;  %v1530_v27 = vand.u32 4294901760, %v7699_v11  ;;  %v11951_v19 = vand.u32 4294901760, %v7328_v8  ;;  %v611_v36 = vand.u32 4294901760, %v610_v12 }
  0x8a   : > { %1646 = vmatpush.msra.mxu0 %v7699_v11  ;;  %v618_v8 = vsub.f32 %v616_v26, %v617_v14 }
  0x8b   : > { %v1531_v63 = vsub.f32 %v7699_v11, %v1530_v27  ;;  %1864 = vmatpush.msra.mxu2 %v11951_v19  ;;  %v456_v19 = vld [vmem:[%s7771_s10 + $0x8] sm:$0xff] }
  0x8d   : > { %604 = vmatmul.f32.gmra.mxu0 %v603_v10  ;;  %v1532_v57 = vand.u32 4294901760, %v1531_v63  ;;  %1868 = vmatpush.msra.mxu2 %v1452_v24  ;;  %v619_v24 = vand.u32 4294901760, %v618_v8  ;;  %v224_v10 = vld [vmem:[%s7207_s16 + $0xc8] sm:$0xff] }
  0x8e   : > { %773 = vmatmul.f32.gmra.mxu1 %v7627_v4 }
  0x8f   : > { %1029 = vmatmul.f32.gmra.mxu3 %v601_v25  ;;  %1872 = vmatpush.msra.mxu2 %v1458_v0  ;;  %v11954_v0 = vand.u32 4294901760, %v7479_v21  ;;  %v208_v21 = vld [vmem:[%s7207_s16 + $0x48] sm:$0xff] }
  0x90   : > { %903 = vmatmul.f32.gmra.mxu2 %v600_v54  ;;  %1533 = vmatpush.msrb.mxu3 %v1532_v57  ;;  %v11952_v54 = vand.u32 4294901760, %v7421_v22  ;;  %v11955_v22 = vand.u32 4294901760, %v7507_v13  ;;  %v7751_v29 = vand.u32 4294901760, %v208_v21 }
  0x92   : > { %1987 = vmatpush.msra.mxu3 %v7278_v31  ;;  %1876 = vmatpush.msra.mxu2 %v11952_v54  ;;  %v200_v31 = vld [vmem:[%s7207_s16 + $0x8] sm:$0xff]  ;;  %v7763_v13 = vsub.f32 %v208_v21, %v7751_v29 }
  0x94   : > { %1989 = vmatpush.msra.mxu3 %v7301_v50  ;;  %1880 = vmatpush.msra.mxu2 %v11953_v61  ;;  %v7733_v50 = vand.u32 4294901760, %v200_v31  ;;  %v11714_v25 = vand.u32 4294901760, %v7763_v13  ;;  %v457_v61 = vld [vmem:[%s7771_s10 + $0x10] sm:$0xff] }
  0x95   : > { %612 = vmatmul.f32.gmra.mxu0 %v611_v36 }
  0x96   : > { %777 = vmatmul.f32.gmra.mxu1 %v7653_v41  ;;  %1991 = vmatpush.msra.mxu3 %v7339_v39  ;;  %v626_v39 = vsub.f32 %v624_v18, %v625_v35 }
  0x97   : > { %1035 = vmatmul.f32.gmra.mxu3 %v609_v47  ;;  %1884 = vmatpush.msra.mxu2 %v11954_v0 }
  0x98   : > { %908 = vmatmul.f32.gmra.mxu2 %v608_v9  ;;  %1993 = vmatpush.msra.mxu3 %v7366_v7  ;;  %v7741_v7 = vsub.f32 %v200_v31, %v7733_v50  ;;  %v627_v33 = vand.u32 4294901760, %v626_v39 }
  0x99   : > { %1888 = vmatpush.msra.mxu2 %v11955_v22 }
  0x9a   : > { %1995 = vmatpush.msra.mxu3 %v7412_v37  ;;  %v11956_v37 = vand.u32 4294901760, %v7536_v5  ;;  %v11959_v5 = vand.u32 4294901760, %v7614_v58  ;;  %v11961_v58 = vand.u32 4294901760, %v7659_v53  ;;  %v11962_v53 = vand.u32 4294901760, %v7679_v28 }
  0x9c   : > { %1997 = vmatpush.msra.mxu3 %v7443_v60  ;;  %1892 = vmatpush.msra.mxu2 %v11956_v37  ;;  %v11957_v60 = vand.u32 4294901760, %v7564_v42  ;;  %v11960_v42 = vand.u32 4294901760, %v7639_v40  ;;  %v1320_v40 = vsub.f32 %v7763_v13, %v11714_v25 }
  0x9d   : > { %620 = vmatmul.f32.gmra.mxu0 %v619_v24 }
  0x9e   : > { %781 = vmatmul.f32.gmra.mxu1 %v7673_v51  ;;  %1999 = vmatpush.msra.mxu3 %v7473_v32  ;;  %v11958_v32 = vand.u32 4294901760, %v7589_v52  ;;  %v455_v52 = vld [vmem:[%s7771_s10] sm:$0xff]  ;;  %v1321_v57 = vand.u32 4294901760, %v1320_v40 }
  0x9f   : > { %1041 = vmatmul.f32.gmra.mxu3 %v617_v14  ;;  %1896 = vmatpush.msra.mxu2 %v11957_v60  ;;  %v11715_v14 = vand.u32 4294901760, %v7741_v7 }
  0xa0   : > { %913 = vmatmul.f32.gmra.mxu2 %v616_v26  ;;  %2001 = vmatpush.msra.mxu3 %v7500_v43 }
  0xa1   : > { %1900 = vmatpush.msra.mxu2 %v11958_v32  ;;  %v1312_v43 = vsub.f32 %v7741_v7, %v11715_v14 }
  0xa2   : > { %2003 = vmatpush.msra.mxu3 %v7529_v48  ;;  %v216_v48 = vld [vmem:[%s7207_s16 + $0x88] sm:$0xff] }
  0xa3   : > { %1904 = vmatpush.msra.mxu2 %v11959_v5  ;;  %v7781_v9 = vand.u32 4294901760, %v216_v48 }
  0xa4   : > { %2005 = vmatpush.msra.mxu3 %v7558_v17 }
  0xa5   : > { %628 = vmatmul.f32.gmra.mxu0 %v627_v33  ;;  %1908 = vmatpush.msra.mxu2 %v11960_v42 }
  0xa6   : > { %785 = vmatmul.f32.gmra.mxu1 %v7695_v44  ;;  %2007 = vmatpush.msra.mxu3 %v7583_v59  ;;  %v1313_v59 = vand.u32 4294901760, %v1312_v43  ;;  %v240_v43 = vld [vmem:[%s7207_s16 + $0x148] sm:$0xff] }
  0xa7   : > { %1047 = vmatmul.f32.gmra.mxu3 %v625_v35  ;;  %1912 = vmatpush.msra.mxu2 %v11961_v58 }
  0xa8   : > { %918 = vmatmul.f32.gmra.mxu2 %v624_v18  ;;  %2009 = vmatpush.msra.mxu3 %v7608_v1  ;;  %v232_v18 = vld [vmem:[%s7207_s16 + $0x108] sm:$0xff] }
  0xa9   : > { %1916 = vmatpush.msra.mxu2 %v11962_v53  ;;  %v7821_v22 = vand.u32 4294901760, %v232_v18 }
  0xaa   : > { %v509_v17 = vpop.f32.mrf.mxu0  ;;  %2011 = vmatpush.msra.mxu3 %v7633_v46  ;;  %v7794_v46 = vsub.f32 %v216_v48, %v7781_v9 }
  0xab   : > { %v510_v1 = vadd.f32 %v509_v17, %v455_v52  ;;  %1920 = vmatpush.msra.mxu2 %v1530_v27  ;;  %v7832_v32 = vsub.f32 %v232_v18, %v7821_v22  ;;  %v458_v52 = vld [vmem:[%s7771_s10 + $0x18] sm:$0xff] }
  0xac   : > { %2013 = vmatpush.msra.mxu3 %v7655_v2  ;;  %v11713_v36 = vand.u32 4294901760, %v7794_v46 }
  0xad   : > { %1116 = vmatmul.f32.vlgmr.msrb.gmra.mxu0 %v7258_v6  ;;  %v11711_v58 = vand.u32 4294901760, %v7832_v32 }
  0xae   : > { %789 = vmatmul.f32.gmra.mxu1 %v7714_v15  ;;  %2015 = vmatpush.msra.mxu3 %v7675_v45  ;;  %v7805_v45 = vand.u32 4294901760, %v224_v10  ;;  %v1328_v11 = vsub.f32 %v7794_v46, %v11713_v36 }
  0xaf   : > { %1535 = vmatmul.f32.vlgmr.msrb.gmra.mxu3 %v7733_v50 }
  0xb0   : > { %1314 = vmatmul.f32.vlgmr.msrb.gmra.mxu2 %v1313_v59  ;;  %2017 = vmatpush.msra.mxu3 %v7693_v3  ;;  %v7816_v27 = vsub.f32 %v224_v10, %v7805_v45  ;;  %v1329_v0 = vand.u32 4294901760, %v1328_v11 }
  0xb2   : > { %v517_v47 = vpop.f32.mrf.mxu0  ;;  %v730_v2 = vpop.f32.mrf.mxu1  ;;  %v11712_v39 = vand.u32 4294901760, %v7816_v27 }
  0xb3   : > { %v731_v12 = vadd.f32 %v730_v2, %v510_v1  ;;  %v844_v26 = vpop.f32.mrf.mxu2  ;;  %v958_v63 = vpop.f32.mrf.mxu3  ;;  %v518_v3 = vadd.f32 %v517_v47, %v456_v19  ;;  %v7837_v1 = vand.u32 4294901760, %v240_v43  ;;  %v1344_v47 = vsub.f32 %v7832_v32, %v11711_v58 }
  0xb4   : > { %v1336_v60 = vsub.f32 %v7816_v27, %v11712_v39 }
  0xb5   : > { %v845_v28 = vadd.f32 %v844_v26, %v731_v12  ;;  %1120 = vmatmul.f32.gmra.mxu0 %v7299_v49  ;;  %v7848_v2 = vsub.f32 %v240_v43, %v7837_v1  ;;  %v248_v12 = vld [vmem:[%s7207_s16 + $0x188] sm:$0xff] }
  0xb6   : > { %1213 = vmatmul.f32.vlgmr.msrb.gmra.mxu1 %v7258_v6  ;;  %v1337_v59 = vand.u32 4294901760, %v1336_v60  ;;  %v7853_v18 = vand.u32 4294901760, %v248_v12  ;;  %v460_v43 = vld [vmem:[%s7771_s10 + $0x28] sm:$0xff] }
  0xb7   : > { %v7809_v8 = vadd.f32 %v958_v63, %v845_v28  ;;  %1539 = vmatmul.f32.gmra.mxu3 %v7751_v29  ;;  %v459_v28 = vld [vmem:[%s7771_s10 + $0x20] sm:$0xff]  ;;  %v11708_v11 = vand.u32 4294901760, %v7848_v2 }
  0xb8   : > { %1322 = vmatmul.f32.gmra.mxu2 %v1321_v57 }
  0xba   : > { %v525_v54 = vpop.f32.mrf.mxu0  ;;  %v734_v24 = vpop.f32.mrf.mxu1 }
  0xbb   : > { %v735_v35 = vadd.f32 %v734_v24, %v518_v3  ;;  %v849_v31 = vpop.f32.mrf.mxu2  ;;  %v964_v6 = vpop.f32.mrf.mxu3  ;;  %v526_v21 = vadd.f32 %v525_v54, %v457_v61  ;;  %v1345_v3 = vand.u32 4294901760, %v1344_v47  ;;  %v256_v61 = vld [vmem:[%s7207_s16 + $0x1c8] sm:$0xff] }
  0xbd   : > { %v850_v33 = vadd.f32 %v849_v31, %v735_v35  ;;  %1124 = vmatmul.f32.gmra.mxu0 %v7355_v55  ;;  %v1352_v31 = vsub.f32 %v7848_v2, %v11708_v11 }
  0xbe   : > { %1217 = vmatmul.f32.gmra.mxu1 %v7299_v49 }
  0xbf   : > { %v7825_v37 = vadd.f32 %v964_v6, %v850_v33  ;;  %1543 = vmatmul.f32.gmra.mxu3 %v7781_v9  ;;  %v7864_v6 = vsub.f32 %v248_v12, %v7853_v18 }
  0xc0   : > { %1330 = vmatmul.f32.gmra.mxu2 %v1329_v0 }
  0xc2   : > { %v533_v48 = vpop.f32.mrf.mxu0  ;;  %v738_v5 = vpop.f32.mrf.mxu1 }
  0xc3   : > { %v739_v17 = vadd.f32 %v738_v5, %v526_v21  ;;  %v854_v42 = vpop.f32.mrf.mxu2  ;;  %v970_v49 = vpop.f32.mrf.mxu3  ;;  %v534_v10 = vadd.f32 %v533_v48, %v458_v52  ;;  %v1353_v48 = vand.u32 4294901760, %v1352_v31  ;;  %v11707_v5 = vand.u32 4294901760, %v7864_v6 }
  0xc5   : > { %v855_v40 = vadd.f32 %v854_v42, %v739_v17  ;;  %1128 = vmatmul.f32.gmra.mxu0 %v7400_v23  ;;  %v7869_v17 = vand.u32 4294901760, %v256_v61 }
  0xc6   : > { %1221 = vmatmul.f32.gmra.mxu1 %v7355_v55 }
  0xc7   : > { %v7841_v53 = vadd.f32 %v970_v49, %v855_v40  ;;  %1547 = vmatmul.f32.gmra.mxu3 %v7805_v45  ;;  %v7880_v40 = vsub.f32 %v256_v61, %v7869_v17 }
  0xc8   : > { %1338 = vmatmul.f32.gmra.mxu2 %v1337_v59  ;;  %v1360_v59 = vsub.f32 %v7864_v6, %v11707_v5 }
  0xca   : > { %v541_v26 = vpop.f32.mrf.mxu0  ;;  %v742_v63 = vpop.f32.mrf.mxu1 }
  0xcb   : > { %v743_v19 = vadd.f32 %v742_v63, %v534_v10  ;;  %v859_v57 = vpop.f32.mrf.mxu2  ;;  %v976_v55 = vpop.f32.mrf.mxu3  ;;  %v542_v24 = vadd.f32 %v541_v26, %v459_v28  ;;  %v264_v10 = vld [vmem:[%s7207_s16 + $0x208] sm:$0xff] }
  0xcc   : > { %v7885_v28 = vand.u32 4294901760, %v264_v10 }
  0xcd   : > { %v860_v54 = vadd.f32 %v859_v57, %v743_v19  ;;  %1132 = vmatmul.f32.gmra.mxu0 %v7441_v16  ;;  %v461_v19 = vld [vmem:[%s7771_s10 + $0x30] sm:$0xff]  ;;  %v1361_v57 = vand.u32 4294901760, %v1360_v59 }
  0xce   : > { %1225 = vmatmul.f32.gmra.mxu1 %v7400_v23  ;;  %v7896_v61 = vsub.f32 %v264_v10, %v7885_v28 }
  0xcf   : > { %v7857_v35 = vadd.f32 %v976_v55, %v860_v54  ;;  %1551 = vmatmul.f32.gmra.mxu3 %v7821_v22  ;;  %v11705_v55 = vand.u32 4294901760, %v7880_v40 }
  0xd0   : > { %1346 = vmatmul.f32.gmra.mxu2 %v1345_v3 }
  0xd1   : > { %v1368_v31 = vsub.f32 %v7880_v40, %v11705_v55 }
  0xd2   : > { %v549_v0 = vpop.f32.mrf.mxu0  ;;  %v746_v33 = vpop.f32.mrf.mxu1 }
  0xd3   : > { %v747_v21 = vadd.f32 %v746_v33, %v542_v24  ;;  %v864_v60 = vpop.f32.mrf.mxu2  ;;  %v982_v23 = vpop.f32.mrf.mxu3  ;;  %v550_v49 = vadd.f32 %v549_v0, %v460_v43  ;;  %v272_v0 = vld [vmem:[%s7207_s16 + $0x248] sm:$0xff]  ;;  %v462_v43 = vld [vmem:[%s7771_s10 + $0x38] sm:$0xff] }
  0xd5   : > { %v865_v42 = vadd.f32 %v864_v60, %v747_v21  ;;  %1136 = vmatmul.f32.gmra.mxu0 %v7465_v20 }
  0xd6   : > { %1229 = vmatmul.f32.gmra.mxu1 %v7441_v16 }
  0xd7   : > { %v7873_v52 = vadd.f32 %v982_v23, %v865_v42  ;;  %1555 = vmatmul.f32.gmra.mxu3 %v7837_v1  ;;  %v11704_v42 = vand.u32 4294901760, %v7896_v61 }
  0xd8   : > { %1354 = vmatmul.f32.gmra.mxu2 %v1353_v48  ;;  %v1369_v48 = vand.u32 4294901760, %v1368_v31 }
  0xda   : > { %v557_v47 = vpop.f32.mrf.mxu0 }
  0xdb   : > { %v750_v12 = vpop.f32.mrf.mxu1  ;;  %v869_v63 = vpop.f32.mrf.mxu2  ;;  %v558_v54 = vadd.f32 %v557_v47, %v461_v19 }
  0xdc   : > { %v751_v26 = vadd.f32 %v750_v12, %v550_v49  ;;  %v988_v16 = vpop.f32.mrf.mxu3  ;;  %v7901_v49 = vand.u32 4294901760, %v272_v0  ;;  %v1376_v12 = vsub.f32 %v7896_v61, %v11704_v42 }
  0xdd   : > { %1140 = vmatmul.f32.gmra.mxu0 %v7498_v30 }
  0xde   : > { %v870_v3 = vadd.f32 %v869_v63, %v751_v26  ;;  %1233 = vmatmul.f32.gmra.mxu1 %v7465_v20  ;;  %v7912_v26 = vsub.f32 %v272_v0, %v7901_v49  ;;  %v280_v63 = vld [vmem:[%s7207_s16 + $0x288] sm:$0xff]  ;;  %v1377_v31 = vand.u32 4294901760, %v1376_v12 }
  0xdf   : > { %1559 = vmatmul.f32.gmra.mxu3 %v7853_v18 }
  0xe0   : > { %v7889_v24 = vadd.f32 %v988_v16, %v870_v3  ;;  %1362 = vmatmul.f32.gmra.mxu2 %v1361_v57 }
  0xe2   : > { %v565_v33 = vpop.f32.mrf.mxu0 }
  0xe3   : > { %v754_v21 = vpop.f32.mrf.mxu1  ;;  %v874_v23 = vpop.f32.mrf.mxu2  ;;  %v566_v10 = vadd.f32 %v565_v33, %v462_v43  ;;  %v11702_v33 = vand.u32 4294901760, %v7912_v26 }
  0xe4   : > { %v755_v60 = vadd.f32 %v754_v21, %v558_v54  ;;  %v994_v20 = vpop.f32.mrf.mxu3  ;;  %v463_v54 = vld [vmem:[%s7771_s10 + $0x40] sm:$0xff]  ;;  %v7917_v21 = vand.u32 4294901760, %v280_v63 }
  0xe5   : > { %1144 = vmatmul.f32.gmra.mxu0 %v7527_v62 }
  0xe6   : > { %v875_v59 = vadd.f32 %v874_v23, %v755_v60  ;;  %1237 = vmatmul.f32.gmra.mxu1 %v7498_v30  ;;  %v7928_v43 = vsub.f32 %v280_v63, %v7917_v21 }
  0xe7   : > { %1563 = vmatmul.f32.gmra.mxu3 %v7869_v17 }
  0xe8   : > { %v7905_v47 = vadd.f32 %v994_v20, %v875_v59  ;;  %1370 = vmatmul.f32.gmra.mxu2 %v1369_v48  ;;  %v1384_v20 = vsub.f32 %v7912_v26, %v11702_v33  ;;  %v288_v48 = vld [vmem:[%s7207_s16 + $0x2c8] sm:$0xff] }
  0xea   : > { %v573_v16 = vpop.f32.mrf.mxu0 }
  0xeb   : > { %v758_v19 = vpop.f32.mrf.mxu1  ;;  %v879_v3 = vpop.f32.mrf.mxu2  ;;  %v574_v0 = vadd.f32 %v573_v16, %v463_v54  ;;  %v464_v16 = vld [vmem:[%s7771_s10 + $0x48] sm:$0xff] }
  0xec   : > { %v759_v57 = vadd.f32 %v758_v19, %v566_v10  ;;  %v1000_v30 = vpop.f32.mrf.mxu3 }
  0xed   : > { %1148 = vmatmul.f32.gmra.mxu0 %v7552_v56 }
  0xee   : > { %v880_v60 = vadd.f32 %v879_v3, %v759_v57  ;;  %1241 = vmatmul.f32.gmra.mxu1 %v7527_v62  ;;  %v1385_v57 = vand.u32 4294901760, %v1384_v20  ;;  %v11703_v3 = vand.u32 4294901760, %v7928_v43  ;;  %v296_v20 = vld [vmem:[%s7207_s16 + $0x308] sm:$0xff] }
  0xef   : > { %1567 = vmatmul.f32.gmra.mxu3 %v7885_v28 }
  0xf0   : > { %v7921_v23 = vadd.f32 %v1000_v30, %v880_v60  ;;  %1378 = vmatmul.f32.gmra.mxu2 %v1377_v31  ;;  %v7933_v30 = vand.u32 4294901760, %v288_v48  ;;  %v1392_v60 = vsub.f32 %v7928_v43, %v11703_v3 }
  0xf2   : > { %v581_v59 = vpop.f32.mrf.mxu0 }
  0xf3   : > { %v762_v10 = vpop.f32.mrf.mxu1  ;;  %v884_v19 = vpop.f32.mrf.mxu2  ;;  %v582_v63 = vadd.f32 %v581_v59, %v464_v16  ;;  %v465_v59 = vld [vmem:[%s7771_s10 + $0x50] sm:$0xff] }
  0xf4   : > { %v763_v12 = vadd.f32 %v762_v10, %v574_v0  ;;  %v1006_v62 = vpop.f32.mrf.mxu3  ;;  %v7944_v0 = vsub.f32 %v288_v48, %v7933_v30 }
  0xf5   : > { %1152 = vmatmul.f32.gmra.mxu0 %v7581_v34 }
  0xf6   : > { %v885_v54 = vadd.f32 %v884_v19, %v763_v12  ;;  %1245 = vmatmul.f32.gmra.mxu1 %v7552_v56  ;;  %v11706_v16 = vand.u32 4294901760, %v7944_v0 }
  0xf7   : > { %1571 = vmatmul.f32.gmra.mxu3 %v7901_v49 }
  0xf8   : > { %v7937_v31 = vadd.f32 %v1006_v62, %v885_v54  ;;  %1386 = vmatmul.f32.gmra.mxu2 %v1385_v57  ;;  %v1393_v62 = vand.u32 4294901760, %v1392_v60  ;;  %v7949_v54 = vand.u32 4294901760, %v296_v20 }
  0xfa   : > { %v589_v10 = vpop.f32.mrf.mxu0  ;;  %v7960_v60 = vsub.f32 %v296_v20, %v7949_v54 }
  0xfb   : > { %v766_v12 = vpop.f32.mrf.mxu1  ;;  %v889_v33 = vpop.f32.mrf.mxu2  ;;  %v590_v48 = vadd.f32 %v589_v10, %v465_v59  ;;  %v466_v10 = vld [vmem:[%s7771_s10 + $0x58] sm:$0xff] }
  0xfc   : > { %v767_v19 = vadd.f32 %v766_v12, %v582_v63  ;;  %v1012_v56 = vpop.f32.mrf.mxu3  ;;  %v1400_v63 = vsub.f32 %v7944_v0, %v11706_v16  ;;  %v304_v12 = vld [vmem:[%s7207_s16 + $0x348] sm:$0xff]  ;;  %v11709_v59 = vand.u32 4294901760, %v7960_v60 }
  0xfd   : > { %1156 = vmatmul.f32.gmra.mxu0 %v7606_v38 }
  0xfe   : > { %v890_v57 = vadd.f32 %v889_v33, %v767_v19  ;;  %1249 = vmatmul.f32.gmra.mxu1 %v7581_v34 }
  0xff   : > { %1575 = vmatmul.f32.gmra.mxu3 %v7917_v21 }
 0x100   : > { %v7953_v3 = vadd.f32 %v1012_v56, %v890_v57  ;;  %1394 = vmatmul.f32.gmra.mxu2 %v1393_v62  ;;  %v1401_v56 = vand.u32 4294901760, %v1400_v63  ;;  %v7965_v57 = vand.u32 4294901760, %v304_v12 }
 0x102   : > { %v597_v42 = vpop.f32.mrf.mxu0  ;;  %v7976_v63 = vsub.f32 %v304_v12, %v7965_v57 }
 0x103   : > { %v770_v33 = vpop.f32.mrf.mxu1  ;;  %v894_v55 = vpop.f32.mrf.mxu2  ;;  %v598_v20 = vadd.f32 %v597_v42, %v466_v10  ;;  %v467_v42 = vld [vmem:[%s7771_s10 + $0x60] sm:$0xff] }
 0x104   : > { %v771_v19 = vadd.f32 %v770_v33, %v590_v48  ;;  %v1018_v34 = vpop.f32.mrf.mxu3  ;;  %v1408_v48 = vsub.f32 %v7960_v60, %v11709_v59  ;;  %v312_v33 = vld [vmem:[%s7207_s16 + $0x388] sm:$0xff]  ;;  %v11710_v10 = vand.u32 4294901760, %v7976_v63 }
 0x105   : > { %1160 = vmatmul.f32.gmra.mxu0 %v7627_v4 }
 0x106   : > { %v895_v62 = vadd.f32 %v894_v55, %v771_v19  ;;  %1253 = vmatmul.f32.gmra.mxu1 %v7606_v38 }
 0x107   : > { %1579 = vmatmul.f32.gmra.mxu3 %v7933_v30 }
 0x108   : > { %v7969_v16 = vadd.f32 %v1018_v34, %v895_v62  ;;  %1402 = vmatmul.f32.gmra.mxu2 %v1401_v56  ;;  %v1409_v34 = vand.u32 4294901760, %v1408_v48  ;;  %v7981_v62 = vand.u32 4294901760, %v312_v33 }
 0x10a   : > { %v605_v5 = vpop.f32.mrf.mxu0  ;;  %11963 = vst [vmem:[#allocation2_spill] sm:$0xff] %v7981_v62  ;;  %v7992_v48 = vsub.f32 %v312_v33, %v7981_v62  ;;  %v468_v33 = vld [vmem:[%s7771_s10 + $0x68] sm:$0xff] }
 0x10b   : > { %v774_v55 = vpop.f32.mrf.mxu1  ;;  %v899_v11 = vpop.f32.mrf.mxu2  ;;  %v606_v12 = vadd.f32 %v605_v5, %v467_v42 }
 0x10c   : > { %v775_v19 = vadd.f32 %v774_v55, %v598_v20  ;;  %v1024_v38 = vpop.f32.mrf.mxu3  ;;  %v1416_v20 = vsub.f32 %v7976_v63, %v11710_v10  ;;  %11964 = vst [vmem:[#allocation3_spill] sm:$0xff] %v7992_v48  ;;  %v320_v55 = vld [vmem:[%s7207_s16 + $0x3c8] sm:$0xff]  ;;  %v11717_v58 = vand.u32 4294901760, %v7992_v48 }
 0x10d   : > { %1164 = vmatmul.f32.gmra.mxu0 %v7653_v41  ;;  %v8007_v39 = vand.u32 4294901760, %v320_v55 }
 0x10e   : > { %v900_v56 = vadd.f32 %v899_v11, %v775_v19  ;;  %1257 = vmatmul.f32.gmra.mxu1 %v7627_v4  ;;  %v374_v11 = vld [vmem:[%s11671_s1 + $0x178] sm:$0xff]  ;;  %v1417_v10 = vand.u32 4294901760, %v1416_v20 }
 0x10f   : > { %1583 = vmatmul.f32.gmra.mxu3 %v7949_v54  ;;  %v7998_v4 = vand.u32 4294901760, %v374_v11 }
 0x110   : > { %v7985_v59 = vadd.f32 %v1024_v38, %v900_v56  ;;  %1410 = vmatmul.f32.gmra.mxu2 %v1409_v34 }
 0x111   : > { %v8001_v34 = vsub.f32 %v374_v11, %v7998_v4  ;;  %2084 = vmatpush.msrb.mxu0 %v7998_v4  ;;  %2535 = vmatpush.msrb.mxu3 %v7998_v4 }
 0x112   : > { %v613_v5 = vpop.f32.mrf.mxu0 }
 0x113   : > { %v778_v19 = vpop.f32.mrf.mxu1  ;;  %v904_v42 = vpop.f32.mrf.mxu2  ;;  %2407 = vmatpush.msrb.mxu2 %v8001_v34  ;;  %v614_v11 = vadd.f32 %v613_v5, %v468_v33 }
 0x114   : > { %v779_v38 = vadd.f32 %v778_v19, %v606_v12  ;;  %v1030_v56 = vpop.f32.mrf.mxu3  ;;  %v11716_v12 = vand.u32 4294901760, %v8001_v34 }
 0x115   : > { %1168 = vmatmul.f32.gmra.mxu0 %v7673_v51 }
 0x116   : > { %v905_v36 = vadd.f32 %v904_v42, %v779_v38  ;;  %1261 = vmatmul.f32.gmra.mxu1 %v7653_v41  ;;  %v2247_v20 = vsub.f32 %v8001_v34, %v11716_v12  ;;  %v1424_v38 = vsub.f32 %v7992_v48, %v11717_v58  ;;  %v8023_v41 = vsub.f32 %v320_v55, %v8007_v39  ;;  %v469_v55 = vld [vmem:[%s7771_s10 + $0x70] sm:$0xff] }
 0x117   : > { %1587 = vmatmul.f32.gmra.mxu3 %v7965_v57 }
 0x118   : > { %v8013_v19 = vadd.f32 %v1030_v56, %v905_v36  ;;  %1418 = vmatmul.f32.gmra.mxu2 %v1417_v10  ;;  %11965 = vst [vmem:[#allocation4_spill] sm:$0xff] %v8023_v41  ;;  %v373_v36 = vld [vmem:[%s11671_s1 + $0x170] sm:$0xff]  ;;  %v2248_v5 = vand.u32 4294901760, %v2247_v20  ;;  %v1425_v58 = vand.u32 4294901760, %v1424_v38  ;;  %v11723_v48 = vand.u32 4294901760, %v8023_v41 }
 0x119   : > { %v8028_v42 = vand.u32 4294901760, %v373_v36 }
 0x11a   : > { %v621_v56 = vpop.f32.mrf.mxu0  ;;  %2249 = vmatpush.msrb.mxu1 %v2248_v5 }
 0x11b   : > { %v782_v33 = vpop.f32.mrf.mxu1  ;;  %v909_v14 = vpop.f32.mrf.mxu2  ;;  %v8031_v10 = vsub.f32 %v373_v36, %v8028_v42  ;;  %2086 = vmatpush.msrb.mxu0 %v8028_v42  ;;  %2537 = vmatpush.msrb.mxu3 %v8028_v42  ;;  %v622_v5 = vadd.f32 %v621_v56, %v469_v55 }
 0x11c   : > { %v783_v25 = vadd.f32 %v782_v33, %v614_v11  ;;  %v1036_v12 = vpop.f32.mrf.mxu3 }
 0x11d   : > { %1172 = vmatmul.f32.gmra.mxu0 %v7695_v44  ;;  %v11722_v11 = vand.u32 4294901760, %v8031_v10  ;;  %2410 = vmatpush.msrb.mxu2 %v8031_v10 }
 0x11e   : > { %v910_v20 = vadd.f32 %v909_v14, %v783_v25  ;;  %1265 = vmatmul.f32.gmra.mxu1 %v7673_v51  ;;  %v1432_v14 = vsub.f32 %v8023_v41, %v11723_v48  ;;  %v372_v51 = vld [vmem:[%s11671_s1 + $0x168] sm:$0xff] }
 0x11f   : > { %1591 = vmatmul.f32.gmra.mxu3 %v7981_v62  ;;  %v2253_v38 = vsub.f32 %v8031_v10, %v11722_v11  ;;  %v8053_v56 = vand.u32 4294901760, %v372_v51 }
 0x120   : > { %v8041_v36 = vadd.f32 %v1036_v12, %v910_v20  ;;  %1426 = vmatmul.f32.gmra.mxu2 %v1425_v58  ;;  %v470_v58 = vld [vmem:[%s7771_s10 + $0x78] sm:$0xff]  ;;  %v1433_v48 = vand.u32 4294901760, %v1432_v14 }
 0x121   : > { %v2254_v25 = vand.u32 4294901760, %v2253_v38  ;;  %v8056_v11 = vsub.f32 %v372_v51, %v8053_v56  ;;  %2088 = vmatpush.msrb.mxu0 %v8053_v56  ;;  %2539 = vmatpush.msrb.mxu3 %v8053_v56  ;;  %v371_v51 = vld [vmem:[%s11671_s1 + $0x160] sm:$0xff] }
 0x122   : > { %11966 = vst [vmem:[#allocation5_spill] sm:$0xff] %v8041_v36  ;;  %v629_v12 = vpop.f32.mrf.mxu0 }
 0x123   : > { %v786_v33 = vpop.f32.mrf.mxu1  ;;  %v914_v20 = vpop.f32.mrf.mxu2  ;;  %2255 = vmatpush.msrb.mxu1 %v2254_v25  ;;  %v11726_v38 = vand.u32 4294901760, %v8056_v11  ;;  %2413 = vmatpush.msrb.mxu2 %v8056_v11 }
 0x124   : > { %v787_v55 = vadd.f32 %v786_v33, %v622_v5  ;;  %v1042_v62 = vpop.f32.mrf.mxu3  ;;  %v630_v5 = vadd.f32 %v629_v12, %v470_v58 }
 0x125   : > { %1176 = vmatmul.f32.gmra.mxu0 %v7714_v15  ;;  %v2259_v14 = vsub.f32 %v8056_v11, %v11726_v38 }
 0x126   : > { %v915_v41 = vadd.f32 %v914_v20, %v787_v55  ;;  %1269 = vmatmul.f32.gmra.mxu1 %v7695_v44  ;;  %v8074_v44 = vand.u32 4294901760, %v371_v51 }
 0x127   : > { %1595 = vmatmul.f32.gmra.mxu3 %v8007_v39  ;;  %v2260_v33 = vand.u32 4294901760, %v2259_v14 }
 0x128   : > { %v8065_v25 = vadd.f32 %v1042_v62, %v915_v41  ;;  %1434 = vmatmul.f32.gmra.mxu2 %v1433_v48  ;;  %v8077_v41 = vsub.f32 %v371_v51, %v8074_v44  ;;  %2090 = vmatpush.msrb.mxu0 %v8074_v44 }
 0x129   : > { %2261 = vmatpush.msrb.mxu1 %v2260_v33  ;;  %2541 = vmatpush.msrb.mxu3 %v8074_v44 }
 0x12a   : > { %v1117_v20 = vpop.f32.mrf.mxu0  ;;  %v11727_v58 = vand.u32 4294901760, %v8077_v41  ;;  %2416 = vmatpush.msrb.mxu2 %v8077_v41 }
 0x12b   : > { %v790_v55 = vpop.f32.mrf.mxu1  ;;  %v919_v12 = vpop.f32.mrf.mxu2 }
 0x12c   : > { %v791_v36 = vadd.f32 %v790_v55, %v630_v5  ;;  %v1048_v62 = vpop.f32.mrf.mxu3  ;;  %v2265_v14 = vsub.f32 %v8077_v41, %v11727_v58 }
 0x12d   : > { %1649 = vmatmul.f32.vlgmr.msra.gmra.mxu0 %v7741_v7 }
 0x12e   : > { %v920_v48 = vadd.f32 %v919_v12, %v791_v36  ;;  %1273 = vmatmul.f32.gmra.mxu1 %v7714_v15  ;;  %v370_v15 = vld [vmem:[%s11671_s1 + $0x158] sm:$0xff]  ;;  %v1118_v36 = vadd.f32 %v1117_v20, %v7809_v8  ;;  %v2266_v51 = vand.u32 4294901760, %v2265_v14  ;;  %v11968_v8 = vand.u32 4294901760, %v7741_v7 }
 0x12f   : > { %2019 = vmatmul.f32.vlgmr.msra.gmra.mxu3 %v7733_v50  ;;  %v8096_v33 = vand.u32 4294901760, %v370_v15 }
 0x130   : > { %v8085_v5 = vadd.f32 %v1048_v62, %v920_v48  ;;  %1922 = vmatmul.f32.vlgmr.msra.gmra.mxu2 %v7733_v50  ;;  %2267 = vmatpush.msrb.mxu1 %v2266_v51 }
 0x131   : > { %2092 = vmatpush.msrb.mxu0 %v8096_v33  ;;  %2543 = vmatpush.msrb.mxu3 %v8096_v33 }
 0x132   : > { %11967 = vst [vmem:[#allocation6_spill] sm:$0xff] %v8085_v5  ;;  %v1121_v55 = vpop.f32.mrf.mxu0  ;;  %v8099_v5 = vsub.f32 %v370_v15, %v8096_v33 }
 0x133   : > { %v1214_v12 = vpop.f32.mrf.mxu1  ;;  %v1315_v48 = vpop.f32.mrf.mxu2  ;;  %v1122_v7 = vadd.f32 %v1121_v55, %v7825_v37  ;;  %v11969_v37 = vand.u32 4294901760, %v7763_v13 }
 0x134   : > { %v1215_v62 = vadd.f32 %v1214_v12, %v1118_v36  ;;  %v1536_v38 = vpop.f32.mrf.mxu3  ;;  %v11728_v20 = vand.u32 4294901760, %v8099_v5  ;;  %2419 = vmatpush.msrb.mxu2 %v8099_v5  ;;  %v369_v36 = vld [vmem:[%s11671_s1 + $0x150] sm:$0xff] }
 0x135   : > { %1654 = vmatmul.f32.gmra.mxu0 %v7763_v13  ;;  %v8119_v12 = vand.u32 4294901760, %v369_v36 }
 0x136   : > { %v1316_v50 = vadd.f32 %v1315_v48, %v1215_v62  ;;  %1763 = vmatmul.f32.vlgmr.msra.gmra.mxu1 %v11968_v8  ;;  %v2271_v15 = vsub.f32 %v8099_v5, %v11728_v20 }
 0x137   : > { %2023 = vmatmul.f32.gmra.mxu3 %v7751_v29  ;;  %v8122_v58 = vsub.f32 %v369_v36, %v8119_v12  ;;  %2094 = vmatpush.msrb.mxu0 %v8119_v12 }
 0x138   : > { %v8108_v14 = vadd.f32 %v1536_v38, %v1316_v50  ;;  %1926 = vmatmul.f32.gmra.mxu2 %v7751_v29  ;;  %v2272_v51 = vand.u32 4294901760, %v2271_v15  ;;  %2545 = vmatpush.msrb.mxu3 %v8119_v12 }
 0x139   : > { %v11729_v55 = vand.u32 4294901760, %v8122_v58  ;;  %2422 = vmatpush.msrb.mxu2 %v8122_v58 }
 0x13a   : > { %v1125_v62 = vpop.f32.mrf.mxu0  ;;  %2273 = vmatpush.msrb.mxu1 %v2272_v51 }
 0x13b   : > { %v1218_v38 = vpop.f32.mrf.mxu1  ;;  %v1323_v50 = vpop.f32.mrf.mxu2  ;;  %v2277_v36 = vsub.f32 %v8122_v58, %v11729_v55  ;;  %v1126_v13 = vadd.f32 %v1125_v62, %v7841_v53  ;;  %v11970_v53 = vand.u32 4294901760, %v7794_v46 }
 0x13c   : > { %v1219_v48 = vadd.f32 %v1218_v38, %v1122_v7  ;;  %v1540_v8 = vpop.f32.mrf.mxu3  ;;  %v368_v7 = vld [vmem:[%s11671_s1 + $0x148] sm:$0xff] }
 0x13d   : > { %1659 = vmatmul.f32.gmra.mxu0 %v7794_v46  ;;  %v2278_v51 = vand.u32 4294901760, %v2277_v36  ;;  %v8142_v38 = vand.u32 4294901760, %v368_v7 }
 0x13e   : > { %v1324_v29 = vadd.f32 %v1323_v50, %v1219_v48  ;;  %1769 = vmatmul.f32.gmra.mxu1 %v11969_v37 }
 0x13f   : > { %2027 = vmatmul.f32.gmra.mxu3 %v7781_v9  ;;  %2279 = vmatpush.msrb.mxu1 %v2278_v51  ;;  %v8145_v20 = vsub.f32 %v368_v7, %v8142_v38 }
 0x140   : > { %v8131_v15 = vadd.f32 %v1540_v8, %v1324_v29  ;;  %1930 = vmatmul.f32.gmra.mxu2 %v7781_v9  ;;  %2096 = vmatpush.msrb.mxu0 %v8142_v38 }
 0x141   : > { %2547 = vmatpush.msrb.mxu3 %v8142_v38  ;;  %v11730_v62 = vand.u32 4294901760, %v8145_v20  ;;  %2425 = vmatpush.msrb.mxu2 %v8145_v20 }
 0x142   : > { %v1129_v48 = vpop.f32.mrf.mxu0 }
 0x143   : > { %v1222_v50 = vpop.f32.mrf.mxu1  ;;  %v1331_v29 = vpop.f32.mrf.mxu2  ;;  %v2283_v7 = vsub.f32 %v8145_v20, %v11730_v62  ;;  %v1130_v46 = vadd.f32 %v1129_v48, %v7857_v35  ;;  %v11971_v35 = vand.u32 4294901760, %v7816_v27 }
 0x144   : > { %v1223_v8 = vadd.f32 %v1222_v50, %v1126_v13  ;;  %v1544_v37 = vpop.f32.mrf.mxu3  ;;  %v367_v13 = vld [vmem:[%s11671_s1 + $0x140] sm:$0xff] }
 0x145   : > { %1664 = vmatmul.f32.gmra.mxu0 %v7816_v27  ;;  %v2284_v51 = vand.u32 4294901760, %v2283_v7  ;;  %v8165_v50 = vand.u32 4294901760, %v367_v13 }
 0x146   : > { %v1332_v9 = vadd.f32 %v1331_v29, %v1223_v8  ;;  %1775 = vmatmul.f32.gmra.mxu1 %v11970_v53 }
 0x147   : > { %2031 = vmatmul.f32.gmra.mxu3 %v7805_v45  ;;  %2285 = vmatpush.msrb.mxu1 %v2284_v51  ;;  %v8168_v55 = vsub.f32 %v367_v13, %v8165_v50 }
 0x148   : > { %v8154_v36 = vadd.f32 %v1544_v37, %v1332_v9  ;;  %1934 = vmatmul.f32.gmra.mxu2 %v7805_v45  ;;  %2098 = vmatpush.msrb.mxu0 %v8165_v50 }
 0x149   : > { %2549 = vmatpush.msrb.mxu3 %v8165_v50  ;;  %v11731_v48 = vand.u32 4294901760, %v8168_v55  ;;  %2428 = vmatpush.msrb.mxu2 %v8168_v55 }
 0x14a   : > { %v1133_v8 = vpop.f32.mrf.mxu0 }
 0x14b   : > { %v1226_v29 = vpop.f32.mrf.mxu1  ;;  %v1339_v9 = vpop.f32.mrf.mxu2  ;;  %v2289_v13 = vsub.f32 %v8168_v55, %v11731_v48  ;;  %v1134_v27 = vadd.f32 %v1133_v8, %v7873_v52  ;;  %v11972_v52 = vand.u32 4294901760, %v7832_v32 }
 0x14c   : > { %v1227_v37 = vadd.f32 %v1226_v29, %v1130_v46  ;;  %v1548_v53 = vpop.f32.mrf.mxu3  ;;  %v366_v46 = vld [vmem:[%s11671_s1 + $0x138] sm:$0xff] }
 0x14d   : > { %1669 = vmatmul.f32.gmra.mxu0 %v7832_v32  ;;  %v2290_v51 = vand.u32 4294901760, %v2289_v13  ;;  %v8188_v29 = vand.u32 4294901760, %v366_v46 }
 0x14e   : > { %v1340_v45 = vadd.f32 %v1339_v9, %v1227_v37  ;;  %1781 = vmatmul.f32.gmra.mxu1 %v11971_v35 }
 0x14f   : > { %2035 = vmatmul.f32.gmra.mxu3 %v7821_v22  ;;  %2291 = vmatpush.msrb.mxu1 %v2290_v51  ;;  %v8191_v62 = vsub.f32 %v366_v46, %v8188_v29 }
 0x150   : > { %v8177_v7 = vadd.f32 %v1548_v53, %v1340_v45  ;;  %1938 = vmatmul.f32.gmra.mxu2 %v7821_v22  ;;  %2100 = vmatpush.msrb.mxu0 %v8188_v29 }
 0x151   : > { %2551 = vmatpush.msrb.mxu3 %v8188_v29  ;;  %v11732_v8 = vand.u32 4294901760, %v8191_v62  ;;  %2431 = vmatpush.msrb.mxu2 %v8191_v62 }
 0x152   : > { %v1137_v37 = vpop.f32.mrf.mxu0 }
 0x153   : > { %v1230_v9 = vpop.f32.mrf.mxu1  ;;  %v1347_v45 = vpop.f32.mrf.mxu2  ;;  %v2295_v46 = vsub.f32 %v8191_v62, %v11732_v8  ;;  %v1138_v32 = vadd.f32 %v1137_v37, %v7889_v24  ;;  %v11973_v24 = vand.u32 4294901760, %v7848_v2 }
 0x154   : > { %v1231_v53 = vadd.f32 %v1230_v9, %v1134_v27  ;;  %v1552_v35 = vpop.f32.mrf.mxu3  ;;  %v365_v27 = vld [vmem:[%s11671_s1 + $0x130] sm:$0xff] }
 0x155   : > { %1674 = vmatmul.f32.gmra.mxu0 %v7848_v2  ;;  %v2296_v51 = vand.u32 4294901760, %v2295_v46  ;;  %v8211_v9 = vand.u32 4294901760, %v365_v27 }
 0x156   : > { %v1348_v22 = vadd.f32 %v1347_v45, %v1231_v53  ;;  %1787 = vmatmul.f32.gmra.mxu1 %v11972_v52 }
 0x157   : > { %2039 = vmatmul.f32.gmra.mxu3 %v7837_v1  ;;  %2297 = vmatpush.msrb.mxu1 %v2296_v51  ;;  %v8214_v48 = vsub.f32 %v365_v27, %v8211_v9 }
 0x158   : > { %v8200_v13 = vadd.f32 %v1552_v35, %v1348_v22  ;;  %1942 = vmatmul.f32.gmra.mxu2 %v7837_v1  ;;  %2102 = vmatpush.msrb.mxu0 %v8211_v9 }
 0x159   : > { %2553 = vmatpush.msrb.mxu3 %v8211_v9  ;;  %v11733_v37 = vand.u32 4294901760, %v8214_v48  ;;  %2434 = vmatpush.msrb.mxu2 %v8214_v48 }
 0x15a   : > { %v1141_v53 = vpop.f32.mrf.mxu0 }
 0x15b   : > { %v1234_v45 = vpop.f32.mrf.mxu1  ;;  %v1355_v22 = vpop.f32.mrf.mxu2  ;;  %v2301_v27 = vsub.f32 %v8214_v48, %v11733_v37  ;;  %v1142_v2 = vadd.f32 %v1141_v53, %v7905_v47  ;;  %v11974_v47 = vand.u32 4294901760, %v7864_v6 }
 0x15c   : > { %v1235_v35 = vadd.f32 %v1234_v45, %v1138_v32  ;;  %v1556_v52 = vpop.f32.mrf.mxu3  ;;  %v364_v32 = vld [vmem:[%s11671_s1 + $0x128] sm:$0xff] }
 0x15d   : > { %1679 = vmatmul.f32.gmra.mxu0 %v7864_v6  ;;  %v2302_v51 = vand.u32 4294901760, %v2301_v27  ;;  %v8234_v45 = vand.u32 4294901760, %v364_v32 }
 0x15e   : > { %v1356_v1 = vadd.f32 %v1355_v22, %v1235_v35  ;;  %1793 = vmatmul.f32.gmra.mxu1 %v11973_v24 }
 0x15f   : > { %2043 = vmatmul.f32.gmra.mxu3 %v7853_v18  ;;  %2303 = vmatpush.msrb.mxu1 %v2302_v51  ;;  %v8237_v8 = vsub.f32 %v364_v32, %v8234_v45 }
 0x160   : > { %v8223_v46 = vadd.f32 %v1556_v52, %v1356_v1  ;;  %1946 = vmatmul.f32.gmra.mxu2 %v7853_v18  ;;  %2104 = vmatpush.msrb.mxu0 %v8234_v45 }
 0x161   : > { %2555 = vmatpush.msrb.mxu3 %v8234_v45  ;;  %v11734_v53 = vand.u32 4294901760, %v8237_v8  ;;  %2437 = vmatpush.msrb.mxu2 %v8237_v8 }
 0x162   : > { %v1145_v35 = vpop.f32.mrf.mxu0 }
 0x163   : > { %v1238_v22 = vpop.f32.mrf.mxu1  ;;  %v1363_v1 = vpop.f32.mrf.mxu2  ;;  %v2307_v32 = vsub.f32 %v8237_v8, %v11734_v53  ;;  %v1146_v6 = vadd.f32 %v1145_v35, %v7921_v23  ;;  %v11975_v23 = vand.u32 4294901760, %v7880_v40 }
 0x164   : > { %v1239_v52 = vadd.f32 %v1238_v22, %v1142_v2  ;;  %v1560_v24 = vpop.f32.mrf.mxu3  ;;  %v363_v2 = vld [vmem:[%s11671_s1 + $0x120] sm:$0xff] }
 0x165   : > { %1684 = vmatmul.f32.gmra.mxu0 %v7880_v40  ;;  %v2308_v51 = vand.u32 4294901760, %v2307_v32  ;;  %v8257_v22 = vand.u32 4294901760, %v363_v2 }
 0x166   : > { %v1364_v18 = vadd.f32 %v1363_v1, %v1239_v52  ;;  %1799 = vmatmul.f32.gmra.mxu1 %v11974_v47 }
 0x167   : > { %2047 = vmatmul.f32.gmra.mxu3 %v7869_v17  ;;  %2309 = vmatpush.msrb.mxu1 %v2308_v51  ;;  %v8260_v37 = vsub.f32 %v363_v2, %v8257_v22 }
 0x168   : > { %v8246_v27 = vadd.f32 %v1560_v24, %v1364_v18  ;;  %1950 = vmatmul.f32.gmra.mxu2 %v7869_v17  ;;  %2106 = vmatpush.msrb.mxu0 %v8257_v22 }
 0x169   : > { %2557 = vmatpush.msrb.mxu3 %v8257_v22  ;;  %v11735_v35 = vand.u32 4294901760, %v8260_v37  ;;  %2440 = vmatpush.msrb.mxu2 %v8260_v37 }
 0x16a   : > { %v1149_v52 = vpop.f32.mrf.mxu0 }
 0x16b   : > { %v1242_v1 = vpop.f32.mrf.mxu1  ;;  %v1371_v18 = vpop.f32.mrf.mxu2  ;;  %v2313_v2 = vsub.f32 %v8260_v37, %v11735_v35  ;;  %v1150_v40 = vadd.f32 %v1149_v52, %v7937_v31  ;;  %v11976_v31 = vand.u32 4294901760, %v7896_v61 }
 0x16c   : > { %v1243_v24 = vadd.f32 %v1242_v1, %v1146_v6  ;;  %v1564_v47 = vpop.f32.mrf.mxu3  ;;  %v362_v6 = vld [vmem:[%s11671_s1 + $0x118] sm:$0xff] }
 0x16d   : > { %1689 = vmatmul.f32.gmra.mxu0 %v7896_v61  ;;  %v2314_v51 = vand.u32 4294901760, %v2313_v2  ;;  %v8280_v1 = vand.u32 4294901760, %v362_v6 }
 0x16e   : > { %v1372_v17 = vadd.f32 %v1371_v18, %v1243_v24  ;;  %1805 = vmatmul.f32.gmra.mxu1 %v11975_v23 }
 0x16f   : > { %2051 = vmatmul.f32.gmra.mxu3 %v7885_v28  ;;  %2315 = vmatpush.msrb.mxu1 %v2314_v51  ;;  %v8283_v53 = vsub.f32 %v362_v6, %v8280_v1 }
 0x170   : > { %v8269_v32 = vadd.f32 %v1564_v47, %v1372_v17  ;;  %1954 = vmatmul.f32.gmra.mxu2 %v7885_v28  ;;  %2108 = vmatpush.msrb.mxu0 %v8280_v1 }
 0x171   : > { %2559 = vmatpush.msrb.mxu3 %v8280_v1  ;;  %v11736_v52 = vand.u32 4294901760, %v8283_v53  ;;  %2443 = vmatpush.msrb.mxu2 %v8283_v53 }
 0x172   : > { %v1153_v24 = vpop.f32.mrf.mxu0 }
 0x173   : > { %v1246_v18 = vpop.f32.mrf.mxu1  ;;  %v1379_v17 = vpop.f32.mrf.mxu2  ;;  %v2319_v6 = vsub.f32 %v8283_v53, %v11736_v52  ;;  %v1154_v61 = vadd.f32 %v1153_v24, %v7953_v3  ;;  %v11977_v3 = vand.u32 4294901760, %v7912_v26 }
 0x174   : > { %v1247_v47 = vadd.f32 %v1246_v18, %v1150_v40  ;;  %v1568_v23 = vpop.f32.mrf.mxu3  ;;  %v361_v40 = vld [vmem:[%s11671_s1 + $0x110] sm:$0xff] }
 0x175   : > { %1694 = vmatmul.f32.gmra.mxu0 %v7912_v26  ;;  %v2320_v51 = vand.u32 4294901760, %v2319_v6  ;;  %v8303_v18 = vand.u32 4294901760, %v361_v40 }
 0x176   : > { %v1380_v28 = vadd.f32 %v1379_v17, %v1247_v47  ;;  %1811 = vmatmul.f32.gmra.mxu1 %v11976_v31 }
 0x177   : > { %2055 = vmatmul.f32.gmra.mxu3 %v7901_v49  ;;  %2321 = vmatpush.msrb.mxu1 %v2320_v51  ;;  %v8306_v35 = vsub.f32 %v361_v40, %v8303_v18 }
 0x178   : > { %v8292_v2 = vadd.f32 %v1568_v23, %v1380_v28  ;;  %1958 = vmatmul.f32.gmra.mxu2 %v7901_v49  ;;  %2110 = vmatpush.msrb.mxu0 %v8303_v18 }
 0x179   : > { %2561 = vmatpush.msrb.mxu3 %v8303_v18  ;;  %v11737_v24 = vand.u32 4294901760, %v8306_v35  ;;  %2446 = vmatpush.msrb.mxu2 %v8306_v35 }
 0x17a   : > { %v1157_v47 = vpop.f32.mrf.mxu0 }
 0x17b   : > { %v1250_v17 = vpop.f32.mrf.mxu1  ;;  %v1387_v28 = vpop.f32.mrf.mxu2  ;;  %v2325_v40 = vsub.f32 %v8306_v35, %v11737_v24  ;;  %v1158_v26 = vadd.f32 %v1157_v47, %v7969_v16  ;;  %v11978_v16 = vand.u32 4294901760, %v7928_v43 }
 0x17c   : > { %v1251_v23 = vadd.f32 %v1250_v17, %v1154_v61  ;;  %v1572_v31 = vpop.f32.mrf.mxu3  ;;  %v360_v61 = vld [vmem:[%s11671_s1 + $0x108] sm:$0xff] }
 0x17d   : > { %1699 = vmatmul.f32.gmra.mxu0 %v7928_v43  ;;  %v2326_v51 = vand.u32 4294901760, %v2325_v40  ;;  %v8326_v17 = vand.u32 4294901760, %v360_v61 }
 0x17e   : > { %v1388_v49 = vadd.f32 %v1387_v28, %v1251_v23  ;;  %1817 = vmatmul.f32.gmra.mxu1 %v11977_v3 }
 0x17f   : > { %2059 = vmatmul.f32.gmra.mxu3 %v7917_v21  ;;  %2327 = vmatpush.msrb.mxu1 %v2326_v51  ;;  %v8329_v52 = vsub.f32 %v360_v61, %v8326_v17 }
 0x180   : > { %v8315_v6 = vadd.f32 %v1572_v31, %v1388_v49  ;;  %1962 = vmatmul.f32.gmra.mxu2 %v7917_v21  ;;  %2112 = vmatpush.msrb.mxu0 %v8326_v17 }
 0x181   : > { %2563 = vmatpush.msrb.mxu3 %v8326_v17  ;;  %v2330_v47 = vand.u32 4294901760, %v8329_v52  ;;  %2449 = vmatpush.msrb.mxu2 %v8329_v52 }
 0x182   : > { %v1161_v23 = vpop.f32.mrf.mxu0 }
 0x183   : > { %v1254_v28 = vpop.f32.mrf.mxu1  ;;  %v1395_v49 = vpop.f32.mrf.mxu2  ;;  %v2331_v61 = vsub.f32 %v8329_v52, %v2330_v47  ;;  %v1162_v43 = vadd.f32 %v1161_v23, %v7985_v59  ;;  %v11980_v23 = vand.u32 4294901760, %v7944_v0 }
 0x184   : > { %v1255_v31 = vadd.f32 %v1254_v28, %v1158_v26  ;;  %v1576_v3 = vpop.f32.mrf.mxu3  ;;  %v359_v26 = vld [vmem:[%s11671_s1 + $0x100] sm:$0xff] }
 0x185   : > { %1704 = vmatmul.f32.gmra.mxu0 %v7944_v0  ;;  %v2332_v51 = vand.u32 4294901760, %v2331_v61  ;;  %v8349_v28 = vand.u32 4294901760, %v359_v26  ;;  %v390_v0 = vld [vmem:[%s11671_s1 + $0x1f8] sm:$0xff] }
 0x186   : > { %v1396_v21 = vadd.f32 %v1395_v49, %v1255_v31  ;;  %1823 = vmatmul.f32.gmra.mxu1 %v11978_v16 }
 0x187   : > { %2063 = vmatmul.f32.gmra.mxu3 %v7933_v30  ;;  %2333 = vmatpush.msrb.mxu1 %v2332_v51  ;;  %v8352_v24 = vsub.f32 %v359_v26, %v8349_v28  ;;  %v11981_v26 = vand.u32 4294901760, %v8031_v10  ;;  %v11982_v51 = vand.u32 4294901760, %v8056_v11 }
 0x188   : > { %v8338_v40 = vadd.f32 %v1576_v3, %v1396_v21  ;;  %1966 = vmatmul.f32.gmra.mxu2 %v7933_v30  ;;  %2114 = vmatpush.msrb.mxu0 %v8349_v28  ;;  %v11979_v30 = vand.u32 4294901760, %v8001_v34 }
 0x189   : > { %2565 = vmatpush.msrb.mxu3 %v8349_v28  ;;  %v2336_v61 = vand.u32 4294901760, %v8352_v24  ;;  %2452 = vmatpush.msrb.mxu2 %v8352_v24 }
 0x18a   : > { %v1165_v31 = vpop.f32.mrf.mxu0  ;;  %2666 = vmatpush.msra.mxu0 %v11979_v30  ;;  %v11983_v30 = vand.u32 4294901760, %v8077_v41  ;;  %v11985_v41 = vand.u32 4294901760, %v7960_v60 }
 0x18b   : > { %v1258_v49 = vpop.f32.mrf.mxu1  ;;  %v1403_v21 = vpop.f32.mrf.mxu2  ;;  %v2337_v34 = vsub.f32 %v8352_v24, %v2336_v61  ;;  %v1166_v10 = vadd.f32 %v1165_v31, %v8013_v19  ;;  %v11984_v19 = vand.u32 4294901760, %v8099_v5  ;;  %v389_v5 = vld [vmem:[%s11671_s1 + $0x1f0] sm:$0xff] }
 0x18c   : > { %v1259_v3 = vadd.f32 %v1258_v49, %v1162_v43  ;;  %v1580_v16 = vpop.f32.mrf.mxu3  ;;  %2670 = vmatpush.msra.mxu0 %v11981_v26  ;;  %v201_v26 = vld [vmem:[%s7207_s16 + $0x10] sm:$0xff] }
 0x18d   : > { %1709 = vmatmul.f32.gmra.mxu0 %v7960_v60  ;;  %v2338_v49 = vand.u32 4294901760, %v2337_v34  ;;  %v8404_v60 = vand.u32 4294901760, %v201_v26 }
 0x18e   : > { %v1404_v59 = vadd.f32 %v1403_v21, %v1259_v3  ;;  %1829 = vmatmul.f32.gmra.mxu1 %v11980_v23  ;;  %2674 = vmatpush.msra.mxu0 %v11982_v51  ;;  %v8378_v3 = vand.u32 4294901760, %v390_v0  ;;  %v11986_v51 = vand.u32 4294901760, %v8122_v58 }
 0x18f   : > { %2067 = vmatmul.f32.gmra.mxu3 %v7949_v54  ;;  %2339 = vmatpush.msrb.mxu1 %v2338_v49  ;;  %v8411_v49 = vand.u32 4294901760, %v389_v5 }
 0x190   : > { %v8365_v43 = vadd.f32 %v1580_v16, %v1404_v59  ;;  %1970 = vmatmul.f32.gmra.mxu2 %v7949_v54  ;;  %2678 = vmatpush.msra.mxu0 %v11983_v30  ;;  %v8384_v11 = vsub.f32 %v390_v0, %v8378_v3 }
 0x191   : > { %2890 = vmatpush.msra.mxu2 %v8378_v3  ;;  %2793 = vmatpush.msra.mxu1 %v7998_v4 }
 0x192   : > { %v1169_v21 = vpop.f32.mrf.mxu0  ;;  %2682 = vmatpush.msra.mxu0 %v11984_v19  ;;  %v11747_v34 = vand.u32 4294901760, %v8384_v11 }
 0x193   : > { %v1262_v16 = vpop.f32.mrf.mxu1  ;;  %v1411_v54 = vpop.f32.mrf.mxu2  ;;  %2795 = vmatpush.msra.mxu1 %v8028_v42  ;;  %v11987_v42 = vld [vmem:[#allocation5_spill] sm:$0xff]  ;;  %2892 = vmatpush.msra.mxu2 %v8411_v49 }
 0x194   : > { %v1263_v59 = vadd.f32 %v1262_v16, %v1166_v10  ;;  %v1584_v23 = vpop.f32.mrf.mxu3  ;;  %2686 = vmatpush.msra.mxu0 %v11986_v51  ;;  %v3053_v4 = vsub.f32 %v8384_v11, %v11747_v34  ;;  %v1170_v58 = vadd.f32 %v1169_v21, %v11987_v42  ;;  %v11988_v16 = vand.u32 4294901760, %v8145_v20  ;;  %v209_v51 = vld [vmem:[%s7207_s16 + $0x50] sm:$0xff] }
 0x195   : > { %1714 = vmatmul.f32.gmra.mxu0 %v7976_v63  ;;  %2797 = vmatpush.msra.mxu1 %v8053_v56  ;;  %v8418_v56 = vsub.f32 %v389_v5, %v8411_v49  ;;  %v8421_v21 = vsub.f32 %v201_v26, %v8404_v60  ;;  %v11989_v20 = vand.u32 4294901760, %v8168_v55  ;;  %v388_v5 = vld [vmem:[%s11671_s1 + $0x1e8] sm:$0xff] }
 0x196   : > { %v1412_v31 = vadd.f32 %v1411_v54, %v1263_v59  ;;  %1835 = vmatmul.f32.gmra.mxu1 %v11985_v41  ;;  %v3054_v10 = vand.u32 4294901760, %v3053_v4  ;;  %2690 = vmatpush.msra.mxu0 %v11988_v16  ;;  %v11992_v4 = vand.u32 4294901760, %v8191_v62  ;;  %v8447_v62 = vand.u32 4294901760, %v209_v51 }
 0x197   : > { %2071 = vmatmul.f32.gmra.mxu3 %v7965_v57  ;;  %2799 = vmatpush.msra.mxu1 %v8074_v44  ;;  %v11991_v44 = vand.u32 4294901760, %v7976_v63  ;;  %v11745_v41 = vand.u32 4294901760, %v8418_v56  ;;  %v2117_v63 = vand.u32 4294901760, %v8421_v21 }
 0x198   : > { %v8397_v0 = vadd.f32 %v1584_v23, %v1412_v31  ;;  %1974 = vmatmul.f32.gmra.mxu2 %v7965_v57  ;;  %3055 = vmatpush.msra.mxu3 %v3054_v10  ;;  %v11990_v31 = vld [vmem:[#allocation3_spill] sm:$0xff]  ;;  %v11994_v10 = vand.u32 4294901760, %v8214_v48  ;;  %v11995_v48 = vand.u32 4294901760, %v8237_v8 }
 0x199   : > { %2801 = vmatpush.msra.mxu1 %v8096_v33  ;;  %2694 = vmatpush.msra.mxu0 %v11989_v20  ;;  %v11993_v33 = vld [vmem:[#allocation2_spill] sm:$0xff]  ;;  %v3059_v55 = vsub.f32 %v8418_v56, %v11745_v41  ;;  %v11996_v20 = vld [vmem:[#allocation4_spill] sm:$0xff] }
 0x19a   : > { %v1173_v30 = vpop.f32.mrf.mxu0 }
 0x19b   : > { %v1266_v59 = vpop.f32.mrf.mxu1  ;;  %v1419_v54 = vpop.f32.mrf.mxu2  ;;  %2803 = vmatpush.msra.mxu1 %v8119_v12  ;;  %2698 = vmatpush.msra.mxu0 %v11992_v4  ;;  %v1174_v12 = vadd.f32 %v1173_v30, %v8065_v25  ;;  %v3060_v42 = vand.u32 4294901760, %v3059_v55 }
 0x19c   : > { %v1267_v57 = vadd.f32 %v1266_v59, %v1170_v58  ;;  %v1588_v23 = vpop.f32.mrf.mxu3  ;;  %v8449_v58 = vand.u32 4294901760, %v388_v5 }
 0x19d   : > { %1719 = vmatmul.f32.gmra.mxu0 %v11990_v31  ;;  %2805 = vmatpush.msra.mxu1 %v8142_v38  ;;  %v2118_v38 = vsub.f32 %v8421_v21, %v2117_v63 }
 0x19e   : > { %v1420_v19 = vadd.f32 %v1419_v54, %v1267_v57  ;;  %1841 = vmatmul.f32.gmra.mxu1 %v11991_v44  ;;  %2702 = vmatpush.msra.mxu0 %v11994_v10  ;;  %v8456_v25 = vsub.f32 %v388_v5, %v8449_v58  ;;  %v217_v44 = vld [vmem:[%s7207_s16 + $0x90] sm:$0xff]  ;;  %v12000_v10 = vand.u32 4294901760, %v8283_v53  ;;  %v12001_v53 = vand.u32 4294901760, %v8306_v35 }
 0x19f   : > { %2075 = vmatmul.f32.gmra.mxu3 %v11993_v33  ;;  %2807 = vmatpush.msra.mxu1 %v8165_v50  ;;  %v11997_v50 = vand.u32 4294901760, %v11990_v31  ;;  %v2119_v31 = vand.u32 4294901760, %v2118_v38 }
 0x1a0   : > { %v8434_v26 = vadd.f32 %v1588_v23, %v1420_v19  ;;  %1978 = vmatmul.f32.gmra.mxu2 %v11993_v33  ;;  %3061 = vmatpush.msra.mxu3 %v3060_v42  ;;  %v8466_v19 = vsub.f32 %v209_v51, %v8447_v62  ;;  %v11744_v4 = vand.u32 4294901760, %v8456_v25  ;;  %v11998_v33 = vand.u32 4294901760, %v8260_v37  ;;  %v11999_v37 = vld [vmem:[#allocation6_spill] sm:$0xff] }
 0x1a1   : > { %2894 = vmatpush.msra.mxu2 %v8449_v58  ;;  %2809 = vmatpush.msra.mxu1 %v8188_v29  ;;  %v8480_v51 = vand.u32 4294901760, %v217_v44 }
 0x1a2   : > { %v1177_v16 = vpop.f32.mrf.mxu0  ;;  %2706 = vmatpush.msra.mxu0 %v11995_v48  ;;  %v3065_v8 = vsub.f32 %v8456_v25, %v11744_v4  ;;  %v2125_v5 = vand.u32 4294901760, %v8466_v19 }
 0x1a3   : > { %v1270_v59 = vpop.f32.mrf.mxu1  ;;  %v1427_v54 = vpop.f32.mrf.mxu2  ;;  %2811 = vmatpush.msra.mxu1 %v8211_v9  ;;  %v387_v9 = vld [vmem:[%s11671_s1 + $0x1e0] sm:$0xff]  ;;  %v1178_v55 = vadd.f32 %v1177_v16, %v11999_v37  ;;  %v8498_v16 = vsub.f32 %v217_v44, %v8480_v51 }
 0x1a4   : > { %v1271_v57 = vadd.f32 %v1270_v59, %v1174_v12  ;;  %v1592_v23 = vpop.f32.mrf.mxu3  ;;  %2710 = vmatpush.msra.mxu0 %v11998_v33  ;;  %v3066_v12 = vand.u32 4294901760, %v3065_v8  ;;  %v8488_v42 = vand.u32 4294901760, %v387_v9  ;;  %v2126_v48 = vsub.f32 %v8466_v19, %v2125_v5 }
 0x1a5   : > { %1724 = vmatmul.f32.gmra.mxu0 %v11996_v20  ;;  %2813 = vmatpush.msra.mxu1 %v8234_v45 }
 0x1a6   : > { %v1428_v30 = vadd.f32 %v1427_v54, %v1271_v57  ;;  %1847 = vmatmul.f32.gmra.mxu1 %v11997_v50  ;;  %2714 = vmatpush.msra.mxu0 %v12000_v10  ;;  %v8495_v45 = vsub.f32 %v387_v9, %v8488_v42 }
 0x1a7   : > { %2079 = vmatmul.f32.gmra.mxu3 %v8007_v39  ;;  %2815 = vmatpush.msra.mxu1 %v8257_v22  ;;  %v12002_v22 = vand.u32 4294901760, %v11996_v20 }
 0x1a8   : > { %v8473_v29 = vadd.f32 %v1592_v23, %v1428_v30  ;;  %1982 = vmatmul.f32.gmra.mxu2 %v8007_v39  ;;  %3067 = vmatpush.msra.mxu3 %v3066_v12  ;;  %v225_v30 = vld [vmem:[%s7207_s16 + $0xd0] sm:$0xff]  ;;  %v11743_v50 = vand.u32 4294901760, %v8495_v45 }
 0x1a9   : > { %2896 = vmatpush.msra.mxu2 %v8488_v42  ;;  %2817 = vmatpush.msra.mxu1 %v8280_v1  ;;  %v2133_v1 = vand.u32 4294901760, %v8498_v16  ;;  %v8518_v20 = vand.u32 4294901760, %v225_v30 }
 0x1aa   : > { %v1650_v59 = vpop.f32.mrf.mxu0  ;;  %2718 = vmatpush.msra.mxu0 %v12001_v53  ;;  %v3071_v35 = vsub.f32 %v8495_v45, %v11743_v50 }
 0x1ab   : > { %v1274_v39 = vpop.f32.mrf.mxu1  ;;  %v1435_v54 = vpop.f32.mrf.mxu2  ;;  %2819 = vmatpush.msra.mxu1 %v8303_v18  ;;  %12003 = vst [vmem:[#allocation5_spill] sm:$0xff] %v8518_v20  ;;  %v386_v18 = vld [vmem:[%s11671_s1 + $0x1d8] sm:$0xff]  ;;  %v1651_v52 = vadd.f32 %v1650_v59, %v8108_v14  ;;  %v2134_v24 = vsub.f32 %v8498_v16, %v2133_v1 }
 0x1ac   : > { %v1275_v57 = vadd.f32 %v1274_v39, %v1178_v55  ;;  %v1596_v23 = vpop.f32.mrf.mxu3  ;;  %2722 = vmatpush.msra.mxu0 %v2330_v47  ;;  %v2127_v47 = vand.u32 4294901760, %v2126_v48  ;;  %v8525_v33 = vand.u32 4294901760, %v386_v18  ;;  %v233_v55 = vld [vmem:[%s7207_s16 + $0x110] sm:$0xff] }
 0x1ad   : > { %2120 = vmatmul.f32.vlgmr.msrb.gmra.mxu0 %v2119_v31  ;;  %2821 = vmatpush.msra.mxu1 %v8326_v17  ;;  %v8539_v17 = vsub.f32 %v225_v30, %v8518_v20  ;;  %v2135_v39 = vand.u32 4294901760, %v2134_v24 }
 0x1ae   : > { %v1436_v38 = vadd.f32 %v1435_v54, %v1275_v57  ;;  %1853 = vmatmul.f32.gmra.mxu1 %v12002_v22  ;;  %2726 = vmatpush.msra.mxu0 %v2336_v61  ;;  %v8533_v14 = vsub.f32 %v386_v18, %v8525_v33  ;;  %v385_v57 = vld [vmem:[%s11671_s1 + $0x1d0] sm:$0xff] }
 0x1af   : > { %2569 = vmatmul.f32.vlgmr.msrb.gmra.mxu3 %v2117_v63  ;;  %v3072_v63 = vand.u32 4294901760, %v3071_v35  ;;  %2823 = vmatpush.msra.mxu1 %v8349_v28  ;;  %v2141_v59 = vand.u32 4294901760, %v8539_v17  ;;  %v8561_v53 = vand.u32 4294901760, %v385_v57 }
 0x1b0   : > { %v8511_v44 = vadd.f32 %v1596_v23, %v1436_v38  ;;  %2455 = vmatmul.f32.vlgmr.msrb.gmra.mxu2 %v8421_v21  ;;  %3213 = vmatpush.msrb.mxu0 %v8384_v11  ;;  %v11741_v61 = vand.u32 4294901760, %v8533_v14  ;;  %v8559_v23 = vand.u32 4294901760, %v233_v55 }
 0x1b1   : > { %3073 = vmatpush.msra.mxu3 %v3072_v63  ;;  %2898 = vmatpush.msra.mxu2 %v8525_v33  ;;  %v2142_v35 = vsub.f32 %v8539_v17, %v2141_v59 }
 0x1b2   : > { %v1655_v21 = vpop.f32.mrf.mxu0  ;;  %3216 = vmatpush.msrb.mxu0 %v8418_v56  ;;  %v3077_v10 = vsub.f32 %v8533_v14, %v11741_v61  ;;  %12004 = vst [vmem:[#allocation3_spill] sm:$0xff] %v8559_v23 }
 0x1b3   : > { %v1764_v8 = vpop.f32.mrf.mxu1  ;;  %v1923_v9 = vpop.f32.mrf.mxu2  ;;  %v1656_v54 = vadd.f32 %v1655_v21, %v8131_v15  ;;  %2900 = vmatpush.msra.mxu2 %v8561_v53  ;;  %v8567_v15 = vsub.f32 %v385_v57, %v8561_v53 }
 0x1b4   : > { %v1765_v31 = vadd.f32 %v1764_v8, %v1651_v52  ;;  %v2020_v37 = vpop.f32.mrf.mxu3  ;;  %3219 = vmatpush.msrb.mxu0 %v8456_v25  ;;  %v8574_v52 = vsub.f32 %v233_v55, %v8559_v23 }
 0x1b5   : > { %2128 = vmatmul.f32.gmra.mxu0 %v2127_v47  ;;  %v241_v47 = vld [vmem:[%s7207_s16 + $0x150] sm:$0xff]  ;;  %v11740_v63 = vand.u32 4294901760, %v8567_v15 }
 0x1b6   : > { %v1924_v28 = vadd.f32 %v1923_v9, %v1765_v31  ;;  %2341 = vmatmul.f32.vlgmr.msrb.gmra.mxu1 %v8404_v60  ;;  %3222 = vmatpush.msrb.mxu0 %v8495_v45  ;;  %v2143_v31 = vand.u32 4294901760, %v2142_v35  ;;  %v8588_v9 = vand.u32 4294901760, %v241_v47 }
 0x1b7   : > { %3341 = vmatpush.msrb.mxu1 %v8378_v3  ;;  %2575 = vmatmul.f32.gmra.mxu3 %v2125_v5  ;;  %v3078_v5 = vand.u32 4294901760, %v3077_v10  ;;  %v3083_v8 = vsub.f32 %v8567_v15, %v11740_v63 }
 0x1b8   : > { %v8547_v12 = vadd.f32 %v2020_v37, %v1924_v28  ;;  %2460 = vmatmul.f32.gmra.mxu2 %v8466_v19  ;;  %3225 = vmatpush.msrb.mxu0 %v8533_v14  ;;  %12005 = vst [vmem:[#allocation2_spill] sm:$0xff] %v8588_v9  ;;  %v384_v37 = vld [vmem:[%s11671_s1 + $0x1c8] sm:$0xff]  ;;  %v2149_v28 = vand.u32 4294901760, %v8574_v52 }
 0x1b9   : > { %3343 = vmatpush.msrb.mxu1 %v8411_v49  ;;  %3079 = vmatpush.msra.mxu3 %v3078_v5  ;;  %v8596_v55 = vand.u32 4294901760, %v384_v37 }
 0x1ba   : > { %v1660_v38 = vpop.f32.mrf.mxu0  ;;  %3228 = vmatpush.msrb.mxu0 %v8567_v15 }
 0x1bb   : > { %v1770_v19 = vpop.f32.mrf.mxu1  ;;  %3345 = vmatpush.msrb.mxu1 %v8449_v58  ;;  %v1927_v48 = vpop.f32.mrf.mxu2  ;;  %v1661_v24 = vadd.f32 %v1660_v38, %v8154_v36  ;;  %2902 = vmatpush.msra.mxu2 %v8596_v55  ;;  %v8600_v5 = vsub.f32 %v384_v37, %v8596_v55  ;;  %v2150_v38 = vsub.f32 %v8574_v52, %v2149_v28 }
 0x1bc   : > { %v1771_v22 = vadd.f32 %v1770_v19, %v1656_v54  ;;  %v2024_v30 = vpop.f32.mrf.mxu3  ;;  %v8603_v19 = vsub.f32 %v241_v47, %v8588_v9 }
 0x1bd   : > { %3347 = vmatpush.msrb.mxu1 %v8488_v42  ;;  %2136 = vmatmul.f32.gmra.mxu0 %v2135_v39  ;;  %v2151_v37 = vand.u32 4294901760, %v2150_v38 }
 0x1be   : > { %v1928_v18 = vadd.f32 %v1927_v48, %v1771_v22  ;;  %2345 = vmatmul.f32.gmra.mxu1 %v8447_v62  ;;  %v249_v22 = vld [vmem:[%s7207_s16 + $0x190] sm:$0xff]  ;;  %v11739_v48 = vand.u32 4294901760, %v8600_v5  ;;  %3231 = vmatpush.msrb.mxu0 %v8600_v5 }
 0x1bf   : > { %3349 = vmatpush.msrb.mxu1 %v8525_v33  ;;  %2581 = vmatmul.f32.gmra.mxu3 %v2133_v1  ;;  %v3084_v1 = vand.u32 4294901760, %v3083_v8  ;;  %v8618_v47 = vand.u32 4294901760, %v249_v22  ;;  %v383_v8 = vld [vmem:[%s11671_s1 + $0x1c0] sm:$0xff] }
 0x1c0   : > { %v8580_v21 = vadd.f32 %v2024_v30, %v1928_v18  ;;  %2465 = vmatmul.f32.gmra.mxu2 %v8498_v16  ;;  %v3089_v35 = vsub.f32 %v8600_v5, %v11739_v48  ;;  %v2157_v18 = vand.u32 4294901760, %v8603_v19 }
 0x1c1   : > { %3351 = vmatpush.msrb.mxu1 %v8561_v53  ;;  %3085 = vmatpush.msra.mxu3 %v3084_v1  ;;  %12007 = vst [vmem:[#allocation6_spill] sm:$0xff] %v8618_v47  ;;  %v8624_v1 = vand.u32 4294901760, %v383_v8 }
 0x1c2   : > { %v1665_v10 = vpop.f32.mrf.mxu0 }
 0x1c3   : > { %v1776_v39 = vpop.f32.mrf.mxu1  ;;  %v1931_v57 = vpop.f32.mrf.mxu2  ;;  %3353 = vmatpush.msrb.mxu1 %v8596_v55  ;;  %2904 = vmatpush.msra.mxu2 %v8624_v1 }
 0x1c4   : > { %v1777_v16 = vadd.f32 %v1776_v39, %v1661_v24  ;;  %v2028_v54 = vpop.f32.mrf.mxu3  ;;  %v3090_v24 = vand.u32 4294901760, %v3089_v35  ;;  %v257_v35 = vld [vmem:[%s7207_s16 + $0x1d0] sm:$0xff] }
 0x1c5   : > { %2144 = vmatmul.f32.gmra.mxu0 %v2143_v31  ;;  %v1666_v31 = vadd.f32 %v1665_v10, %v8177_v7  ;;  %v8632_v7 = vsub.f32 %v249_v22, %v8618_v47  ;;  %3355 = vmatpush.msrb.mxu1 %v8624_v1 }
 0x1c6   : > { %v1932_v36 = vadd.f32 %v1931_v57, %v1777_v16  ;;  %2349 = vmatmul.f32.gmra.mxu1 %v8480_v51  ;;  %3091 = vmatpush.msra.mxu3 %v3090_v24 }
 0x1c7   : > { %2587 = vmatmul.f32.gmra.mxu3 %v2141_v59  ;;  %v2165_v24 = vand.u32 4294901760, %v8632_v7 }
 0x1c8   : > { %v8611_v30 = vadd.f32 %v2028_v54, %v1932_v36  ;;  %2470 = vmatmul.f32.gmra.mxu2 %v8539_v17  ;;  %v8628_v54 = vsub.f32 %v383_v8, %v8624_v1  ;;  %v2158_v36 = vsub.f32 %v8603_v19, %v2157_v18 }
 0x1c9   : > { %v2166_v63 = vsub.f32 %v8632_v7, %v2165_v24 }
 0x1ca   : > { %12006 = vst [vmem:[#allocation4_spill] sm:$0xff] %v8611_v30  ;;  %v1670_v59 = vpop.f32.mrf.mxu0  ;;  %v11738_v38 = vand.u32 4294901760, %v8628_v54  ;;  %3234 = vmatpush.msrb.mxu0 %v8628_v54  ;;  %v2159_v22 = vand.u32 4294901760, %v2158_v36  ;;  %v321_v30 = vld [vmem:[%s7207_s16 + $0x3d0] sm:$0xff] }
 0x1cb   : > { %v1782_v39 = vpop.f32.mrf.mxu1  ;;  %v1935_v57 = vpop.f32.mrf.mxu2 }
 0x1cc   : > { %v1783_v16 = vadd.f32 %v1782_v39, %v1666_v31  ;;  %v2032_v17 = vpop.f32.mrf.mxu3  ;;  %v3095_v8 = vsub.f32 %v8628_v54, %v11738_v38  ;;  %v1671_v39 = vadd.f32 %v1670_v59, %v8200_v13 }
 0x1cd   : > { %2152 = vmatmul.f32.gmra.mxu0 %v2151_v37  ;;  %v382_v37 = vld [vmem:[%s11671_s1 + $0x1b8] sm:$0xff] }
 0x1ce   : > { %v1936_v10 = vadd.f32 %v1935_v57, %v1783_v16  ;;  %2353 = vmatmul.f32.gmra.mxu1 %v8518_v20  ;;  %v8650_v16 = vand.u32 4294901760, %v257_v35  ;;  %v3096_v57 = vand.u32 4294901760, %v3095_v8  ;;  %v265_v8 = vld [vmem:[%s7207_s16 + $0x210] sm:$0xff] }
 0x1cf   : > { %2593 = vmatmul.f32.gmra.mxu3 %v2149_v28  ;;  %v8652_v28 = vand.u32 4294901760, %v382_v37 }
 0x1d0   : > { %v8639_v31 = vadd.f32 %v2032_v17, %v1936_v10  ;;  %2475 = vmatmul.f32.gmra.mxu2 %v8574_v52  ;;  %12009 = vst [vmem:[#allocation8_spill] sm:$0xff] %v8650_v16  ;;  %3097 = vmatpush.msra.mxu3 %v3096_v57  ;;  %v8662_v59 = vsub.f32 %v257_v35, %v8650_v16  ;;  %v381_v35 = vld [vmem:[%s11671_s1 + $0x1b0] sm:$0xff] }
 0x1d1   : > { %2906 = vmatpush.msra.mxu2 %v8652_v28  ;;  %v8656_v36 = vsub.f32 %v382_v37, %v8652_v28  ;;  %3357 = vmatpush.msrb.mxu1 %v8652_v28 }
 0x1d2   : > { %12008 = vst [vmem:[#allocation7_spill] sm:$0xff] %v8639_v31  ;;  %v1675_v17 = vpop.f32.mrf.mxu0 }
 0x1d3   : > { %v1788_v10 = vpop.f32.mrf.mxu1  ;;  %v1939_v48 = vpop.f32.mrf.mxu2  ;;  %3237 = vmatpush.msrb.mxu0 %v8656_v36 }
 0x1d4   : > { %v1789_v38 = vadd.f32 %v1788_v10, %v1671_v39  ;;  %v2036_v52 = vpop.f32.mrf.mxu3  ;;  %v11742_v39 = vand.u32 4294901760, %v8656_v36  ;;  %v2173_v10 = vand.u32 4294901760, %v8662_v59 }
 0x1d5   : > { %2160 = vmatmul.f32.gmra.mxu0 %v2159_v22  ;;  %v1676_v22 = vadd.f32 %v1675_v17, %v8223_v46 }
 0x1d6   : > { %v1940_v13 = vadd.f32 %v1939_v48, %v1789_v38  ;;  %2357 = vmatmul.f32.gmra.mxu1 %v8559_v23  ;;  %v3101_v37 = vsub.f32 %v8656_v36, %v11742_v39  ;;  %v2167_v48 = vand.u32 4294901760, %v2166_v63  ;;  %v8673_v38 = vand.u32 4294901760, %v265_v8 }
 0x1d7   : > { %2599 = vmatmul.f32.gmra.mxu3 %v2157_v18  ;;  %v8680_v18 = vand.u32 4294901760, %v381_v35  ;;  %v2174_v17 = vsub.f32 %v8662_v59, %v2173_v10 }
 0x1d8   : > { %v8667_v57 = vadd.f32 %v2036_v52, %v1940_v13  ;;  %2480 = vmatmul.f32.gmra.mxu2 %v8603_v19  ;;  %12011 = vst [vmem:[#allocation10_spill] sm:$0xff] %v8673_v38  ;;  %v3102_v52 = vand.u32 4294901760, %v3101_v37  ;;  %v8687_v4 = vsub.f32 %v265_v8, %v8673_v38 }
 0x1d9   : > { %2908 = vmatpush.msra.mxu2 %v8680_v18  ;;  %v8684_v63 = vsub.f32 %v381_v35, %v8680_v18  ;;  %3359 = vmatpush.msrb.mxu1 %v8680_v18 }
 0x1da   : > { %12010 = vst [vmem:[#allocation9_spill] sm:$0xff] %v8667_v57  ;;  %v1680_v13 = vpop.f32.mrf.mxu0  ;;  %3103 = vmatpush.msra.mxu3 %v3102_v52  ;;  %v2175_v52 = vand.u32 4294901760, %v2174_v17  ;;  %v281_v17 = vld [vmem:[%s7207_s16 + $0x290] sm:$0xff] }
 0x1db   : > { %v1794_v61 = vpop.f32.mrf.mxu1  ;;  %v1943_v50 = vpop.f32.mrf.mxu2  ;;  %v11746_v37 = vand.u32 4294901760, %v8684_v63  ;;  %3240 = vmatpush.msrb.mxu0 %v8684_v63  ;;  %v1681_v35 = vadd.f32 %v1680_v13, %v8246_v27 }
 0x1dc   : > { %v1795_v39 = vadd.f32 %v1794_v61, %v1676_v22  ;;  %v2040_v19 = vpop.f32.mrf.mxu3  ;;  %v273_v61 = vld [vmem:[%s7207_s16 + $0x250] sm:$0xff] }
 0x1dd   : > { %2168 = vmatmul.f32.gmra.mxu0 %v2167_v48  ;;  %v3107_v8 = vsub.f32 %v8684_v63, %v11746_v37  ;;  %v380_v48 = vld [vmem:[%s11671_s1 + $0x1a8] sm:$0xff] }
 0x1de   : > { %v1944_v46 = vadd.f32 %v1943_v50, %v1795_v39  ;;  %2361 = vmatmul.f32.gmra.mxu1 %v8588_v9  ;;  %v2181_v50 = vand.u32 4294901760, %v8687_v4  ;;  %v8702_v39 = vand.u32 4294901760, %v273_v61 }
 0x1df   : > { %2605 = vmatmul.f32.gmra.mxu3 %v2165_v24 }
 0x1e0   : > { %v8695_v22 = vadd.f32 %v2040_v19, %v1944_v46  ;;  %2485 = vmatmul.f32.gmra.mxu2 %v8632_v7  ;;  %12013 = vst [vmem:[#allocation12_spill] sm:$0xff] %v8702_v39  ;;  %v3108_v19 = vand.u32 4294901760, %v3107_v8  ;;  %v8708_v46 = vand.u32 4294901760, %v380_v48  ;;  %v2182_v9 = vsub.f32 %v8687_v4, %v2181_v50 }
 0x1e1   : > { %v8716_v27 = vsub.f32 %v273_v61, %v8702_v39 }
 0x1e2   : > { %12012 = vst [vmem:[#allocation11_spill] sm:$0xff] %v8695_v22  ;;  %v1685_v24 = vpop.f32.mrf.mxu0  ;;  %3109 = vmatpush.msra.mxu3 %v3108_v19  ;;  %2910 = vmatpush.msra.mxu2 %v8708_v46  ;;  %v8712_v22 = vsub.f32 %v380_v48, %v8708_v46  ;;  %v2183_v61 = vand.u32 4294901760, %v2182_v9 }
 0x1e3   : > { %v1800_v41 = vpop.f32.mrf.mxu1  ;;  %v1947_v34 = vpop.f32.mrf.mxu2  ;;  %3361 = vmatpush.msrb.mxu1 %v8708_v46 }
 0x1e4   : > { %v1801_v37 = vadd.f32 %v1800_v41, %v1681_v35  ;;  %v2044_v7 = vpop.f32.mrf.mxu3  ;;  %v11750_v41 = vand.u32 4294901760, %v8712_v22  ;;  %3243 = vmatpush.msrb.mxu0 %v8712_v22  ;;  %v1686_v35 = vadd.f32 %v1685_v24, %v8269_v32 }
 0x1e5   : > { %2176 = vmatmul.f32.gmra.mxu0 %v2175_v52  ;;  %v8734_v52 = vand.u32 4294901760, %v281_v17 }
 0x1e6   : > { %v1948_v13 = vadd.f32 %v1947_v34, %v1801_v37  ;;  %2365 = vmatmul.f32.gmra.mxu1 %v8618_v47  ;;  %v3113_v48 = vsub.f32 %v8712_v22, %v11750_v41  ;;  %v2189_v34 = vand.u32 4294901760, %v8716_v27  ;;  %v379_v37 = vld [vmem:[%s11671_s1 + $0x1a0] sm:$0xff] }
 0x1e7   : > { %2611 = vmatmul.f32.gmra.mxu3 %v2173_v10  ;;  %12015 = vst [vmem:[#allocation14_spill] sm:$0xff] %v8734_v52  ;;  %v8736_v10 = vand.u32 4294901760, %v379_v37  ;;  %v8746_v24 = vsub.f32 %v281_v17, %v8734_v52  ;;  %v378_v17 = vld [vmem:[%s11671_s1 + $0x198] sm:$0xff] }
 0x1e8   : > { %v8723_v8 = vadd.f32 %v2044_v7, %v1948_v13  ;;  %2490 = vmatmul.f32.gmra.mxu2 %v8662_v59  ;;  %v3114_v19 = vand.u32 4294901760, %v3113_v48  ;;  %v2190_v47 = vsub.f32 %v8716_v27, %v2189_v34  ;;  %v289_v48 = vld [vmem:[%s7207_s16 + $0x2d0] sm:$0xff] }
 0x1e9   : > { %2912 = vmatpush.msra.mxu2 %v8736_v10  ;;  %v8740_v9 = vsub.f32 %v379_v37, %v8736_v10  ;;  %3363 = vmatpush.msrb.mxu1 %v8736_v10 }
 0x1ea   : > { %12014 = vst [vmem:[#allocation13_spill] sm:$0xff] %v8723_v8  ;;  %v1690_v7 = vpop.f32.mrf.mxu0  ;;  %3115 = vmatpush.msra.mxu3 %v3114_v19 }
 0x1eb   : > { %v1806_v13 = vpop.f32.mrf.mxu1  ;;  %v1951_v8 = vpop.f32.mrf.mxu2  ;;  %3246 = vmatpush.msrb.mxu0 %v8740_v9 }
 0x1ec   : > { %v1807_v41 = vadd.f32 %v1806_v13, %v1686_v35  ;;  %v2048_v59 = vpop.f32.mrf.mxu3  ;;  %v11753_v35 = vand.u32 4294901760, %v8740_v9  ;;  %v2197_v13 = vand.u32 4294901760, %v8746_v24 }
 0x1ed   : > { %2184 = vmatmul.f32.gmra.mxu0 %v2183_v61  ;;  %v1691_v61 = vadd.f32 %v1690_v7, %v8292_v2 }
 0x1ee   : > { %v1952_v32 = vadd.f32 %v1951_v8, %v1807_v41  ;;  %2369 = vmatmul.f32.gmra.mxu1 %v8650_v16  ;;  %v3119_v37 = vsub.f32 %v8740_v9, %v11753_v35  ;;  %v2191_v41 = vand.u32 4294901760, %v2190_v47  ;;  %v8757_v8 = vand.u32 4294901760, %v289_v48 }
 0x1ef   : > { %2617 = vmatmul.f32.gmra.mxu3 %v2181_v50  ;;  %v8764_v50 = vand.u32 4294901760, %v378_v17  ;;  %v2198_v7 = vsub.f32 %v8746_v24, %v2197_v13 }
 0x1f0   : > { %v8751_v19 = vadd.f32 %v2048_v59, %v1952_v32  ;;  %2495 = vmatmul.f32.gmra.mxu2 %v8687_v4  ;;  %12017 = vst [vmem:[#allocation16_spill] sm:$0xff] %v8757_v8  ;;  %v3120_v59 = vand.u32 4294901760, %v3119_v37  ;;  %v8771_v57 = vsub.f32 %v289_v48, %v8757_v8 }
 0x1f1   : > { %2914 = vmatpush.msra.mxu2 %v8764_v50  ;;  %v8768_v47 = vsub.f32 %v378_v17, %v8764_v50  ;;  %3365 = vmatpush.msrb.mxu1 %v8764_v50 }
 0x1f2   : > { %12016 = vst [vmem:[#allocation15_spill] sm:$0xff] %v8751_v19  ;;  %v1695_v32 = vpop.f32.mrf.mxu0  ;;  %3121 = vmatpush.msra.mxu3 %v3120_v59  ;;  %v2199_v59 = vand.u32 4294901760, %v2198_v7 }
 0x1f3   : > { %v1812_v19 = vpop.f32.mrf.mxu1  ;;  %v1955_v16 = vpop.f32.mrf.mxu2  ;;  %v11756_v37 = vand.u32 4294901760, %v8768_v47  ;;  %3249 = vmatpush.msrb.mxu0 %v8768_v47  ;;  %v1696_v17 = vadd.f32 %v1695_v32, %v8315_v6 }
 0x1f4   : > { %v1813_v35 = vadd.f32 %v1812_v19, %v1691_v61  ;;  %v2052_v4 = vpop.f32.mrf.mxu3  ;;  %v297_v19 = vld [vmem:[%s7207_s16 + $0x310] sm:$0xff] }
 0x1f5   : > { %2192 = vmatmul.f32.gmra.mxu0 %v2191_v41  ;;  %v3125_v48 = vsub.f32 %v8768_v47, %v11756_v37  ;;  %v377_v41 = vld [vmem:[%s11671_s1 + $0x190] sm:$0xff] }
 0x1f6   : > { %v1956_v2 = vadd.f32 %v1955_v16, %v1813_v35  ;;  %2373 = vmatmul.f32.gmra.mxu1 %v8673_v38  ;;  %v2205_v16 = vand.u32 4294901760, %v8771_v57  ;;  %v8786_v35 = vand.u32 4294901760, %v297_v19 }
 0x1f7   : > { %2623 = vmatmul.f32.gmra.mxu3 %v2189_v34 }
 0x1f8   : > { %v8779_v61 = vadd.f32 %v2052_v4, %v1956_v2  ;;  %2500 = vmatmul.f32.gmra.mxu2 %v8716_v27  ;;  %v3126_v4 = vand.u32 4294901760, %v3125_v48  ;;  %v8792_v2 = vand.u32 4294901760, %v377_v41  ;;  %v2206_v31 = vsub.f32 %v8771_v57, %v2205_v16 }
 0x1f9   : > { %v8800_v6 = vsub.f32 %v297_v19, %v8786_v35 }
 0x1fa   : > { %12018 = vst [vmem:[#allocation17_spill] sm:$0xff] %v8779_v61  ;;  %v1700_v34 = vpop.f32.mrf.mxu0  ;;  %3127 = vmatpush.msra.mxu3 %v3126_v4  ;;  %2916 = vmatpush.msra.mxu2 %v8792_v2  ;;  %v8796_v23 = vsub.f32 %v377_v41, %v8792_v2  ;;  %v2207_v19 = vand.u32 4294901760, %v2206_v31 }
 0x1fb   : > { %v1818_v61 = vpop.f32.mrf.mxu1  ;;  %v1959_v38 = vpop.f32.mrf.mxu2  ;;  %3367 = vmatpush.msrb.mxu1 %v8792_v2 }
 0x1fc   : > { %v1819_v37 = vadd.f32 %v1818_v61, %v1696_v17  ;;  %v2056_v27 = vpop.f32.mrf.mxu3  ;;  %v11761_v7 = vand.u32 4294901760, %v8796_v23  ;;  %v305_v61 = vld [vmem:[%s7207_s16 + $0x350] sm:$0xff]  ;;  %3252 = vmatpush.msrb.mxu0 %v8796_v23  ;;  %v1701_v17 = vadd.f32 %v1700_v34, %v8338_v40 }
 0x1fd   : > { %2200 = vmatmul.f32.gmra.mxu0 %v2199_v59  ;;  %v8818_v59 = vand.u32 4294901760, %v305_v61 }
 0x1fe   : > { %v1960_v32 = vadd.f32 %v1959_v38, %v1819_v37  ;;  %2377 = vmatmul.f32.gmra.mxu1 %v8702_v39  ;;  %v3131_v41 = vsub.f32 %v8796_v23, %v11761_v7  ;;  %v2213_v38 = vand.u32 4294901760, %v8800_v6  ;;  %v376_v37 = vld [vmem:[%s11671_s1 + $0x188] sm:$0xff] }
 0x1ff   : > { %2629 = vmatmul.f32.gmra.mxu3 %v2197_v13  ;;  %v2220_v34 = vsub.f32 %v305_v61, %v8818_v59 }
 0x200   : > { %v8807_v48 = vadd.f32 %v2056_v27, %v1960_v32  ;;  %2505 = vmatmul.f32.gmra.mxu2 %v8746_v24  ;;  %v3132_v4 = vand.u32 4294901760, %v3131_v41  ;;  %v8820_v27 = vand.u32 4294901760, %v376_v37  ;;  %v2214_v39 = vsub.f32 %v8800_v6, %v2213_v38 }
 0x202   : > { %12019 = vst [vmem:[#allocation18_spill] sm:$0xff] %v8807_v48  ;;  %v1705_v13 = vpop.f32.mrf.mxu0  ;;  %3133 = vmatpush.msra.mxu3 %v3132_v4  ;;  %2918 = vmatpush.msra.mxu2 %v8820_v27  ;;  %v8824_v31 = vsub.f32 %v376_v37, %v8820_v27 }
 0x203   : > { %v1824_v32 = vpop.f32.mrf.mxu1  ;;  %v1963_v48 = vpop.f32.mrf.mxu2  ;;  %3369 = vmatpush.msrb.mxu1 %v8820_v27 }
 0x204   : > { %v1825_v7 = vadd.f32 %v1824_v32, %v1701_v17  ;;  %v2060_v24 = vpop.f32.mrf.mxu3  ;;  %v11766_v41 = vand.u32 4294901760, %v8824_v31  ;;  %v313_v17 = vld [vmem:[%s7207_s16 + $0x390] sm:$0xff]  ;;  %3255 = vmatpush.msrb.mxu0 %v8824_v31  ;;  %v2221_v32 = vand.u32 4294901760, %v2220_v34 }
 0x205   : > { %2208 = vmatmul.f32.gmra.mxu0 %v2207_v19  ;;  %v1706_v19 = vadd.f32 %v1705_v13, %v8365_v43  ;;  %v12021_v43 = vand.u32 4294901760, %v8384_v11 }
 0x206   : > { %v1964_v40 = vadd.f32 %v1963_v48, %v1825_v7  ;;  %2381 = vmatmul.f32.gmra.mxu1 %v8734_v52  ;;  %v3137_v37 = vsub.f32 %v8824_v31, %v11766_v41  ;;  %v375_v7 = vld [vmem:[%s11671_s1 + $0x180] sm:$0xff]  ;;  %v2215_v48 = vand.u32 4294901760, %v2214_v39  ;;  %v8845_v52 = vand.u32 4294901760, %v313_v17 }
 0x207   : > { %2635 = vmatmul.f32.gmra.mxu3 %v2205_v16  ;;  %v8842_v61 = vand.u32 4294901760, %v375_v7  ;;  %v2222_v20 = vsub.f32 %v2220_v34, %v2221_v32 }
 0x208   : > { %v8833_v4 = vadd.f32 %v2060_v24, %v1964_v40  ;;  %2510 = vmatmul.f32.gmra.mxu2 %v8771_v57  ;;  %v3138_v24 = vand.u32 4294901760, %v3137_v37 }
 0x209   : > { %2920 = vmatpush.msra.mxu2 %v8842_v61  ;;  %v8849_v41 = vsub.f32 %v375_v7, %v8842_v61  ;;  %3371 = vmatpush.msrb.mxu1 %v8842_v61  ;;  %v2228_v7 = vsub.f32 %v313_v17, %v8845_v52  ;;  %v12023_v17 = vand.u32 4294901760, %v8456_v25 }
 0x20a   : > { %12020 = vst [vmem:[#allocation19_spill] sm:$0xff] %v8833_v4  ;;  %v1710_v16 = vpop.f32.mrf.mxu0  ;;  %3139 = vmatpush.msra.mxu3 %v3138_v24  ;;  %v12022_v24 = vand.u32 4294901760, %v8418_v56 }
 0x20b   : > { %v1830_v40 = vpop.f32.mrf.mxu1  ;;  %v1967_v39 = vpop.f32.mrf.mxu2  ;;  %3472 = vmatpush.msrb.mxu2 %v12021_v43  ;;  %v11771_v13 = vand.u32 4294901760, %v8849_v41  ;;  %3258 = vmatpush.msrb.mxu0 %v8849_v41  ;;  %v8868_v43 = vand.u32 4294901760, %v321_v30 }
 0x20c   : > { %v1831_v57 = vadd.f32 %v1830_v40, %v1706_v19  ;;  %v2064_v4 = vpop.f32.mrf.mxu3 }
 0x20d   : > { %2216 = vmatmul.f32.gmra.mxu0 %v2215_v48  ;;  %v3143_v19 = vsub.f32 %v8849_v41, %v11771_v13  ;;  %3476 = vmatpush.msrb.mxu2 %v12022_v24  ;;  %v1711_v48 = vadd.f32 %v1710_v16, %v8397_v0  ;;  %v2236_v25 = vsub.f32 %v321_v30, %v8868_v43 }
 0x20e   : > { %v1968_v37 = vadd.f32 %v1967_v39, %v1831_v57  ;;  %2385 = vmatmul.f32.gmra.mxu1 %v8757_v8  ;;  %v2223_v57 = vand.u32 4294901760, %v2222_v20  ;;  %v2229_v39 = vand.u32 4294901760, %v2228_v7 }
 0x20f   : > { %2641 = vmatmul.f32.gmra.mxu3 %v2213_v38  ;;  %v3144_v40 = vand.u32 4294901760, %v3143_v19  ;;  %3480 = vmatpush.msrb.mxu2 %v12023_v17  ;;  %v12025_v38 = vand.u32 4294901760, %v8533_v14  ;;  %v12026_v19 = vand.u32 4294901760, %v8567_v15  ;;  %v12029_v17 = vand.u32 4294901760, %v8656_v36 }
 0x210   : > { %v8864_v11 = vadd.f32 %v2064_v4, %v1968_v37  ;;  %2515 = vmatmul.f32.gmra.mxu2 %v8800_v6  ;;  %v12024_v6 = vand.u32 4294901760, %v8495_v45  ;;  %v2230_v20 = vsub.f32 %v2228_v7, %v2229_v39  ;;  %v202_v37 = vld [vmem:[%s7207_s16 + $0x18] sm:$0xff] }
 0x211   : > { %3145 = vmatpush.msra.mxu3 %v3144_v40 }
 0x212   : > { %v1715_v8 = vpop.f32.mrf.mxu0  ;;  %3484 = vmatpush.msrb.mxu2 %v12024_v6  ;;  %v2231_v45 = vand.u32 4294901760, %v2230_v20 }
 0x213   : > { %v1836_v13 = vpop.f32.mrf.mxu1  ;;  %v1971_v24 = vpop.f32.mrf.mxu2  ;;  %3599 = vmatpush.msrb.mxu3 %v8378_v3  ;;  %v1716_v3 = vadd.f32 %v1715_v8, %v8434_v26 }
 0x214   : > { %v1837_v56 = vadd.f32 %v1836_v13, %v1711_v48  ;;  %v2068_v4 = vpop.f32.mrf.mxu3  ;;  %3488 = vmatpush.msrb.mxu2 %v12025_v38  ;;  %v2237_v13 = vand.u32 4294901760, %v2236_v25 }
 0x215   : > { %2224 = vmatmul.f32.gmra.mxu0 %v2223_v57  ;;  %3601 = vmatpush.msrb.mxu3 %v8411_v49  ;;  %v210_v57 = vld [vmem:[%s7207_s16 + $0x58] sm:$0xff] }
 0x216   : > { %v1972_v0 = vadd.f32 %v1971_v24, %v1837_v56  ;;  %2389 = vmatmul.f32.gmra.mxu1 %v8786_v35  ;;  %3492 = vmatpush.msrb.mxu2 %v12026_v19  ;;  %v2238_v15 = vsub.f32 %v2236_v25, %v2237_v13 }
 0x217   : > { %2647 = vmatmul.f32.gmra.mxu3 %v2221_v32  ;;  %v12027_v32 = vand.u32 4294901760, %v8600_v5 }
 0x218   : > { %v8880_v16 = vadd.f32 %v2068_v4, %v1972_v0  ;;  %2520 = vmatmul.f32.gmra.mxu2 %v2220_v34  ;;  %3603 = vmatpush.msrb.mxu3 %v8449_v58  ;;  %v8890_v58 = vand.u32 4294901760, %v202_v37  ;;  %v2239_v34 = vand.u32 4294901760, %v2238_v15  ;;  %v8911_v4 = vand.u32 4294901760, %v210_v57  ;;  %v218_v0 = vld [vmem:[%s7207_s16 + $0x98] sm:$0xff] }
 0x219   : > { %3496 = vmatpush.msrb.mxu2 %v12027_v32  ;;  %v12036_v32 = vand.u32 4294901760, %v8849_v41 }
 0x21a   : > { %v1720_v30 = vpop.f32.mrf.mxu0  ;;  %3605 = vmatpush.msrb.mxu3 %v8488_v42  ;;  %v12028_v42 = vand.u32 4294901760, %v8628_v54  ;;  %v8900_v5 = vsub.f32 %v202_v37, %v8890_v58  ;;  %v8924_v6 = vsub.f32 %v210_v57, %v8911_v4  ;;  %v8935_v37 = vand.u32 4294901760, %v218_v0 }
 0x21b   : > { %v1842_v40 = vpop.f32.mrf.mxu1  ;;  %v1975_v14 = vpop.f32.mrf.mxu2 }
 0x21c   : > { %v1843_v49 = vadd.f32 %v1842_v40, %v1716_v3  ;;  %v2072_v48 = vpop.f32.mrf.mxu3  ;;  %3607 = vmatpush.msrb.mxu3 %v8525_v33  ;;  %3500 = vmatpush.msrb.mxu2 %v12028_v42  ;;  %v1721_v33 = vadd.f32 %v1720_v30, %v8473_v29  ;;  %v12035_v30 = vand.u32 4294901760, %v8824_v31 }
 0x21d   : > { %2232 = vmatmul.f32.gmra.mxu0 %v2231_v45  ;;  %v12033_v45 = vand.u32 4294901760, %v8768_v47 }
 0x21e   : > { %v1976_v26 = vadd.f32 %v1975_v14, %v1843_v49  ;;  %2393 = vmatmul.f32.gmra.mxu1 %v8818_v59  ;;  %3609 = vmatpush.msrb.mxu3 %v8561_v53 }
 0x21f   : > { %2653 = vmatmul.f32.gmra.mxu3 %v2229_v39  ;;  %3504 = vmatpush.msrb.mxu2 %v12029_v17 }
 0x220   : > { %v8897_v8 = vadd.f32 %v2072_v48, %v1976_v26  ;;  %2525 = vmatmul.f32.gmra.mxu2 %v2228_v7  ;;  %3611 = vmatpush.msrb.mxu3 %v8596_v55  ;;  %v12030_v7 = vand.u32 4294901760, %v8684_v63  ;;  %v11783_v55 = vand.u32 4294901760, %v8900_v5 }
 0x222   : > { %v1725_v53 = vpop.f32.mrf.mxu0  ;;  %3613 = vmatpush.msrb.mxu3 %v8624_v1  ;;  %3508 = vmatpush.msrb.mxu2 %v12030_v7  ;;  %v12031_v1 = vand.u32 4294901760, %v8712_v22  ;;  %v2924_v63 = vsub.f32 %v8900_v5, %v11783_v55 }
 0x223   : > { %v1848_v56 = vpop.f32.mrf.mxu1  ;;  %v1979_v24 = vpop.f32.mrf.mxu2 }
 0x224   : > { %v1849_v54 = vadd.f32 %v1848_v56, %v1721_v33  ;;  %v2076_v39 = vpop.f32.mrf.mxu3  ;;  %3615 = vmatpush.msrb.mxu3 %v8652_v28  ;;  %3512 = vmatpush.msrb.mxu2 %v12031_v1  ;;  %v1726_v28 = vadd.f32 %v1725_v53, %v8511_v44  ;;  %v234_v33 = vld [vmem:[%s7207_s16 + $0x118] sm:$0xff]  ;;  %v12037_v1 = vld [vmem:[#allocation4_spill] sm:$0xff] }
 0x225   : > { %2240 = vmatmul.f32.gmra.mxu0 %v2239_v34 }
 0x226   : > { %v1980_v29 = vadd.f32 %v1979_v24, %v1849_v54  ;;  %2397 = vmatmul.f32.gmra.mxu1 %v8845_v52  ;;  %3617 = vmatpush.msrb.mxu3 %v8680_v18  ;;  %v12032_v18 = vand.u32 4294901760, %v8740_v9  ;;  %v8977_v24 = vand.u32 4294901760, %v234_v33 }
 0x227   : > { %2659 = vmatmul.f32.gmra.mxu3 %v2237_v13  ;;  %v2925_v13 = vand.u32 4294901760, %v2924_v63 }
 0x228   : > { %v8918_v36 = vadd.f32 %v2076_v39, %v1980_v29  ;;  %2530 = vmatmul.f32.gmra.mxu2 %v2236_v25  ;;  %3619 = vmatpush.msrb.mxu3 %v8708_v46  ;;  %v11781_v46 = vand.u32 4294901760, %v8924_v6  ;;  %v8988_v29 = vsub.f32 %v234_v33, %v8977_v24 }
 0x229   : > { %3516 = vmatpush.msrb.mxu2 %v12032_v18 }
 0x22a   : > { %v2121_v20 = vpop.f32.mrf.mxu0  ;;  %3621 = vmatpush.msrb.mxu3 %v8736_v10  ;;  %v12034_v10 = vand.u32 4294901760, %v8796_v23  ;;  %v2932_v47 = vsub.f32 %v8924_v6, %v11781_v46  ;;  %v226_v23 = vld [vmem:[%s7207_s16 + $0xd8] sm:$0xff]  ;;  %v12055_v46 = vld [vmem:[#allocation16_spill] sm:$0xff] }
 0x22b   : > { %v1854_v22 = vpop.f32.mrf.mxu1  ;;  %v1983_v38 = vpop.f32.mrf.mxu2  ;;  %3520 = vmatpush.msrb.mxu2 %v12033_v45  ;;  %v2122_v19 = vadd.f32 %v2121_v20, %v8547_v12  ;;  %v8961_v15 = vand.u32 4294901760, %v226_v23 }
 0x22c   : > { %v1855_v25 = vadd.f32 %v1854_v22, %v1726_v28  ;;  %v2080_v3 = vpop.f32.mrf.mxu3  ;;  %3623 = vmatpush.msrb.mxu3 %v8764_v50  ;;  %v8950_v50 = vsub.f32 %v218_v0, %v8935_v37  ;;  %v2933_v26 = vand.u32 4294901760, %v2932_v47  ;;  %v242_v28 = vld [vmem:[%s7207_s16 + $0x158] sm:$0xff] }
 0x22d   : > { %2728 = vmatmul.f32.vlgmr.msra.gmra.mxu0 %v8404_v60  ;;  %3524 = vmatpush.msrb.mxu2 %v12034_v10 }
 0x22e   : > { %v1984_v44 = vadd.f32 %v1983_v38, %v1855_v25  ;;  %2401 = vmatmul.f32.gmra.mxu1 %v8868_v43  ;;  %3625 = vmatpush.msrb.mxu3 %v8792_v2  ;;  %v11777_v38 = vand.u32 4294901760, %v8988_v29 }
 0x22f   : > { %3147 = vmatmul.f32.vlgmr.msra.gmra.mxu3 %v8890_v58  ;;  %3528 = vmatpush.msrb.mxu2 %v12035_v30  ;;  %v250_v30 = vld [vmem:[%s7207_s16 + $0x198] sm:$0xff] }
 0x230   : > { %v8943_v9 = vadd.f32 %v2080_v3, %v1984_v44  ;;  %2926 = vmatmul.f32.vlgmr.msra.gmra.mxu2 %v2925_v13  ;;  %3627 = vmatpush.msrb.mxu3 %v8820_v27  ;;  %v11780_v27 = vand.u32 4294901760, %v8950_v50  ;;  %v8993_v3 = vand.u32 4294901760, %v242_v28  ;;  %v12038_v13 = vld [vmem:[#allocation5_spill] sm:$0xff]  ;;  %v2956_v10 = vsub.f32 %v8988_v29, %v11777_v38  ;;  %v12052_v38 = vld [vmem:[#allocation14_spill] sm:$0xff] }
 0x231   : > { %3532 = vmatpush.msrb.mxu2 %v12036_v32 }
 0x232   : > { %v2129_v2 = vpop.f32.mrf.mxu0  ;;  %3629 = vmatpush.msrb.mxu3 %v8842_v61  ;;  %v2940_v41 = vsub.f32 %v8950_v50, %v11780_v27  ;;  %v8972_v61 = vsub.f32 %v226_v23, %v8961_v15  ;;  %v9004_v47 = vsub.f32 %v242_v28, %v8993_v3 }
 0x233   : > { %v2342_v40 = vpop.f32.mrf.mxu1  ;;  %v2456_v14 = vpop.f32.mrf.mxu2  ;;  %v2130_v42 = vadd.f32 %v2129_v2, %v8580_v21 }
 0x234   : > { %v2343_v49 = vadd.f32 %v2342_v40, %v2122_v19  ;;  %v2570_v48 = vpop.f32.mrf.mxu3  ;;  %v2941_v56 = vand.u32 4294901760, %v2940_v41  ;;  %v11779_v54 = vand.u32 4294901760, %v8972_v61  ;;  %v12039_v19 = vld [vmem:[#allocation7_spill] sm:$0xff]  ;;  %v11776_v32 = vand.u32 4294901760, %v9004_v47 }
 0x235   : > { %2732 = vmatmul.f32.gmra.mxu0 %v8447_v62  ;;  %v12040_v41 = vld [vmem:[#allocation3_spill] sm:$0xff] }
 0x236   : > { %v2457_v12 = vadd.f32 %v2456_v14, %v2343_v49  ;;  %2825 = vmatmul.f32.vlgmr.msra.gmra.mxu1 %v8404_v60  ;;  %v2948_v21 = vsub.f32 %v8972_v61, %v11779_v54  ;;  %v2964_v33 = vsub.f32 %v9004_v47, %v11776_v32 }
 0x237   : > { %3151 = vmatmul.f32.gmra.mxu3 %v8911_v4 }
 0x238   : > { %v8965_v31 = vadd.f32 %v2570_v48, %v2457_v12  ;;  %2934 = vmatmul.f32.gmra.mxu2 %v2933_v26  ;;  %v2949_v25 = vand.u32 4294901760, %v2948_v21  ;;  %v2957_v48 = vand.u32 4294901760, %v2956_v10  ;;  %v9009_v26 = vand.u32 4294901760, %v250_v30  ;;  %v266_v10 = vld [vmem:[%s7207_s16 + $0x218] sm:$0xff] }
 0x23a   : > { %v2137_v34 = vpop.f32.mrf.mxu0 }
 0x23b   : > { %v2346_v57 = vpop.f32.mrf.mxu1  ;;  %v2461_v60 = vpop.f32.mrf.mxu2  ;;  %v2138_v63 = vadd.f32 %v2137_v34, %v12037_v1  ;;  %v9020_v34 = vsub.f32 %v250_v30, %v9009_v26 }
 0x23c   : > { %v2347_v17 = vadd.f32 %v2346_v57, %v2130_v42  ;;  %v2576_v53 = vpop.f32.mrf.mxu3  ;;  %v12041_v57 = vld [vmem:[#allocation9_spill] sm:$0xff] }
 0x23d   : > { %2736 = vmatmul.f32.gmra.mxu0 %v8480_v51  ;;  %v11775_v28 = vand.u32 4294901760, %v9020_v34 }
 0x23e   : > { %v2462_v39 = vadd.f32 %v2461_v60, %v2347_v17  ;;  %2829 = vmatmul.f32.gmra.mxu1 %v8447_v62  ;;  %v258_v60 = vld [vmem:[%s7207_s16 + $0x1d8] sm:$0xff] }
 0x23f   : > { %3155 = vmatmul.f32.gmra.mxu3 %v8935_v37 }
 0x240   : > { %v8981_v7 = vadd.f32 %v2576_v53, %v2462_v39  ;;  %2942 = vmatmul.f32.gmra.mxu2 %v2941_v56 }
 0x242   : > { %v2145_v0 = vpop.f32.mrf.mxu0 }
 0x243   : > { %v2350_v18 = vpop.f32.mrf.mxu1  ;;  %v2466_v62 = vpop.f32.mrf.mxu2  ;;  %v2146_v23 = vadd.f32 %v2145_v0, %v12039_v19  ;;  %v9025_v0 = vand.u32 4294901760, %v258_v60 }
 0x244   : > { %v2351_v22 = vadd.f32 %v2350_v18, %v2138_v63  ;;  %v2582_v20 = vpop.f32.mrf.mxu3  ;;  %v2965_v63 = vand.u32 4294901760, %v2964_v33 }
 0x245   : > { %2740 = vmatmul.f32.gmra.mxu0 %v12038_v13 }
 0x246   : > { %v2467_v45 = vadd.f32 %v2466_v62, %v2351_v22  ;;  %2833 = vmatmul.f32.gmra.mxu1 %v8480_v51  ;;  %v12042_v22 = vld [vmem:[#allocation2_spill] sm:$0xff] }
 0x247   : > { %3159 = vmatmul.f32.gmra.mxu3 %v8961_v15 }
 0x248   : > { %v8997_v44 = vadd.f32 %v2582_v20, %v2467_v45  ;;  %2950 = vmatmul.f32.gmra.mxu2 %v2949_v25  ;;  %v2972_v20 = vsub.f32 %v9020_v34, %v11775_v28  ;;  %v9036_v25 = vsub.f32 %v258_v60, %v9025_v0  ;;  %v12043_v45 = vld [vmem:[#allocation11_spill] sm:$0xff] }
 0x24a   : > { %v2153_v2 = vpop.f32.mrf.mxu0 }
 0x24b   : > { %v2354_v40 = vpop.f32.mrf.mxu1  ;;  %v2471_v51 = vpop.f32.mrf.mxu2  ;;  %v2154_v17 = vadd.f32 %v2153_v2, %v12041_v57 }
 0x24c   : > { %v2355_v49 = vadd.f32 %v2354_v40, %v2146_v23  ;;  %v2588_v14 = vpop.f32.mrf.mxu3 }
 0x24d   : > { %2744 = vmatmul.f32.gmra.mxu0 %v12040_v41 }
 0x24e   : > { %v2472_v12 = vadd.f32 %v2471_v51, %v2355_v49  ;;  %2837 = vmatmul.f32.gmra.mxu1 %v12038_v13  ;;  %v2973_v49 = vand.u32 4294901760, %v2972_v20  ;;  %v11773_v51 = vand.u32 4294901760, %v9036_v25 }
 0x24f   : > { %3163 = vmatmul.f32.gmra.mxu3 %v8977_v24 }
 0x250   : > { %v9013_v42 = vadd.f32 %v2588_v14, %v2472_v12  ;;  %2958 = vmatmul.f32.gmra.mxu2 %v2957_v48  ;;  %v9041_v14 = vand.u32 4294901760, %v266_v10  ;;  %v12044_v12 = vld [vmem:[#allocation6_spill] sm:$0xff]  ;;  %v2980_v33 = vsub.f32 %v9036_v25, %v11773_v51  ;;  %v12050_v51 = vld [vmem:[#allocation12_spill] sm:$0xff] }
 0x252   : > { %v2161_v53 = vpop.f32.mrf.mxu0  ;;  %v9052_v57 = vsub.f32 %v266_v10, %v9041_v14 }
 0x253   : > { %v2358_v56 = vpop.f32.mrf.mxu1  ;;  %v2476_v21 = vpop.f32.mrf.mxu2  ;;  %v2162_v13 = vadd.f32 %v2161_v53, %v12043_v45  ;;  %v274_v53 = vld [vmem:[%s7207_s16 + $0x258] sm:$0xff] }
 0x254   : > { %v2359_v39 = vadd.f32 %v2358_v56, %v2154_v17  ;;  %v2594_v1 = vpop.f32.mrf.mxu3  ;;  %v12045_v17 = vld [vmem:[#allocation13_spill] sm:$0xff]  ;;  %v9057_v20 = vand.u32 4294901760, %v274_v53 }
 0x255   : > { %2748 = vmatmul.f32.gmra.mxu0 %v12042_v22 }
 0x256   : > { %v2477_v18 = vadd.f32 %v2476_v21, %v2359_v39  ;;  %2841 = vmatmul.f32.gmra.mxu1 %v12040_v41 }
 0x257   : > { %3167 = vmatmul.f32.gmra.mxu3 %v8993_v3 }
 0x258   : > { %v9029_v62 = vadd.f32 %v2594_v1, %v2477_v18  ;;  %2966 = vmatmul.f32.gmra.mxu2 %v2965_v63  ;;  %v2981_v18 = vand.u32 4294901760, %v2980_v33 }
 0x25a   : > { %v2169_v19 = vpop.f32.mrf.mxu0 }
 0x25b   : > { %v2362_v23 = vpop.f32.mrf.mxu1  ;;  %v2481_v2 = vpop.f32.mrf.mxu2  ;;  %v2170_v60 = vadd.f32 %v2169_v19, %v12045_v17 }
 0x25c   : > { %v2363_v30 = vadd.f32 %v2362_v23, %v2162_v13  ;;  %v2600_v40 = vpop.f32.mrf.mxu3  ;;  %v12046_v13 = vld [vmem:[#allocation8_spill] sm:$0xff]  ;;  %v9068_v23 = vsub.f32 %v274_v53, %v9057_v20 }
 0x25d   : > { %2752 = vmatmul.f32.gmra.mxu0 %v12044_v12 }
 0x25e   : > { %v2482_v48 = vadd.f32 %v2481_v2, %v2363_v30  ;;  %2845 = vmatmul.f32.gmra.mxu1 %v12042_v22  ;;  %v11772_v22 = vand.u32 4294901760, %v9052_v57  ;;  %v12047_v30 = vld [vmem:[#allocation15_spill] sm:$0xff] }
 0x25f   : > { %3171 = vmatmul.f32.gmra.mxu3 %v9009_v26 }
 0x260   : > { %v9045_v41 = vadd.f32 %v2600_v40, %v2482_v48  ;;  %2974 = vmatmul.f32.gmra.mxu2 %v2973_v49  ;;  %v2988_v19 = vsub.f32 %v9052_v57, %v11772_v22  ;;  %v282_v40 = vld [vmem:[%s7207_s16 + $0x298] sm:$0xff] }
 0x262   : > { %v2177_v56 = vpop.f32.mrf.mxu0 }
 0x263   : > { %v2366_v39 = vpop.f32.mrf.mxu1  ;;  %v2486_v1 = vpop.f32.mrf.mxu2  ;;  %v2178_v2 = vadd.f32 %v2177_v56, %v12047_v30  ;;  %v290_v30 = vld [vmem:[%s7207_s16 + $0x2d8] sm:$0xff] }
 0x264   : > { %v2367_v21 = vadd.f32 %v2366_v39, %v2170_v60  ;;  %v2606_v63 = vpop.f32.mrf.mxu3  ;;  %v2989_v60 = vand.u32 4294901760, %v2988_v19  ;;  %v11774_v39 = vand.u32 4294901760, %v9068_v23 }
 0x265   : > { %2756 = vmatmul.f32.gmra.mxu0 %v12046_v13 }
 0x266   : > { %v2487_v45 = vadd.f32 %v2486_v1, %v2367_v21  ;;  %2849 = vmatmul.f32.gmra.mxu1 %v12044_v12  ;;  %v9073_v21 = vand.u32 4294901760, %v282_v40  ;;  %v2996_v56 = vsub.f32 %v9068_v23, %v11774_v39 }
 0x267   : > { %3175 = vmatmul.f32.gmra.mxu3 %v9025_v0 }
 0x268   : > { %v9061_v10 = vadd.f32 %v2606_v63, %v2487_v45  ;;  %2982 = vmatmul.f32.gmra.mxu2 %v2981_v18  ;;  %v12048_v63 = vld [vmem:[#allocation10_spill] sm:$0xff]  ;;  %v9084_v18 = vsub.f32 %v282_v40, %v9073_v21  ;;  %v12049_v45 = vld [vmem:[#allocation17_spill] sm:$0xff] }
 0x26a   : > { %v2185_v49 = vpop.f32.mrf.mxu0 }
 0x26b   : > { %v2370_v48 = vpop.f32.mrf.mxu1  ;;  %v2491_v12 = vpop.f32.mrf.mxu2  ;;  %v2186_v19 = vadd.f32 %v2185_v49, %v12049_v45  ;;  %v12051_v45 = vld [vmem:[#allocation18_spill] sm:$0xff] }
 0x26c   : > { %v2371_v33 = vadd.f32 %v2370_v48, %v2178_v2  ;;  %v2612_v17 = vpop.f32.mrf.mxu3 }
 0x26d   : > { %2760 = vmatmul.f32.gmra.mxu0 %v12048_v63 }
 0x26e   : > { %v2492_v1 = vadd.f32 %v2491_v12, %v2371_v33  ;;  %2853 = vmatmul.f32.gmra.mxu1 %v12046_v13 }
 0x26f   : > { %3179 = vmatmul.f32.gmra.mxu3 %v9041_v14 }
 0x270   : > { %v9077_v53 = vadd.f32 %v2612_v17, %v2492_v1  ;;  %2990 = vmatmul.f32.gmra.mxu2 %v2989_v60  ;;  %v2997_v17 = vand.u32 4294901760, %v2996_v56  ;;  %v11778_v1 = vand.u32 4294901760, %v9084_v18  ;;  %v9089_v60 = vand.u32 4294901760, %v290_v30 }
 0x272   : > { %v2193_v2 = vpop.f32.mrf.mxu0  ;;  %v3004_v49 = vsub.f32 %v9084_v18, %v11778_v1  ;;  %v9100_v56 = vsub.f32 %v290_v30, %v9089_v60 }
 0x273   : > { %v2374_v48 = vpop.f32.mrf.mxu1  ;;  %v2496_v13 = vpop.f32.mrf.mxu2 }
 0x274   : > { %v2375_v33 = vadd.f32 %v2374_v48, %v2186_v19  ;;  %v2618_v12 = vpop.f32.mrf.mxu3  ;;  %v2194_v19 = vadd.f32 %v2193_v2, %v12051_v45  ;;  %v298_v48 = vld [vmem:[%s7207_s16 + $0x318] sm:$0xff]  ;;  %v11782_v28 = vand.u32 4294901760, %v9100_v56  ;;  %v12053_v45 = vld [vmem:[#allocation19_spill] sm:$0xff] }
 0x275   : > { %2764 = vmatmul.f32.gmra.mxu0 %v12050_v51 }
 0x276   : > { %v2497_v22 = vadd.f32 %v2496_v13, %v2375_v33  ;;  %2857 = vmatmul.f32.gmra.mxu1 %v12048_v63  ;;  %v3012_v2 = vsub.f32 %v9100_v56, %v11782_v28 }
 0x277   : > { %3183 = vmatmul.f32.gmra.mxu3 %v9057_v20 }
 0x278   : > { %v9093_v40 = vadd.f32 %v2618_v12, %v2497_v22  ;;  %2998 = vmatmul.f32.gmra.mxu2 %v2997_v17  ;;  %v3005_v12 = vand.u32 4294901760, %v3004_v49  ;;  %v9105_v17 = vand.u32 4294901760, %v298_v48 }
 0x27a   : > { %v2201_v33 = vpop.f32.mrf.mxu0  ;;  %v9116_v49 = vsub.f32 %v298_v48, %v9105_v17 }
 0x27b   : > { %v2378_v13 = vpop.f32.mrf.mxu1  ;;  %v2501_v63 = vpop.f32.mrf.mxu2 }
 0x27c   : > { %v2379_v39 = vadd.f32 %v2378_v13, %v2194_v19  ;;  %v2624_v22 = vpop.f32.mrf.mxu3  ;;  %v2202_v19 = vadd.f32 %v2201_v33, %v12053_v45  ;;  %v306_v13 = vld [vmem:[%s7207_s16 + $0x358] sm:$0xff]  ;;  %v11784_v54 = vand.u32 4294901760, %v9116_v49 }
 0x27d   : > { %2768 = vmatmul.f32.gmra.mxu0 %v12052_v38 }
 0x27e   : > { %v2502_v32 = vadd.f32 %v2501_v63, %v2379_v39  ;;  %2861 = vmatmul.f32.gmra.mxu1 %v12050_v51  ;;  %v3020_v33 = vsub.f32 %v9116_v49, %v11784_v54 }
 0x27f   : > { %3187 = vmatmul.f32.gmra.mxu3 %v9073_v21 }
 0x280   : > { %v9109_v30 = vadd.f32 %v2624_v22, %v2502_v32  ;;  %3006 = vmatmul.f32.gmra.mxu2 %v3005_v12  ;;  %v3013_v22 = vand.u32 4294901760, %v3012_v2  ;;  %v9121_v12 = vand.u32 4294901760, %v306_v13 }
 0x282   : > { %v2209_v39 = vpop.f32.mrf.mxu0  ;;  %12054 = vst [vmem:[#allocation4_spill] sm:$0xff] %v9121_v12  ;;  %v9132_v2 = vsub.f32 %v306_v13, %v9121_v12 }
 0x283   : > { %v2382_v63 = vpop.f32.mrf.mxu1  ;;  %v2506_v51 = vpop.f32.mrf.mxu2  ;;  %v2210_v45 = vadd.f32 %v2209_v39, %v8864_v11 }
 0x284   : > { %v2383_v1 = vadd.f32 %v2382_v63, %v2202_v19  ;;  %v2630_v32 = vpop.f32.mrf.mxu3  ;;  %12056 = vst [vmem:[#allocation5_spill] sm:$0xff] %v9132_v2  ;;  %v314_v19 = vld [vmem:[%s7207_s16 + $0x398] sm:$0xff]  ;;  %v11785_v28 = vand.u32 4294901760, %v9132_v2 }
 0x285   : > { %2772 = vmatmul.f32.gmra.mxu0 %v12055_v46 }
 0x286   : > { %v2507_v27 = vadd.f32 %v2506_v51, %v2383_v1  ;;  %2865 = vmatmul.f32.gmra.mxu1 %v12052_v38  ;;  %v3028_v11 = vsub.f32 %v9132_v2, %v11785_v28 }
 0x287   : > { %3191 = vmatmul.f32.gmra.mxu3 %v9089_v60 }
 0x288   : > { %v9125_v48 = vadd.f32 %v2630_v32, %v2507_v27  ;;  %3014 = vmatmul.f32.gmra.mxu2 %v3013_v22  ;;  %v3021_v32 = vand.u32 4294901760, %v3020_v33  ;;  %v9137_v22 = vand.u32 4294901760, %v314_v19  ;;  %v406_v33 = vld [vmem:[%s11671_s1 + $0x278] sm:$0xff] }
 0x28a   : > { %v2217_v1 = vpop.f32.mrf.mxu0  ;;  %12057 = vst [vmem:[#allocation7_spill] sm:$0xff] %v9137_v22  ;;  %v9148_v39 = vsub.f32 %v314_v19, %v9137_v22  ;;  %v3029_v19 = vand.u32 4294901760, %v3028_v11 }
 0x28b   : > { %v2386_v63 = vpop.f32.mrf.mxu1  ;;  %v2511_v38 = vpop.f32.mrf.mxu2 }
 0x28c   : > { %v2387_v51 = vadd.f32 %v2386_v63, %v2210_v45  ;;  %v2636_v27 = vpop.f32.mrf.mxu3  ;;  %12058 = vst [vmem:[#allocation3_spill] sm:$0xff] %v9148_v39  ;;  %v2218_v45 = vadd.f32 %v2217_v1, %v8880_v16  ;;  %v322_v63 = vld [vmem:[%s7207_s16 + $0x3d8] sm:$0xff]  ;;  %v11792_v28 = vand.u32 4294901760, %v9148_v39 }
 0x28d   : > { %2776 = vmatmul.f32.gmra.mxu0 %v8786_v35  ;;  %v9163_v2 = vand.u32 4294901760, %v322_v63 }
 0x28e   : > { %v2512_v55 = vadd.f32 %v2511_v38, %v2387_v51  ;;  %2869 = vmatmul.f32.gmra.mxu1 %v12055_v46  ;;  %v9155_v46 = vand.u32 4294901760, %v406_v33 }
 0x28f   : > { %3195 = vmatmul.f32.gmra.mxu3 %v9105_v17 }
 0x290   : > { %v9141_v13 = vadd.f32 %v2636_v27, %v2512_v55  ;;  %3022 = vmatmul.f32.gmra.mxu2 %v3021_v32  ;;  %12059 = vst [vmem:[#allocation9_spill] sm:$0xff] %v9155_v46  ;;  %v9158_v54 = vsub.f32 %v406_v33, %v9155_v46  ;;  %3696 = vmatpush.msra.mxu0 %v9155_v46 }
 0x291   : > { %4147 = vmatpush.msra.mxu3 %v9155_v46 }
 0x292   : > { %v2225_v55 = vpop.f32.mrf.mxu0  ;;  %v11790_v1 = vand.u32 4294901760, %v9158_v54  ;;  %4019 = vmatpush.msra.mxu2 %v9158_v54 }
 0x293   : > { %v2390_v51 = vpop.f32.mrf.mxu1  ;;  %v2516_v27 = vpop.f32.mrf.mxu2 }
 0x294   : > { %v2391_v38 = vadd.f32 %v2390_v51, %v2218_v45  ;;  %v2642_v32 = vpop.f32.mrf.mxu3  ;;  %v3859_v11 = vsub.f32 %v9158_v54, %v11790_v1  ;;  %v3036_v45 = vsub.f32 %v9148_v39, %v11792_v28  ;;  %v9179_v51 = vsub.f32 %v322_v63, %v9163_v2 }
 0x295   : > { %2780 = vmatmul.f32.gmra.mxu0 %v8818_v59 }
 0x296   : > { %v2517_v16 = vadd.f32 %v2516_v27, %v2391_v38  ;;  %2873 = vmatmul.f32.gmra.mxu1 %v8786_v35  ;;  %v405_v35 = vld [vmem:[%s11671_s1 + $0x270] sm:$0xff]  ;;  %v2226_v38 = vadd.f32 %v2225_v55, %v8897_v8  ;;  %v3860_v27 = vand.u32 4294901760, %v3859_v11  ;;  %v3037_v63 = vand.u32 4294901760, %v3036_v45 }
 0x297   : > { %3199 = vmatmul.f32.gmra.mxu3 %v9121_v12  ;;  %v11797_v39 = vand.u32 4294901760, %v9179_v51 }
 0x298   : > { %v9169_v33 = vadd.f32 %v2642_v32, %v2517_v16  ;;  %3030 = vmatmul.f32.gmra.mxu2 %v3029_v19  ;;  %v9185_v32 = vand.u32 4294901760, %v405_v35  ;;  %3861 = vmatpush.msra.mxu1 %v3860_v27 }
 0x29a   : > { %v2233_v16 = vpop.f32.mrf.mxu0  ;;  %v9188_v28 = vsub.f32 %v405_v35, %v9185_v32  ;;  %3698 = vmatpush.msra.mxu0 %v9185_v32  ;;  %4149 = vmatpush.msra.mxu3 %v9185_v32 }
 0x29b   : > { %v2394_v12 = vpop.f32.mrf.mxu1  ;;  %v2521_v19 = vpop.f32.mrf.mxu2  ;;  %v2234_v45 = vadd.f32 %v2233_v16, %v8918_v36 }
 0x29c   : > { %v2395_v1 = vadd.f32 %v2394_v12, %v2226_v38  ;;  %v2648_v46 = vpop.f32.mrf.mxu3  ;;  %v11798_v12 = vand.u32 4294901760, %v9188_v28  ;;  %4022 = vmatpush.msra.mxu2 %v9188_v28 }
 0x29d   : > { %2784 = vmatmul.f32.gmra.mxu0 %v8845_v52 }
 0x29e   : > { %v2522_v8 = vadd.f32 %v2521_v19, %v2395_v1  ;;  %2877 = vmatmul.f32.gmra.mxu1 %v8818_v59  ;;  %v3865_v11 = vsub.f32 %v9188_v28, %v11798_v12  ;;  %v3044_v1 = vsub.f32 %v9179_v51, %v11797_v39  ;;  %v404_v59 = vld [vmem:[%s11671_s1 + $0x268] sm:$0xff] }
 0x29f   : > { %3203 = vmatmul.f32.gmra.mxu3 %v9137_v22 }
 0x2a0   : > { %v9197_v55 = vadd.f32 %v2648_v46, %v2522_v8  ;;  %3038 = vmatmul.f32.gmra.mxu2 %v3037_v63  ;;  %v3866_v35 = vand.u32 4294901760, %v3865_v11  ;;  %v9210_v46 = vand.u32 4294901760, %v404_v59  ;;  %v3045_v39 = vand.u32 4294901760, %v3044_v1  ;;  %v403_v1 = vld [vmem:[%s11671_s1 + $0x260] sm:$0xff] }
 0x2a2   : > { %v2241_v38 = vpop.f32.mrf.mxu0  ;;  %3867 = vmatpush.msra.mxu1 %v3866_v35  ;;  %v9213_v63 = vsub.f32 %v404_v59, %v9210_v46  ;;  %3700 = vmatpush.msra.mxu0 %v9210_v46 }
 0x2a3   : > { %v2398_v27 = vpop.f32.mrf.mxu1  ;;  %v2526_v8 = vpop.f32.mrf.mxu2  ;;  %4151 = vmatpush.msra.mxu3 %v9210_v46  ;;  %v2242_v59 = vadd.f32 %v2241_v38, %v8943_v9 }
 0x2a4   : > { %v2399_v19 = vadd.f32 %v2398_v27, %v2234_v45  ;;  %v2654_v22 = vpop.f32.mrf.mxu3  ;;  %v11799_v36 = vand.u32 4294901760, %v9213_v63  ;;  %4025 = vmatpush.msra.mxu2 %v9213_v63  ;;  %v9231_v45 = vand.u32 4294901760, %v403_v1 }
 0x2a5   : > { %2788 = vmatmul.f32.gmra.mxu0 %v8868_v43 }
 0x2a6   : > { %v2527_v12 = vadd.f32 %v2526_v8, %v2399_v19  ;;  %2881 = vmatmul.f32.gmra.mxu1 %v8845_v52  ;;  %v3871_v11 = vsub.f32 %v9213_v63, %v11799_v36  ;;  %v9234_v8 = vsub.f32 %v403_v1, %v9231_v45  ;;  %3702 = vmatpush.msra.mxu0 %v9231_v45 }
 0x2a7   : > { %3207 = vmatmul.f32.gmra.mxu3 %v9163_v2 }
 0x2a8   : > { %v9221_v16 = vadd.f32 %v2654_v22, %v2527_v12  ;;  %3046 = vmatmul.f32.gmra.mxu2 %v3045_v39  ;;  %v3872_v52 = vand.u32 4294901760, %v3871_v11  ;;  %4153 = vmatpush.msra.mxu3 %v9231_v45  ;;  %v11800_v9 = vand.u32 4294901760, %v9234_v8 }
 0x2a9   : > { %4028 = vmatpush.msra.mxu2 %v9234_v8 }
 0x2aa   : > { %v2729_v27 = vpop.f32.mrf.mxu0  ;;  %3873 = vmatpush.msra.mxu1 %v3872_v52  ;;  %v3877_v11 = vsub.f32 %v9234_v8, %v11800_v9 }
 0x2ab   : > { %v2402_v35 = vpop.f32.mrf.mxu1  ;;  %v2531_v12 = vpop.f32.mrf.mxu2  ;;  %v2730_v1 = vadd.f32 %v2729_v27, %v8965_v31  ;;  %v12060_v31 = vand.u32 4294901760, %v8900_v5 }
 0x2ac   : > { %v2403_v22 = vadd.f32 %v2402_v35, %v2242_v59  ;;  %v2660_v19 = vpop.f32.mrf.mxu3  ;;  %v3878_v59 = vand.u32 4294901760, %v3877_v11 }
 0x2ad   : > { %3261 = vmatmul.f32.vlgmr.msrb.gmra.mxu0 %v8900_v5 }
 0x2ae   : > { %v2532_v39 = vadd.f32 %v2531_v12, %v2403_v22  ;;  %2885 = vmatmul.f32.gmra.mxu1 %v8868_v43  ;;  %v402_v43 = vld [vmem:[%s11671_s1 + $0x258] sm:$0xff] }
 0x2af   : > { %3631 = vmatmul.f32.vlgmr.msrb.gmra.mxu3 %v8890_v58  ;;  %v9253_v52 = vand.u32 4294901760, %v402_v43  ;;  %3879 = vmatpush.msra.mxu1 %v3878_v59 }
 0x2b0   : > { %v9242_v38 = vadd.f32 %v2660_v19, %v2532_v39  ;;  %3534 = vmatmul.f32.vlgmr.msrb.gmra.mxu2 %v8890_v58 }
 0x2b1   : > { %v9256_v36 = vsub.f32 %v402_v43, %v9253_v52  ;;  %3704 = vmatpush.msra.mxu0 %v9253_v52  ;;  %4155 = vmatpush.msra.mxu3 %v9253_v52 }
 0x2b2   : > { %v2733_v35 = vpop.f32.mrf.mxu0 }
 0x2b3   : > { %v2826_v22 = vpop.f32.mrf.mxu1  ;;  %v2927_v19 = vpop.f32.mrf.mxu2  ;;  %v11801_v27 = vand.u32 4294901760, %v9256_v36  ;;  %4031 = vmatpush.msra.mxu2 %v9256_v36  ;;  %v2734_v5 = vadd.f32 %v2733_v35, %v8981_v7  ;;  %v12061_v7 = vand.u32 4294901760, %v8924_v6 }
 0x2b4   : > { %v2827_v12 = vadd.f32 %v2826_v22, %v2730_v1  ;;  %v3148_v39 = vpop.f32.mrf.mxu3  ;;  %v401_v1 = vld [vmem:[%s11671_s1 + $0x250] sm:$0xff] }
 0x2b5   : > { %3266 = vmatmul.f32.gmra.mxu0 %v8924_v6  ;;  %v3883_v43 = vsub.f32 %v9256_v36, %v11801_v27  ;;  %v9276_v22 = vand.u32 4294901760, %v401_v1 }
 0x2b6   : > { %v2928_v58 = vadd.f32 %v2927_v19, %v2827_v12  ;;  %3375 = vmatmul.f32.vlgmr.msrb.gmra.mxu1 %v12060_v31 }
 0x2b7   : > { %3635 = vmatmul.f32.gmra.mxu3 %v8911_v4  ;;  %v3884_v59 = vand.u32 4294901760, %v3883_v43  ;;  %v9279_v9 = vsub.f32 %v401_v1, %v9276_v22  ;;  %3706 = vmatpush.msra.mxu0 %v9276_v22 }
 0x2b8   : > { %v9265_v11 = vadd.f32 %v3148_v39, %v2928_v58  ;;  %3538 = vmatmul.f32.gmra.mxu2 %v8911_v4  ;;  %4157 = vmatpush.msra.mxu3 %v9276_v22 }
 0x2b9   : > { %3885 = vmatpush.msra.mxu1 %v3884_v59  ;;  %v11802_v35 = vand.u32 4294901760, %v9279_v9  ;;  %4034 = vmatpush.msra.mxu2 %v9279_v9 }
 0x2ba   : > { %v2737_v12 = vpop.f32.mrf.mxu0 }
 0x2bb   : > { %v2830_v19 = vpop.f32.mrf.mxu1  ;;  %v2935_v58 = vpop.f32.mrf.mxu2  ;;  %v3889_v1 = vsub.f32 %v9279_v9, %v11802_v35  ;;  %v2738_v6 = vadd.f32 %v2737_v12, %v8997_v44  ;;  %v12062_v44 = vand.u32 4294901760, %v8950_v50 }
 0x2bc   : > { %v2831_v39 = vadd.f32 %v2830_v19, %v2734_v5  ;;  %v3152_v31 = vpop.f32.mrf.mxu3  ;;  %v400_v5 = vld [vmem:[%s11671_s1 + $0x248] sm:$0xff] }
 0x2bd   : > { %3271 = vmatmul.f32.gmra.mxu0 %v8950_v50  ;;  %v3890_v59 = vand.u32 4294901760, %v3889_v1  ;;  %v9299_v19 = vand.u32 4294901760, %v400_v5 }
 0x2be   : > { %v2936_v4 = vadd.f32 %v2935_v58, %v2831_v39  ;;  %3381 = vmatmul.f32.gmra.mxu1 %v12061_v7 }
 0x2bf   : > { %3639 = vmatmul.f32.gmra.mxu3 %v8935_v37  ;;  %3891 = vmatpush.msra.mxu1 %v3890_v59  ;;  %v9302_v27 = vsub.f32 %v400_v5, %v9299_v19 }
 0x2c0   : > { %v9288_v43 = vadd.f32 %v3152_v31, %v2936_v4  ;;  %3542 = vmatmul.f32.gmra.mxu2 %v8935_v37  ;;  %3708 = vmatpush.msra.mxu0 %v9299_v19 }
 0x2c1   : > { %4159 = vmatpush.msra.mxu3 %v9299_v19  ;;  %v11803_v12 = vand.u32 4294901760, %v9302_v27  ;;  %4037 = vmatpush.msra.mxu2 %v9302_v27 }
 0x2c2   : > { %v2741_v39 = vpop.f32.mrf.mxu0 }
 0x2c3   : > { %v2834_v58 = vpop.f32.mrf.mxu1  ;;  %v2943_v4 = vpop.f32.mrf.mxu2  ;;  %v3895_v5 = vsub.f32 %v9302_v27, %v11803_v12  ;;  %v2742_v50 = vadd.f32 %v2741_v39, %v9013_v42  ;;  %v12063_v42 = vand.u32 4294901760, %v8972_v61 }
 0x2c4   : > { %v2835_v31 = vadd.f32 %v2834_v58, %v2738_v6  ;;  %v3156_v7 = vpop.f32.mrf.mxu3  ;;  %v399_v6 = vld [vmem:[%s11671_s1 + $0x240] sm:$0xff] }
 0x2c5   : > { %3276 = vmatmul.f32.gmra.mxu0 %v8972_v61  ;;  %v3896_v59 = vand.u32 4294901760, %v3895_v5  ;;  %v9322_v58 = vand.u32 4294901760, %v399_v6 }
 0x2c6   : > { %v2944_v37 = vadd.f32 %v2943_v4, %v2835_v31  ;;  %3387 = vmatmul.f32.gmra.mxu1 %v12062_v44 }
 0x2c7   : > { %3643 = vmatmul.f32.gmra.mxu3 %v8961_v15  ;;  %3897 = vmatpush.msra.mxu1 %v3896_v59  ;;  %v9325_v35 = vsub.f32 %v399_v6, %v9322_v58 }
 0x2c8   : > { %v9311_v1 = vadd.f32 %v3156_v7, %v2944_v37  ;;  %3546 = vmatmul.f32.gmra.mxu2 %v8961_v15  ;;  %3710 = vmatpush.msra.mxu0 %v9322_v58 }
 0x2c9   : > { %4161 = vmatpush.msra.mxu3 %v9322_v58  ;;  %v11804_v39 = vand.u32 4294901760, %v9325_v35  ;;  %4040 = vmatpush.msra.mxu2 %v9325_v35 }
 0x2ca   : > { %v2745_v31 = vpop.f32.mrf.mxu0 }
 0x2cb   : > { %v2838_v4 = vpop.f32.mrf.mxu1  ;;  %v2951_v37 = vpop.f32.mrf.mxu2  ;;  %v3901_v6 = vsub.f32 %v9325_v35, %v11804_v39  ;;  %v2746_v61 = vadd.f32 %v2745_v31, %v9029_v62  ;;  %v12064_v62 = vand.u32 4294901760, %v8988_v29 }
 0x2cc   : > { %v2839_v7 = vadd.f32 %v2838_v4, %v2742_v50  ;;  %v3160_v44 = vpop.f32.mrf.mxu3  ;;  %v398_v50 = vld [vmem:[%s11671_s1 + $0x238] sm:$0xff] }
 0x2cd   : > { %3281 = vmatmul.f32.gmra.mxu0 %v8988_v29  ;;  %v3902_v59 = vand.u32 4294901760, %v3901_v6  ;;  %v9345_v4 = vand.u32 4294901760, %v398_v50 }
 0x2ce   : > { %v2952_v15 = vadd.f32 %v2951_v37, %v2839_v7  ;;  %3393 = vmatmul.f32.gmra.mxu1 %v12063_v42 }
 0x2cf   : > { %3647 = vmatmul.f32.gmra.mxu3 %v8977_v24  ;;  %3903 = vmatpush.msra.mxu1 %v3902_v59  ;;  %v9348_v12 = vsub.f32 %v398_v50, %v9345_v4 }
 0x2d0   : > { %v9334_v5 = vadd.f32 %v3160_v44, %v2952_v15  ;;  %3550 = vmatmul.f32.gmra.mxu2 %v8977_v24  ;;  %3712 = vmatpush.msra.mxu0 %v9345_v4 }
 0x2d1   : > { %4163 = vmatpush.msra.mxu3 %v9345_v4  ;;  %v11805_v31 = vand.u32 4294901760, %v9348_v12  ;;  %4043 = vmatpush.msra.mxu2 %v9348_v12 }
 0x2d2   : > { %v2749_v7 = vpop.f32.mrf.mxu0 }
 0x2d3   : > { %v2842_v37 = vpop.f32.mrf.mxu1  ;;  %v2959_v15 = vpop.f32.mrf.mxu2  ;;  %v3907_v50 = vsub.f32 %v9348_v12, %v11805_v31  ;;  %v2750_v29 = vadd.f32 %v2749_v7, %v9045_v41  ;;  %v12065_v41 = vand.u32 4294901760, %v9004_v47 }
 0x2d4   : > { %v2843_v44 = vadd.f32 %v2842_v37, %v2746_v61  ;;  %v3164_v42 = vpop.f32.mrf.mxu3  ;;  %v397_v61 = vld [vmem:[%s11671_s1 + $0x230] sm:$0xff] }
 0x2d5   : > { %3286 = vmatmul.f32.gmra.mxu0 %v9004_v47  ;;  %v3908_v59 = vand.u32 4294901760, %v3907_v50  ;;  %v9368_v37 = vand.u32 4294901760, %v397_v61 }
 0x2d6   : > { %v2960_v24 = vadd.f32 %v2959_v15, %v2843_v44  ;;  %3399 = vmatmul.f32.gmra.mxu1 %v12064_v62 }
 0x2d7   : > { %3651 = vmatmul.f32.gmra.mxu3 %v8993_v3  ;;  %3909 = vmatpush.msra.mxu1 %v3908_v59  ;;  %v9371_v39 = vsub.f32 %v397_v61, %v9368_v37 }
 0x2d8   : > { %v9357_v6 = vadd.f32 %v3164_v42, %v2960_v24  ;;  %3554 = vmatmul.f32.gmra.mxu2 %v8993_v3  ;;  %3714 = vmatpush.msra.mxu0 %v9368_v37 }
 0x2d9   : > { %4165 = vmatpush.msra.mxu3 %v9368_v37  ;;  %v11806_v7 = vand.u32 4294901760, %v9371_v39  ;;  %4046 = vmatpush.msra.mxu2 %v9371_v39 }
 0x2da   : > { %v2753_v44 = vpop.f32.mrf.mxu0 }
 0x2db   : > { %v2846_v15 = vpop.f32.mrf.mxu1  ;;  %v2967_v24 = vpop.f32.mrf.mxu2  ;;  %v3913_v61 = vsub.f32 %v9371_v39, %v11806_v7  ;;  %v2754_v47 = vadd.f32 %v2753_v44, %v9061_v10  ;;  %v12066_v10 = vand.u32 4294901760, %v9020_v34 }
 0x2dc   : > { %v2847_v42 = vadd.f32 %v2846_v15, %v2750_v29  ;;  %v3168_v62 = vpop.f32.mrf.mxu3  ;;  %v396_v29 = vld [vmem:[%s11671_s1 + $0x228] sm:$0xff] }
 0x2dd   : > { %3291 = vmatmul.f32.gmra.mxu0 %v9020_v34  ;;  %v3914_v59 = vand.u32 4294901760, %v3913_v61  ;;  %v9391_v15 = vand.u32 4294901760, %v396_v29 }
 0x2de   : > { %v2968_v3 = vadd.f32 %v2967_v24, %v2847_v42  ;;  %3405 = vmatmul.f32.gmra.mxu1 %v12065_v41 }
 0x2df   : > { %3655 = vmatmul.f32.gmra.mxu3 %v9009_v26  ;;  %3915 = vmatpush.msra.mxu1 %v3914_v59  ;;  %v9394_v31 = vsub.f32 %v396_v29, %v9391_v15 }
 0x2e0   : > { %v9380_v50 = vadd.f32 %v3168_v62, %v2968_v3  ;;  %3558 = vmatmul.f32.gmra.mxu2 %v9009_v26  ;;  %3716 = vmatpush.msra.mxu0 %v9391_v15 }
 0x2e1   : > { %4167 = vmatpush.msra.mxu3 %v9391_v15  ;;  %v11807_v44 = vand.u32 4294901760, %v9394_v31  ;;  %4049 = vmatpush.msra.mxu2 %v9394_v31 }
 0x2e2   : > { %v2757_v42 = vpop.f32.mrf.mxu0 }
 0x2e3   : > { %v2850_v24 = vpop.f32.mrf.mxu1  ;;  %v2975_v3 = vpop.f32.mrf.mxu2  ;;  %v3919_v29 = vsub.f32 %v9394_v31, %v11807_v44  ;;  %v2758_v34 = vadd.f32 %v2757_v42, %v9077_v53  ;;  %v12067_v53 = vand.u32 4294901760, %v9036_v25 }
 0x2e4   : > { %v2851_v62 = vadd.f32 %v2850_v24, %v2754_v47  ;;  %v3172_v41 = vpop.f32.mrf.mxu3  ;;  %v395_v47 = vld [vmem:[%s11671_s1 + $0x220] sm:$0xff] }
 0x2e5   : > { %3296 = vmatmul.f32.gmra.mxu0 %v9036_v25  ;;  %v3920_v59 = vand.u32 4294901760, %v3919_v29  ;;  %v9414_v24 = vand.u32 4294901760, %v395_v47 }
 0x2e6   : > { %v2976_v26 = vadd.f32 %v2975_v3, %v2851_v62  ;;  %3411 = vmatmul.f32.gmra.mxu1 %v12066_v10 }
 0x2e7   : > { %3659 = vmatmul.f32.gmra.mxu3 %v9025_v0  ;;  %3921 = vmatpush.msra.mxu1 %v3920_v59  ;;  %v9417_v7 = vsub.f32 %v395_v47, %v9414_v24 }
 0x2e8   : > { %v9403_v61 = vadd.f32 %v3172_v41, %v2976_v26  ;;  %3562 = vmatmul.f32.gmra.mxu2 %v9025_v0  ;;  %3718 = vmatpush.msra.mxu0 %v9414_v24 }
 0x2e9   : > { %4169 = vmatpush.msra.mxu3 %v9414_v24  ;;  %v11808_v42 = vand.u32 4294901760, %v9417_v7  ;;  %4052 = vmatpush.msra.mxu2 %v9417_v7 }
 0x2ea   : > { %v2761_v62 = vpop.f32.mrf.mxu0 }
 0x2eb   : > { %v2854_v3 = vpop.f32.mrf.mxu1  ;;  %v2983_v26 = vpop.f32.mrf.mxu2  ;;  %v3925_v47 = vsub.f32 %v9417_v7, %v11808_v42  ;;  %v2762_v25 = vadd.f32 %v2761_v62, %v9093_v40  ;;  %v12068_v40 = vand.u32 4294901760, %v9052_v57 }
 0x2ec   : > { %v2855_v41 = vadd.f32 %v2854_v3, %v2758_v34  ;;  %v3176_v10 = vpop.f32.mrf.mxu3  ;;  %v394_v34 = vld [vmem:[%s11671_s1 + $0x218] sm:$0xff] }
 0x2ed   : > { %3301 = vmatmul.f32.gmra.mxu0 %v9052_v57  ;;  %v3926_v59 = vand.u32 4294901760, %v3925_v47  ;;  %v9437_v3 = vand.u32 4294901760, %v394_v34 }
 0x2ee   : > { %v2984_v0 = vadd.f32 %v2983_v26, %v2855_v41  ;;  %3417 = vmatmul.f32.gmra.mxu1 %v12067_v53 }
 0x2ef   : > { %3663 = vmatmul.f32.gmra.mxu3 %v9041_v14  ;;  %3927 = vmatpush.msra.mxu1 %v3926_v59  ;;  %v9440_v44 = vsub.f32 %v394_v34, %v9437_v3 }
 0x2f0   : > { %v9426_v29 = vadd.f32 %v3176_v10, %v2984_v0  ;;  %3566 = vmatmul.f32.gmra.mxu2 %v9041_v14  ;;  %3720 = vmatpush.msra.mxu0 %v9437_v3 }
 0x2f1   : > { %4171 = vmatpush.msra.mxu3 %v9437_v3  ;;  %v11809_v62 = vand.u32 4294901760, %v9440_v44  ;;  %4055 = vmatpush.msra.mxu2 %v9440_v44 }
 0x2f2   : > { %v2765_v41 = vpop.f32.mrf.mxu0 }
 0x2f3   : > { %v2858_v26 = vpop.f32.mrf.mxu1  ;;  %v2991_v0 = vpop.f32.mrf.mxu2  ;;  %v3931_v34 = vsub.f32 %v9440_v44, %v11809_v62  ;;  %v2766_v57 = vadd.f32 %v2765_v41, %v9109_v30  ;;  %v12069_v30 = vand.u32 4294901760, %v9068_v23 }
 0x2f4   : > { %v2859_v10 = vadd.f32 %v2858_v26, %v2762_v25  ;;  %v3180_v53 = vpop.f32.mrf.mxu3  ;;  %v393_v25 = vld [vmem:[%s11671_s1 + $0x210] sm:$0xff] }
 0x2f5   : > { %3306 = vmatmul.f32.gmra.mxu0 %v9068_v23  ;;  %v3932_v59 = vand.u32 4294901760, %v3931_v34  ;;  %v9460_v26 = vand.u32 4294901760, %v393_v25 }
 0x2f6   : > { %v2992_v14 = vadd.f32 %v2991_v0, %v2859_v10  ;;  %3423 = vmatmul.f32.gmra.mxu1 %v12068_v40 }
 0x2f7   : > { %3667 = vmatmul.f32.gmra.mxu3 %v9057_v20  ;;  %3933 = vmatpush.msra.mxu1 %v3932_v59  ;;  %v9463_v42 = vsub.f32 %v393_v25, %v9460_v26 }
 0x2f8   : > { %v9449_v47 = vadd.f32 %v3180_v53, %v2992_v14  ;;  %3570 = vmatmul.f32.gmra.mxu2 %v9057_v20  ;;  %3722 = vmatpush.msra.mxu0 %v9460_v26 }
 0x2f9   : > { %4173 = vmatpush.msra.mxu3 %v9460_v26  ;;  %v11810_v41 = vand.u32 4294901760, %v9463_v42  ;;  %4058 = vmatpush.msra.mxu2 %v9463_v42 }
 0x2fa   : > { %v2769_v10 = vpop.f32.mrf.mxu0 }
 0x2fb   : > { %v2862_v0 = vpop.f32.mrf.mxu1  ;;  %v2999_v14 = vpop.f32.mrf.mxu2  ;;  %v3937_v25 = vsub.f32 %v9463_v42, %v11810_v41  ;;  %v2770_v23 = vadd.f32 %v2769_v10, %v9125_v48  ;;  %v12070_v48 = vand.u32 4294901760, %v9084_v18 }
 0x2fc   : > { %v2863_v53 = vadd.f32 %v2862_v0, %v2766_v57  ;;  %v3184_v40 = vpop.f32.mrf.mxu3  ;;  %v392_v57 = vld [vmem:[%s11671_s1 + $0x208] sm:$0xff] }
 0x2fd   : > { %3311 = vmatmul.f32.gmra.mxu0 %v9084_v18  ;;  %v3938_v59 = vand.u32 4294901760, %v3937_v25  ;;  %v9483_v0 = vand.u32 4294901760, %v392_v57 }
 0x2fe   : > { %v3000_v20 = vadd.f32 %v2999_v14, %v2863_v53  ;;  %3429 = vmatmul.f32.gmra.mxu1 %v12069_v30 }
 0x2ff   : > { %3671 = vmatmul.f32.gmra.mxu3 %v9073_v21  ;;  %3939 = vmatpush.msra.mxu1 %v3938_v59  ;;  %v9486_v62 = vsub.f32 %v392_v57, %v9483_v0 }
 0x300   : > { %v9472_v34 = vadd.f32 %v3184_v40, %v3000_v20  ;;  %3574 = vmatmul.f32.gmra.mxu2 %v9073_v21  ;;  %3724 = vmatpush.msra.mxu0 %v9483_v0 }
 0x301   : > { %4175 = vmatpush.msra.mxu3 %v9483_v0  ;;  %v3942_v10 = vand.u32 4294901760, %v9486_v62  ;;  %4061 = vmatpush.msra.mxu2 %v9486_v62 }
 0x302   : > { %v2773_v53 = vpop.f32.mrf.mxu0 }
 0x303   : > { %v2866_v14 = vpop.f32.mrf.mxu1  ;;  %v3007_v20 = vpop.f32.mrf.mxu2  ;;  %v3943_v57 = vsub.f32 %v9486_v62, %v3942_v10  ;;  %v2774_v18 = vadd.f32 %v2773_v53, %v9141_v13  ;;  %v12072_v53 = vand.u32 4294901760, %v9100_v56 }
 0x304   : > { %v2867_v40 = vadd.f32 %v2866_v14, %v2770_v23  ;;  %v3188_v30 = vpop.f32.mrf.mxu3  ;;  %v391_v23 = vld [vmem:[%s11671_s1 + $0x200] sm:$0xff] }
 0x305   : > { %3316 = vmatmul.f32.gmra.mxu0 %v9100_v56  ;;  %v3944_v59 = vand.u32 4294901760, %v3943_v57  ;;  %v9506_v14 = vand.u32 4294901760, %v391_v23  ;;  %v422_v56 = vld [vmem:[%s11671_s1 + $0x2f8] sm:$0xff] }
 0x306   : > { %v3008_v21 = vadd.f32 %v3007_v20, %v2867_v40  ;;  %3435 = vmatmul.f32.gmra.mxu1 %v12070_v48 }
 0x307   : > { %3675 = vmatmul.f32.gmra.mxu3 %v9089_v60  ;;  %3945 = vmatpush.msra.mxu1 %v3944_v59  ;;  %v9509_v41 = vsub.f32 %v391_v23, %v9506_v14  ;;  %v12073_v23 = vand.u32 4294901760, %v9188_v28  ;;  %v12074_v59 = vand.u32 4294901760, %v9213_v63 }
 0x308   : > { %v9495_v25 = vadd.f32 %v3188_v30, %v3008_v21  ;;  %3578 = vmatmul.f32.gmra.mxu2 %v9089_v60  ;;  %3726 = vmatpush.msra.mxu0 %v9506_v14  ;;  %v12071_v60 = vand.u32 4294901760, %v9158_v54 }
 0x309   : > { %4177 = vmatpush.msra.mxu3 %v9506_v14  ;;  %v3948_v57 = vand.u32 4294901760, %v9509_v41  ;;  %4064 = vmatpush.msra.mxu2 %v9509_v41 }
 0x30a   : > { %v2777_v40 = vpop.f32.mrf.mxu0  ;;  %4278 = vmatpush.msrb.mxu0 %v12071_v60  ;;  %v12075_v60 = vand.u32 4294901760, %v9234_v8  ;;  %v12079_v8 = vand.u32 4294901760, %v9116_v49 }
 0x30b   : > { %v2870_v20 = vpop.f32.mrf.mxu1  ;;  %v3015_v21 = vpop.f32.mrf.mxu2  ;;  %v3949_v54 = vsub.f32 %v9509_v41, %v3948_v57  ;;  %v2778_v28 = vadd.f32 %v2777_v40, %v9169_v33  ;;  %v12077_v33 = vand.u32 4294901760, %v9256_v36 }
 0x30c   : > { %v2871_v30 = vadd.f32 %v2870_v20, %v2774_v18  ;;  %v3192_v48 = vpop.f32.mrf.mxu3  ;;  %4282 = vmatpush.msrb.mxu0 %v12073_v23  ;;  %v12076_v23 = vld [vmem:[#allocation9_spill] sm:$0xff] }
 0x30d   : > { %3321 = vmatmul.f32.gmra.mxu0 %v9116_v49  ;;  %v3950_v20 = vand.u32 4294901760, %v3949_v54  ;;  %v12078_v54 = vld [vmem:[#allocation5_spill] sm:$0xff] }
 0x30e   : > { %v3016_v13 = vadd.f32 %v3015_v21, %v2871_v30  ;;  %3441 = vmatmul.f32.gmra.mxu1 %v12072_v53  ;;  %4286 = vmatpush.msrb.mxu0 %v12074_v59  ;;  %v9535_v30 = vand.u32 4294901760, %v422_v56  ;;  %v203_v59 = vld [vmem:[%s7207_s16 + $0x20] sm:$0xff] }
 0x30f   : > { %3679 = vmatmul.f32.gmra.mxu3 %v9105_v17  ;;  %3951 = vmatpush.msra.mxu1 %v3950_v20  ;;  %v12080_v20 = vand.u32 4294901760, %v9279_v9  ;;  %v9561_v49 = vand.u32 4294901760, %v203_v59 }
 0x310   : > { %v9522_v18 = vadd.f32 %v3192_v48, %v3016_v13  ;;  %3582 = vmatmul.f32.gmra.mxu2 %v9105_v17  ;;  %4290 = vmatpush.msrb.mxu0 %v12075_v60  ;;  %v9541_v63 = vsub.f32 %v422_v56, %v9535_v30  ;;  %v421_v60 = vld [vmem:[%s11671_s1 + $0x2f0] sm:$0xff] }
 0x311   : > { %4502 = vmatpush.msrb.mxu2 %v9535_v30  ;;  %4405 = vmatpush.msrb.mxu1 %v12076_v23 }
 0x312   : > { %v2781_v21 = vpop.f32.mrf.mxu0  ;;  %4294 = vmatpush.msrb.mxu0 %v12077_v33 }
 0x313   : > { %v2874_v48 = vpop.f32.mrf.mxu1  ;;  %v3023_v17 = vpop.f32.mrf.mxu2  ;;  %4407 = vmatpush.msrb.mxu1 %v9185_v32  ;;  %v2782_v32 = vadd.f32 %v2781_v21, %v9197_v55  ;;  %v9578_v55 = vsub.f32 %v203_v59, %v9561_v49 }
 0x314   : > { %v2875_v13 = vadd.f32 %v2874_v48, %v2778_v28  ;;  %v3196_v53 = vpop.f32.mrf.mxu3  ;;  %v11820_v28 = vand.u32 4294901760, %v9541_v63  ;;  %4298 = vmatpush.msrb.mxu0 %v12080_v20  ;;  %v12081_v48 = vld [vmem:[#allocation4_spill] sm:$0xff]  ;;  %v12084_v20 = vld [vmem:[#allocation3_spill] sm:$0xff] }
 0x315   : > { %3326 = vmatmul.f32.gmra.mxu0 %v12078_v54  ;;  %4409 = vmatpush.msrb.mxu1 %v9210_v46 }
 0x316   : > { %v3024_v40 = vadd.f32 %v3023_v17, %v2875_v13  ;;  %3447 = vmatmul.f32.gmra.mxu1 %v12079_v8  ;;  %v4665_v36 = vsub.f32 %v9541_v63, %v11820_v28  ;;  %v9568_v13 = vand.u32 4294901760, %v421_v60  ;;  %v12082_v17 = vand.u32 4294901760, %v9302_v27 }
 0x317   : > { %3683 = vmatmul.f32.gmra.mxu3 %v12081_v48  ;;  %4411 = vmatpush.msrb.mxu1 %v9231_v45  ;;  %v12083_v27 = vand.u32 4294901760, %v9325_v35  ;;  %v12085_v45 = vand.u32 4294901760, %v12078_v54  ;;  %v3729_v54 = vand.u32 4294901760, %v9578_v55 }
 0x318   : > { %v9554_v56 = vadd.f32 %v3196_v53, %v3024_v40  ;;  %3586 = vmatmul.f32.gmra.mxu2 %v12081_v48  ;;  %v4666_v9 = vand.u32 4294901760, %v4665_v36  ;;  %4302 = vmatpush.msrb.mxu0 %v12082_v17  ;;  %v9575_v46 = vsub.f32 %v421_v60, %v9568_v13  ;;  %v211_v36 = vld [vmem:[%s7207_s16 + $0x60] sm:$0xff]  ;;  %v12086_v60 = vand.u32 4294901760, %v9348_v12 }
 0x319   : > { %4504 = vmatpush.msrb.mxu2 %v9568_v13  ;;  %4413 = vmatpush.msrb.mxu1 %v9253_v52  ;;  %v12087_v52 = vld [vmem:[#allocation7_spill] sm:$0xff]  ;;  %v9604_v12 = vand.u32 4294901760, %v211_v36 }
 0x31a   : > { %v2785_v53 = vpop.f32.mrf.mxu0  ;;  %4667 = vmatpush.msrb.mxu3 %v4666_v9  ;;  %4306 = vmatpush.msrb.mxu0 %v12083_v27  ;;  %v11818_v48 = vand.u32 4294901760, %v9575_v46 }
 0x31b   : > { %v2878_v23 = vpop.f32.mrf.mxu1  ;;  %v3031_v40 = vpop.f32.mrf.mxu2  ;;  %4415 = vmatpush.msrb.mxu1 %v9276_v22  ;;  %v2786_v22 = vadd.f32 %v2785_v53, %v9221_v16 }
 0x31c   : > { %v2879_v33 = vadd.f32 %v2878_v23, %v2782_v32  ;;  %v3200_v8 = vpop.f32.mrf.mxu3  ;;  %4310 = vmatpush.msrb.mxu0 %v12086_v60  ;;  %v4671_v35 = vsub.f32 %v9575_v46, %v11818_v48  ;;  %v420_v32 = vld [vmem:[%s11671_s1 + $0x2e8] sm:$0xff]  ;;  %v12088_v23 = vand.u32 4294901760, %v9371_v39  ;;  %v12089_v39 = vand.u32 4294901760, %v9394_v31  ;;  %v219_v60 = vld [vmem:[%s7207_s16 + $0xa0] sm:$0xff] }
 0x31d   : > { %3331 = vmatmul.f32.gmra.mxu0 %v12084_v20  ;;  %4417 = vmatpush.msrb.mxu1 %v9299_v19  ;;  %v9606_v17 = vand.u32 4294901760, %v420_v32  ;;  %v3730_v19 = vsub.f32 %v9578_v55, %v3729_v54 }
 0x31e   : > { %v3032_v21 = vadd.f32 %v3031_v40, %v2879_v33  ;;  %3453 = vmatmul.f32.gmra.mxu1 %v12085_v45  ;;  %v4672_v9 = vand.u32 4294901760, %v4671_v35  ;;  %4314 = vmatpush.msrb.mxu0 %v12088_v23  ;;  %v9623_v45 = vsub.f32 %v211_v36, %v9604_v12  ;;  %v12091_v35 = vand.u32 4294901760, %v9417_v7 }
 0x31f   : > { %3687 = vmatmul.f32.gmra.mxu3 %v12087_v52  ;;  %4419 = vmatpush.msrb.mxu1 %v9322_v58  ;;  %v9613_v16 = vsub.f32 %v420_v32, %v9606_v17  ;;  %v12090_v58 = vand.u32 4294901760, %v12084_v20  ;;  %v3731_v20 = vand.u32 4294901760, %v3730_v19  ;;  %v9637_v36 = vand.u32 4294901760, %v219_v60 }
 0x320   : > { %v9591_v59 = vadd.f32 %v3200_v8, %v3032_v21  ;;  %3590 = vmatmul.f32.gmra.mxu2 %v12087_v52  ;;  %4673 = vmatpush.msrb.mxu3 %v4672_v9  ;;  %v3737_v32 = vand.u32 4294901760, %v9623_v45  ;;  %v12092_v23 = vand.u32 4294901760, %v9440_v44  ;;  %v12093_v44 = vand.u32 4294901760, %v9463_v42 }
 0x321   : > { %4506 = vmatpush.msrb.mxu2 %v9606_v17  ;;  %4421 = vmatpush.msrb.mxu1 %v9345_v4  ;;  %v11817_v52 = vand.u32 4294901760, %v9613_v16 }
 0x322   : > { %v2789_v33 = vpop.f32.mrf.mxu0  ;;  %4318 = vmatpush.msrb.mxu0 %v12089_v39  ;;  %v3738_v19 = vsub.f32 %v9623_v45, %v3737_v32  ;;  %v227_v39 = vld [vmem:[%s7207_s16 + $0xe0] sm:$0xff] }
 0x323   : > { %v2882_v40 = vpop.f32.mrf.mxu1  ;;  %v3039_v27 = vpop.f32.mrf.mxu2  ;;  %4423 = vmatpush.msrb.mxu1 %v9368_v37  ;;  %v4677_v31 = vsub.f32 %v9613_v16, %v11817_v52  ;;  %v419_v37 = vld [vmem:[%s11671_s1 + $0x2e0] sm:$0xff]  ;;  %v2790_v7 = vadd.f32 %v2789_v33, %v9242_v38 }
 0x324   : > { %v2883_v8 = vadd.f32 %v2882_v40, %v2786_v22  ;;  %v3204_v21 = vpop.f32.mrf.mxu3  ;;  %4322 = vmatpush.msrb.mxu0 %v12091_v35  ;;  %v9645_v9 = vand.u32 4294901760, %v419_v37 }
 0x325   : > { %3336 = vmatmul.f32.gmra.mxu0 %v9179_v51  ;;  %4425 = vmatpush.msrb.mxu1 %v9391_v15  ;;  %v4678_v22 = vand.u32 4294901760, %v4677_v31  ;;  %v9655_v15 = vsub.f32 %v219_v60, %v9637_v36 }
 0x326   : > { %v3040_v53 = vadd.f32 %v3039_v27, %v2883_v8  ;;  %3459 = vmatmul.f32.gmra.mxu1 %v12090_v58  ;;  %4326 = vmatpush.msrb.mxu0 %v12092_v23  ;;  %v9652_v38 = vsub.f32 %v419_v37, %v9645_v9 }
 0x327   : > { %3691 = vmatmul.f32.gmra.mxu3 %v9163_v2  ;;  %4427 = vmatpush.msrb.mxu1 %v9414_v24  ;;  %v12094_v24 = vand.u32 4294901760, %v9179_v51  ;;  %v3745_v51 = vand.u32 4294901760, %v9655_v15 }
 0x328   : > { %v9630_v4 = vadd.f32 %v3204_v21, %v3040_v53  ;;  %3594 = vmatmul.f32.gmra.mxu2 %v9163_v2  ;;  %4679 = vmatpush.msrb.mxu3 %v4678_v22  ;;  %v11816_v53 = vand.u32 4294901760, %v9652_v38 }
 0x329   : > { %4508 = vmatpush.msrb.mxu2 %v9645_v9  ;;  %4429 = vmatpush.msrb.mxu1 %v9437_v3  ;;  %v9675_v3 = vand.u32 4294901760, %v227_v39  ;;  %v3746_v41 = vsub.f32 %v9655_v15, %v3745_v51 }
 0x32a   : > { %v3262_v40 = vpop.f32.mrf.mxu0  ;;  %4330 = vmatpush.msrb.mxu0 %v12093_v44  ;;  %v4683_v42 = vsub.f32 %v9652_v38, %v11816_v53 }
 0x32b   : > { %v2886_v2 = vpop.f32.mrf.mxu1  ;;  %v3047_v27 = vpop.f32.mrf.mxu2  ;;  %4431 = vmatpush.msrb.mxu1 %v9460_v26  ;;  %12095 = vst [vmem:[#allocation2_spill] sm:$0xff] %v9675_v3  ;;  %v418_v26 = vld [vmem:[%s11671_s1 + $0x2d8] sm:$0xff]  ;;  %v3263_v62 = vadd.f32 %v3262_v40, %v9265_v11 }
 0x32c   : > { %v2887_v8 = vadd.f32 %v2886_v2, %v2790_v7  ;;  %v3208_v21 = vpop.f32.mrf.mxu3  ;;  %4334 = vmatpush.msrb.mxu0 %v3942_v10  ;;  %v3739_v10 = vand.u32 4294901760, %v3738_v19  ;;  %v9682_v60 = vand.u32 4294901760, %v418_v26  ;;  %v235_v7 = vld [vmem:[%s7207_s16 + $0x120] sm:$0xff]  ;;  %v3747_v2 = vand.u32 4294901760, %v3746_v41 }
 0x32d   : > { %3732 = vmatmul.f32.vlgmr.msra.gmra.mxu0 %v3731_v20  ;;  %4433 = vmatpush.msrb.mxu1 %v9483_v0  ;;  %v9696_v0 = vsub.f32 %v227_v39, %v9675_v3 }
 0x32e   : > { %v3048_v33 = vadd.f32 %v3047_v27, %v2887_v8  ;;  %3465 = vmatmul.f32.gmra.mxu1 %v12094_v24  ;;  %4338 = vmatpush.msrb.mxu0 %v3948_v57  ;;  %v9690_v11 = vsub.f32 %v418_v26, %v9682_v60  ;;  %v417_v8 = vld [vmem:[%s11671_s1 + $0x2d0] sm:$0xff] }
 0x32f   : > { %4181 = vmatmul.f32.vlgmr.msra.gmra.mxu3 %v3729_v54  ;;  %v4684_v54 = vand.u32 4294901760, %v4683_v42  ;;  %4435 = vmatpush.msrb.mxu1 %v9506_v14  ;;  %v3753_v40 = vand.u32 4294901760, %v9696_v0  ;;  %v9718_v44 = vand.u32 4294901760, %v417_v8 }
 0x330   : > { %v9668_v58 = vadd.f32 %v3208_v21, %v3048_v33  ;;  %4067 = vmatmul.f32.vlgmr.msra.gmra.mxu2 %v9578_v55  ;;  %4825 = vmatpush.msra.mxu0 %v9541_v63  ;;  %v11814_v57 = vand.u32 4294901760, %v9690_v11  ;;  %v9716_v21 = vand.u32 4294901760, %v235_v7 }
 0x331   : > { %4685 = vmatpush.msrb.mxu3 %v4684_v54  ;;  %4510 = vmatpush.msrb.mxu2 %v9682_v60  ;;  %v3754_v42 = vsub.f32 %v9696_v0, %v3753_v40 }
 0x332   : > { %v3267_v55 = vpop.f32.mrf.mxu0  ;;  %4828 = vmatpush.msra.mxu0 %v9575_v46  ;;  %v4689_v23 = vsub.f32 %v9690_v11, %v11814_v57  ;;  %12096 = vst [vmem:[#allocation11_spill] sm:$0xff] %v9716_v21 }
 0x333   : > { %v3376_v35 = vpop.f32.mrf.mxu1  ;;  %v3535_v20 = vpop.f32.mrf.mxu2  ;;  %v3268_v27 = vadd.f32 %v3267_v55, %v9288_v43  ;;  %4512 = vmatpush.msrb.mxu2 %v9718_v44  ;;  %v9724_v43 = vsub.f32 %v417_v8, %v9718_v44 }
 0x334   : > { %v3377_v31 = vadd.f32 %v3376_v35, %v3263_v62  ;;  %v3632_v37 = vpop.f32.mrf.mxu3  ;;  %4831 = vmatpush.msra.mxu0 %v9613_v16  ;;  %v9731_v62 = vsub.f32 %v235_v7, %v9716_v21 }
 0x335   : > { %3740 = vmatmul.f32.gmra.mxu0 %v3739_v10  ;;  %v243_v10 = vld [vmem:[%s7207_s16 + $0x160] sm:$0xff]  ;;  %v11813_v54 = vand.u32 4294901760, %v9724_v43 }
 0x336   : > { %v3536_v14 = vadd.f32 %v3535_v20, %v3377_v31  ;;  %3953 = vmatmul.f32.vlgmr.msra.gmra.mxu1 %v9561_v49  ;;  %4834 = vmatpush.msra.mxu0 %v9652_v38  ;;  %v3755_v31 = vand.u32 4294901760, %v3754_v42  ;;  %v9745_v20 = vand.u32 4294901760, %v243_v10 }
 0x337   : > { %4953 = vmatpush.msra.mxu1 %v9535_v30  ;;  %4187 = vmatmul.f32.gmra.mxu3 %v3737_v32  ;;  %v4690_v32 = vand.u32 4294901760, %v4689_v23  ;;  %v4695_v35 = vsub.f32 %v9724_v43, %v11813_v54 }
 0x338   : > { %v9704_v22 = vadd.f32 %v3632_v37, %v3536_v14  ;;  %4072 = vmatmul.f32.gmra.mxu2 %v9623_v45  ;;  %4837 = vmatpush.msra.mxu0 %v9690_v11  ;;  %12097 = vst [vmem:[#allocation6_spill] sm:$0xff] %v9745_v20  ;;  %v416_v37 = vld [vmem:[%s11671_s1 + $0x2c8] sm:$0xff]  ;;  %v3761_v14 = vand.u32 4294901760, %v9731_v62 }
 0x339   : > { %4955 = vmatpush.msra.mxu1 %v9568_v13  ;;  %4691 = vmatpush.msrb.mxu3 %v4690_v32  ;;  %v9753_v7 = vand.u32 4294901760, %v416_v37 }
 0x33a   : > { %v3272_v33 = vpop.f32.mrf.mxu0  ;;  %4840 = vmatpush.msra.mxu0 %v9724_v43 }
 0x33b   : > { %v3382_v45 = vpop.f32.mrf.mxu1  ;;  %4957 = vmatpush.msra.mxu1 %v9606_v17  ;;  %v3539_v19 = vpop.f32.mrf.mxu2  ;;  %v3273_v41 = vadd.f32 %v3272_v33, %v9311_v1  ;;  %4514 = vmatpush.msrb.mxu2 %v9753_v7  ;;  %v9757_v32 = vsub.f32 %v416_v37, %v9753_v7  ;;  %v3762_v33 = vsub.f32 %v9731_v62, %v3761_v14 }
 0x33c   : > { %v3383_v24 = vadd.f32 %v3382_v45, %v3268_v27  ;;  %v3636_v39 = vpop.f32.mrf.mxu3  ;;  %v9760_v45 = vsub.f32 %v243_v10, %v9745_v20 }
 0x33d   : > { %4959 = vmatpush.msra.mxu1 %v9645_v9  ;;  %3748 = vmatmul.f32.gmra.mxu0 %v3747_v2  ;;  %v3763_v37 = vand.u32 4294901760, %v3762_v33 }
 0x33e   : > { %v3540_v26 = vadd.f32 %v3539_v19, %v3383_v24  ;;  %3957 = vmatmul.f32.gmra.mxu1 %v9604_v12  ;;  %v251_v24 = vld [vmem:[%s7207_s16 + $0x1a0] sm:$0xff]  ;;  %v11812_v19 = vand.u32 4294901760, %v9757_v32  ;;  %4843 = vmatpush.msra.mxu0 %v9757_v32 }
 0x33f   : > { %4961 = vmatpush.msra.mxu1 %v9682_v60  ;;  %4193 = vmatmul.f32.gmra.mxu3 %v3745_v51  ;;  %v4696_v51 = vand.u32 4294901760, %v4695_v35  ;;  %v9775_v10 = vand.u32 4294901760, %v251_v24  ;;  %v415_v35 = vld [vmem:[%s11671_s1 + $0x2c0] sm:$0xff] }
 0x340   : > { %v9737_v55 = vadd.f32 %v3636_v39, %v3540_v26  ;;  %4077 = vmatmul.f32.gmra.mxu2 %v9655_v15  ;;  %v4701_v42 = vsub.f32 %v9757_v32, %v11812_v19  ;;  %v3769_v26 = vand.u32 4294901760, %v9760_v45 }
 0x341   : > { %4963 = vmatpush.msra.mxu1 %v9718_v44  ;;  %4697 = vmatpush.msrb.mxu3 %v4696_v51  ;;  %12099 = vst [vmem:[#allocation8_spill] sm:$0xff] %v9775_v10  ;;  %v9781_v51 = vand.u32 4294901760, %v415_v35 }
 0x342   : > { %v3277_v23 = vpop.f32.mrf.mxu0 }
 0x343   : > { %v3388_v2 = vpop.f32.mrf.mxu1  ;;  %v3543_v8 = vpop.f32.mrf.mxu2  ;;  %4965 = vmatpush.msra.mxu1 %v9753_v7  ;;  %4516 = vmatpush.msrb.mxu2 %v9781_v51 }
 0x344   : > { %v3389_v15 = vadd.f32 %v3388_v2, %v3273_v41  ;;  %v3640_v27 = vpop.f32.mrf.mxu3  ;;  %v4702_v41 = vand.u32 4294901760, %v4701_v42  ;;  %v259_v42 = vld [vmem:[%s7207_s16 + $0x1e0] sm:$0xff] }
 0x345   : > { %3756 = vmatmul.f32.gmra.mxu0 %v3755_v31  ;;  %v3278_v31 = vadd.f32 %v3277_v23, %v9334_v5  ;;  %v9789_v5 = vsub.f32 %v251_v24, %v9775_v10  ;;  %4967 = vmatpush.msra.mxu1 %v9781_v51 }
 0x346   : > { %v3544_v1 = vadd.f32 %v3543_v8, %v3389_v15  ;;  %3961 = vmatmul.f32.gmra.mxu1 %v9637_v36  ;;  %4703 = vmatpush.msrb.mxu3 %v4702_v41 }
 0x347   : > { %4199 = vmatmul.f32.gmra.mxu3 %v3753_v40  ;;  %v3777_v41 = vand.u32 4294901760, %v9789_v5 }
 0x348   : > { %v9768_v39 = vadd.f32 %v3640_v27, %v3544_v1  ;;  %4082 = vmatmul.f32.gmra.mxu2 %v9696_v0  ;;  %v9785_v27 = vsub.f32 %v415_v35, %v9781_v51  ;;  %v3770_v1 = vsub.f32 %v9760_v45, %v3769_v26 }
 0x349   : > { %v3778_v54 = vsub.f32 %v9789_v5, %v3777_v41 }
 0x34a   : > { %12098 = vst [vmem:[#allocation13_spill] sm:$0xff] %v9768_v39  ;;  %v3282_v40 = vpop.f32.mrf.mxu0  ;;  %v11811_v33 = vand.u32 4294901760, %v9785_v27  ;;  %4846 = vmatpush.msra.mxu0 %v9785_v27  ;;  %v3771_v24 = vand.u32 4294901760, %v3770_v1  ;;  %v323_v39 = vld [vmem:[%s7207_s16 + $0x3e0] sm:$0xff] }
 0x34b   : > { %v3394_v2 = vpop.f32.mrf.mxu1  ;;  %v3547_v8 = vpop.f32.mrf.mxu2 }
 0x34c   : > { %v3395_v15 = vadd.f32 %v3394_v2, %v3278_v31  ;;  %v3644_v0 = vpop.f32.mrf.mxu3  ;;  %v4707_v35 = vsub.f32 %v9785_v27, %v11811_v33  ;;  %v3283_v2 = vadd.f32 %v3282_v40, %v9357_v6 }
 0x34d   : > { %3764 = vmatmul.f32.gmra.mxu0 %v3763_v37  ;;  %v414_v37 = vld [vmem:[%s11671_s1 + $0x2b8] sm:$0xff] }
 0x34e   : > { %v3548_v23 = vadd.f32 %v3547_v8, %v3395_v15  ;;  %3965 = vmatmul.f32.gmra.mxu1 %v9675_v3  ;;  %v9807_v15 = vand.u32 4294901760, %v259_v42  ;;  %v4708_v8 = vand.u32 4294901760, %v4707_v35  ;;  %v267_v35 = vld [vmem:[%s7207_s16 + $0x220] sm:$0xff] }
 0x34f   : > { %4205 = vmatmul.f32.gmra.mxu3 %v3761_v14  ;;  %v9809_v14 = vand.u32 4294901760, %v414_v37 }
 0x350   : > { %v9796_v31 = vadd.f32 %v3644_v0, %v3548_v23  ;;  %4087 = vmatmul.f32.gmra.mxu2 %v9731_v62  ;;  %12101 = vst [vmem:[#allocation10_spill] sm:$0xff] %v9807_v15  ;;  %4709 = vmatpush.msrb.mxu3 %v4708_v8  ;;  %v9819_v40 = vsub.f32 %v259_v42, %v9807_v15  ;;  %v413_v42 = vld [vmem:[%s11671_s1 + $0x2b0] sm:$0xff] }
 0x351   : > { %4518 = vmatpush.msrb.mxu2 %v9809_v14  ;;  %v9813_v1 = vsub.f32 %v414_v37, %v9809_v14  ;;  %4969 = vmatpush.msra.mxu1 %v9809_v14 }
 0x352   : > { %12100 = vst [vmem:[#allocation15_spill] sm:$0xff] %v9796_v31  ;;  %v3287_v0 = vpop.f32.mrf.mxu0 }
 0x353   : > { %v3400_v23 = vpop.f32.mrf.mxu1  ;;  %v3551_v19 = vpop.f32.mrf.mxu2  ;;  %4849 = vmatpush.msra.mxu0 %v9813_v1 }
 0x354   : > { %v3401_v33 = vadd.f32 %v3400_v23, %v3283_v2  ;;  %v3648_v62 = vpop.f32.mrf.mxu3  ;;  %v11815_v2 = vand.u32 4294901760, %v9813_v1  ;;  %v3785_v23 = vand.u32 4294901760, %v9819_v40 }
 0x355   : > { %3772 = vmatmul.f32.gmra.mxu0 %v3771_v24  ;;  %v3288_v24 = vadd.f32 %v3287_v0, %v9380_v50 }
 0x356   : > { %v3552_v6 = vadd.f32 %v3551_v19, %v3401_v33  ;;  %3969 = vmatmul.f32.gmra.mxu1 %v9716_v21  ;;  %v4713_v37 = vsub.f32 %v9813_v1, %v11815_v2  ;;  %v3779_v19 = vand.u32 4294901760, %v3778_v54  ;;  %v9830_v33 = vand.u32 4294901760, %v267_v35 }
 0x357   : > { %4211 = vmatmul.f32.gmra.mxu3 %v3769_v26  ;;  %v9837_v26 = vand.u32 4294901760, %v413_v42  ;;  %v3786_v0 = vsub.f32 %v9819_v40, %v3785_v23 }
 0x358   : > { %v9824_v8 = vadd.f32 %v3648_v62, %v3552_v6  ;;  %4092 = vmatmul.f32.gmra.mxu2 %v9760_v45  ;;  %12103 = vst [vmem:[#allocation12_spill] sm:$0xff] %v9830_v33  ;;  %v4714_v62 = vand.u32 4294901760, %v4713_v37  ;;  %v9844_v52 = vsub.f32 %v267_v35, %v9830_v33 }
 0x359   : > { %4520 = vmatpush.msrb.mxu2 %v9837_v26  ;;  %v9841_v54 = vsub.f32 %v413_v42, %v9837_v26  ;;  %4971 = vmatpush.msra.mxu1 %v9837_v26 }
 0x35a   : > { %12102 = vst [vmem:[#allocation17_spill] sm:$0xff] %v9824_v8  ;;  %v3292_v6 = vpop.f32.mrf.mxu0  ;;  %4715 = vmatpush.msrb.mxu3 %v4714_v62  ;;  %v3787_v62 = vand.u32 4294901760, %v3786_v0  ;;  %v283_v0 = vld [vmem:[%s7207_s16 + $0x2a0] sm:$0xff] }
 0x35b   : > { %v3406_v57 = vpop.f32.mrf.mxu1  ;;  %v3555_v53 = vpop.f32.mrf.mxu2  ;;  %v11819_v37 = vand.u32 4294901760, %v9841_v54  ;;  %4852 = vmatpush.msra.mxu0 %v9841_v54  ;;  %v3293_v42 = vadd.f32 %v3292_v6, %v9403_v61 }
 0x35c   : > { %v3407_v2 = vadd.f32 %v3406_v57, %v3288_v24  ;;  %v3652_v45 = vpop.f32.mrf.mxu3  ;;  %v275_v57 = vld [vmem:[%s7207_s16 + $0x260] sm:$0xff] }
 0x35d   : > { %3780 = vmatmul.f32.gmra.mxu0 %v3779_v19  ;;  %v4719_v35 = vsub.f32 %v9841_v54, %v11819_v37  ;;  %v412_v19 = vld [vmem:[%s11671_s1 + $0x2a8] sm:$0xff] }
 0x35e   : > { %v3556_v50 = vadd.f32 %v3555_v53, %v3407_v2  ;;  %3973 = vmatmul.f32.gmra.mxu1 %v9745_v20  ;;  %v3793_v53 = vand.u32 4294901760, %v9844_v52  ;;  %v9859_v2 = vand.u32 4294901760, %v275_v57 }
 0x35f   : > { %4217 = vmatmul.f32.gmra.mxu3 %v3777_v41 }
 0x360   : > { %v9852_v24 = vadd.f32 %v3652_v45, %v3556_v50  ;;  %4097 = vmatmul.f32.gmra.mxu2 %v9789_v5  ;;  %12105 = vst [vmem:[#allocation14_spill] sm:$0xff] %v9859_v2  ;;  %v4720_v45 = vand.u32 4294901760, %v4719_v35  ;;  %v9865_v50 = vand.u32 4294901760, %v412_v19  ;;  %v3794_v20 = vsub.f32 %v9844_v52, %v3793_v53 }
 0x361   : > { %v9873_v61 = vsub.f32 %v275_v57, %v9859_v2 }
 0x362   : > { %12104 = vst [vmem:[#allocation18_spill] sm:$0xff] %v9852_v24  ;;  %v3297_v41 = vpop.f32.mrf.mxu0  ;;  %4721 = vmatpush.msrb.mxu3 %v4720_v45  ;;  %4522 = vmatpush.msrb.mxu2 %v9865_v50  ;;  %v9869_v24 = vsub.f32 %v412_v19, %v9865_v50  ;;  %v3795_v57 = vand.u32 4294901760, %v3794_v20 }
 0x363   : > { %v3412_v48 = vpop.f32.mrf.mxu1  ;;  %v3559_v28 = vpop.f32.mrf.mxu2  ;;  %4973 = vmatpush.msra.mxu1 %v9865_v50 }
 0x364   : > { %v3413_v37 = vadd.f32 %v3412_v48, %v3293_v42  ;;  %v3656_v5 = vpop.f32.mrf.mxu3  ;;  %v11823_v48 = vand.u32 4294901760, %v9869_v24  ;;  %4855 = vmatpush.msra.mxu0 %v9869_v24  ;;  %v3298_v42 = vadd.f32 %v3297_v41, %v9426_v29 }
 0x365   : > { %3788 = vmatmul.f32.gmra.mxu0 %v3787_v62  ;;  %v9891_v62 = vand.u32 4294901760, %v283_v0 }
 0x366   : > { %v3560_v6 = vadd.f32 %v3559_v28, %v3413_v37  ;;  %3977 = vmatmul.f32.gmra.mxu1 %v9775_v10  ;;  %v4725_v19 = vsub.f32 %v9869_v24, %v11823_v48  ;;  %v3801_v28 = vand.u32 4294901760, %v9873_v61  ;;  %v411_v37 = vld [vmem:[%s11671_s1 + $0x2a0] sm:$0xff] }
 0x367   : > { %4223 = vmatmul.f32.gmra.mxu3 %v3785_v23  ;;  %12107 = vst [vmem:[#allocation16_spill] sm:$0xff] %v9891_v62  ;;  %v9893_v23 = vand.u32 4294901760, %v411_v37  ;;  %v9903_v41 = vsub.f32 %v283_v0, %v9891_v62  ;;  %v410_v0 = vld [vmem:[%s11671_s1 + $0x298] sm:$0xff] }
 0x368   : > { %v9880_v35 = vadd.f32 %v3656_v5, %v3560_v6  ;;  %4102 = vmatmul.f32.gmra.mxu2 %v9819_v40  ;;  %v4726_v45 = vand.u32 4294901760, %v4725_v19  ;;  %v3802_v10 = vsub.f32 %v9873_v61, %v3801_v28  ;;  %v291_v19 = vld [vmem:[%s7207_s16 + $0x2e0] sm:$0xff] }
 0x369   : > { %4524 = vmatpush.msrb.mxu2 %v9893_v23  ;;  %v9897_v20 = vsub.f32 %v411_v37, %v9893_v23  ;;  %4975 = vmatpush.msra.mxu1 %v9893_v23 }
 0x36a   : > { %12106 = vst [vmem:[#allocation19_spill] sm:$0xff] %v9880_v35  ;;  %v3302_v5 = vpop.f32.mrf.mxu0  ;;  %4727 = vmatpush.msrb.mxu3 %v4726_v45 }
 0x36b   : > { %v3418_v6 = vpop.f32.mrf.mxu1  ;;  %v3563_v35 = vpop.f32.mrf.mxu2  ;;  %4858 = vmatpush.msra.mxu0 %v9897_v20 }
 0x36c   : > { %v3419_v48 = vadd.f32 %v3418_v6, %v3298_v42  ;;  %v3660_v40 = vpop.f32.mrf.mxu3  ;;  %v11826_v42 = vand.u32 4294901760, %v9897_v20  ;;  %v3809_v6 = vand.u32 4294901760, %v9903_v41 }
 0x36d   : > { %3796 = vmatmul.f32.gmra.mxu0 %v3795_v57  ;;  %v3303_v57 = vadd.f32 %v3302_v5, %v9449_v47 }
 0x36e   : > { %v3564_v29 = vadd.f32 %v3563_v35, %v3419_v48  ;;  %3981 = vmatmul.f32.gmra.mxu1 %v9807_v15  ;;  %v4731_v37 = vsub.f32 %v9897_v20, %v11826_v42  ;;  %v3803_v48 = vand.u32 4294901760, %v3802_v10  ;;  %v9914_v35 = vand.u32 4294901760, %v291_v19 }
 0x36f   : > { %4229 = vmatmul.f32.gmra.mxu3 %v3793_v53  ;;  %v9921_v53 = vand.u32 4294901760, %v410_v0  ;;  %v3810_v5 = vsub.f32 %v9903_v41, %v3809_v6 }
 0x370   : > { %v9908_v45 = vadd.f32 %v3660_v40, %v3564_v29  ;;  %4107 = vmatmul.f32.gmra.mxu2 %v9844_v52  ;;  %12109 = vst [vmem:[#allocation5_spill] sm:$0xff] %v9914_v35  ;;  %v4732_v40 = vand.u32 4294901760, %v4731_v37  ;;  %v9928_v8 = vsub.f32 %v291_v19, %v9914_v35 }
 0x371   : > { %4526 = vmatpush.msrb.mxu2 %v9921_v53  ;;  %v9925_v10 = vsub.f32 %v410_v0, %v9921_v53  ;;  %4977 = vmatpush.msra.mxu1 %v9921_v53 }
 0x372   : > { %12108 = vst [vmem:[#allocation9_spill] sm:$0xff] %v9908_v45  ;;  %v3307_v29 = vpop.f32.mrf.mxu0  ;;  %4733 = vmatpush.msrb.mxu3 %v4732_v40  ;;  %v3811_v40 = vand.u32 4294901760, %v3810_v5 }
 0x373   : > { %v3424_v45 = vpop.f32.mrf.mxu1  ;;  %v3567_v15 = vpop.f32.mrf.mxu2  ;;  %v11829_v37 = vand.u32 4294901760, %v9925_v10  ;;  %4861 = vmatpush.msra.mxu0 %v9925_v10  ;;  %v3308_v0 = vadd.f32 %v3307_v29, %v9472_v34 }
 0x374   : > { %v3425_v42 = vadd.f32 %v3424_v45, %v3303_v57  ;;  %v3664_v52 = vpop.f32.mrf.mxu3  ;;  %v299_v45 = vld [vmem:[%s7207_s16 + $0x320] sm:$0xff] }
 0x375   : > { %3804 = vmatmul.f32.gmra.mxu0 %v3803_v48  ;;  %v4737_v19 = vsub.f32 %v9925_v10, %v11829_v37  ;;  %v409_v48 = vld [vmem:[%s11671_s1 + $0x290] sm:$0xff] }
 0x376   : > { %v3568_v47 = vadd.f32 %v3567_v15, %v3425_v42  ;;  %3985 = vmatmul.f32.gmra.mxu1 %v9830_v33  ;;  %v3817_v15 = vand.u32 4294901760, %v9928_v8  ;;  %v9943_v42 = vand.u32 4294901760, %v299_v45 }
 0x377   : > { %4235 = vmatmul.f32.gmra.mxu3 %v3801_v28 }
 0x378   : > { %v9936_v57 = vadd.f32 %v3664_v52, %v3568_v47  ;;  %4112 = vmatmul.f32.gmra.mxu2 %v9873_v61  ;;  %v4738_v52 = vand.u32 4294901760, %v4737_v19  ;;  %v9949_v47 = vand.u32 4294901760, %v409_v48  ;;  %v3818_v31 = vsub.f32 %v9928_v8, %v3817_v15 }
 0x379   : > { %v9957_v34 = vsub.f32 %v299_v45, %v9943_v42 }
 0x37a   : > { %12110 = vst [vmem:[#allocation4_spill] sm:$0xff] %v9936_v57  ;;  %v3312_v28 = vpop.f32.mrf.mxu0  ;;  %4739 = vmatpush.msrb.mxu3 %v4738_v52  ;;  %4528 = vmatpush.msrb.mxu2 %v9949_v47  ;;  %v9953_v21 = vsub.f32 %v409_v48, %v9949_v47  ;;  %v3819_v45 = vand.u32 4294901760, %v3818_v31 }
 0x37b   : > { %v3430_v57 = vpop.f32.mrf.mxu1  ;;  %v3571_v33 = vpop.f32.mrf.mxu2  ;;  %4979 = vmatpush.msra.mxu1 %v9949_v47 }
 0x37c   : > { %v3431_v37 = vadd.f32 %v3430_v57, %v3308_v0  ;;  %v3668_v61 = vpop.f32.mrf.mxu3  ;;  %v11834_v5 = vand.u32 4294901760, %v9953_v21  ;;  %v307_v57 = vld [vmem:[%s7207_s16 + $0x360] sm:$0xff]  ;;  %4864 = vmatpush.msra.mxu0 %v9953_v21  ;;  %v3313_v0 = vadd.f32 %v3312_v28, %v9495_v25 }
 0x37d   : > { %3812 = vmatmul.f32.gmra.mxu0 %v3811_v40  ;;  %v9975_v40 = vand.u32 4294901760, %v307_v57 }
 0x37e   : > { %v3572_v29 = vadd.f32 %v3571_v33, %v3431_v37  ;;  %3989 = vmatmul.f32.gmra.mxu1 %v9859_v2  ;;  %v4743_v48 = vsub.f32 %v9953_v21, %v11834_v5  ;;  %v3825_v33 = vand.u32 4294901760, %v9957_v34  ;;  %v408_v37 = vld [vmem:[%s11671_s1 + $0x288] sm:$0xff] }
 0x37f   : > { %4241 = vmatmul.f32.gmra.mxu3 %v3809_v6  ;;  %v3832_v28 = vsub.f32 %v307_v57, %v9975_v40 }
 0x380   : > { %v9964_v19 = vadd.f32 %v3668_v61, %v3572_v29  ;;  %4117 = vmatmul.f32.gmra.mxu2 %v9903_v41  ;;  %v4744_v52 = vand.u32 4294901760, %v4743_v48  ;;  %v9977_v61 = vand.u32 4294901760, %v408_v37  ;;  %v3826_v2 = vsub.f32 %v9957_v34, %v3825_v33 }
 0x382   : > { %12111 = vst [vmem:[#allocation3_spill] sm:$0xff] %v9964_v19  ;;  %v3317_v6 = vpop.f32.mrf.mxu0  ;;  %4745 = vmatpush.msrb.mxu3 %v4744_v52  ;;  %4530 = vmatpush.msrb.mxu2 %v9977_v61  ;;  %v9981_v31 = vsub.f32 %v408_v37, %v9977_v61 }
 0x383   : > { %v3436_v29 = vpop.f32.mrf.mxu1  ;;  %v3575_v19 = vpop.f32.mrf.mxu2  ;;  %4981 = vmatpush.msra.mxu1 %v9977_v61 }
 0x384   : > { %v3437_v5 = vadd.f32 %v3436_v29, %v3313_v0  ;;  %v3672_v41 = vpop.f32.mrf.mxu3  ;;  %v11839_v48 = vand.u32 4294901760, %v9981_v31  ;;  %v315_v0 = vld [vmem:[%s7207_s16 + $0x3a0] sm:$0xff]  ;;  %4867 = vmatpush.msra.mxu0 %v9981_v31  ;;  %v3833_v29 = vand.u32 4294901760, %v3832_v28 }
 0x385   : > { %3820 = vmatmul.f32.gmra.mxu0 %v3819_v45  ;;  %v3318_v45 = vadd.f32 %v3317_v6, %v9522_v18  ;;  %v12113_v18 = vand.u32 4294901760, %v9541_v63 }
 0x386   : > { %v3576_v25 = vadd.f32 %v3575_v19, %v3437_v5  ;;  %3993 = vmatmul.f32.gmra.mxu1 %v9891_v62  ;;  %v4749_v37 = vsub.f32 %v9981_v31, %v11839_v48  ;;  %v407_v5 = vld [vmem:[%s11671_s1 + $0x280] sm:$0xff]  ;;  %v3827_v19 = vand.u32 4294901760, %v3826_v2  ;;  %v10002_v62 = vand.u32 4294901760, %v315_v0 }
 0x387   : > { %4247 = vmatmul.f32.gmra.mxu3 %v3817_v15  ;;  %v9999_v57 = vand.u32 4294901760, %v407_v5  ;;  %v3834_v3 = vsub.f32 %v3832_v28, %v3833_v29 }
 0x388   : > { %v9990_v52 = vadd.f32 %v3672_v41, %v3576_v25  ;;  %4122 = vmatmul.f32.gmra.mxu2 %v9928_v8  ;;  %v4750_v41 = vand.u32 4294901760, %v4749_v37 }
 0x389   : > { %4532 = vmatpush.msrb.mxu2 %v9999_v57  ;;  %v10006_v48 = vsub.f32 %v407_v5, %v9999_v57  ;;  %4983 = vmatpush.msra.mxu1 %v9999_v57  ;;  %v3840_v5 = vsub.f32 %v315_v0, %v10002_v62  ;;  %v12115_v0 = vand.u32 4294901760, %v9613_v16 }
 0x38a   : > { %12112 = vst [vmem:[#allocation7_spill] sm:$0xff] %v9990_v52  ;;  %v3322_v15 = vpop.f32.mrf.mxu0  ;;  %4751 = vmatpush.msrb.mxu3 %v4750_v41  ;;  %v12114_v41 = vand.u32 4294901760, %v9575_v46 }
 0x38b   : > { %v3442_v25 = vpop.f32.mrf.mxu1  ;;  %v3579_v2 = vpop.f32.mrf.mxu2  ;;  %5084 = vmatpush.msra.mxu2 %v12113_v18  ;;  %v11844_v6 = vand.u32 4294901760, %v10006_v48  ;;  %4870 = vmatpush.msra.mxu0 %v10006_v48  ;;  %v10025_v18 = vand.u32 4294901760, %v323_v39 }
 0x38c   : > { %v3443_v8 = vadd.f32 %v3442_v25, %v3318_v45  ;;  %v3676_v52 = vpop.f32.mrf.mxu3 }
 0x38d   : > { %3828 = vmatmul.f32.gmra.mxu0 %v3827_v19  ;;  %v4755_v45 = vsub.f32 %v10006_v48, %v11844_v6  ;;  %5088 = vmatpush.msra.mxu2 %v12114_v41  ;;  %v3323_v19 = vadd.f32 %v3322_v15, %v9554_v56  ;;  %v3848_v16 = vsub.f32 %v323_v39, %v10025_v18 }
 0x38e   : > { %v3580_v37 = vadd.f32 %v3579_v2, %v3443_v8  ;;  %3997 = vmatmul.f32.gmra.mxu1 %v9914_v35  ;;  %v3835_v8 = vand.u32 4294901760, %v3834_v3  ;;  %v3841_v2 = vand.u32 4294901760, %v3840_v5 }
 0x38f   : > { %4253 = vmatmul.f32.gmra.mxu3 %v3825_v33  ;;  %v4756_v25 = vand.u32 4294901760, %v4755_v45  ;;  %5092 = vmatpush.msra.mxu2 %v12115_v0  ;;  %v12117_v33 = vand.u32 4294901760, %v9690_v11  ;;  %v12118_v45 = vand.u32 4294901760, %v9724_v43  ;;  %v12121_v0 = vand.u32 4294901760, %v9813_v1 }
 0x390   : > { %v10021_v63 = vadd.f32 %v3676_v52, %v3580_v37  ;;  %4127 = vmatmul.f32.gmra.mxu2 %v9957_v34  ;;  %v12116_v34 = vand.u32 4294901760, %v9652_v38  ;;  %v3842_v3 = vsub.f32 %v3840_v5, %v3841_v2  ;;  %v204_v37 = vld [vmem:[%s7207_s16 + $0x28] sm:$0xff] }
 0x391   : > { %4757 = vmatpush.msrb.mxu3 %v4756_v25 }
 0x392   : > { %v3327_v35 = vpop.f32.mrf.mxu0  ;;  %5096 = vmatpush.msra.mxu2 %v12116_v34  ;;  %v3843_v38 = vand.u32 4294901760, %v3842_v3 }
 0x393   : > { %v3448_v6 = vpop.f32.mrf.mxu1  ;;  %v3583_v41 = vpop.f32.mrf.mxu2  ;;  %5211 = vmatpush.msra.mxu3 %v9535_v30  ;;  %v3328_v30 = vadd.f32 %v3327_v35, %v9591_v59 }
 0x394   : > { %v3449_v46 = vadd.f32 %v3448_v6, %v3323_v19  ;;  %v3680_v52 = vpop.f32.mrf.mxu3  ;;  %5100 = vmatpush.msra.mxu2 %v12117_v33  ;;  %v3849_v6 = vand.u32 4294901760, %v3848_v16 }
 0x395   : > { %3836 = vmatmul.f32.gmra.mxu0 %v3835_v8  ;;  %5213 = vmatpush.msra.mxu3 %v9568_v13  ;;  %v212_v8 = vld [vmem:[%s7207_s16 + $0x68] sm:$0xff] }
 0x396   : > { %v3584_v56 = vadd.f32 %v3583_v41, %v3449_v46  ;;  %4001 = vmatmul.f32.gmra.mxu1 %v9943_v42  ;;  %5104 = vmatpush.msra.mxu2 %v12118_v45  ;;  %v3850_v43 = vsub.f32 %v3848_v16, %v3849_v6 }
 0x397   : > { %4259 = vmatmul.f32.gmra.mxu3 %v3833_v29  ;;  %v12119_v29 = vand.u32 4294901760, %v9757_v32 }
 0x398   : > { %v10037_v15 = vadd.f32 %v3680_v52, %v3584_v56  ;;  %4132 = vmatmul.f32.gmra.mxu2 %v3832_v28  ;;  %5215 = vmatpush.msra.mxu3 %v9606_v17  ;;  %v10047_v17 = vand.u32 4294901760, %v204_v37  ;;  %v3851_v28 = vand.u32 4294901760, %v3850_v43  ;;  %v10068_v52 = vand.u32 4294901760, %v212_v8  ;;  %v220_v56 = vld [vmem:[%s7207_s16 + $0xa8] sm:$0xff] }
 0x399   : > { %5108 = vmatpush.msra.mxu2 %v12119_v29  ;;  %v12128_v29 = vand.u32 4294901760, %v10006_v48 }
 0x39a   : > { %v3332_v39 = vpop.f32.mrf.mxu0  ;;  %5217 = vmatpush.msra.mxu3 %v9645_v9  ;;  %v12120_v9 = vand.u32 4294901760, %v9785_v27  ;;  %v10057_v32 = vsub.f32 %v204_v37, %v10047_v17  ;;  %v10081_v34 = vsub.f32 %v212_v8, %v10068_v52  ;;  %v10092_v37 = vand.u32 4294901760, %v220_v56 }
 0x39b   : > { %v3454_v25 = vpop.f32.mrf.mxu1  ;;  %v3587_v11 = vpop.f32.mrf.mxu2 }
 0x39c   : > { %v3455_v13 = vadd.f32 %v3454_v25, %v3328_v30  ;;  %v3684_v19 = vpop.f32.mrf.mxu3  ;;  %5219 = vmatpush.msra.mxu3 %v9682_v60  ;;  %5112 = vmatpush.msra.mxu2 %v12120_v9  ;;  %v3333_v60 = vadd.f32 %v3332_v39, %v9630_v4  ;;  %v12127_v39 = vand.u32 4294901760, %v9981_v31 }
 0x39d   : > { %3844 = vmatmul.f32.gmra.mxu0 %v3843_v38  ;;  %v12125_v38 = vand.u32 4294901760, %v9925_v10 }
 0x39e   : > { %v3588_v59 = vadd.f32 %v3587_v11, %v3455_v13  ;;  %4005 = vmatmul.f32.gmra.mxu1 %v9975_v40  ;;  %5221 = vmatpush.msra.mxu3 %v9718_v44 }
 0x39f   : > { %4265 = vmatmul.f32.gmra.mxu3 %v3841_v2  ;;  %5116 = vmatpush.msra.mxu2 %v12121_v0 }
 0x3a0   : > { %v10054_v35 = vadd.f32 %v3684_v19, %v3588_v59  ;;  %4137 = vmatmul.f32.gmra.mxu2 %v3840_v5  ;;  %5223 = vmatpush.msra.mxu3 %v9753_v7  ;;  %v12122_v5 = vand.u32 4294901760, %v9841_v54  ;;  %v11856_v7 = vand.u32 4294901760, %v10057_v32 }
 0x3a2   : > { %v3337_v44 = vpop.f32.mrf.mxu0  ;;  %5225 = vmatpush.msra.mxu3 %v9781_v51  ;;  %5120 = vmatpush.msra.mxu2 %v12122_v5  ;;  %v12123_v51 = vand.u32 4294901760, %v9869_v24  ;;  %v4536_v54 = vsub.f32 %v10057_v32, %v11856_v7 }
 0x3a3   : > { %v3460_v46 = vpop.f32.mrf.mxu1  ;;  %v3591_v41 = vpop.f32.mrf.mxu2 }
 0x3a4   : > { %v3461_v27 = vadd.f32 %v3460_v46, %v3333_v60  ;;  %v3688_v2 = vpop.f32.mrf.mxu3  ;;  %5227 = vmatpush.msra.mxu3 %v9809_v14  ;;  %5124 = vmatpush.msra.mxu2 %v12123_v51  ;;  %v3338_v14 = vadd.f32 %v3337_v44, %v9668_v58  ;;  %v236_v60 = vld [vmem:[%s7207_s16 + $0x128] sm:$0xff]  ;;  %v12129_v51 = vld [vmem:[#allocation13_spill] sm:$0xff] }
 0x3a5   : > { %3852 = vmatmul.f32.gmra.mxu0 %v3851_v28 }
 0x3a6   : > { %v3592_v4 = vadd.f32 %v3591_v41, %v3461_v27  ;;  %4009 = vmatmul.f32.gmra.mxu1 %v10002_v62  ;;  %5229 = vmatpush.msra.mxu3 %v9837_v26  ;;  %v12124_v26 = vand.u32 4294901760, %v9897_v20  ;;  %v10134_v41 = vand.u32 4294901760, %v236_v60 }
 0x3a7   : > { %4271 = vmatmul.f32.gmra.mxu3 %v3849_v6  ;;  %v4537_v6 = vand.u32 4294901760, %v4536_v54 }
 0x3a8   : > { %v10075_v1 = vadd.f32 %v3688_v2, %v3592_v4  ;;  %4142 = vmatmul.f32.gmra.mxu2 %v3848_v16  ;;  %5231 = vmatpush.msra.mxu3 %v9865_v50  ;;  %v11854_v50 = vand.u32 4294901760, %v10081_v34  ;;  %v10145_v4 = vsub.f32 %v236_v60, %v10134_v41 }
 0x3a9   : > { %5128 = vmatpush.msra.mxu2 %v12124_v26 }
 0x3aa   : > { %v3733_v3 = vpop.f32.mrf.mxu0  ;;  %5233 = vmatpush.msra.mxu3 %v9893_v23  ;;  %v12126_v23 = vand.u32 4294901760, %v9953_v21  ;;  %v4544_v10 = vsub.f32 %v10081_v34, %v11854_v50  ;;  %v228_v21 = vld [vmem:[%s7207_s16 + $0xe8] sm:$0xff]  ;;  %v12147_v50 = vld [vmem:[#allocation5_spill] sm:$0xff] }
 0x3ab   : > { %v3466_v24 = vpop.f32.mrf.mxu1  ;;  %v3595_v33 = vpop.f32.mrf.mxu2  ;;  %5132 = vmatpush.msra.mxu2 %v12125_v38  ;;  %v3734_v45 = vadd.f32 %v3733_v3, %v9704_v22  ;;  %v10118_v43 = vand.u32 4294901760, %v228_v21 }
 0x3ac   : > { %v3467_v16 = vadd.f32 %v3466_v24, %v3338_v14  ;;  %v3692_v30 = vpop.f32.mrf.mxu3  ;;  %5235 = vmatpush.msra.mxu3 %v9921_v53  ;;  %v10107_v53 = vsub.f32 %v220_v56, %v10092_v37  ;;  %v4545_v59 = vand.u32 4294901760, %v4544_v10  ;;  %v244_v14 = vld [vmem:[%s7207_s16 + $0x168] sm:$0xff] }
 0x3ad   : > { %4340 = vmatmul.f32.vlgmr.msrb.gmra.mxu0 %v9561_v49  ;;  %5136 = vmatpush.msra.mxu2 %v12126_v23 }
 0x3ae   : > { %v3596_v58 = vadd.f32 %v3595_v33, %v3467_v16  ;;  %4013 = vmatmul.f32.gmra.mxu1 %v10025_v18  ;;  %5237 = vmatpush.msra.mxu3 %v9949_v47  ;;  %v11850_v33 = vand.u32 4294901760, %v10145_v4 }
 0x3af   : > { %4759 = vmatmul.f32.vlgmr.msrb.gmra.mxu3 %v10047_v17  ;;  %5140 = vmatpush.msra.mxu2 %v12127_v39  ;;  %v252_v39 = vld [vmem:[%s7207_s16 + $0x1a8] sm:$0xff] }
 0x3b0   : > { %v10100_v20 = vadd.f32 %v3692_v30, %v3596_v58  ;;  %4538 = vmatmul.f32.vlgmr.msrb.gmra.mxu2 %v4537_v6  ;;  %5239 = vmatpush.msra.mxu3 %v9977_v61  ;;  %v11853_v61 = vand.u32 4294901760, %v10107_v53  ;;  %v10150_v30 = vand.u32 4294901760, %v244_v14  ;;  %v12130_v6 = vld [vmem:[#allocation2_spill] sm:$0xff]  ;;  %v4568_v23 = vsub.f32 %v10145_v4, %v11850_v33  ;;  %v12144_v33 = vld [vmem:[#allocation16_spill] sm:$0xff] }
 0x3b1   : > { %5144 = vmatpush.msra.mxu2 %v12128_v29 }
 0x3b2   : > { %v3741_v47 = vpop.f32.mrf.mxu0  ;;  %5241 = vmatpush.msra.mxu3 %v9999_v57  ;;  %v4552_v48 = vsub.f32 %v10107_v53, %v11853_v61  ;;  %v10129_v57 = vsub.f32 %v228_v21, %v10118_v43  ;;  %v10161_v10 = vsub.f32 %v244_v14, %v10150_v30 }
 0x3b3   : > { %v3954_v25 = vpop.f32.mrf.mxu1  ;;  %v4068_v11 = vpop.f32.mrf.mxu2  ;;  %v3742_v9 = vadd.f32 %v3741_v47, %v9737_v55 }
 0x3b4   : > { %v3955_v13 = vadd.f32 %v3954_v25, %v3734_v45  ;;  %v4182_v19 = vpop.f32.mrf.mxu3  ;;  %v4553_v46 = vand.u32 4294901760, %v4552_v48  ;;  %v11852_v27 = vand.u32 4294901760, %v10129_v57  ;;  %v12131_v45 = vld [vmem:[#allocation15_spill] sm:$0xff]  ;;  %v11849_v29 = vand.u32 4294901760, %v10161_v10 }
 0x3b5   : > { %4344 = vmatmul.f32.gmra.mxu0 %v9604_v12  ;;  %v12132_v48 = vld [vmem:[#allocation11_spill] sm:$0xff] }
 0x3b6   : > { %v4069_v22 = vadd.f32 %v4068_v11, %v3955_v13  ;;  %4437 = vmatmul.f32.vlgmr.msrb.gmra.mxu1 %v9561_v49  ;;  %v4560_v55 = vsub.f32 %v10129_v57, %v11852_v27  ;;  %v4576_v60 = vsub.f32 %v10161_v10, %v11849_v29 }
 0x3b7   : > { %4763 = vmatmul.f32.gmra.mxu3 %v10068_v52 }
 0x3b8   : > { %v10122_v31 = vadd.f32 %v4182_v19, %v4069_v22  ;;  %4546 = vmatmul.f32.gmra.mxu2 %v4545_v59  ;;  %v4561_v16 = vand.u32 4294901760, %v4560_v55  ;;  %v4569_v19 = vand.u32 4294901760, %v4568_v23  ;;  %v10166_v59 = vand.u32 4294901760, %v252_v39  ;;  %v268_v23 = vld [vmem:[%s7207_s16 + $0x228] sm:$0xff] }
 0x3ba   : > { %v3749_v28 = vpop.f32.mrf.mxu0 }
 0x3bb   : > { %v3958_v8 = vpop.f32.mrf.mxu1  ;;  %v4073_v49 = vpop.f32.mrf.mxu2  ;;  %v3750_v54 = vadd.f32 %v3749_v28, %v12129_v51  ;;  %v10177_v28 = vsub.f32 %v252_v39, %v10166_v59 }
 0x3bc   : > { %v3959_v0 = vadd.f32 %v3958_v8, %v3742_v9  ;;  %v4188_v44 = vpop.f32.mrf.mxu3  ;;  %v12133_v8 = vld [vmem:[#allocation17_spill] sm:$0xff] }
 0x3bd   : > { %4348 = vmatmul.f32.gmra.mxu0 %v9637_v36  ;;  %v11848_v14 = vand.u32 4294901760, %v10177_v28 }
 0x3be   : > { %v4074_v2 = vadd.f32 %v4073_v49, %v3959_v0  ;;  %4441 = vmatmul.f32.gmra.mxu1 %v9604_v12  ;;  %v260_v49 = vld [vmem:[%s7207_s16 + $0x1e8] sm:$0xff] }
 0x3bf   : > { %4767 = vmatmul.f32.gmra.mxu3 %v10092_v37 }
 0x3c0   : > { %v10138_v5 = vadd.f32 %v4188_v44, %v4074_v2  ;;  %4554 = vmatmul.f32.gmra.mxu2 %v4553_v46 }
 0x3c2   : > { %v3757_v56 = vpop.f32.mrf.mxu0 }
 0x3c3   : > { %v3962_v26 = vpop.f32.mrf.mxu1  ;;  %v4078_v12 = vpop.f32.mrf.mxu2  ;;  %v3758_v21 = vadd.f32 %v3757_v56, %v12131_v45  ;;  %v10182_v56 = vand.u32 4294901760, %v260_v49 }
 0x3c4   : > { %v3963_v24 = vadd.f32 %v3962_v26, %v3750_v54  ;;  %v4194_v3 = vpop.f32.mrf.mxu3  ;;  %v4577_v54 = vand.u32 4294901760, %v4576_v60 }
 0x3c5   : > { %4352 = vmatmul.f32.gmra.mxu0 %v12130_v6 }
 0x3c6   : > { %v4079_v38 = vadd.f32 %v4078_v12, %v3963_v24  ;;  %4445 = vmatmul.f32.gmra.mxu1 %v9637_v36  ;;  %v12134_v24 = vld [vmem:[#allocation6_spill] sm:$0xff] }
 0x3c7   : > { %4771 = vmatmul.f32.gmra.mxu3 %v10118_v43 }
 0x3c8   : > { %v10154_v58 = vadd.f32 %v4194_v3, %v4079_v38  ;;  %4562 = vmatmul.f32.gmra.mxu2 %v4561_v16  ;;  %v4584_v3 = vsub.f32 %v10177_v28, %v11848_v14  ;;  %v10193_v16 = vsub.f32 %v260_v49, %v10182_v56  ;;  %v12135_v38 = vld [vmem:[#allocation18_spill] sm:$0xff] }
 0x3ca   : > { %v3765_v47 = vpop.f32.mrf.mxu0 }
 0x3cb   : > { %v3966_v25 = vpop.f32.mrf.mxu1  ;;  %v4083_v36 = vpop.f32.mrf.mxu2  ;;  %v3766_v0 = vadd.f32 %v3765_v47, %v12133_v8 }
 0x3cc   : > { %v3967_v13 = vadd.f32 %v3966_v25, %v3758_v21  ;;  %v4200_v11 = vpop.f32.mrf.mxu3 }
 0x3cd   : > { %4356 = vmatmul.f32.gmra.mxu0 %v12132_v48 }
 0x3ce   : > { %v4084_v22 = vadd.f32 %v4083_v36, %v3967_v13  ;;  %4449 = vmatmul.f32.gmra.mxu1 %v12130_v6  ;;  %v4585_v13 = vand.u32 4294901760, %v4584_v3  ;;  %v11846_v36 = vand.u32 4294901760, %v10193_v16 }
 0x3cf   : > { %4775 = vmatmul.f32.gmra.mxu3 %v10134_v41 }
 0x3d0   : > { %v10170_v9 = vadd.f32 %v4200_v11, %v4084_v22  ;;  %4570 = vmatmul.f32.gmra.mxu2 %v4569_v19  ;;  %v10198_v11 = vand.u32 4294901760, %v268_v23  ;;  %v12136_v22 = vld [vmem:[#allocation8_spill] sm:$0xff]  ;;  %v4592_v60 = vsub.f32 %v10193_v16, %v11846_v36  ;;  %v12142_v36 = vld [vmem:[#allocation14_spill] sm:$0xff] }
 0x3d2   : > { %v3773_v44 = vpop.f32.mrf.mxu0  ;;  %v10209_v8 = vsub.f32 %v268_v23, %v10198_v11 }
 0x3d3   : > { %v3970_v46 = vpop.f32.mrf.mxu1  ;;  %v4088_v55 = vpop.f32.mrf.mxu2  ;;  %v3774_v6 = vadd.f32 %v3773_v44, %v12135_v38  ;;  %v276_v44 = vld [vmem:[%s7207_s16 + $0x268] sm:$0xff] }
 0x3d4   : > { %v3971_v2 = vadd.f32 %v3970_v46, %v3766_v0  ;;  %v4206_v51 = vpop.f32.mrf.mxu3  ;;  %v12137_v0 = vld [vmem:[#allocation19_spill] sm:$0xff]  ;;  %v10214_v3 = vand.u32 4294901760, %v276_v44 }
 0x3d5   : > { %4360 = vmatmul.f32.gmra.mxu0 %v12134_v24 }
 0x3d6   : > { %v4089_v26 = vadd.f32 %v4088_v55, %v3971_v2  ;;  %4453 = vmatmul.f32.gmra.mxu1 %v12132_v48 }
 0x3d7   : > { %4779 = vmatmul.f32.gmra.mxu3 %v10150_v30 }
 0x3d8   : > { %v10186_v12 = vadd.f32 %v4206_v51, %v4089_v26  ;;  %4578 = vmatmul.f32.gmra.mxu2 %v4577_v54  ;;  %v4593_v26 = vand.u32 4294901760, %v4592_v60 }
 0x3da   : > { %v3781_v45 = vpop.f32.mrf.mxu0 }
 0x3db   : > { %v3974_v21 = vpop.f32.mrf.mxu1  ;;  %v4093_v47 = vpop.f32.mrf.mxu2  ;;  %v3782_v49 = vadd.f32 %v3781_v45, %v12137_v0 }
 0x3dc   : > { %v3975_v39 = vadd.f32 %v3974_v21, %v3774_v6  ;;  %v4212_v25 = vpop.f32.mrf.mxu3  ;;  %v12138_v6 = vld [vmem:[#allocation10_spill] sm:$0xff]  ;;  %v10225_v21 = vsub.f32 %v276_v44, %v10214_v3 }
 0x3dd   : > { %4364 = vmatmul.f32.gmra.mxu0 %v12136_v22 }
 0x3de   : > { %v4094_v19 = vadd.f32 %v4093_v47, %v3975_v39  ;;  %4457 = vmatmul.f32.gmra.mxu1 %v12134_v24  ;;  %v11845_v24 = vand.u32 4294901760, %v10209_v8  ;;  %v12139_v39 = vld [vmem:[#allocation9_spill] sm:$0xff] }
 0x3df   : > { %4783 = vmatmul.f32.gmra.mxu3 %v10166_v59 }
 0x3e0   : > { %v10202_v48 = vadd.f32 %v4212_v25, %v4094_v19  ;;  %4586 = vmatmul.f32.gmra.mxu2 %v4585_v13  ;;  %v4600_v45 = vsub.f32 %v10209_v8, %v11845_v24  ;;  %v284_v25 = vld [vmem:[%s7207_s16 + $0x2a8] sm:$0xff] }
 0x3e2   : > { %v3789_v46 = vpop.f32.mrf.mxu0 }
 0x3e3   : > { %v3978_v2 = vpop.f32.mrf.mxu1  ;;  %v4098_v51 = vpop.f32.mrf.mxu2  ;;  %v3790_v47 = vadd.f32 %v3789_v46, %v12139_v39  ;;  %v292_v39 = vld [vmem:[%s7207_s16 + $0x2e8] sm:$0xff] }
 0x3e4   : > { %v3979_v55 = vadd.f32 %v3978_v2, %v3782_v49  ;;  %v4218_v54 = vpop.f32.mrf.mxu3  ;;  %v4601_v49 = vand.u32 4294901760, %v4600_v45  ;;  %v11847_v2 = vand.u32 4294901760, %v10225_v21 }
 0x3e5   : > { %4368 = vmatmul.f32.gmra.mxu0 %v12138_v6 }
 0x3e6   : > { %v4099_v38 = vadd.f32 %v4098_v51, %v3979_v55  ;;  %4461 = vmatmul.f32.gmra.mxu1 %v12136_v22  ;;  %v10230_v55 = vand.u32 4294901760, %v284_v25  ;;  %v4608_v46 = vsub.f32 %v10225_v21, %v11847_v2 }
 0x3e7   : > { %4787 = vmatmul.f32.gmra.mxu3 %v10182_v56 }
 0x3e8   : > { %v10218_v23 = vadd.f32 %v4218_v54, %v4099_v38  ;;  %4594 = vmatmul.f32.gmra.mxu2 %v4593_v26  ;;  %v12140_v54 = vld [vmem:[#allocation12_spill] sm:$0xff]  ;;  %v10241_v26 = vsub.f32 %v284_v25, %v10230_v55 }
 0x3e9   : > { %v12141_v38 = vld [vmem:[#allocation4_spill] sm:$0xff] }
 0x3ea   : > { %v3797_v13 = vpop.f32.mrf.mxu0 }
 0x3eb   : > { %v3982_v19 = vpop.f32.mrf.mxu1  ;;  %v4103_v22 = vpop.f32.mrf.mxu2  ;;  %v3798_v45 = vadd.f32 %v3797_v13, %v12141_v38  ;;  %v12143_v38 = vld [vmem:[#allocation3_spill] sm:$0xff] }
 0x3ec   : > { %v3983_v60 = vadd.f32 %v3982_v19, %v3790_v47  ;;  %v4224_v0 = vpop.f32.mrf.mxu3 }
 0x3ed   : > { %4372 = vmatmul.f32.gmra.mxu0 %v12140_v54 }
 0x3ee   : > { %v4104_v51 = vadd.f32 %v4103_v22, %v3983_v60  ;;  %4465 = vmatmul.f32.gmra.mxu1 %v12138_v6 }
 0x3ef   : > { %4791 = vmatmul.f32.gmra.mxu3 %v10198_v11 }
 0x3f0   : > { %v10234_v44 = vadd.f32 %v4224_v0, %v4104_v51  ;;  %4602 = vmatmul.f32.gmra.mxu2 %v4601_v49  ;;  %v4609_v0 = vand.u32 4294901760, %v4608_v46  ;;  %v11851_v51 = vand.u32 4294901760, %v10241_v26  ;;  %v10246_v49 = vand.u32 4294901760, %v292_v39 }
 0x3f2   : > { %v3805_v47 = vpop.f32.mrf.mxu0  ;;  %v4616_v13 = vsub.f32 %v10241_v26, %v11851_v51  ;;  %v10257_v46 = vsub.f32 %v292_v39, %v10246_v49 }
 0x3f3   : > { %v3986_v19 = vpop.f32.mrf.mxu1  ;;  %v4108_v6 = vpop.f32.mrf.mxu2 }
 0x3f4   : > { %v3987_v60 = vadd.f32 %v3986_v19, %v3798_v45  ;;  %v4230_v22 = vpop.f32.mrf.mxu3  ;;  %v3806_v45 = vadd.f32 %v3805_v47, %v12143_v38  ;;  %v300_v19 = vld [vmem:[%s7207_s16 + $0x328] sm:$0xff]  ;;  %v11855_v14 = vand.u32 4294901760, %v10257_v46 }
 0x3f5   : > { %4376 = vmatmul.f32.gmra.mxu0 %v12142_v36  ;;  %v12145_v38 = vld [vmem:[#allocation7_spill] sm:$0xff] }
 0x3f6   : > { %v4109_v24 = vadd.f32 %v4108_v6, %v3987_v60  ;;  %4469 = vmatmul.f32.gmra.mxu1 %v12140_v54  ;;  %v4624_v47 = vsub.f32 %v10257_v46, %v11855_v14 }
 0x3f7   : > { %4795 = vmatmul.f32.gmra.mxu3 %v10214_v3 }
 0x3f8   : > { %v10250_v25 = vadd.f32 %v4230_v22, %v4109_v24  ;;  %4610 = vmatmul.f32.gmra.mxu2 %v4609_v0  ;;  %v4617_v22 = vand.u32 4294901760, %v4616_v13  ;;  %v10262_v0 = vand.u32 4294901760, %v300_v19 }
 0x3fa   : > { %v3813_v60 = vpop.f32.mrf.mxu0  ;;  %v10273_v13 = vsub.f32 %v300_v19, %v10262_v0 }
 0x3fb   : > { %v3990_v6 = vpop.f32.mrf.mxu1  ;;  %v4113_v54 = vpop.f32.mrf.mxu2 }
 0x3fc   : > { %v3991_v2 = vadd.f32 %v3990_v6, %v3806_v45  ;;  %v4236_v24 = vpop.f32.mrf.mxu3  ;;  %v3814_v45 = vadd.f32 %v3813_v60, %v12145_v38  ;;  %v308_v6 = vld [vmem:[%s7207_s16 + $0x368] sm:$0xff]  ;;  %v11857_v27 = vand.u32 4294901760, %v10273_v13 }
 0x3fd   : > { %4380 = vmatmul.f32.gmra.mxu0 %v12144_v33 }
 0x3fe   : > { %v4114_v29 = vadd.f32 %v4113_v54, %v3991_v2  ;;  %4473 = vmatmul.f32.gmra.mxu1 %v12142_v36  ;;  %v4632_v60 = vsub.f32 %v10273_v13, %v11857_v27 }
 0x3ff   : > { %4799 = vmatmul.f32.gmra.mxu3 %v10230_v55 }
 0x400   : > { %v10266_v39 = vadd.f32 %v4236_v24, %v4114_v29  ;;  %4618 = vmatmul.f32.gmra.mxu2 %v4617_v22  ;;  %v4625_v24 = vand.u32 4294901760, %v4624_v47  ;;  %v10278_v22 = vand.u32 4294901760, %v308_v6 }
 0x402   : > { %v3821_v2 = vpop.f32.mrf.mxu0  ;;  %12146 = vst [vmem:[#allocation13_spill] sm:$0xff] %v10278_v22  ;;  %v10289_v47 = vsub.f32 %v308_v6, %v10278_v22 }
 0x403   : > { %v3994_v54 = vpop.f32.mrf.mxu1  ;;  %v4118_v36 = vpop.f32.mrf.mxu2  ;;  %v3822_v38 = vadd.f32 %v3821_v2, %v10021_v63 }
 0x404   : > { %v3995_v51 = vadd.f32 %v3994_v54, %v3814_v45  ;;  %v4242_v29 = vpop.f32.mrf.mxu3  ;;  %12148 = vst [vmem:[#allocation2_spill] sm:$0xff] %v10289_v47  ;;  %v316_v45 = vld [vmem:[%s7207_s16 + $0x3a8] sm:$0xff]  ;;  %v11858_v14 = vand.u32 4294901760, %v10289_v47 }
 0x405   : > { %4384 = vmatmul.f32.gmra.mxu0 %v12147_v50 }
 0x406   : > { %v4119_v61 = vadd.f32 %v4118_v36, %v3995_v51  ;;  %4477 = vmatmul.f32.gmra.mxu1 %v12144_v33  ;;  %v4640_v63 = vsub.f32 %v10289_v47, %v11858_v14 }
 0x407   : > { %4803 = vmatmul.f32.gmra.mxu3 %v10246_v49 }
 0x408   : > { %v10282_v19 = vadd.f32 %v4242_v29, %v4119_v61  ;;  %4626 = vmatmul.f32.gmra.mxu2 %v4625_v24  ;;  %v4633_v29 = vand.u32 4294901760, %v4632_v60  ;;  %v10294_v24 = vand.u32 4294901760, %v316_v45  ;;  %v438_v60 = vld [vmem:[%s11671_s1 + $0x378] sm:$0xff] }
 0x40a   : > { %v3829_v51 = vpop.f32.mrf.mxu0  ;;  %12149 = vst [vmem:[#allocation15_spill] sm:$0xff] %v10294_v24  ;;  %v10305_v2 = vsub.f32 %v316_v45, %v10294_v24  ;;  %v4641_v45 = vand.u32 4294901760, %v4640_v63 }
 0x40b   : > { %v3998_v54 = vpop.f32.mrf.mxu1  ;;  %v4123_v33 = vpop.f32.mrf.mxu2 }
 0x40c   : > { %v3999_v36 = vadd.f32 %v3998_v54, %v3822_v38  ;;  %v4248_v61 = vpop.f32.mrf.mxu3  ;;  %12150 = vst [vmem:[#allocation11_spill] sm:$0xff] %v10305_v2  ;;  %v3830_v38 = vadd.f32 %v3829_v51, %v10037_v15  ;;  %v324_v54 = vld [vmem:[%s7207_s16 + $0x3e8] sm:$0xff]  ;;  %v11865_v14 = vand.u32 4294901760, %v10305_v2 }
 0x40d   : > { %4388 = vmatmul.f32.gmra.mxu0 %v9943_v42  ;;  %v10320_v47 = vand.u32 4294901760, %v324_v54 }
 0x40e   : > { %v4124_v7 = vadd.f32 %v4123_v33, %v3999_v36  ;;  %4481 = vmatmul.f32.gmra.mxu1 %v12147_v50  ;;  %v10312_v50 = vand.u32 4294901760, %v438_v60 }
 0x40f   : > { %4807 = vmatmul.f32.gmra.mxu3 %v10262_v0 }
 0x410   : > { %v10298_v6 = vadd.f32 %v4248_v61, %v4124_v7  ;;  %4634 = vmatmul.f32.gmra.mxu2 %v4633_v29  ;;  %12151 = vst [vmem:[#allocation17_spill] sm:$0xff] %v10312_v50  ;;  %v10315_v27 = vsub.f32 %v438_v60, %v10312_v50  ;;  %5308 = vmatpush.msrb.mxu0 %v10312_v50 }
 0x411   : > { %5759 = vmatpush.msrb.mxu3 %v10312_v50 }
 0x412   : > { %v3837_v7 = vpop.f32.mrf.mxu0  ;;  %v11863_v51 = vand.u32 4294901760, %v10315_v27  ;;  %5631 = vmatpush.msrb.mxu2 %v10315_v27 }
 0x413   : > { %v4002_v36 = vpop.f32.mrf.mxu1  ;;  %v4128_v61 = vpop.f32.mrf.mxu2 }
 0x414   : > { %v4003_v33 = vadd.f32 %v4002_v36, %v3830_v38  ;;  %v4254_v29 = vpop.f32.mrf.mxu3  ;;  %v5471_v63 = vsub.f32 %v10315_v27, %v11863_v51  ;;  %v4648_v38 = vsub.f32 %v10305_v2, %v11865_v14  ;;  %v10336_v36 = vsub.f32 %v324_v54, %v10320_v47 }
 0x415   : > { %4392 = vmatmul.f32.gmra.mxu0 %v9975_v40 }
 0x416   : > { %v4129_v15 = vadd.f32 %v4128_v61, %v4003_v33  ;;  %4485 = vmatmul.f32.gmra.mxu1 %v9943_v42  ;;  %v437_v42 = vld [vmem:[%s11671_s1 + $0x370] sm:$0xff]  ;;  %v3838_v33 = vadd.f32 %v3837_v7, %v10054_v35  ;;  %v5472_v61 = vand.u32 4294901760, %v5471_v63  ;;  %v4649_v54 = vand.u32 4294901760, %v4648_v38 }
 0x417   : > { %4811 = vmatmul.f32.gmra.mxu3 %v10278_v22  ;;  %v11870_v2 = vand.u32 4294901760, %v10336_v36 }
 0x418   : > { %v10326_v60 = vadd.f32 %v4254_v29, %v4129_v15  ;;  %4642 = vmatmul.f32.gmra.mxu2 %v4641_v45  ;;  %v10342_v29 = vand.u32 4294901760, %v437_v42  ;;  %5473 = vmatpush.msrb.mxu1 %v5472_v61 }
 0x41a   : > { %v3845_v15 = vpop.f32.mrf.mxu0  ;;  %v10345_v14 = vsub.f32 %v437_v42, %v10342_v29  ;;  %5310 = vmatpush.msrb.mxu0 %v10342_v29  ;;  %5761 = vmatpush.msrb.mxu3 %v10342_v29 }
 0x41b   : > { %v4006_v22 = vpop.f32.mrf.mxu1  ;;  %v4133_v45 = vpop.f32.mrf.mxu2  ;;  %v3846_v38 = vadd.f32 %v3845_v15, %v10075_v1 }
 0x41c   : > { %v4007_v51 = vadd.f32 %v4006_v22, %v3838_v33  ;;  %v4260_v50 = vpop.f32.mrf.mxu3  ;;  %v11871_v22 = vand.u32 4294901760, %v10345_v14  ;;  %5634 = vmatpush.msrb.mxu2 %v10345_v14 }
 0x41d   : > { %4396 = vmatmul.f32.gmra.mxu0 %v10002_v62 }
 0x41e   : > { %v4134_v35 = vadd.f32 %v4133_v45, %v4007_v51  ;;  %4489 = vmatmul.f32.gmra.mxu1 %v9975_v40  ;;  %v5477_v63 = vsub.f32 %v10345_v14, %v11871_v22  ;;  %v4656_v51 = vsub.f32 %v10336_v36, %v11870_v2  ;;  %v436_v40 = vld [vmem:[%s11671_s1 + $0x368] sm:$0xff] }
 0x41f   : > { %4815 = vmatmul.f32.gmra.mxu3 %v10294_v24 }
 0x420   : > { %v10354_v7 = vadd.f32 %v4260_v50, %v4134_v35  ;;  %4650 = vmatmul.f32.gmra.mxu2 %v4649_v54  ;;  %v5478_v42 = vand.u32 4294901760, %v5477_v63  ;;  %v10367_v50 = vand.u32 4294901760, %v436_v40  ;;  %v4657_v2 = vand.u32 4294901760, %v4656_v51  ;;  %v435_v51 = vld [vmem:[%s11671_s1 + $0x360] sm:$0xff] }
 0x422   : > { %v3853_v33 = vpop.f32.mrf.mxu0  ;;  %5479 = vmatpush.msrb.mxu1 %v5478_v42  ;;  %v10370_v54 = vsub.f32 %v436_v40, %v10367_v50  ;;  %5312 = vmatpush.msrb.mxu0 %v10367_v50 }
 0x423   : > { %v4010_v61 = vpop.f32.mrf.mxu1  ;;  %v4138_v35 = vpop.f32.mrf.mxu2  ;;  %5763 = vmatpush.msrb.mxu3 %v10367_v50  ;;  %v3854_v40 = vadd.f32 %v3853_v33, %v10100_v20 }
 0x424   : > { %v4011_v45 = vadd.f32 %v4010_v61, %v3846_v38  ;;  %v4266_v24 = vpop.f32.mrf.mxu3  ;;  %v11872_v1 = vand.u32 4294901760, %v10370_v54  ;;  %5637 = vmatpush.msrb.mxu2 %v10370_v54  ;;  %v10388_v38 = vand.u32 4294901760, %v435_v51 }
 0x425   : > { %4400 = vmatmul.f32.gmra.mxu0 %v10025_v18 }
 0x426   : > { %v4139_v22 = vadd.f32 %v4138_v35, %v4011_v45  ;;  %4493 = vmatmul.f32.gmra.mxu1 %v10002_v62  ;;  %v5483_v63 = vsub.f32 %v10370_v54, %v11872_v1  ;;  %v10391_v35 = vsub.f32 %v435_v51, %v10388_v38  ;;  %5314 = vmatpush.msrb.mxu0 %v10388_v38 }
 0x427   : > { %4819 = vmatmul.f32.gmra.mxu3 %v10320_v47 }
 0x428   : > { %v10378_v15 = vadd.f32 %v4266_v24, %v4139_v22  ;;  %4658 = vmatmul.f32.gmra.mxu2 %v4657_v2  ;;  %v5484_v62 = vand.u32 4294901760, %v5483_v63  ;;  %5765 = vmatpush.msrb.mxu3 %v10388_v38  ;;  %v11873_v20 = vand.u32 4294901760, %v10391_v35 }
 0x429   : > { %5640 = vmatpush.msrb.mxu2 %v10391_v35 }
 0x42a   : > { %v4341_v61 = vpop.f32.mrf.mxu0  ;;  %5485 = vmatpush.msrb.mxu1 %v5484_v62  ;;  %v5489_v63 = vsub.f32 %v10391_v35, %v11873_v20 }
 0x42b   : > { %v4014_v42 = vpop.f32.mrf.mxu1  ;;  %v4143_v22 = vpop.f32.mrf.mxu2  ;;  %v4342_v51 = vadd.f32 %v4341_v61, %v10122_v31  ;;  %v12152_v31 = vand.u32 4294901760, %v10057_v32 }
 0x42c   : > { %v4015_v24 = vadd.f32 %v4014_v42, %v3854_v40  ;;  %v4272_v45 = vpop.f32.mrf.mxu3  ;;  %v5490_v40 = vand.u32 4294901760, %v5489_v63 }
 0x42d   : > { %4873 = vmatmul.f32.vlgmr.msra.gmra.mxu0 %v10057_v32 }
 0x42e   : > { %v4144_v2 = vadd.f32 %v4143_v22, %v4015_v24  ;;  %4497 = vmatmul.f32.gmra.mxu1 %v10025_v18  ;;  %v434_v18 = vld [vmem:[%s11671_s1 + $0x358] sm:$0xff] }
 0x42f   : > { %5243 = vmatmul.f32.vlgmr.msra.gmra.mxu3 %v10047_v17  ;;  %v10410_v62 = vand.u32 4294901760, %v434_v18  ;;  %5491 = vmatpush.msrb.mxu1 %v5490_v40 }
 0x430   : > { %v10399_v33 = vadd.f32 %v4272_v45, %v4144_v2  ;;  %5146 = vmatmul.f32.vlgmr.msra.gmra.mxu2 %v10047_v17 }
 0x431   : > { %v10413_v1 = vsub.f32 %v434_v18, %v10410_v62  ;;  %5316 = vmatpush.msrb.mxu0 %v10410_v62  ;;  %5767 = vmatpush.msrb.mxu3 %v10410_v62 }
 0x432   : > { %v4345_v42 = vpop.f32.mrf.mxu0 }
 0x433   : > { %v4438_v24 = vpop.f32.mrf.mxu1  ;;  %v4539_v45 = vpop.f32.mrf.mxu2  ;;  %v11874_v61 = vand.u32 4294901760, %v10413_v1  ;;  %5643 = vmatpush.msrb.mxu2 %v10413_v1  ;;  %v4346_v32 = vadd.f32 %v4345_v42, %v10138_v5  ;;  %v12153_v5 = vand.u32 4294901760, %v10081_v34 }
 0x434   : > { %v4439_v22 = vadd.f32 %v4438_v24, %v4342_v51  ;;  %v4760_v2 = vpop.f32.mrf.mxu3  ;;  %v433_v51 = vld [vmem:[%s11671_s1 + $0x350] sm:$0xff] }
 0x435   : > { %4878 = vmatmul.f32.gmra.mxu0 %v10081_v34  ;;  %v5495_v18 = vsub.f32 %v10413_v1, %v11874_v61  ;;  %v10433_v24 = vand.u32 4294901760, %v433_v51 }
 0x436   : > { %v4540_v17 = vadd.f32 %v4539_v45, %v4439_v22  ;;  %4987 = vmatmul.f32.vlgmr.msra.gmra.mxu1 %v12152_v31 }
 0x437   : > { %5247 = vmatmul.f32.gmra.mxu3 %v10068_v52  ;;  %v5496_v40 = vand.u32 4294901760, %v5495_v18  ;;  %v10436_v20 = vsub.f32 %v433_v51, %v10433_v24  ;;  %5318 = vmatpush.msrb.mxu0 %v10433_v24 }
 0x438   : > { %v10422_v63 = vadd.f32 %v4760_v2, %v4540_v17  ;;  %5150 = vmatmul.f32.gmra.mxu2 %v10068_v52  ;;  %5769 = vmatpush.msrb.mxu3 %v10433_v24 }
 0x439   : > { %5497 = vmatpush.msrb.mxu1 %v5496_v40  ;;  %v11875_v42 = vand.u32 4294901760, %v10436_v20  ;;  %5646 = vmatpush.msrb.mxu2 %v10436_v20 }
 0x43a   : > { %v4349_v22 = vpop.f32.mrf.mxu0 }
 0x43b   : > { %v4442_v45 = vpop.f32.mrf.mxu1  ;;  %v4547_v17 = vpop.f32.mrf.mxu2  ;;  %v5501_v51 = vsub.f32 %v10436_v20, %v11875_v42  ;;  %v4350_v34 = vadd.f32 %v4349_v22, %v10154_v58  ;;  %v12154_v58 = vand.u32 4294901760, %v10107_v53 }
 0x43c   : > { %v4443_v2 = vadd.f32 %v4442_v45, %v4346_v32  ;;  %v4764_v31 = vpop.f32.mrf.mxu3  ;;  %v432_v32 = vld [vmem:[%s11671_s1 + $0x348] sm:$0xff] }
 0x43d   : > { %4883 = vmatmul.f32.gmra.mxu0 %v10107_v53  ;;  %v5502_v40 = vand.u32 4294901760, %v5501_v51  ;;  %v10456_v45 = vand.u32 4294901760, %v432_v32 }
 0x43e   : > { %v4548_v52 = vadd.f32 %v4547_v17, %v4443_v2  ;;  %4993 = vmatmul.f32.gmra.mxu1 %v12153_v5 }
 0x43f   : > { %5251 = vmatmul.f32.gmra.mxu3 %v10092_v37  ;;  %5503 = vmatpush.msrb.mxu1 %v5502_v40  ;;  %v10459_v61 = vsub.f32 %v432_v32, %v10456_v45 }
 0x440   : > { %v10445_v18 = vadd.f32 %v4764_v31, %v4548_v52  ;;  %5154 = vmatmul.f32.gmra.mxu2 %v10092_v37  ;;  %5320 = vmatpush.msrb.mxu0 %v10456_v45 }
 0x441   : > { %5771 = vmatpush.msrb.mxu3 %v10456_v45  ;;  %v11876_v22 = vand.u32 4294901760, %v10459_v61  ;;  %5649 = vmatpush.msrb.mxu2 %v10459_v61 }
 0x442   : > { %v4353_v2 = vpop.f32.mrf.mxu0 }
 0x443   : > { %v4446_v17 = vpop.f32.mrf.mxu1  ;;  %v4555_v52 = vpop.f32.mrf.mxu2  ;;  %v5507_v32 = vsub.f32 %v10459_v61, %v11876_v22  ;;  %v4354_v53 = vadd.f32 %v4353_v2, %v10170_v9  ;;  %v12155_v9 = vand.u32 4294901760, %v10129_v57 }
 0x444   : > { %v4447_v31 = vadd.f32 %v4446_v17, %v4350_v34  ;;  %v4768_v5 = vpop.f32.mrf.mxu3  ;;  %v431_v34 = vld [vmem:[%s11671_s1 + $0x340] sm:$0xff] }
 0x445   : > { %4888 = vmatmul.f32.gmra.mxu0 %v10129_v57  ;;  %v5508_v40 = vand.u32 4294901760, %v5507_v32  ;;  %v10479_v17 = vand.u32 4294901760, %v431_v34 }
 0x446   : > { %v4556_v37 = vadd.f32 %v4555_v52, %v4447_v31  ;;  %4999 = vmatmul.f32.gmra.mxu1 %v12154_v58 }
 0x447   : > { %5255 = vmatmul.f32.gmra.mxu3 %v10118_v43  ;;  %5509 = vmatpush.msrb.mxu1 %v5508_v40  ;;  %v10482_v42 = vsub.f32 %v431_v34, %v10479_v17 }
 0x448   : > { %v10468_v51 = vadd.f32 %v4768_v5, %v4556_v37  ;;  %5158 = vmatmul.f32.gmra.mxu2 %v10118_v43  ;;  %5322 = vmatpush.msrb.mxu0 %v10479_v17 }
 0x449   : > { %5773 = vmatpush.msrb.mxu3 %v10479_v17  ;;  %v11877_v2 = vand.u32 4294901760, %v10482_v42  ;;  %5652 = vmatpush.msrb.mxu2 %v10482_v42 }
 0x44a   : > { %v4357_v31 = vpop.f32.mrf.mxu0 }
 0x44b   : > { %v4450_v52 = vpop.f32.mrf.mxu1  ;;  %v4563_v37 = vpop.f32.mrf.mxu2  ;;  %v5513_v34 = vsub.f32 %v10482_v42, %v11877_v2  ;;  %v4358_v57 = vadd.f32 %v4357_v31, %v10186_v12  ;;  %v12156_v12 = vand.u32 4294901760, %v10145_v4 }
 0x44c   : > { %v4451_v5 = vadd.f32 %v4450_v52, %v4354_v53  ;;  %v4772_v58 = vpop.f32.mrf.mxu3  ;;  %v430_v53 = vld [vmem:[%s11671_s1 + $0x338] sm:$0xff] }
 0x44d   : > { %4893 = vmatmul.f32.gmra.mxu0 %v10145_v4  ;;  %v5514_v40 = vand.u32 4294901760, %v5513_v34  ;;  %v10502_v52 = vand.u32 4294901760, %v430_v53 }
 0x44e   : > { %v4564_v43 = vadd.f32 %v4563_v37, %v4451_v5  ;;  %5005 = vmatmul.f32.gmra.mxu1 %v12155_v9 }
 0x44f   : > { %5259 = vmatmul.f32.gmra.mxu3 %v10134_v41  ;;  %5515 = vmatpush.msrb.mxu1 %v5514_v40  ;;  %v10505_v22 = vsub.f32 %v430_v53, %v10502_v52 }
 0x450   : > { %v10491_v32 = vadd.f32 %v4772_v58, %v4564_v43  ;;  %5162 = vmatmul.f32.gmra.mxu2 %v10134_v41  ;;  %5324 = vmatpush.msrb.mxu0 %v10502_v52 }
 0x451   : > { %5775 = vmatpush.msrb.mxu3 %v10502_v52  ;;  %v11878_v31 = vand.u32 4294901760, %v10505_v22  ;;  %5655 = vmatpush.msrb.mxu2 %v10505_v22 }
 0x452   : > { %v4361_v5 = vpop.f32.mrf.mxu0 }
 0x453   : > { %v4454_v37 = vpop.f32.mrf.mxu1  ;;  %v4571_v43 = vpop.f32.mrf.mxu2  ;;  %v5519_v53 = vsub.f32 %v10505_v22, %v11878_v31  ;;  %v4362_v4 = vadd.f32 %v4361_v5, %v10202_v48  ;;  %v12157_v48 = vand.u32 4294901760, %v10161_v10 }
 0x454   : > { %v4455_v58 = vadd.f32 %v4454_v37, %v4358_v57  ;;  %v4776_v9 = vpop.f32.mrf.mxu3  ;;  %v429_v57 = vld [vmem:[%s11671_s1 + $0x330] sm:$0xff] }
 0x455   : > { %4898 = vmatmul.f32.gmra.mxu0 %v10161_v10  ;;  %v5520_v40 = vand.u32 4294901760, %v5519_v53  ;;  %v10525_v37 = vand.u32 4294901760, %v429_v57 }
 0x456   : > { %v4572_v41 = vadd.f32 %v4571_v43, %v4455_v58  ;;  %5011 = vmatmul.f32.gmra.mxu1 %v12156_v12 }
 0x457   : > { %5263 = vmatmul.f32.gmra.mxu3 %v10150_v30  ;;  %5521 = vmatpush.msrb.mxu1 %v5520_v40  ;;  %v10528_v2 = vsub.f32 %v429_v57, %v10525_v37 }
 0x458   : > { %v10514_v34 = vadd.f32 %v4776_v9, %v4572_v41  ;;  %5166 = vmatmul.f32.gmra.mxu2 %v10150_v30  ;;  %5326 = vmatpush.msrb.mxu0 %v10525_v37 }
 0x459   : > { %5777 = vmatpush.msrb.mxu3 %v10525_v37  ;;  %v11879_v5 = vand.u32 4294901760, %v10528_v2  ;;  %5658 = vmatpush.msrb.mxu2 %v10528_v2 }
 0x45a   : > { %v4365_v58 = vpop.f32.mrf.mxu0 }
 0x45b   : > { %v4458_v43 = vpop.f32.mrf.mxu1  ;;  %v4579_v41 = vpop.f32.mrf.mxu2  ;;  %v5525_v57 = vsub.f32 %v10528_v2, %v11879_v5  ;;  %v4366_v10 = vadd.f32 %v4365_v58, %v10218_v23  ;;  %v12158_v23 = vand.u32 4294901760, %v10177_v28 }
 0x45c   : > { %v4459_v9 = vadd.f32 %v4458_v43, %v4362_v4  ;;  %v4780_v12 = vpop.f32.mrf.mxu3  ;;  %v428_v4 = vld [vmem:[%s11671_s1 + $0x328] sm:$0xff] }
 0x45d   : > { %4903 = vmatmul.f32.gmra.mxu0 %v10177_v28  ;;  %v5526_v40 = vand.u32 4294901760, %v5525_v57  ;;  %v10548_v43 = vand.u32 4294901760, %v428_v4 }
 0x45e   : > { %v4580_v30 = vadd.f32 %v4579_v41, %v4459_v9  ;;  %5017 = vmatmul.f32.gmra.mxu1 %v12157_v48 }
 0x45f   : > { %5267 = vmatmul.f32.gmra.mxu3 %v10166_v59  ;;  %5527 = vmatpush.msrb.mxu1 %v5526_v40  ;;  %v10551_v31 = vsub.f32 %v428_v4, %v10548_v43 }
 0x460   : > { %v10537_v53 = vadd.f32 %v4780_v12, %v4580_v30  ;;  %5170 = vmatmul.f32.gmra.mxu2 %v10166_v59  ;;  %5328 = vmatpush.msrb.mxu0 %v10548_v43 }
 0x461   : > { %5779 = vmatpush.msrb.mxu3 %v10548_v43  ;;  %v11880_v58 = vand.u32 4294901760, %v10551_v31  ;;  %5661 = vmatpush.msrb.mxu2 %v10551_v31 }
 0x462   : > { %v4369_v9 = vpop.f32.mrf.mxu0 }
 0x463   : > { %v4462_v41 = vpop.f32.mrf.mxu1  ;;  %v4587_v30 = vpop.f32.mrf.mxu2  ;;  %v5531_v4 = vsub.f32 %v10551_v31, %v11880_v58  ;;  %v4370_v28 = vadd.f32 %v4369_v9, %v10234_v44  ;;  %v12159_v44 = vand.u32 4294901760, %v10193_v16 }
 0x464   : > { %v4463_v12 = vadd.f32 %v4462_v41, %v4366_v10  ;;  %v4784_v48 = vpop.f32.mrf.mxu3  ;;  %v427_v10 = vld [vmem:[%s11671_s1 + $0x320] sm:$0xff] }
 0x465   : > { %4908 = vmatmul.f32.gmra.mxu0 %v10193_v16  ;;  %v5532_v40 = vand.u32 4294901760, %v5531_v4  ;;  %v10571_v41 = vand.u32 4294901760, %v427_v10 }
 0x466   : > { %v4588_v59 = vadd.f32 %v4587_v30, %v4463_v12  ;;  %5023 = vmatmul.f32.gmra.mxu1 %v12158_v23 }
 0x467   : > { %5271 = vmatmul.f32.gmra.mxu3 %v10182_v56  ;;  %5533 = vmatpush.msrb.mxu1 %v5532_v40  ;;  %v10574_v5 = vsub.f32 %v427_v10, %v10571_v41 }
 0x468   : > { %v10560_v57 = vadd.f32 %v4784_v48, %v4588_v59  ;;  %5174 = vmatmul.f32.gmra.mxu2 %v10182_v56  ;;  %5330 = vmatpush.msrb.mxu0 %v10571_v41 }
 0x469   : > { %5781 = vmatpush.msrb.mxu3 %v10571_v41  ;;  %v11881_v9 = vand.u32 4294901760, %v10574_v5  ;;  %5664 = vmatpush.msrb.mxu2 %v10574_v5 }
 0x46a   : > { %v4373_v12 = vpop.f32.mrf.mxu0 }
 0x46b   : > { %v4466_v30 = vpop.f32.mrf.mxu1  ;;  %v4595_v59 = vpop.f32.mrf.mxu2  ;;  %v5537_v10 = vsub.f32 %v10574_v5, %v11881_v9  ;;  %v4374_v16 = vadd.f32 %v4373_v12, %v10250_v25  ;;  %v12160_v25 = vand.u32 4294901760, %v10209_v8 }
 0x46c   : > { %v4467_v48 = vadd.f32 %v4466_v30, %v4370_v28  ;;  %v4788_v23 = vpop.f32.mrf.mxu3  ;;  %v426_v28 = vld [vmem:[%s11671_s1 + $0x318] sm:$0xff] }
 0x46d   : > { %4913 = vmatmul.f32.gmra.mxu0 %v10209_v8  ;;  %v5538_v40 = vand.u32 4294901760, %v5537_v10  ;;  %v10594_v30 = vand.u32 4294901760, %v426_v28 }
 0x46e   : > { %v4596_v56 = vadd.f32 %v4595_v59, %v4467_v48  ;;  %5029 = vmatmul.f32.gmra.mxu1 %v12159_v44 }
 0x46f   : > { %5275 = vmatmul.f32.gmra.mxu3 %v10198_v11  ;;  %5539 = vmatpush.msrb.mxu1 %v5538_v40  ;;  %v10597_v58 = vsub.f32 %v426_v28, %v10594_v30 }
 0x470   : > { %v10583_v4 = vadd.f32 %v4788_v23, %v4596_v56  ;;  %5178 = vmatmul.f32.gmra.mxu2 %v10198_v11  ;;  %5332 = vmatpush.msrb.mxu0 %v10594_v30 }
 0x471   : > { %5783 = vmatpush.msrb.mxu3 %v10594_v30  ;;  %v11882_v12 = vand.u32 4294901760, %v10597_v58  ;;  %5667 = vmatpush.msrb.mxu2 %v10597_v58 }
 0x472   : > { %v4377_v48 = vpop.f32.mrf.mxu0 }
 0x473   : > { %v4470_v59 = vpop.f32.mrf.mxu1  ;;  %v4603_v56 = vpop.f32.mrf.mxu2  ;;  %v5543_v28 = vsub.f32 %v10597_v58, %v11882_v12  ;;  %v4378_v8 = vadd.f32 %v4377_v48, %v10266_v39  ;;  %v12161_v39 = vand.u32 4294901760, %v10225_v21 }
 0x474   : > { %v4471_v23 = vadd.f32 %v4470_v59, %v4374_v16  ;;  %v4792_v44 = vpop.f32.mrf.mxu3  ;;  %v425_v16 = vld [vmem:[%s11671_s1 + $0x310] sm:$0xff] }
 0x475   : > { %4918 = vmatmul.f32.gmra.mxu0 %v10225_v21  ;;  %v5544_v40 = vand.u32 4294901760, %v5543_v28  ;;  %v10617_v59 = vand.u32 4294901760, %v425_v16 }
 0x476   : > { %v4604_v11 = vadd.f32 %v4603_v56, %v4471_v23  ;;  %5035 = vmatmul.f32.gmra.mxu1 %v12160_v25 }
 0x477   : > { %5279 = vmatmul.f32.gmra.mxu3 %v10214_v3  ;;  %5545 = vmatpush.msrb.mxu1 %v5544_v40  ;;  %v10620_v9 = vsub.f32 %v425_v16, %v10617_v59 }
 0x478   : > { %v10606_v10 = vadd.f32 %v4792_v44, %v4604_v11  ;;  %5182 = vmatmul.f32.gmra.mxu2 %v10214_v3  ;;  %5334 = vmatpush.msrb.mxu0 %v10617_v59 }
 0x479   : > { %5785 = vmatpush.msrb.mxu3 %v10617_v59  ;;  %v11883_v48 = vand.u32 4294901760, %v10620_v9  ;;  %5670 = vmatpush.msrb.mxu2 %v10620_v9 }
 0x47a   : > { %v4381_v23 = vpop.f32.mrf.mxu0 }
 0x47b   : > { %v4474_v56 = vpop.f32.mrf.mxu1  ;;  %v4611_v11 = vpop.f32.mrf.mxu2  ;;  %v5549_v16 = vsub.f32 %v10620_v9, %v11883_v48  ;;  %v4382_v21 = vadd.f32 %v4381_v23, %v10282_v19  ;;  %v12162_v19 = vand.u32 4294901760, %v10241_v26 }
 0x47c   : > { %v4475_v44 = vadd.f32 %v4474_v56, %v4378_v8  ;;  %v4796_v25 = vpop.f32.mrf.mxu3  ;;  %v424_v8 = vld [vmem:[%s11671_s1 + $0x308] sm:$0xff] }
 0x47d   : > { %4923 = vmatmul.f32.gmra.mxu0 %v10241_v26  ;;  %v5550_v40 = vand.u32 4294901760, %v5549_v16  ;;  %v10640_v56 = vand.u32 4294901760, %v424_v8 }
 0x47e   : > { %v4612_v3 = vadd.f32 %v4611_v11, %v4475_v44  ;;  %5041 = vmatmul.f32.gmra.mxu1 %v12161_v39 }
 0x47f   : > { %5283 = vmatmul.f32.gmra.mxu3 %v10230_v55  ;;  %5551 = vmatpush.msrb.mxu1 %v5550_v40  ;;  %v10643_v12 = vsub.f32 %v424_v8, %v10640_v56 }
 0x480   : > { %v10629_v28 = vadd.f32 %v4796_v25, %v4612_v3  ;;  %5186 = vmatmul.f32.gmra.mxu2 %v10230_v55  ;;  %5336 = vmatpush.msrb.mxu0 %v10640_v56 }
 0x481   : > { %5787 = vmatpush.msrb.mxu3 %v10640_v56  ;;  %v5554_v23 = vand.u32 4294901760, %v10643_v12  ;;  %5673 = vmatpush.msrb.mxu2 %v10643_v12 }
 0x482   : > { %v4385_v44 = vpop.f32.mrf.mxu0 }
 0x483   : > { %v4478_v11 = vpop.f32.mrf.mxu1  ;;  %v4619_v3 = vpop.f32.mrf.mxu2  ;;  %v5555_v8 = vsub.f32 %v10643_v12, %v5554_v23  ;;  %v4386_v26 = vadd.f32 %v4385_v44, %v10298_v6  ;;  %v12164_v44 = vand.u32 4294901760, %v10257_v46 }
 0x484   : > { %v4479_v25 = vadd.f32 %v4478_v11, %v4382_v21  ;;  %v4800_v39 = vpop.f32.mrf.mxu3  ;;  %v423_v21 = vld [vmem:[%s11671_s1 + $0x300] sm:$0xff] }
 0x485   : > { %4928 = vmatmul.f32.gmra.mxu0 %v10257_v46  ;;  %v5556_v40 = vand.u32 4294901760, %v5555_v8  ;;  %v10663_v11 = vand.u32 4294901760, %v423_v21  ;;  %v454_v46 = vld [vmem:[%s11671_s1 + $0x3f8] sm:$0xff] }
 0x486   : > { %v4620_v55 = vadd.f32 %v4619_v3, %v4479_v25  ;;  %5047 = vmatmul.f32.gmra.mxu1 %v12162_v19 }
 0x487   : > { %5287 = vmatmul.f32.gmra.mxu3 %v10246_v49  ;;  %5557 = vmatpush.msrb.mxu1 %v5556_v40  ;;  %v10666_v48 = vsub.f32 %v423_v21, %v10663_v11  ;;  %v12165_v21 = vand.u32 4294901760, %v10345_v14  ;;  %v12166_v40 = vand.u32 4294901760, %v10370_v54 }
 0x488   : > { %v10652_v16 = vadd.f32 %v4800_v39, %v4620_v55  ;;  %5190 = vmatmul.f32.gmra.mxu2 %v10246_v49  ;;  %5338 = vmatpush.msrb.mxu0 %v10663_v11  ;;  %v12163_v49 = vand.u32 4294901760, %v10315_v27 }
 0x489   : > { %5789 = vmatpush.msrb.mxu3 %v10663_v11  ;;  %v5560_v8 = vand.u32 4294901760, %v10666_v48  ;;  %5676 = vmatpush.msrb.mxu2 %v10666_v48 }
 0x48a   : > { %v4389_v25 = vpop.f32.mrf.mxu0  ;;  %5890 = vmatpush.msra.mxu0 %v12163_v49  ;;  %v12167_v49 = vand.u32 4294901760, %v10391_v35  ;;  %v12171_v35 = vand.u32 4294901760, %v10273_v13 }
 0x48b   : > { %v4482_v3 = vpop.f32.mrf.mxu1  ;;  %v4627_v55 = vpop.f32.mrf.mxu2  ;;  %v5561_v27 = vsub.f32 %v10666_v48, %v5560_v8  ;;  %v4390_v14 = vadd.f32 %v4389_v25, %v10326_v60  ;;  %v12169_v60 = vand.u32 4294901760, %v10413_v1 }
 0x48c   : > { %v4483_v39 = vadd.f32 %v4482_v3, %v4386_v26  ;;  %v4804_v19 = vpop.f32.mrf.mxu3  ;;  %5894 = vmatpush.msra.mxu0 %v12165_v21  ;;  %v12168_v21 = vld [vmem:[#allocation17_spill] sm:$0xff] }
 0x48d   : > { %4933 = vmatmul.f32.gmra.mxu0 %v10273_v13  ;;  %v5562_v3 = vand.u32 4294901760, %v5561_v27  ;;  %v12170_v27 = vld [vmem:[#allocation2_spill] sm:$0xff] }
 0x48e   : > { %v4628_v6 = vadd.f32 %v4627_v55, %v4483_v39  ;;  %5053 = vmatmul.f32.gmra.mxu1 %v12164_v44  ;;  %5898 = vmatpush.msra.mxu0 %v12166_v40  ;;  %v10692_v39 = vand.u32 4294901760, %v454_v46  ;;  %v205_v40 = vld [vmem:[%s7207_s16 + $0x30] sm:$0xff] }
 0x48f   : > { %5291 = vmatmul.f32.gmra.mxu3 %v10262_v0  ;;  %5563 = vmatpush.msrb.mxu1 %v5562_v3  ;;  %v12172_v3 = vand.u32 4294901760, %v10436_v20  ;;  %v10718_v13 = vand.u32 4294901760, %v205_v40 }
 0x490   : > { %v10679_v26 = vadd.f32 %v4804_v19, %v4628_v6  ;;  %5194 = vmatmul.f32.gmra.mxu2 %v10262_v0  ;;  %5902 = vmatpush.msra.mxu0 %v12167_v49  ;;  %v10698_v54 = vsub.f32 %v454_v46, %v10692_v39  ;;  %v453_v49 = vld [vmem:[%s11671_s1 + $0x3f0] sm:$0xff] }
 0x491   : > { %6114 = vmatpush.msra.mxu2 %v10692_v39  ;;  %6017 = vmatpush.msra.mxu1 %v12168_v21 }
 0x492   : > { %v4393_v55 = vpop.f32.mrf.mxu0  ;;  %5906 = vmatpush.msra.mxu0 %v12169_v60 }
 0x493   : > { %v4486_v19 = vpop.f32.mrf.mxu1  ;;  %v4635_v0 = vpop.f32.mrf.mxu2  ;;  %6019 = vmatpush.msra.mxu1 %v10342_v29  ;;  %v4394_v29 = vadd.f32 %v4393_v55, %v10354_v7  ;;  %v10735_v7 = vsub.f32 %v205_v40, %v10718_v13 }
 0x494   : > { %v4487_v6 = vadd.f32 %v4486_v19, %v4390_v14  ;;  %v4808_v44 = vpop.f32.mrf.mxu3  ;;  %v11893_v14 = vand.u32 4294901760, %v10698_v54  ;;  %5910 = vmatpush.msra.mxu0 %v12172_v3  ;;  %v12173_v19 = vld [vmem:[#allocation13_spill] sm:$0xff]  ;;  %v12176_v3 = vld [vmem:[#allocation11_spill] sm:$0xff] }
 0x495   : > { %4938 = vmatmul.f32.gmra.mxu0 %v12170_v27  ;;  %6021 = vmatpush.msra.mxu1 %v10367_v50 }
 0x496   : > { %v4636_v25 = vadd.f32 %v4635_v0, %v4487_v6  ;;  %5059 = vmatmul.f32.gmra.mxu1 %v12171_v35  ;;  %v6277_v1 = vsub.f32 %v10698_v54, %v11893_v14  ;;  %v10725_v6 = vand.u32 4294901760, %v453_v49  ;;  %v12174_v0 = vand.u32 4294901760, %v10459_v61 }
 0x497   : > { %5295 = vmatmul.f32.gmra.mxu3 %v12173_v19  ;;  %6023 = vmatpush.msra.mxu1 %v10388_v38  ;;  %v12175_v61 = vand.u32 4294901760, %v10482_v42  ;;  %v12177_v38 = vand.u32 4294901760, %v12170_v27  ;;  %v5341_v27 = vand.u32 4294901760, %v10735_v7 }
 0x498   : > { %v10711_v46 = vadd.f32 %v4808_v44, %v4636_v25  ;;  %5198 = vmatmul.f32.gmra.mxu2 %v12173_v19  ;;  %v6278_v20 = vand.u32 4294901760, %v6277_v1  ;;  %5914 = vmatpush.msra.mxu0 %v12174_v0  ;;  %v10732_v50 = vsub.f32 %v453_v49, %v10725_v6  ;;  %v213_v1 = vld [vmem:[%s7207_s16 + $0x70] sm:$0xff]  ;;  %v12178_v49 = vand.u32 4294901760, %v10505_v22 }
 0x499   : > { %6116 = vmatpush.msra.mxu2 %v10725_v6  ;;  %6025 = vmatpush.msra.mxu1 %v10410_v62  ;;  %v12179_v62 = vld [vmem:[#allocation15_spill] sm:$0xff]  ;;  %v10761_v22 = vand.u32 4294901760, %v213_v1 }
 0x49a   : > { %v4397_v44 = vpop.f32.mrf.mxu0  ;;  %6279 = vmatpush.msra.mxu3 %v6278_v20  ;;  %5918 = vmatpush.msra.mxu0 %v12175_v61  ;;  %v11891_v19 = vand.u32 4294901760, %v10732_v50 }
 0x49b   : > { %v4490_v21 = vpop.f32.mrf.mxu1  ;;  %v4643_v25 = vpop.f32.mrf.mxu2  ;;  %6027 = vmatpush.msra.mxu1 %v10433_v24  ;;  %v4398_v24 = vadd.f32 %v4397_v44, %v10378_v15 }
 0x49c   : > { %v4491_v60 = vadd.f32 %v4490_v21, %v4394_v29  ;;  %v4812_v35 = vpop.f32.mrf.mxu3  ;;  %5922 = vmatpush.msra.mxu0 %v12178_v49  ;;  %v6283_v42 = vsub.f32 %v10732_v50, %v11891_v19  ;;  %v452_v29 = vld [vmem:[%s11671_s1 + $0x3e8] sm:$0xff]  ;;  %v12180_v21 = vand.u32 4294901760, %v10528_v2  ;;  %v12181_v2 = vand.u32 4294901760, %v10551_v31  ;;  %v221_v49 = vld [vmem:[%s7207_s16 + $0xb0] sm:$0xff] }
 0x49d   : > { %4943 = vmatmul.f32.gmra.mxu0 %v12176_v3  ;;  %6029 = vmatpush.msra.mxu1 %v10456_v45  ;;  %v10763_v0 = vand.u32 4294901760, %v452_v29  ;;  %v5342_v45 = vsub.f32 %v10735_v7, %v5341_v27 }
 0x49e   : > { %v4644_v55 = vadd.f32 %v4643_v25, %v4491_v60  ;;  %5065 = vmatmul.f32.gmra.mxu1 %v12177_v38  ;;  %v6284_v20 = vand.u32 4294901760, %v6283_v42  ;;  %5926 = vmatpush.msra.mxu0 %v12180_v21  ;;  %v10780_v38 = vsub.f32 %v213_v1, %v10761_v22  ;;  %v12183_v42 = vand.u32 4294901760, %v10574_v5 }
 0x49f   : > { %5299 = vmatmul.f32.gmra.mxu3 %v12179_v62  ;;  %6031 = vmatpush.msra.mxu1 %v10479_v17  ;;  %v10770_v15 = vsub.f32 %v452_v29, %v10763_v0  ;;  %v12182_v17 = vand.u32 4294901760, %v12176_v3  ;;  %v5343_v3 = vand.u32 4294901760, %v5342_v45  ;;  %v10794_v1 = vand.u32 4294901760, %v221_v49 }
 0x4a0   : > { %v10748_v40 = vadd.f32 %v4812_v35, %v4644_v55  ;;  %5202 = vmatmul.f32.gmra.mxu2 %v12179_v62  ;;  %6285 = vmatpush.msra.mxu3 %v6284_v20  ;;  %v5349_v29 = vand.u32 4294901760, %v10780_v38  ;;  %v12184_v21 = vand.u32 4294901760, %v10597_v58  ;;  %v12185_v58 = vand.u32 4294901760, %v10620_v9 }
 0x4a1   : > { %6118 = vmatpush.msra.mxu2 %v10763_v0  ;;  %6033 = vmatpush.msra.mxu1 %v10502_v52  ;;  %v11890_v62 = vand.u32 4294901760, %v10770_v15 }
 0x4a2   : > { %v4401_v60 = vpop.f32.mrf.mxu0  ;;  %5930 = vmatpush.msra.mxu0 %v12181_v2  ;;  %v5350_v45 = vsub.f32 %v10780_v38, %v5349_v29  ;;  %v229_v2 = vld [vmem:[%s7207_s16 + $0xf0] sm:$0xff] }
 0x4a3   : > { %v4494_v25 = vpop.f32.mrf.mxu1  ;;  %v4651_v61 = vpop.f32.mrf.mxu2  ;;  %6035 = vmatpush.msra.mxu1 %v10525_v37  ;;  %v6289_v31 = vsub.f32 %v10770_v15, %v11890_v62  ;;  %v451_v37 = vld [vmem:[%s11671_s1 + $0x3e0] sm:$0xff]  ;;  %v4402_v5 = vadd.f32 %v4401_v60, %v10399_v33 }
 0x4a4   : > { %v4495_v35 = vadd.f32 %v4494_v25, %v4398_v24  ;;  %v4816_v55 = vpop.f32.mrf.mxu3  ;;  %5934 = vmatpush.msra.mxu0 %v12183_v42  ;;  %v10802_v20 = vand.u32 4294901760, %v451_v37 }
 0x4a5   : > { %4948 = vmatmul.f32.gmra.mxu0 %v10336_v36  ;;  %6037 = vmatpush.msra.mxu1 %v10548_v43  ;;  %v6290_v24 = vand.u32 4294901760, %v6289_v31  ;;  %v10812_v43 = vsub.f32 %v221_v49, %v10794_v1 }
 0x4a6   : > { %v4652_v44 = vadd.f32 %v4651_v61, %v4495_v35  ;;  %5071 = vmatmul.f32.gmra.mxu1 %v12182_v17  ;;  %5938 = vmatpush.msra.mxu0 %v12184_v21  ;;  %v10809_v33 = vsub.f32 %v451_v37, %v10802_v20 }
 0x4a7   : > { %5303 = vmatmul.f32.gmra.mxu3 %v10320_v47  ;;  %6039 = vmatpush.msra.mxu1 %v10571_v41  ;;  %v12186_v41 = vand.u32 4294901760, %v10336_v36  ;;  %v5357_v36 = vand.u32 4294901760, %v10812_v43 }
 0x4a8   : > { %v10787_v52 = vadd.f32 %v4816_v55, %v4652_v44  ;;  %5206 = vmatmul.f32.gmra.mxu2 %v10320_v47  ;;  %6291 = vmatpush.msra.mxu3 %v6290_v24  ;;  %v11889_v44 = vand.u32 4294901760, %v10809_v33 }
 0x4a9   : > { %6120 = vmatpush.msra.mxu2 %v10802_v20  ;;  %6041 = vmatpush.msra.mxu1 %v10594_v30  ;;  %v10832_v30 = vand.u32 4294901760, %v229_v2  ;;  %v5358_v48 = vsub.f32 %v10812_v43, %v5357_v36 }
 0x4aa   : > { %v4874_v25 = vpop.f32.mrf.mxu0  ;;  %5942 = vmatpush.msra.mxu0 %v12185_v58  ;;  %v6295_v9 = vsub.f32 %v10809_v33, %v11889_v44 }
 0x4ab   : > { %v4498_v47 = vpop.f32.mrf.mxu1  ;;  %v4659_v61 = vpop.f32.mrf.mxu2  ;;  %6043 = vmatpush.msra.mxu1 %v10617_v59  ;;  %12187 = vst [vmem:[#allocation6_spill] sm:$0xff] %v10832_v30  ;;  %v450_v59 = vld [vmem:[%s11671_s1 + $0x3d8] sm:$0xff]  ;;  %v4875_v12 = vadd.f32 %v4874_v25, %v10422_v63 }
 0x4ac   : > { %v4499_v35 = vadd.f32 %v4498_v47, %v4402_v5  ;;  %v4820_v55 = vpop.f32.mrf.mxu3  ;;  %5946 = vmatpush.msra.mxu0 %v5554_v23  ;;  %v5351_v23 = vand.u32 4294901760, %v5350_v45  ;;  %v10839_v49 = vand.u32 4294901760, %v450_v59  ;;  %v237_v5 = vld [vmem:[%s7207_s16 + $0x130] sm:$0xff]  ;;  %v5359_v47 = vand.u32 4294901760, %v5358_v48 }
 0x4ad   : > { %5344 = vmatmul.f32.vlgmr.msrb.gmra.mxu0 %v5343_v3  ;;  %6045 = vmatpush.msra.mxu1 %v10640_v56  ;;  %v10853_v56 = vsub.f32 %v229_v2, %v10832_v30 }
 0x4ae   : > { %v4660_v60 = vadd.f32 %v4659_v61, %v4499_v35  ;;  %5077 = vmatmul.f32.gmra.mxu1 %v12186_v41  ;;  %5950 = vmatpush.msra.mxu0 %v5560_v8  ;;  %v10847_v63 = vsub.f32 %v450_v59, %v10839_v49  ;;  %v449_v35 = vld [vmem:[%s11671_s1 + $0x3d0] sm:$0xff] }
 0x4af   : > { %5793 = vmatmul.f32.vlgmr.msrb.gmra.mxu3 %v5341_v27  ;;  %v6296_v27 = vand.u32 4294901760, %v6295_v9  ;;  %6047 = vmatpush.msra.mxu1 %v10663_v11  ;;  %v5365_v25 = vand.u32 4294901760, %v10853_v56  ;;  %v10875_v58 = vand.u32 4294901760, %v449_v35 }
 0x4b0   : > { %v10825_v17 = vadd.f32 %v4820_v55, %v4660_v60  ;;  %5679 = vmatmul.f32.vlgmr.msrb.gmra.mxu2 %v10735_v7  ;;  %6437 = vmatpush.msrb.mxu0 %v10698_v54  ;;  %v11887_v8 = vand.u32 4294901760, %v10847_v63  ;;  %v10873_v55 = vand.u32 4294901760, %v237_v5 }
 0x4b1   : > { %6297 = vmatpush.msra.mxu3 %v6296_v27  ;;  %6122 = vmatpush.msra.mxu2 %v10839_v49  ;;  %v5366_v9 = vsub.f32 %v10853_v56, %v5365_v25 }
 0x4b2   : > { %v4879_v7 = vpop.f32.mrf.mxu0  ;;  %6440 = vmatpush.msrb.mxu0 %v10732_v50  ;;  %v6301_v21 = vsub.f32 %v10847_v63, %v11887_v8  ;;  %12188 = vst [vmem:[#allocation18_spill] sm:$0xff] %v10873_v55 }
 0x4b3   : > { %v4988_v42 = vpop.f32.mrf.mxu1  ;;  %v5147_v3 = vpop.f32.mrf.mxu2  ;;  %v4880_v61 = vadd.f32 %v4879_v7, %v10445_v18  ;;  %6124 = vmatpush.msra.mxu2 %v10875_v58  ;;  %v10881_v18 = vsub.f32 %v449_v35, %v10875_v58 }
 0x4b4   : > { %v4989_v31 = vadd.f32 %v4988_v42, %v4875_v12  ;;  %v5244_v37 = vpop.f32.mrf.mxu3  ;;  %6443 = vmatpush.msrb.mxu0 %v10770_v15  ;;  %v10888_v12 = vsub.f32 %v237_v5, %v10873_v55 }
 0x4b5   : > { %5352 = vmatmul.f32.gmra.mxu0 %v5351_v23  ;;  %v245_v23 = vld [vmem:[%s7207_s16 + $0x170] sm:$0xff]  ;;  %v11886_v27 = vand.u32 4294901760, %v10881_v18 }
 0x4b6   : > { %v5148_v11 = vadd.f32 %v5147_v3, %v4989_v31  ;;  %5565 = vmatmul.f32.vlgmr.msrb.gmra.mxu1 %v10718_v13  ;;  %6446 = vmatpush.msrb.mxu0 %v10809_v33  ;;  %v5367_v31 = vand.u32 4294901760, %v5366_v9  ;;  %v10902_v3 = vand.u32 4294901760, %v245_v23 }
 0x4b7   : > { %6565 = vmatpush.msrb.mxu1 %v10692_v39  ;;  %5799 = vmatmul.f32.gmra.mxu3 %v5349_v29  ;;  %v6302_v29 = vand.u32 4294901760, %v6301_v21  ;;  %v6307_v42 = vsub.f32 %v10881_v18, %v11886_v27 }
 0x4b8   : > { %v10861_v24 = vadd.f32 %v5244_v37, %v5148_v11  ;;  %5684 = vmatmul.f32.gmra.mxu2 %v10780_v38  ;;  %6449 = vmatpush.msrb.mxu0 %v10847_v63  ;;  %12189 = vst [vmem:[#allocation8_spill] sm:$0xff] %v10902_v3  ;;  %v448_v37 = vld [vmem:[%s11671_s1 + $0x3c8] sm:$0xff]  ;;  %v5373_v11 = vand.u32 4294901760, %v10888_v12 }
 0x4b9   : > { %6567 = vmatpush.msrb.mxu1 %v10725_v6  ;;  %6303 = vmatpush.msra.mxu3 %v6302_v29  ;;  %v10910_v5 = vand.u32 4294901760, %v448_v37 }
 0x4ba   : > { %v4884_v60 = vpop.f32.mrf.mxu0  ;;  %6452 = vmatpush.msrb.mxu0 %v10881_v18 }
 0x4bb   : > { %v4994_v38 = vpop.f32.mrf.mxu1  ;;  %6569 = vmatpush.msrb.mxu1 %v10763_v0  ;;  %v5151_v45 = vpop.f32.mrf.mxu2  ;;  %v4885_v48 = vadd.f32 %v4884_v60, %v10468_v51  ;;  %6126 = vmatpush.msra.mxu2 %v10910_v5  ;;  %v10914_v29 = vsub.f32 %v448_v37, %v10910_v5  ;;  %v5374_v60 = vsub.f32 %v10888_v12, %v5373_v11 }
 0x4bc   : > { %v4995_v41 = vadd.f32 %v4994_v38, %v4880_v61  ;;  %v5248_v2 = vpop.f32.mrf.mxu3  ;;  %v10917_v38 = vsub.f32 %v245_v23, %v10902_v3 }
 0x4bd   : > { %6571 = vmatpush.msrb.mxu1 %v10802_v20  ;;  %5360 = vmatmul.f32.gmra.mxu0 %v5359_v47  ;;  %v5375_v37 = vand.u32 4294901760, %v5374_v60 }
 0x4be   : > { %v5152_v59 = vadd.f32 %v5151_v45, %v4995_v41  ;;  %5569 = vmatmul.f32.gmra.mxu1 %v10761_v22  ;;  %v253_v41 = vld [vmem:[%s7207_s16 + $0x1b0] sm:$0xff]  ;;  %v11885_v45 = vand.u32 4294901760, %v10914_v29  ;;  %6455 = vmatpush.msrb.mxu0 %v10914_v29 }
 0x4bf   : > { %6573 = vmatpush.msrb.mxu1 %v10839_v49  ;;  %5805 = vmatmul.f32.gmra.mxu3 %v5357_v36  ;;  %v6308_v36 = vand.u32 4294901760, %v6307_v42  ;;  %v10932_v23 = vand.u32 4294901760, %v253_v41  ;;  %v447_v42 = vld [vmem:[%s11671_s1 + $0x3c0] sm:$0xff] }
 0x4c0   : > { %v10894_v7 = vadd.f32 %v5248_v2, %v5152_v59  ;;  %5689 = vmatmul.f32.gmra.mxu2 %v10812_v43  ;;  %v6313_v9 = vsub.f32 %v10914_v29, %v11885_v45  ;;  %v5381_v59 = vand.u32 4294901760, %v10917_v38 }
 0x4c1   : > { %6575 = vmatpush.msrb.mxu1 %v10875_v58  ;;  %6309 = vmatpush.msra.mxu3 %v6308_v36  ;;  %12191 = vst [vmem:[#allocation10_spill] sm:$0xff] %v10932_v23  ;;  %v10938_v36 = vand.u32 4294901760, %v447_v42 }
 0x4c2   : > { %v4889_v21 = vpop.f32.mrf.mxu0 }
 0x4c3   : > { %v5000_v47 = vpop.f32.mrf.mxu1  ;;  %v5155_v35 = vpop.f32.mrf.mxu2  ;;  %6577 = vmatpush.msrb.mxu1 %v10910_v5  ;;  %6128 = vmatpush.msra.mxu2 %v10938_v36 }
 0x4c4   : > { %v5001_v43 = vadd.f32 %v5000_v47, %v4885_v48  ;;  %v5252_v61 = vpop.f32.mrf.mxu3  ;;  %v6314_v48 = vand.u32 4294901760, %v6313_v9  ;;  %v261_v9 = vld [vmem:[%s7207_s16 + $0x1f0] sm:$0xff] }
 0x4c5   : > { %5368 = vmatmul.f32.gmra.mxu0 %v5367_v31  ;;  %v4890_v31 = vadd.f32 %v4889_v21, %v10491_v32  ;;  %v10946_v32 = vsub.f32 %v253_v41, %v10932_v23  ;;  %6579 = vmatpush.msrb.mxu1 %v10938_v36 }
 0x4c6   : > { %v5156_v51 = vadd.f32 %v5155_v35, %v5001_v43  ;;  %5573 = vmatmul.f32.gmra.mxu1 %v10794_v1  ;;  %6315 = vmatpush.msra.mxu3 %v6314_v48 }
 0x4c7   : > { %5811 = vmatmul.f32.gmra.mxu3 %v5365_v25  ;;  %v5389_v48 = vand.u32 4294901760, %v10946_v32 }
 0x4c8   : > { %v10925_v2 = vadd.f32 %v5252_v61, %v5156_v51  ;;  %5694 = vmatmul.f32.gmra.mxu2 %v10853_v56  ;;  %v10942_v61 = vsub.f32 %v447_v42, %v10938_v36  ;;  %v5382_v51 = vsub.f32 %v10917_v38, %v5381_v59 }
 0x4c9   : > { %v5390_v27 = vsub.f32 %v10946_v32, %v5389_v48 }
 0x4ca   : > { %12190 = vst [vmem:[#allocation19_spill] sm:$0xff] %v10925_v2  ;;  %v4894_v25 = vpop.f32.mrf.mxu0  ;;  %v11884_v60 = vand.u32 4294901760, %v10942_v61  ;;  %6458 = vmatpush.msrb.mxu0 %v10942_v61  ;;  %v5383_v41 = vand.u32 4294901760, %v5382_v51  ;;  %v325_v2 = vld [vmem:[%s7207_s16 + $0x3f0] sm:$0xff] }
 0x4cb   : > { %v5006_v47 = vpop.f32.mrf.mxu1  ;;  %v5159_v35 = vpop.f32.mrf.mxu2 }
 0x4cc   : > { %v5007_v43 = vadd.f32 %v5006_v47, %v4890_v31  ;;  %v5256_v56 = vpop.f32.mrf.mxu3  ;;  %v6319_v42 = vsub.f32 %v10942_v61, %v11884_v60  ;;  %v4895_v47 = vadd.f32 %v4894_v25, %v10514_v34 }
 0x4cd   : > { %5376 = vmatmul.f32.gmra.mxu0 %v5375_v37  ;;  %v446_v37 = vld [vmem:[%s11671_s1 + $0x3b8] sm:$0xff] }
 0x4ce   : > { %v5160_v21 = vadd.f32 %v5159_v35, %v5007_v43  ;;  %5577 = vmatmul.f32.gmra.mxu1 %v10832_v30  ;;  %v10964_v43 = vand.u32 4294901760, %v261_v9  ;;  %v6320_v35 = vand.u32 4294901760, %v6319_v42  ;;  %v269_v42 = vld [vmem:[%s7207_s16 + $0x230] sm:$0xff] }
 0x4cf   : > { %5817 = vmatmul.f32.gmra.mxu3 %v5373_v11  ;;  %v10966_v11 = vand.u32 4294901760, %v446_v37 }
 0x4d0   : > { %v10953_v31 = vadd.f32 %v5256_v56, %v5160_v21  ;;  %5699 = vmatmul.f32.gmra.mxu2 %v10888_v12  ;;  %12193 = vst [vmem:[#allocation12_spill] sm:$0xff] %v10964_v43  ;;  %6321 = vmatpush.msra.mxu3 %v6320_v35  ;;  %v10976_v25 = vsub.f32 %v261_v9, %v10964_v43  ;;  %v445_v9 = vld [vmem:[%s11671_s1 + $0x3b0] sm:$0xff] }
 0x4d1   : > { %6130 = vmatpush.msra.mxu2 %v10966_v11  ;;  %v10970_v51 = vsub.f32 %v446_v37, %v10966_v11  ;;  %6581 = vmatpush.msrb.mxu1 %v10966_v11 }
 0x4d2   : > { %12192 = vst [vmem:[#allocation9_spill] sm:$0xff] %v10953_v31  ;;  %v4899_v56 = vpop.f32.mrf.mxu0 }
 0x4d3   : > { %v5012_v21 = vpop.f32.mrf.mxu1  ;;  %v5163_v45 = vpop.f32.mrf.mxu2  ;;  %6461 = vmatpush.msrb.mxu0 %v10970_v51 }
 0x4d4   : > { %v5013_v60 = vadd.f32 %v5012_v21, %v4895_v47  ;;  %v5260_v12 = vpop.f32.mrf.mxu3  ;;  %v11888_v47 = vand.u32 4294901760, %v10970_v51  ;;  %v5397_v21 = vand.u32 4294901760, %v10976_v25 }
 0x4d5   : > { %5384 = vmatmul.f32.gmra.mxu0 %v5383_v41  ;;  %v4900_v41 = vadd.f32 %v4899_v56, %v10537_v53 }
 0x4d6   : > { %v5164_v34 = vadd.f32 %v5163_v45, %v5013_v60  ;;  %5581 = vmatmul.f32.gmra.mxu1 %v10873_v55  ;;  %v6325_v37 = vsub.f32 %v10970_v51, %v11888_v47  ;;  %v5391_v45 = vand.u32 4294901760, %v5390_v27  ;;  %v10987_v60 = vand.u32 4294901760, %v269_v42 }
 0x4d7   : > { %5823 = vmatmul.f32.gmra.mxu3 %v5381_v59  ;;  %v10994_v59 = vand.u32 4294901760, %v445_v9  ;;  %v5398_v56 = vsub.f32 %v10976_v25, %v5397_v21 }
 0x4d8   : > { %v10981_v35 = vadd.f32 %v5260_v12, %v5164_v34  ;;  %5704 = vmatmul.f32.gmra.mxu2 %v10917_v38  ;;  %12195 = vst [vmem:[#allocation14_spill] sm:$0xff] %v10987_v60  ;;  %v6326_v12 = vand.u32 4294901760, %v6325_v37  ;;  %v11001_v62 = vsub.f32 %v269_v42, %v10987_v60 }
 0x4d9   : > { %6132 = vmatpush.msra.mxu2 %v10994_v59  ;;  %v10998_v27 = vsub.f32 %v445_v9, %v10994_v59  ;;  %6583 = vmatpush.msrb.mxu1 %v10994_v59 }
 0x4da   : > { %12194 = vst [vmem:[#allocation4_spill] sm:$0xff] %v10981_v35  ;;  %v4904_v34 = vpop.f32.mrf.mxu0  ;;  %6327 = vmatpush.msra.mxu3 %v6326_v12  ;;  %v5399_v12 = vand.u32 4294901760, %v5398_v56  ;;  %v285_v56 = vld [vmem:[%s7207_s16 + $0x2b0] sm:$0xff] }
 0x4db   : > { %v5018_v8 = vpop.f32.mrf.mxu1  ;;  %v5167_v44 = vpop.f32.mrf.mxu2  ;;  %v11892_v37 = vand.u32 4294901760, %v10998_v27  ;;  %6464 = vmatpush.msrb.mxu0 %v10998_v27  ;;  %v4905_v9 = vadd.f32 %v4904_v34, %v10560_v57 }
 0x4dc   : > { %v5019_v47 = vadd.f32 %v5018_v8, %v4900_v41  ;;  %v5264_v38 = vpop.f32.mrf.mxu3  ;;  %v277_v8 = vld [vmem:[%s7207_s16 + $0x270] sm:$0xff] }
 0x4dd   : > { %5392 = vmatmul.f32.gmra.mxu0 %v5391_v45  ;;  %v6331_v42 = vsub.f32 %v10998_v27, %v11892_v37  ;;  %v444_v45 = vld [vmem:[%s11671_s1 + $0x3a8] sm:$0xff] }
 0x4de   : > { %v5168_v53 = vadd.f32 %v5167_v44, %v5019_v47  ;;  %5585 = vmatmul.f32.gmra.mxu1 %v10902_v3  ;;  %v5405_v44 = vand.u32 4294901760, %v11001_v62  ;;  %v11016_v47 = vand.u32 4294901760, %v277_v8 }
 0x4df   : > { %5829 = vmatmul.f32.gmra.mxu3 %v5389_v48 }
 0x4e0   : > { %v11009_v41 = vadd.f32 %v5264_v38, %v5168_v53  ;;  %5709 = vmatmul.f32.gmra.mxu2 %v10946_v32  ;;  %12197 = vst [vmem:[#allocation16_spill] sm:$0xff] %v11016_v47  ;;  %v6332_v38 = vand.u32 4294901760, %v6331_v42  ;;  %v11022_v53 = vand.u32 4294901760, %v444_v45  ;;  %v5406_v3 = vsub.f32 %v11001_v62, %v5405_v44 }
 0x4e1   : > { %v11030_v57 = vsub.f32 %v277_v8, %v11016_v47 }
 0x4e2   : > { %12196 = vst [vmem:[#allocation3_spill] sm:$0xff] %v11009_v41  ;;  %v4909_v48 = vpop.f32.mrf.mxu0  ;;  %6333 = vmatpush.msra.mxu3 %v6332_v38  ;;  %6134 = vmatpush.msra.mxu2 %v11022_v53  ;;  %v11026_v41 = vsub.f32 %v444_v45, %v11022_v53  ;;  %v5407_v8 = vand.u32 4294901760, %v5406_v3 }
 0x4e3   : > { %v5024_v19 = vpop.f32.mrf.mxu1  ;;  %v5171_v14 = vpop.f32.mrf.mxu2  ;;  %6585 = vmatpush.msrb.mxu1 %v11022_v53 }
 0x4e4   : > { %v5025_v37 = vadd.f32 %v5024_v19, %v4905_v9  ;;  %v5268_v32 = vpop.f32.mrf.mxu3  ;;  %v11896_v19 = vand.u32 4294901760, %v11026_v41  ;;  %6467 = vmatpush.msrb.mxu0 %v11026_v41  ;;  %v4910_v9 = vadd.f32 %v4909_v48, %v10583_v4 }
 0x4e5   : > { %5400 = vmatmul.f32.gmra.mxu0 %v5399_v12  ;;  %v11048_v12 = vand.u32 4294901760, %v285_v56 }
 0x4e6   : > { %v5172_v34 = vadd.f32 %v5171_v14, %v5025_v37  ;;  %5589 = vmatmul.f32.gmra.mxu1 %v10932_v23  ;;  %v6337_v45 = vsub.f32 %v11026_v41, %v11896_v19  ;;  %v5413_v14 = vand.u32 4294901760, %v11030_v57  ;;  %v443_v37 = vld [vmem:[%s11671_s1 + $0x3a0] sm:$0xff] }
 0x4e7   : > { %5835 = vmatmul.f32.gmra.mxu3 %v5397_v21  ;;  %12199 = vst [vmem:[#allocation5_spill] sm:$0xff] %v11048_v12  ;;  %v11050_v21 = vand.u32 4294901760, %v443_v37  ;;  %v11060_v48 = vsub.f32 %v285_v56, %v11048_v12  ;;  %v442_v56 = vld [vmem:[%s11671_s1 + $0x398] sm:$0xff] }
 0x4e8   : > { %v11037_v42 = vadd.f32 %v5268_v32, %v5172_v34  ;;  %5714 = vmatmul.f32.gmra.mxu2 %v10976_v25  ;;  %v6338_v38 = vand.u32 4294901760, %v6337_v45  ;;  %v5414_v23 = vsub.f32 %v11030_v57, %v5413_v14  ;;  %v293_v45 = vld [vmem:[%s7207_s16 + $0x2f0] sm:$0xff] }
 0x4e9   : > { %6136 = vmatpush.msra.mxu2 %v11050_v21  ;;  %v11054_v3 = vsub.f32 %v443_v37, %v11050_v21  ;;  %6587 = vmatpush.msrb.mxu1 %v11050_v21 }
 0x4ea   : > { %12198 = vst [vmem:[#allocation7_spill] sm:$0xff] %v11037_v42  ;;  %v4914_v32 = vpop.f32.mrf.mxu0  ;;  %6339 = vmatpush.msra.mxu3 %v6338_v38 }
 0x4eb   : > { %v5030_v34 = vpop.f32.mrf.mxu1  ;;  %v5175_v42 = vpop.f32.mrf.mxu2  ;;  %6470 = vmatpush.msrb.mxu0 %v11054_v3 }
 0x4ec   : > { %v5031_v19 = vadd.f32 %v5030_v34, %v4910_v9  ;;  %v5272_v25 = vpop.f32.mrf.mxu3  ;;  %v11899_v9 = vand.u32 4294901760, %v11054_v3  ;;  %v5421_v34 = vand.u32 4294901760, %v11060_v48 }
 0x4ed   : > { %5408 = vmatmul.f32.gmra.mxu0 %v5407_v8  ;;  %v4915_v8 = vadd.f32 %v4914_v32, %v10606_v10 }
 0x4ee   : > { %v5176_v4 = vadd.f32 %v5175_v42, %v5031_v19  ;;  %5593 = vmatmul.f32.gmra.mxu1 %v10964_v43  ;;  %v6343_v37 = vsub.f32 %v11054_v3, %v11899_v9  ;;  %v5415_v19 = vand.u32 4294901760, %v5414_v23  ;;  %v11071_v42 = vand.u32 4294901760, %v293_v45 }
 0x4ef   : > { %5841 = vmatmul.f32.gmra.mxu3 %v5405_v44  ;;  %v11078_v44 = vand.u32 4294901760, %v442_v56  ;;  %v5422_v32 = vsub.f32 %v11060_v48, %v5421_v34 }
 0x4f0   : > { %v11065_v38 = vadd.f32 %v5272_v25, %v5176_v4  ;;  %5719 = vmatmul.f32.gmra.mxu2 %v11001_v62  ;;  %12201 = vst [vmem:[#allocation2_spill] sm:$0xff] %v11071_v42  ;;  %v6344_v25 = vand.u32 4294901760, %v6343_v37  ;;  %v11085_v35 = vsub.f32 %v293_v45, %v11071_v42 }
 0x4f1   : > { %6138 = vmatpush.msra.mxu2 %v11078_v44  ;;  %v11082_v23 = vsub.f32 %v442_v56, %v11078_v44  ;;  %6589 = vmatpush.msrb.mxu1 %v11078_v44 }
 0x4f2   : > { %12200 = vst [vmem:[#allocation17_spill] sm:$0xff] %v11065_v38  ;;  %v4919_v4 = vpop.f32.mrf.mxu0  ;;  %6345 = vmatpush.msra.mxu3 %v6344_v25  ;;  %v5423_v25 = vand.u32 4294901760, %v5422_v32 }
 0x4f3   : > { %v5036_v38 = vpop.f32.mrf.mxu1  ;;  %v5179_v43 = vpop.f32.mrf.mxu2  ;;  %v11902_v37 = vand.u32 4294901760, %v11082_v23  ;;  %6473 = vmatpush.msrb.mxu0 %v11082_v23  ;;  %v4920_v56 = vadd.f32 %v4919_v4, %v10629_v28 }
 0x4f4   : > { %v5037_v9 = vadd.f32 %v5036_v38, %v4915_v8  ;;  %v5276_v62 = vpop.f32.mrf.mxu3  ;;  %v301_v38 = vld [vmem:[%s7207_s16 + $0x330] sm:$0xff] }
 0x4f5   : > { %5416 = vmatmul.f32.gmra.mxu0 %v5415_v19  ;;  %v6349_v45 = vsub.f32 %v11082_v23, %v11902_v37  ;;  %v441_v19 = vld [vmem:[%s11671_s1 + $0x390] sm:$0xff] }
 0x4f6   : > { %v5180_v10 = vadd.f32 %v5179_v43, %v5037_v9  ;;  %5597 = vmatmul.f32.gmra.mxu1 %v10987_v60  ;;  %v5429_v43 = vand.u32 4294901760, %v11085_v35  ;;  %v11100_v9 = vand.u32 4294901760, %v301_v38 }
 0x4f7   : > { %5847 = vmatmul.f32.gmra.mxu3 %v5413_v14 }
 0x4f8   : > { %v11093_v8 = vadd.f32 %v5276_v62, %v5180_v10  ;;  %5724 = vmatmul.f32.gmra.mxu2 %v11030_v57  ;;  %v6350_v62 = vand.u32 4294901760, %v6349_v45  ;;  %v11106_v10 = vand.u32 4294901760, %v441_v19  ;;  %v5430_v31 = vsub.f32 %v11085_v35, %v5429_v43 }
 0x4f9   : > { %v11114_v28 = vsub.f32 %v301_v38, %v11100_v9 }
 0x4fa   : > { %12202 = vst [vmem:[#allocation13_spill] sm:$0xff] %v11093_v8  ;;  %v4924_v14 = vpop.f32.mrf.mxu0  ;;  %6351 = vmatpush.msra.mxu3 %v6350_v62  ;;  %6140 = vmatpush.msra.mxu2 %v11106_v10  ;;  %v11110_v55 = vsub.f32 %v441_v19, %v11106_v10  ;;  %v5431_v38 = vand.u32 4294901760, %v5430_v31 }
 0x4fb   : > { %v5042_v8 = vpop.f32.mrf.mxu1  ;;  %v5183_v60 = vpop.f32.mrf.mxu2  ;;  %6591 = vmatpush.msrb.mxu1 %v11106_v10 }
 0x4fc   : > { %v5043_v37 = vadd.f32 %v5042_v8, %v4920_v56  ;;  %v5280_v57 = vpop.f32.mrf.mxu3  ;;  %v11907_v32 = vand.u32 4294901760, %v11110_v55  ;;  %v309_v8 = vld [vmem:[%s7207_s16 + $0x370] sm:$0xff]  ;;  %6476 = vmatpush.msrb.mxu0 %v11110_v55  ;;  %v4925_v56 = vadd.f32 %v4924_v14, %v10652_v16 }
 0x4fd   : > { %5424 = vmatmul.f32.gmra.mxu0 %v5423_v25  ;;  %v11132_v25 = vand.u32 4294901760, %v309_v8 }
 0x4fe   : > { %v5184_v4 = vadd.f32 %v5183_v60, %v5043_v37  ;;  %5601 = vmatmul.f32.gmra.mxu1 %v11016_v47  ;;  %v6355_v19 = vsub.f32 %v11110_v55, %v11907_v32  ;;  %v5437_v60 = vand.u32 4294901760, %v11114_v28  ;;  %v440_v37 = vld [vmem:[%s11671_s1 + $0x388] sm:$0xff] }
 0x4ff   : > { %5853 = vmatmul.f32.gmra.mxu3 %v5421_v34  ;;  %v5444_v14 = vsub.f32 %v309_v8, %v11132_v25 }
 0x500   : > { %v11121_v45 = vadd.f32 %v5280_v57, %v5184_v4  ;;  %5729 = vmatmul.f32.gmra.mxu2 %v11060_v48  ;;  %v6356_v62 = vand.u32 4294901760, %v6355_v19  ;;  %v11134_v57 = vand.u32 4294901760, %v440_v37  ;;  %v5438_v47 = vsub.f32 %v11114_v28, %v5437_v60 }
 0x502   : > { %12203 = vst [vmem:[#allocation11_spill] sm:$0xff] %v11121_v45  ;;  %v4929_v34 = vpop.f32.mrf.mxu0  ;;  %6357 = vmatpush.msra.mxu3 %v6356_v62  ;;  %6142 = vmatpush.msra.mxu2 %v11134_v57  ;;  %v11138_v31 = vsub.f32 %v440_v37, %v11134_v57 }
 0x503   : > { %v5048_v4 = vpop.f32.mrf.mxu1  ;;  %v5187_v45 = vpop.f32.mrf.mxu2  ;;  %6593 = vmatpush.msrb.mxu1 %v11134_v57 }
 0x504   : > { %v5049_v32 = vadd.f32 %v5048_v4, %v4925_v56  ;;  %v5284_v48 = vpop.f32.mrf.mxu3  ;;  %v11912_v19 = vand.u32 4294901760, %v11138_v31  ;;  %v317_v56 = vld [vmem:[%s7207_s16 + $0x3b0] sm:$0xff]  ;;  %6479 = vmatpush.msrb.mxu0 %v11138_v31  ;;  %v5445_v4 = vand.u32 4294901760, %v5444_v14 }
 0x505   : > { %5432 = vmatmul.f32.gmra.mxu0 %v5431_v38  ;;  %v4930_v38 = vadd.f32 %v4929_v34, %v10679_v26  ;;  %v12205_v26 = vand.u32 4294901760, %v10698_v54 }
 0x506   : > { %v5188_v16 = vadd.f32 %v5187_v45, %v5049_v32  ;;  %5605 = vmatmul.f32.gmra.mxu1 %v11048_v12  ;;  %v6361_v37 = vsub.f32 %v11138_v31, %v11912_v19  ;;  %v439_v32 = vld [vmem:[%s11671_s1 + $0x380] sm:$0xff]  ;;  %v5439_v45 = vand.u32 4294901760, %v5438_v47  ;;  %v11159_v12 = vand.u32 4294901760, %v317_v56 }
 0x507   : > { %5859 = vmatmul.f32.gmra.mxu3 %v5429_v43  ;;  %v11156_v8 = vand.u32 4294901760, %v439_v32  ;;  %v5446_v30 = vsub.f32 %v5444_v14, %v5445_v4 }
 0x508   : > { %v11147_v62 = vadd.f32 %v5284_v48, %v5188_v16  ;;  %5734 = vmatmul.f32.gmra.mxu2 %v11085_v35  ;;  %v6362_v48 = vand.u32 4294901760, %v6361_v37 }
 0x509   : > { %6144 = vmatpush.msra.mxu2 %v11156_v8  ;;  %v11163_v19 = vsub.f32 %v439_v32, %v11156_v8  ;;  %6595 = vmatpush.msrb.mxu1 %v11156_v8  ;;  %v5452_v32 = vsub.f32 %v317_v56, %v11159_v12  ;;  %v12207_v56 = vand.u32 4294901760, %v10770_v15 }
 0x50a   : > { %12204 = vst [vmem:[#allocation15_spill] sm:$0xff] %v11147_v62  ;;  %v4934_v43 = vpop.f32.mrf.mxu0  ;;  %6363 = vmatpush.msra.mxu3 %v6362_v48  ;;  %v12206_v48 = vand.u32 4294901760, %v10732_v50 }
 0x50b   : > { %v5054_v16 = vpop.f32.mrf.mxu1  ;;  %v5191_v47 = vpop.f32.mrf.mxu2  ;;  %6696 = vmatpush.msrb.mxu2 %v12205_v26  ;;  %v11917_v34 = vand.u32 4294901760, %v11163_v19  ;;  %6482 = vmatpush.msrb.mxu0 %v11163_v19  ;;  %v11182_v26 = vand.u32 4294901760, %v325_v2 }
 0x50c   : > { %v5055_v35 = vadd.f32 %v5054_v16, %v4930_v38  ;;  %v5288_v62 = vpop.f32.mrf.mxu3 }
 0x50d   : > { %5440 = vmatmul.f32.gmra.mxu0 %v5439_v45  ;;  %v6367_v38 = vsub.f32 %v11163_v19, %v11917_v34  ;;  %6700 = vmatpush.msrb.mxu2 %v12206_v48  ;;  %v4935_v45 = vadd.f32 %v4934_v43, %v10711_v46  ;;  %v5460_v15 = vsub.f32 %v325_v2, %v11182_v26 }
 0x50e   : > { %v5192_v37 = vadd.f32 %v5191_v47, %v5055_v35  ;;  %5609 = vmatmul.f32.gmra.mxu1 %v11071_v42  ;;  %v5447_v35 = vand.u32 4294901760, %v5446_v30  ;;  %v5453_v47 = vand.u32 4294901760, %v5452_v32 }
 0x50f   : > { %5865 = vmatmul.f32.gmra.mxu3 %v5437_v60  ;;  %v6368_v16 = vand.u32 4294901760, %v6367_v38  ;;  %6704 = vmatpush.msrb.mxu2 %v12207_v56  ;;  %v12209_v60 = vand.u32 4294901760, %v10847_v63  ;;  %v12210_v38 = vand.u32 4294901760, %v10881_v18  ;;  %v12213_v56 = vand.u32 4294901760, %v10970_v51 }
 0x510   : > { %v11178_v54 = vadd.f32 %v5288_v62, %v5192_v37  ;;  %5739 = vmatmul.f32.gmra.mxu2 %v11114_v28  ;;  %v12208_v28 = vand.u32 4294901760, %v10809_v33  ;;  %v5454_v30 = vsub.f32 %v5452_v32, %v5453_v47  ;;  %v206_v37 = vld [vmem:[%s7207_s16 + $0x38] sm:$0xff] }
 0x511   : > { %6369 = vmatpush.msra.mxu3 %v6368_v16 }
 0x512   : > { %v4939_v42 = vpop.f32.mrf.mxu0  ;;  %6708 = vmatpush.msrb.mxu2 %v12208_v28  ;;  %v5455_v33 = vand.u32 4294901760, %v5454_v30 }
 0x513   : > { %v5060_v34 = vpop.f32.mrf.mxu1  ;;  %v5195_v48 = vpop.f32.mrf.mxu2  ;;  %6823 = vmatpush.msrb.mxu3 %v10692_v39  ;;  %v4940_v39 = vadd.f32 %v4939_v42, %v10748_v40 }
 0x514   : > { %v5061_v50 = vadd.f32 %v5060_v34, %v4935_v45  ;;  %v5292_v62 = vpop.f32.mrf.mxu3  ;;  %6712 = vmatpush.msrb.mxu2 %v12209_v60  ;;  %v5461_v34 = vand.u32 4294901760, %v5460_v15 }
 0x515   : > { %5448 = vmatmul.f32.gmra.mxu0 %v5447_v35  ;;  %6825 = vmatpush.msrb.mxu3 %v10725_v6  ;;  %v214_v35 = vld [vmem:[%s7207_s16 + $0x78] sm:$0xff] }
 0x516   : > { %v5196_v46 = vadd.f32 %v5195_v48, %v5061_v50  ;;  %5613 = vmatmul.f32.gmra.mxu1 %v11100_v9  ;;  %6716 = vmatpush.msrb.mxu2 %v12210_v38  ;;  %v5462_v18 = vsub.f32 %v5460_v15, %v5461_v34 }
 0x517   : > { %5871 = vmatmul.f32.gmra.mxu3 %v5445_v4  ;;  %v12211_v4 = vand.u32 4294901760, %v10914_v29 }
 0x518   : > { %v11194_v43 = vadd.f32 %v5292_v62, %v5196_v46  ;;  %5744 = vmatmul.f32.gmra.mxu2 %v5444_v14  ;;  %6827 = vmatpush.msrb.mxu3 %v10763_v0  ;;  %v11204_v0 = vand.u32 4294901760, %v206_v37  ;;  %v5463_v14 = vand.u32 4294901760, %v5462_v18  ;;  %v11225_v62 = vand.u32 4294901760, %v214_v35  ;;  %v222_v46 = vld [vmem:[%s7207_s16 + $0xb8] sm:$0xff] }
 0x519   : > { %6720 = vmatpush.msrb.mxu2 %v12211_v4  ;;  %v12220_v4 = vand.u32 4294901760, %v11163_v19 }
 0x51a   : > { %v4944_v2 = vpop.f32.mrf.mxu0  ;;  %6829 = vmatpush.msrb.mxu3 %v10802_v20  ;;  %v12212_v20 = vand.u32 4294901760, %v10942_v61  ;;  %v11214_v29 = vsub.f32 %v206_v37, %v11204_v0  ;;  %v11238_v28 = vsub.f32 %v214_v35, %v11225_v62  ;;  %v11249_v37 = vand.u32 4294901760, %v222_v46 }
 0x51b   : > { %v5066_v16 = vpop.f32.mrf.mxu1  ;;  %v5199_v63 = vpop.f32.mrf.mxu2 }
 0x51c   : > { %v5067_v6 = vadd.f32 %v5066_v16, %v4940_v39  ;;  %v5296_v45 = vpop.f32.mrf.mxu3  ;;  %6831 = vmatpush.msrb.mxu3 %v10839_v49  ;;  %6724 = vmatpush.msrb.mxu2 %v12212_v20  ;;  %v4945_v49 = vadd.f32 %v4944_v2, %v10787_v52  ;;  %v12219_v2 = vand.u32 4294901760, %v11138_v31 }
 0x51d   : > { %5456 = vmatmul.f32.gmra.mxu0 %v5455_v33  ;;  %v12217_v33 = vand.u32 4294901760, %v11082_v23 }
 0x51e   : > { %v5200_v40 = vadd.f32 %v5199_v63, %v5067_v6  ;;  %5617 = vmatmul.f32.gmra.mxu1 %v11132_v25  ;;  %6833 = vmatpush.msrb.mxu3 %v10875_v58 }
 0x51f   : > { %5877 = vmatmul.f32.gmra.mxu3 %v5453_v47  ;;  %6728 = vmatpush.msrb.mxu2 %v12213_v56 }
 0x520   : > { %v11211_v42 = vadd.f32 %v5296_v45, %v5200_v40  ;;  %5749 = vmatmul.f32.gmra.mxu2 %v5452_v32  ;;  %6835 = vmatpush.msrb.mxu3 %v10910_v5  ;;  %v12214_v32 = vand.u32 4294901760, %v10998_v27  ;;  %v11929_v5 = vand.u32 4294901760, %v11214_v29 }
 0x522   : > { %v4949_v58 = vpop.f32.mrf.mxu0  ;;  %6837 = vmatpush.msrb.mxu3 %v10938_v36  ;;  %6732 = vmatpush.msrb.mxu2 %v12214_v32  ;;  %v12215_v36 = vand.u32 4294901760, %v11026_v41  ;;  %v6148_v27 = vsub.f32 %v11214_v29, %v11929_v5 }
 0x523   : > { %v5072_v50 = vpop.f32.mrf.mxu1  ;;  %v5203_v48 = vpop.f32.mrf.mxu2 }
 0x524   : > { %v5073_v61 = vadd.f32 %v5072_v50, %v4945_v49  ;;  %v5300_v47 = vpop.f32.mrf.mxu3  ;;  %6839 = vmatpush.msrb.mxu3 %v10966_v11  ;;  %6736 = vmatpush.msrb.mxu2 %v12215_v36  ;;  %v4950_v11 = vadd.f32 %v4949_v58, %v10825_v17  ;;  %v238_v49 = vld [vmem:[%s7207_s16 + $0x138] sm:$0xff]  ;;  %v12221_v36 = vld [vmem:[#allocation19_spill] sm:$0xff] }
 0x525   : > { %5464 = vmatmul.f32.gmra.mxu0 %v5463_v14 }
 0x526   : > { %v5204_v52 = vadd.f32 %v5203_v48, %v5073_v61  ;;  %5621 = vmatmul.f32.gmra.mxu1 %v11159_v12  ;;  %6841 = vmatpush.msrb.mxu3 %v10994_v59  ;;  %v12216_v59 = vand.u32 4294901760, %v11054_v3  ;;  %v11291_v48 = vand.u32 4294901760, %v238_v49 }
 0x527   : > { %5883 = vmatmul.f32.gmra.mxu3 %v5461_v34  ;;  %v6149_v34 = vand.u32 4294901760, %v6148_v27 }
 0x528   : > { %v11232_v51 = vadd.f32 %v5300_v47, %v5204_v52  ;;  %5754 = vmatmul.f32.gmra.mxu2 %v5460_v15  ;;  %6843 = vmatpush.msrb.mxu3 %v11022_v53  ;;  %v11927_v53 = vand.u32 4294901760, %v11238_v28  ;;  %v11302_v52 = vsub.f32 %v238_v49, %v11291_v48 }
 0x529   : > { %6740 = vmatpush.msrb.mxu2 %v12216_v59 }
 0x52a   : > { %v5345_v30 = vpop.f32.mrf.mxu0  ;;  %6845 = vmatpush.msrb.mxu3 %v11050_v21  ;;  %v12218_v21 = vand.u32 4294901760, %v11110_v55  ;;  %v6156_v23 = vsub.f32 %v11238_v28, %v11927_v53  ;;  %v230_v55 = vld [vmem:[%s7207_s16 + $0xf8] sm:$0xff]  ;;  %v12239_v53 = vld [vmem:[#allocation2_spill] sm:$0xff] }
 0x52b   : > { %v5078_v41 = vpop.f32.mrf.mxu1  ;;  %v5207_v60 = vpop.f32.mrf.mxu2  ;;  %6744 = vmatpush.msrb.mxu2 %v12217_v33  ;;  %v5346_v38 = vadd.f32 %v5345_v30, %v10861_v24  ;;  %v11275_v18 = vand.u32 4294901760, %v230_v55 }
 0x52c   : > { %v5079_v15 = vadd.f32 %v5078_v41, %v4950_v11  ;;  %v5304_v39 = vpop.f32.mrf.mxu3  ;;  %6847 = vmatpush.msrb.mxu3 %v11078_v44  ;;  %v11264_v44 = vsub.f32 %v222_v46, %v11249_v37  ;;  %v6157_v40 = vand.u32 4294901760, %v6156_v23  ;;  %v246_v11 = vld [vmem:[%s7207_s16 + $0x178] sm:$0xff] }
 0x52d   : > { %5952 = vmatmul.f32.vlgmr.msra.gmra.mxu0 %v10718_v13  ;;  %6748 = vmatpush.msrb.mxu2 %v12218_v21 }
 0x52e   : > { %v5208_v17 = vadd.f32 %v5207_v60, %v5079_v15  ;;  %5625 = vmatmul.f32.gmra.mxu1 %v11182_v26  ;;  %6849 = vmatpush.msrb.mxu3 %v11106_v10  ;;  %v11923_v60 = vand.u32 4294901760, %v11302_v52 }
 0x52f   : > { %6371 = vmatmul.f32.vlgmr.msra.gmra.mxu3 %v11204_v0  ;;  %6752 = vmatpush.msrb.mxu2 %v12219_v2  ;;  %v254_v2 = vld [vmem:[%s7207_s16 + $0x1b8] sm:$0xff] }
 0x530   : > { %v11257_v3 = vadd.f32 %v5304_v39, %v5208_v17  ;;  %6150 = vmatmul.f32.vlgmr.msra.gmra.mxu2 %v6149_v34  ;;  %6851 = vmatpush.msrb.mxu3 %v11134_v57  ;;  %v11926_v57 = vand.u32 4294901760, %v11264_v44  ;;  %v11307_v39 = vand.u32 4294901760, %v246_v11  ;;  %v12222_v34 = vld [vmem:[#allocation6_spill] sm:$0xff]  ;;  %v6180_v21 = vsub.f32 %v11302_v52, %v11923_v60  ;;  %v12237_v60 = vld [vmem:[#allocation5_spill] sm:$0xff] }
 0x531   : > { %6756 = vmatpush.msrb.mxu2 %v12220_v4 }
 0x532   : > { %v5353_v10 = vpop.f32.mrf.mxu0  ;;  %6853 = vmatpush.msrb.mxu3 %v11156_v8  ;;  %v6164_v19 = vsub.f32 %v11264_v44, %v11926_v57  ;;  %v11286_v8 = vsub.f32 %v230_v55, %v11275_v18  ;;  %v11318_v23 = vsub.f32 %v246_v11, %v11307_v39 }
 0x533   : > { %v5566_v16 = vpop.f32.mrf.mxu1  ;;  %v5680_v63 = vpop.f32.mrf.mxu2  ;;  %v5354_v20 = vadd.f32 %v5353_v10, %v10894_v7 }
 0x534   : > { %v5567_v6 = vadd.f32 %v5566_v16, %v5346_v38  ;;  %v5794_v45 = vpop.f32.mrf.mxu3  ;;  %v6165_v50 = vand.u32 4294901760, %v6164_v19  ;;  %v11925_v61 = vand.u32 4294901760, %v11286_v8  ;;  %v12223_v38 = vld [vmem:[#allocation9_spill] sm:$0xff]  ;;  %v11922_v4 = vand.u32 4294901760, %v11318_v23  ;;  %v12224_v19 = vld [vmem:[#allocation18_spill] sm:$0xff] }
 0x535   : > { %5956 = vmatmul.f32.gmra.mxu0 %v10761_v22 }
 0x536   : > { %v5681_v24 = vadd.f32 %v5680_v63, %v5567_v6  ;;  %6049 = vmatmul.f32.vlgmr.msra.gmra.mxu1 %v10718_v13  ;;  %v6172_v7 = vsub.f32 %v11286_v8, %v11925_v61  ;;  %v6188_v49 = vsub.f32 %v11318_v23, %v11922_v4 }
 0x537   : > { %6375 = vmatmul.f32.gmra.mxu3 %v11225_v62 }
 0x538   : > { %v11279_v31 = vadd.f32 %v5794_v45, %v5681_v24  ;;  %6158 = vmatmul.f32.gmra.mxu2 %v6157_v40  ;;  %v6173_v15 = vand.u32 4294901760, %v6172_v7  ;;  %v6181_v45 = vand.u32 4294901760, %v6180_v21  ;;  %v11323_v40 = vand.u32 4294901760, %v254_v2  ;;  %v270_v21 = vld [vmem:[%s7207_s16 + $0x238] sm:$0xff] }
 0x53a   : > { %v5361_v14 = vpop.f32.mrf.mxu0 }
 0x53b   : > { %v5570_v35 = vpop.f32.mrf.mxu1  ;;  %v5685_v13 = vpop.f32.mrf.mxu2  ;;  %v5362_v27 = vadd.f32 %v5361_v14, %v12221_v36  ;;  %v11334_v14 = vsub.f32 %v254_v2, %v11323_v40 }
 0x53c   : > { %v5571_v56 = vadd.f32 %v5570_v35, %v5354_v20  ;;  %v5800_v58 = vpop.f32.mrf.mxu3  ;;  %v12225_v35 = vld [vmem:[#allocation4_spill] sm:$0xff] }
 0x53d   : > { %5960 = vmatmul.f32.gmra.mxu0 %v10794_v1  ;;  %v11921_v11 = vand.u32 4294901760, %v11334_v14 }
 0x53e   : > { %v5686_v47 = vadd.f32 %v5685_v13, %v5571_v56  ;;  %6053 = vmatmul.f32.gmra.mxu1 %v10761_v22  ;;  %v262_v13 = vld [vmem:[%s7207_s16 + $0x1f8] sm:$0xff] }
 0x53f   : > { %6379 = vmatmul.f32.gmra.mxu3 %v11249_v37 }
 0x540   : > { %v11295_v32 = vadd.f32 %v5800_v58, %v5686_v47  ;;  %6166 = vmatmul.f32.gmra.mxu2 %v6165_v50 }
 0x542   : > { %v5369_v46 = vpop.f32.mrf.mxu0 }
 0x543   : > { %v5574_v59 = vpop.f32.mrf.mxu1  ;;  %v5690_v22 = vpop.f32.mrf.mxu2  ;;  %v5370_v55 = vadd.f32 %v5369_v46, %v12223_v38  ;;  %v11339_v46 = vand.u32 4294901760, %v262_v13 }
 0x544   : > { %v5575_v41 = vadd.f32 %v5574_v59, %v5362_v27  ;;  %v5806_v30 = vpop.f32.mrf.mxu3  ;;  %v6189_v27 = vand.u32 4294901760, %v6188_v49 }
 0x545   : > { %5964 = vmatmul.f32.gmra.mxu0 %v12222_v34 }
 0x546   : > { %v5691_v33 = vadd.f32 %v5690_v22, %v5575_v41  ;;  %6057 = vmatmul.f32.gmra.mxu1 %v10794_v1  ;;  %v12226_v41 = vld [vmem:[#allocation8_spill] sm:$0xff] }
 0x547   : > { %6383 = vmatmul.f32.gmra.mxu3 %v11275_v18 }
 0x548   : > { %v11311_v17 = vadd.f32 %v5806_v30, %v5691_v33  ;;  %6174 = vmatmul.f32.gmra.mxu2 %v6173_v15  ;;  %v6196_v30 = vsub.f32 %v11334_v14, %v11921_v11  ;;  %v11350_v15 = vsub.f32 %v262_v13, %v11339_v46  ;;  %v12227_v33 = vld [vmem:[#allocation3_spill] sm:$0xff] }
 0x54a   : > { %v5377_v10 = vpop.f32.mrf.mxu0 }
 0x54b   : > { %v5578_v16 = vpop.f32.mrf.mxu1  ;;  %v5695_v1 = vpop.f32.mrf.mxu2  ;;  %v5378_v56 = vadd.f32 %v5377_v10, %v12225_v35 }
 0x54c   : > { %v5579_v6 = vadd.f32 %v5578_v16, %v5370_v55  ;;  %v5812_v63 = vpop.f32.mrf.mxu3 }
 0x54d   : > { %5968 = vmatmul.f32.gmra.mxu0 %v12224_v19 }
 0x54e   : > { %v5696_v24 = vadd.f32 %v5695_v1, %v5579_v6  ;;  %6061 = vmatmul.f32.gmra.mxu1 %v12222_v34  ;;  %v6197_v6 = vand.u32 4294901760, %v6196_v30  ;;  %v11919_v1 = vand.u32 4294901760, %v11350_v15 }
 0x54f   : > { %6387 = vmatmul.f32.gmra.mxu3 %v11291_v48 }
 0x550   : > { %v11327_v20 = vadd.f32 %v5812_v63, %v5696_v24  ;;  %6182 = vmatmul.f32.gmra.mxu2 %v6181_v45  ;;  %v11355_v63 = vand.u32 4294901760, %v270_v21  ;;  %v12228_v24 = vld [vmem:[#allocation10_spill] sm:$0xff]  ;;  %v6204_v49 = vsub.f32 %v11350_v15, %v11919_v1  ;;  %v12234_v1 = vld [vmem:[#allocation16_spill] sm:$0xff] }
 0x552   : > { %v5385_v58 = vpop.f32.mrf.mxu0  ;;  %v11366_v35 = vsub.f32 %v270_v21, %v11355_v63 }
 0x553   : > { %v5582_v50 = vpop.f32.mrf.mxu1  ;;  %v5700_v7 = vpop.f32.mrf.mxu2  ;;  %v5386_v34 = vadd.f32 %v5385_v58, %v12227_v33  ;;  %v278_v58 = vld [vmem:[%s7207_s16 + $0x278] sm:$0xff] }
 0x554   : > { %v5583_v47 = vadd.f32 %v5582_v50, %v5378_v56  ;;  %v5818_v36 = vpop.f32.mrf.mxu3  ;;  %v12229_v56 = vld [vmem:[#allocation7_spill] sm:$0xff]  ;;  %v11371_v30 = vand.u32 4294901760, %v278_v58 }
 0x555   : > { %5972 = vmatmul.f32.gmra.mxu0 %v12226_v41 }
 0x556   : > { %v5701_v59 = vadd.f32 %v5700_v7, %v5583_v47  ;;  %6065 = vmatmul.f32.gmra.mxu1 %v12224_v19 }
 0x557   : > { %6391 = vmatmul.f32.gmra.mxu3 %v11307_v39 }
 0x558   : > { %v11343_v22 = vadd.f32 %v5818_v36, %v5701_v59  ;;  %6190 = vmatmul.f32.gmra.mxu2 %v6189_v27  ;;  %v6205_v59 = vand.u32 4294901760, %v6204_v49 }
 0x55a   : > { %v5393_v38 = vpop.f32.mrf.mxu0 }
 0x55b   : > { %v5586_v55 = vpop.f32.mrf.mxu1  ;;  %v5705_v10 = vpop.f32.mrf.mxu2  ;;  %v5394_v13 = vadd.f32 %v5393_v38, %v12229_v56 }
 0x55c   : > { %v5587_v2 = vadd.f32 %v5586_v55, %v5386_v34  ;;  %v5824_v16 = vpop.f32.mrf.mxu3  ;;  %v12230_v34 = vld [vmem:[#allocation12_spill] sm:$0xff]  ;;  %v11382_v55 = vsub.f32 %v278_v58, %v11371_v30 }
 0x55d   : > { %5976 = vmatmul.f32.gmra.mxu0 %v12228_v24 }
 0x55e   : > { %v5706_v45 = vadd.f32 %v5705_v10, %v5587_v2  ;;  %6069 = vmatmul.f32.gmra.mxu1 %v12226_v41  ;;  %v11918_v41 = vand.u32 4294901760, %v11366_v35  ;;  %v12231_v2 = vld [vmem:[#allocation17_spill] sm:$0xff] }
 0x55f   : > { %6395 = vmatmul.f32.gmra.mxu3 %v11323_v40 }
 0x560   : > { %v11359_v19 = vadd.f32 %v5824_v16, %v5706_v45  ;;  %6198 = vmatmul.f32.gmra.mxu2 %v6197_v6  ;;  %v6212_v38 = vsub.f32 %v11366_v35, %v11918_v41  ;;  %v286_v16 = vld [vmem:[%s7207_s16 + $0x2b8] sm:$0xff] }
 0x562   : > { %v5401_v50 = vpop.f32.mrf.mxu0 }
 0x563   : > { %v5590_v47 = vpop.f32.mrf.mxu1  ;;  %v5710_v36 = vpop.f32.mrf.mxu2  ;;  %v5402_v10 = vadd.f32 %v5401_v50, %v12231_v2  ;;  %v294_v2 = vld [vmem:[%s7207_s16 + $0x2f8] sm:$0xff] }
 0x564   : > { %v5591_v7 = vadd.f32 %v5590_v47, %v5394_v13  ;;  %v5830_v27 = vpop.f32.mrf.mxu3  ;;  %v6213_v13 = vand.u32 4294901760, %v6212_v38  ;;  %v11920_v47 = vand.u32 4294901760, %v11382_v55 }
 0x565   : > { %5980 = vmatmul.f32.gmra.mxu0 %v12230_v34 }
 0x566   : > { %v5711_v33 = vadd.f32 %v5710_v36, %v5591_v7  ;;  %6073 = vmatmul.f32.gmra.mxu1 %v12228_v24  ;;  %v11387_v7 = vand.u32 4294901760, %v286_v16  ;;  %v6220_v50 = vsub.f32 %v11382_v55, %v11920_v47 }
 0x567   : > { %6399 = vmatmul.f32.gmra.mxu3 %v11339_v46 }
 0x568   : > { %v11375_v21 = vadd.f32 %v5830_v27, %v5711_v33  ;;  %6206 = vmatmul.f32.gmra.mxu2 %v6205_v59  ;;  %v12232_v27 = vld [vmem:[#allocation14_spill] sm:$0xff]  ;;  %v11398_v59 = vsub.f32 %v286_v16, %v11387_v7  ;;  %v12233_v33 = vld [vmem:[#allocation13_spill] sm:$0xff] }
 0x56a   : > { %v5409_v6 = vpop.f32.mrf.mxu0 }
 0x56b   : > { %v5594_v45 = vpop.f32.mrf.mxu1  ;;  %v5715_v24 = vpop.f32.mrf.mxu2  ;;  %v5410_v38 = vadd.f32 %v5409_v6, %v12233_v33  ;;  %v12235_v33 = vld [vmem:[#allocation11_spill] sm:$0xff] }
 0x56c   : > { %v5595_v49 = vadd.f32 %v5594_v45, %v5402_v10  ;;  %v5836_v56 = vpop.f32.mrf.mxu3 }
 0x56d   : > { %5984 = vmatmul.f32.gmra.mxu0 %v12232_v27 }
 0x56e   : > { %v5716_v36 = vadd.f32 %v5715_v24, %v5595_v49  ;;  %6077 = vmatmul.f32.gmra.mxu1 %v12230_v34 }
 0x56f   : > { %6403 = vmatmul.f32.gmra.mxu3 %v11355_v63 }
 0x570   : > { %v11391_v58 = vadd.f32 %v5836_v56, %v5716_v36  ;;  %6214 = vmatmul.f32.gmra.mxu2 %v6213_v13  ;;  %v6221_v56 = vand.u32 4294901760, %v6220_v50  ;;  %v11924_v36 = vand.u32 4294901760, %v11398_v59  ;;  %v11403_v13 = vand.u32 4294901760, %v294_v2 }
 0x572   : > { %v5417_v10 = vpop.f32.mrf.mxu0  ;;  %v6228_v6 = vsub.f32 %v11398_v59, %v11924_v36  ;;  %v11414_v50 = vsub.f32 %v294_v2, %v11403_v13 }
 0x573   : > { %v5598_v45 = vpop.f32.mrf.mxu1  ;;  %v5720_v34 = vpop.f32.mrf.mxu2 }
 0x574   : > { %v5599_v49 = vadd.f32 %v5598_v45, %v5410_v38  ;;  %v5842_v24 = vpop.f32.mrf.mxu3  ;;  %v5418_v38 = vadd.f32 %v5417_v10, %v12235_v33  ;;  %v302_v45 = vld [vmem:[%s7207_s16 + $0x338] sm:$0xff]  ;;  %v11928_v11 = vand.u32 4294901760, %v11414_v50  ;;  %v12238_v33 = vld [vmem:[#allocation15_spill] sm:$0xff] }
 0x575   : > { %5988 = vmatmul.f32.gmra.mxu0 %v12234_v1 }
 0x576   : > { %v5721_v41 = vadd.f32 %v5720_v34, %v5599_v49  ;;  %6081 = vmatmul.f32.gmra.mxu1 %v12232_v27  ;;  %v6236_v10 = vsub.f32 %v11414_v50, %v11928_v11 }
 0x577   : > { %6407 = vmatmul.f32.gmra.mxu3 %v11371_v30 }
 0x578   : > { %v11407_v16 = vadd.f32 %v5842_v24, %v5721_v41  ;;  %6222 = vmatmul.f32.gmra.mxu2 %v6221_v56  ;;  %v6229_v24 = vand.u32 4294901760, %v6228_v6  ;;  %v11419_v56 = vand.u32 4294901760, %v302_v45 }
 0x57a   : > { %v5425_v49 = vpop.f32.mrf.mxu0  ;;  %12236 = vst [vmem:[#allocation19_spill] sm:$0xff] %v11419_v56  ;;  %v11430_v6 = vsub.f32 %v302_v45, %v11419_v56 }
 0x57b   : > { %v5602_v34 = vpop.f32.mrf.mxu1  ;;  %v5725_v27 = vpop.f32.mrf.mxu2 }
 0x57c   : > { %v5603_v47 = vadd.f32 %v5602_v34, %v5418_v38  ;;  %v5848_v41 = vpop.f32.mrf.mxu3  ;;  %v5426_v38 = vadd.f32 %v5425_v49, %v12238_v33  ;;  %v310_v34 = vld [vmem:[%s7207_s16 + $0x378] sm:$0xff]  ;;  %v11930_v61 = vand.u32 4294901760, %v11430_v6 }
 0x57d   : > { %5992 = vmatmul.f32.gmra.mxu0 %v12237_v60 }
 0x57e   : > { %v5726_v4 = vadd.f32 %v5725_v27, %v5603_v47  ;;  %6085 = vmatmul.f32.gmra.mxu1 %v12234_v1  ;;  %v6244_v49 = vsub.f32 %v11430_v6, %v11930_v61 }
 0x57f   : > { %6411 = vmatmul.f32.gmra.mxu3 %v11387_v7 }
 0x580   : > { %v11423_v2 = vadd.f32 %v5848_v41, %v5726_v4  ;;  %6230 = vmatmul.f32.gmra.mxu2 %v6229_v24  ;;  %v6237_v41 = vand.u32 4294901760, %v6236_v10  ;;  %v11435_v24 = vand.u32 4294901760, %v310_v34 }
 0x582   : > { %v5433_v47 = vpop.f32.mrf.mxu0  ;;  %v11446_v10 = vsub.f32 %v310_v34, %v11435_v24 }
 0x583   : > { %v5606_v27 = vpop.f32.mrf.mxu1  ;;  %v5730_v1 = vpop.f32.mrf.mxu2  ;;  %v5434_v33 = vadd.f32 %v5433_v47, %v11178_v54 }
 0x584   : > { %v5607_v36 = vadd.f32 %v5606_v27, %v5426_v38  ;;  %v5854_v4 = vpop.f32.mrf.mxu3  ;;  %v318_v38 = vld [vmem:[%s7207_s16 + $0x3b8] sm:$0xff]  ;;  %v11933_v11 = vand.u32 4294901760, %v11446_v10 }
 0x585   : > { %5996 = vmatmul.f32.gmra.mxu0 %v12239_v53 }
 0x586   : > { %v5731_v57 = vadd.f32 %v5730_v1, %v5607_v36  ;;  %6089 = vmatmul.f32.gmra.mxu1 %v12237_v60  ;;  %v6252_v54 = vsub.f32 %v11446_v10, %v11933_v11 }
 0x587   : > { %6415 = vmatmul.f32.gmra.mxu3 %v11403_v13 }
 0x588   : > { %v11439_v45 = vadd.f32 %v5854_v4, %v5731_v57  ;;  %6238 = vmatmul.f32.gmra.mxu2 %v6237_v41  ;;  %v6245_v4 = vand.u32 4294901760, %v6244_v49  ;;  %v11451_v41 = vand.u32 4294901760, %v318_v38 }
 0x58a   : > { %v5441_v36 = vpop.f32.mrf.mxu0  ;;  %v11462_v47 = vsub.f32 %v318_v38, %v11451_v41 }
 0x58b   : > { %v5610_v27 = vpop.f32.mrf.mxu1  ;;  %v5735_v60 = vpop.f32.mrf.mxu2  ;;  %v5442_v49 = vadd.f32 %v5441_v36, %v11194_v43 }
 0x58c   : > { %v5611_v1 = vadd.f32 %v5610_v27, %v5434_v33  ;;  %v5860_v57 = vpop.f32.mrf.mxu3  ;;  %v326_v33 = vld [vmem:[%s7207_s16 + $0x3f8] sm:$0xff] }
 0x58d   : > { %6000 = vmatmul.f32.gmra.mxu0 %v11100_v9 }
 0x58e   : > { %v5736_v5 = vadd.f32 %v5735_v60, %v5611_v1  ;;  %6093 = vmatmul.f32.gmra.mxu1 %v12239_v53 }
 0x58f   : > { %6419 = vmatmul.f32.gmra.mxu3 %v11419_v56  ;;  %v11467_v56 = vand.u32 4294901760, %v326_v33 }
 0x590   : > { %v11455_v34 = vadd.f32 %v5860_v57, %v5736_v5  ;;  %6246 = vmatmul.f32.gmra.mxu2 %v6245_v4  ;;  %v6253_v5 = vand.u32 4294901760, %v6252_v54  ;;  %v11934_v57 = vand.u32 4294901760, %v11462_v47 }
 0x591   : > { %v11478_v36 = vsub.f32 %v326_v33, %v11467_v56 }
 0x592   : > { %v5449_v27 = vpop.f32.mrf.mxu0  ;;  %v6260_v43 = vsub.f32 %v11462_v47, %v11934_v57 }
 0x593   : > { %v5614_v1 = vpop.f32.mrf.mxu1  ;;  %v5740_v61 = vpop.f32.mrf.mxu2  ;;  %v5450_v54 = vadd.f32 %v5449_v27, %v11211_v42 }
 0x594   : > { %v5615_v60 = vadd.f32 %v5614_v1, %v5442_v49  ;;  %v5866_v53 = vpop.f32.mrf.mxu3 }
 0x595   : > { %6004 = vmatmul.f32.gmra.mxu0 %v11132_v25 }
 0x596   : > { %v5741_v4 = vadd.f32 %v5740_v61, %v5615_v60  ;;  %6097 = vmatmul.f32.gmra.mxu1 %v11100_v9  ;;  %v6261_v9 = vand.u32 4294901760, %v6260_v43 }
 0x597   : > { %6423 = vmatmul.f32.gmra.mxu3 %v11435_v24 }
 0x598   : > { %v11471_v38 = vadd.f32 %v5866_v53, %v5741_v4  ;;  %6254 = vmatmul.f32.gmra.mxu2 %v6253_v5  ;;  %v6267_v53 = vand.u32 4294901760, %v11478_v36 }
 0x59a   : > { %v5457_v49 = vpop.f32.mrf.mxu0  ;;  %v6268_v42 = vsub.f32 %v11478_v36, %v6267_v53 }
 0x59b   : > { %v5618_v61 = vpop.f32.mrf.mxu1  ;;  %v5745_v60 = vpop.f32.mrf.mxu2  ;;  %v5458_v33 = vadd.f32 %v5457_v49, %v11232_v51 }
 0x59c   : > { %v5619_v1 = vadd.f32 %v5618_v61, %v5450_v54  ;;  %v5872_v11 = vpop.f32.mrf.mxu3 }
 0x59d   : > { %6008 = vmatmul.f32.gmra.mxu0 %v11159_v12 }
 0x59e   : > { %v5746_v4 = vadd.f32 %v5745_v60, %v5619_v1  ;;  %6101 = vmatmul.f32.gmra.mxu1 %v11132_v25  ;;  %v6269_v60 = vand.u32 4294901760, %v6268_v42 }
 0x59f   : > { %6427 = vmatmul.f32.gmra.mxu3 %v11451_v41 }
 0x5a0   : > { %v11484_v5 = vadd.f32 %v5872_v11, %v5746_v4  ;;  %6262 = vmatmul.f32.gmra.mxu2 %v6261_v9 }
 0x5a2   : > { %v5465_v27 = vpop.f32.mrf.mxu0 }
 0x5a3   : > { %v5622_v43 = vpop.f32.mrf.mxu1  ;;  %v5750_v61 = vpop.f32.mrf.mxu2  ;;  %v5466_v11 = vadd.f32 %v5465_v27, %v11257_v3 }
 0x5a4   : > { %v5623_v54 = vadd.f32 %v5622_v43, %v5458_v33  ;;  %v5878_v1 = vpop.f32.mrf.mxu3 }
 0x5a5   : > { %6012 = vmatmul.f32.gmra.mxu0 %v11182_v26 }
 0x5a6   : > { %v5751_v57 = vadd.f32 %v5750_v61, %v5623_v54  ;;  %6105 = vmatmul.f32.gmra.mxu1 %v11159_v12 }
 0x5a7   : > { %6431 = vmatmul.f32.gmra.mxu3 %v11467_v56 }
 0x5a8   : > { %v11493_v25 = vadd.f32 %v5878_v1, %v5751_v57  ;;  %6270 = vmatmul.f32.gmra.mxu2 %v6269_v60 }
 0x5aa   : > { %v5953_v51 = vpop.f32.mrf.mxu0 }
 0x5ab   : > { %v5626_v9 = vpop.f32.mrf.mxu1  ;;  %v5755_v4 = vpop.f32.mrf.mxu2  ;;  %v5954_v12 = vadd.f32 %v5953_v51, %v11279_v31 }
 0x5ac   : > { %v5627_v49 = vadd.f32 %v5626_v9, %v5466_v11  ;;  %v5884_v33 = vpop.f32.mrf.mxu3 }
 0x5ad   : > { %6485 = vmatmul.f32.vlgmr.msrb.gmra.mxu0 %v11214_v29 }
 0x5ae   : > { %v5756_v43 = vadd.f32 %v5755_v4, %v5627_v49  ;;  %6109 = vmatmul.f32.gmra.mxu1 %v11182_v26  ;;  %v12240_v26 = vand.u32 4294901760, %v11214_v29 }
 0x5af   : > { %6855 = vmatmul.f32.vlgmr.msrb.gmra.mxu3 %v11204_v0 }
 0x5b0   : > { %v11499_v42 = vadd.f32 %v5884_v33, %v5756_v43  ;;  %6758 = vmatmul.f32.vlgmr.msrb.gmra.mxu2 %v11204_v0  ;;  %v12241_v33 = vand.u32 4294901760, %v11238_v28 }
 0x5b2   : > { %v5957_v57 = vpop.f32.mrf.mxu0 }
 0x5b3   : > { %v6050_v3 = vpop.f32.mrf.mxu1  ;;  %v6151_v54 = vpop.f32.mrf.mxu2  ;;  %v5958_v0 = vadd.f32 %v5957_v57, %v11295_v32 }
 0x5b4   : > { %v6051_v27 = vadd.f32 %v6050_v3, %v5954_v12  ;;  %v6372_v61 = vpop.f32.mrf.mxu3 }
 0x5b5   : > { %6490 = vmatmul.f32.gmra.mxu0 %v11238_v28 }
 0x5b6   : > { %v6152_v1 = vadd.f32 %v6151_v54, %v6051_v27  ;;  %6599 = vmatmul.f32.vlgmr.msrb.gmra.mxu1 %v12240_v26  ;;  %v12242_v54 = vand.u32 4294901760, %v11264_v44 }
 0x5b7   : > { %6859 = vmatmul.f32.gmra.mxu3 %v11225_v62 }
 0x5b8   : > { %v11507_v60 = vadd.f32 %v6372_v61, %v6152_v1  ;;  %6762 = vmatmul.f32.gmra.mxu2 %v11225_v62 }
 0x5ba   : > { %v5961_v31 = vpop.f32.mrf.mxu0 }
 0x5bb   : > { %v6054_v11 = vpop.f32.mrf.mxu1  ;;  %v6159_v51 = vpop.f32.mrf.mxu2  ;;  %v5962_v62 = vadd.f32 %v5961_v31, %v11311_v17 }
 0x5bc   : > { %v6055_v9 = vadd.f32 %v6054_v11, %v5958_v0  ;;  %v6376_v49 = vpop.f32.mrf.mxu3  ;;  %v12243_v11 = vand.u32 4294901760, %v11286_v8 }
 0x5bd   : > { %6495 = vmatmul.f32.gmra.mxu0 %v11264_v44 }
 0x5be   : > { %v6160_v4 = vadd.f32 %v6159_v51, %v6055_v9  ;;  %6605 = vmatmul.f32.gmra.mxu1 %v12241_v33 }
 0x5bf   : > { %6863 = vmatmul.f32.gmra.mxu3 %v11249_v37 }
 0x5c0   : > { %v11515_v29 = vadd.f32 %v6376_v49, %v6160_v4  ;;  %6766 = vmatmul.f32.gmra.mxu2 %v11249_v37 }
 0x5c2   : > { %v5965_v32 = vpop.f32.mrf.mxu0 }
 0x5c3   : > { %v6058_v43 = vpop.f32.mrf.mxu1  ;;  %v6167_v57 = vpop.f32.mrf.mxu2  ;;  %v5966_v37 = vadd.f32 %v5965_v32, %v11327_v20 }
 0x5c4   : > { %v6059_v12 = vadd.f32 %v6058_v43, %v5962_v62  ;;  %v6380_v3 = vpop.f32.mrf.mxu3  ;;  %v12244_v62 = vand.u32 4294901760, %v11302_v52 }
 0x5c5   : > { %6500 = vmatmul.f32.gmra.mxu0 %v11286_v8 }
 0x5c6   : > { %v6168_v27 = vadd.f32 %v6167_v57, %v6059_v12  ;;  %6611 = vmatmul.f32.gmra.mxu1 %v12242_v54 }
 0x5c7   : > { %6867 = vmatmul.f32.gmra.mxu3 %v11275_v18 }
 0x5c8   : > { %v11523_v28 = vadd.f32 %v6380_v3, %v6168_v27  ;;  %6770 = vmatmul.f32.gmra.mxu2 %v11275_v18  ;;  %v12245_v27 = vand.u32 4294901760, %v11318_v23 }
 0x5ca   : > { %v5969_v17 = vpop.f32.mrf.mxu0 }
 0x5cb   : > { %v6062_v61 = vpop.f32.mrf.mxu1  ;;  %v6175_v26 = vpop.f32.mrf.mxu2  ;;  %v5970_v18 = vadd.f32 %v5969_v17, %v11343_v22 }
 0x5cc   : > { %v6063_v1 = vadd.f32 %v6062_v61, %v5966_v37  ;;  %v6384_v0 = vpop.f32.mrf.mxu3 }
 0x5cd   : > { %6505 = vmatmul.f32.gmra.mxu0 %v11302_v52 }
 0x5ce   : > { %v6176_v31 = vadd.f32 %v6175_v26, %v6063_v1  ;;  %6617 = vmatmul.f32.gmra.mxu1 %v12243_v11  ;;  %v12246_v26 = vand.u32 4294901760, %v11334_v14 }
 0x5cf   : > { %6871 = vmatmul.f32.gmra.mxu3 %v11291_v48 }
 0x5d0   : > { %v11531_v44 = vadd.f32 %v6384_v0, %v6176_v31  ;;  %6774 = vmatmul.f32.gmra.mxu2 %v11291_v48 }
 0x5d2   : > { %v5973_v20 = vpop.f32.mrf.mxu0 }
 0x5d3   : > { %v6066_v9 = vpop.f32.mrf.mxu1  ;;  %v6183_v49 = vpop.f32.mrf.mxu2  ;;  %v5974_v48 = vadd.f32 %v5973_v20, %v11359_v19 }
 0x5d4   : > { %v6067_v51 = vadd.f32 %v6066_v9, %v5970_v18  ;;  %v6388_v4 = vpop.f32.mrf.mxu3 }
 0x5d5   : > { %6510 = vmatmul.f32.gmra.mxu0 %v11318_v23 }
 0x5d6   : > { %v6184_v33 = vadd.f32 %v6183_v49, %v6067_v51  ;;  %6623 = vmatmul.f32.gmra.mxu1 %v12244_v62 }
 0x5d7   : > { %6875 = vmatmul.f32.gmra.mxu3 %v11307_v39 }
 0x5d8   : > { %v11539_v8 = vadd.f32 %v6388_v4, %v6184_v33  ;;  %6778 = vmatmul.f32.gmra.mxu2 %v11307_v39 }
 0x5da   : > { %v5977_v22 = vpop.f32.mrf.mxu0 }
 0x5db   : > { %v6070_v32 = vpop.f32.mrf.mxu1  ;;  %v6191_v12 = vpop.f32.mrf.mxu2  ;;  %v5978_v39 = vadd.f32 %v5977_v22, %v11375_v21 }
 0x5dc   : > { %v6071_v43 = vadd.f32 %v6070_v32, %v5974_v48  ;;  %v6392_v57 = vpop.f32.mrf.mxu3  ;;  %v12248_v48 = vand.u32 4294901760, %v11366_v35 }
 0x5dd   : > { %6515 = vmatmul.f32.gmra.mxu0 %v11334_v14  ;;  %v12247_v14 = vand.u32 4294901760, %v11350_v15 }
 0x5de   : > { %v6192_v3 = vadd.f32 %v6191_v12, %v6071_v43  ;;  %6629 = vmatmul.f32.gmra.mxu1 %v12245_v27 }
 0x5df   : > { %6879 = vmatmul.f32.gmra.mxu3 %v11323_v40 }
 0x5e0   : > { %v11547_v52 = vadd.f32 %v6392_v57, %v6192_v3  ;;  %6782 = vmatmul.f32.gmra.mxu2 %v11323_v40  ;;  %v12249_v3 = vand.u32 4294901760, %v11382_v55 }
 0x5e2   : > { %v5981_v19 = vpop.f32.mrf.mxu0 }
 0x5e3   : > { %v6074_v54 = vpop.f32.mrf.mxu1  ;;  %v6199_v17 = vpop.f32.mrf.mxu2  ;;  %v5982_v40 = vadd.f32 %v5981_v19, %v11391_v58 }
 0x5e4   : > { %v6075_v37 = vadd.f32 %v6074_v54, %v5978_v39  ;;  %v6396_v61 = vpop.f32.mrf.mxu3 }
 0x5e5   : > { %6520 = vmatmul.f32.gmra.mxu0 %v11350_v15 }
 0x5e6   : > { %v6200_v1 = vadd.f32 %v6199_v17, %v6075_v37  ;;  %6635 = vmatmul.f32.gmra.mxu1 %v12246_v26  ;;  %v12250_v17 = vand.u32 4294901760, %v11398_v59 }
 0x5e7   : > { %6883 = vmatmul.f32.gmra.mxu3 %v11339_v46 }
 0x5e8   : > { %v11555_v23 = vadd.f32 %v6396_v61, %v6200_v1  ;;  %6786 = vmatmul.f32.gmra.mxu2 %v11339_v46 }
 0x5ea   : > { %v5985_v21 = vpop.f32.mrf.mxu0 }
 0x5eb   : > { %v6078_v0 = vpop.f32.mrf.mxu1  ;;  %v5986_v31 = vadd.f32 %v5985_v21, %v11407_v16  ;;  %v6207_v18 = vpop.f32.mrf.mxu2 }
 0x5ec   : > { %v6079_v11 = vadd.f32 %v6078_v0, %v5982_v40  ;;  %v6400_v20 = vpop.f32.mrf.mxu3  ;;  %v12251_v0 = vand.u32 4294901760, %v11414_v50 }
 0x5ed   : > { %6525 = vmatmul.f32.gmra.mxu0 %v11366_v35 }
 0x5ee   : > { %v6208_v9 = vadd.f32 %v6207_v18, %v6079_v11  ;;  %6641 = vmatmul.f32.gmra.mxu1 %v12247_v14 }
 0x5ef   : > { %6887 = vmatmul.f32.gmra.mxu3 %v11355_v63 }
 0x5f0   : > { %v11564_v51 = vadd.f32 %v6400_v20, %v6208_v9  ;;  %6790 = vmatmul.f32.gmra.mxu2 %v11355_v63 }
 0x5f2   : > { %v5989_v46 = vpop.f32.mrf.mxu0 }
 0x5f3   : > { %v6082_v58 = vpop.f32.mrf.mxu1  ;;  %v5990_v49 = vadd.f32 %v5989_v46, %v11423_v2  ;;  %v6215_v4 = vpop.f32.mrf.mxu2  ;;  %v12253_v46 = vand.u32 4294901760, %v11430_v6 }
 0x5f4   : > { %v6083_v16 = vadd.f32 %v6082_v58, %v5986_v31  ;;  %v6404_v33 = vpop.f32.mrf.mxu3  ;;  %v12252_v31 = vld [vmem:[#allocation19_spill] sm:$0xff] }
 0x5f5   : > { %6530 = vmatmul.f32.gmra.mxu0 %v11382_v55 }
 0x5f6   : > { %v6216_v62 = vadd.f32 %v6215_v4, %v6083_v16  ;;  %6647 = vmatmul.f32.gmra.mxu1 %v12248_v48  ;;  %v12254_v48 = vand.u32 4294901760, %v11446_v10 }
 0x5f7   : > { %6891 = vmatmul.f32.gmra.mxu3 %v11371_v30 }
 0x5f8   : > { %v11572_v15 = vadd.f32 %v6404_v33, %v6216_v62  ;;  %6794 = vmatmul.f32.gmra.mxu2 %v11371_v30 }
 0x5fa   : > { %v5993_v63 = vpop.f32.mrf.mxu0 }
 0x5fb   : > { %v6086_v22 = vpop.f32.mrf.mxu1  ;;  %v5994_v32 = vadd.f32 %v5993_v63, %v11439_v45  ;;  %v6223_v43 = vpop.f32.mrf.mxu2 }
 0x5fc   : > { %v6087_v2 = vadd.f32 %v6086_v22, %v5990_v49  ;;  %v6408_v12 = vpop.f32.mrf.mxu3 }
 0x5fd   : > { %6535 = vmatmul.f32.gmra.mxu0 %v11398_v59 }
 0x5fe   : > { %v6224_v57 = vadd.f32 %v6223_v43, %v6087_v2  ;;  %6653 = vmatmul.f32.gmra.mxu1 %v12249_v3 }
 0x5ff   : > { %6895 = vmatmul.f32.gmra.mxu3 %v11387_v7 }
 0x600   : > { %v11580_v35 = vadd.f32 %v6408_v12, %v6224_v57  ;;  %6798 = vmatmul.f32.gmra.mxu2 %v11387_v7  ;;  %v12255_v12 = vand.u32 4294901760, %v11462_v47 }
 0x602   : > { %v5997_v30 = vpop.f32.mrf.mxu0 }
 0x603   : > { %v6090_v27 = vpop.f32.mrf.mxu1  ;;  %v5998_v39 = vadd.f32 %v5997_v30, %v11455_v34  ;;  %v6231_v19 = vpop.f32.mrf.mxu2 }
 0x604   : > { %v6091_v45 = vadd.f32 %v6090_v27, %v5994_v32  ;;  %v6412_v54 = vpop.f32.mrf.mxu3 }
 0x605   : > { %6540 = vmatmul.f32.gmra.mxu0 %v11414_v50 }
 0x606   : > { %v6232_v37 = vadd.f32 %v6231_v19, %v6091_v45  ;;  %6659 = vmatmul.f32.gmra.mxu1 %v12250_v17 }
 0x607   : > { %6899 = vmatmul.f32.gmra.mxu3 %v11403_v13 }
 0x608   : > { %v11588_v55 = vadd.f32 %v6412_v54, %v6232_v37  ;;  %6802 = vmatmul.f32.gmra.mxu2 %v11403_v13 }
 0x60a   : > { %v6001_v7 = vpop.f32.mrf.mxu0 }
 0x60b   : > { %v6094_v61 = vpop.f32.mrf.mxu1  ;;  %v6002_v1 = vadd.f32 %v6001_v7, %v11471_v38  ;;  %v6239_v26 = vpop.f32.mrf.mxu2 }
 0x60c   : > { %v6095_v34 = vadd.f32 %v6094_v61, %v5998_v39  ;;  %v6416_v40 = vpop.f32.mrf.mxu3 }
 0x60d   : > { %6545 = vmatmul.f32.gmra.mxu0 %v11430_v6 }
 0x60e   : > { %v6240_v21 = vadd.f32 %v6239_v26, %v6095_v34  ;;  %6665 = vmatmul.f32.gmra.mxu1 %v12251_v0 }
 0x60f   : > { %6903 = vmatmul.f32.gmra.mxu3 %v12252_v31 }
 0x610   : > { %v11596_v59 = vadd.f32 %v6416_v40, %v6240_v21  ;;  %6806 = vmatmul.f32.gmra.mxu2 %v12252_v31 }
 0x612   : > { %v6005_v13 = vpop.f32.mrf.mxu0 }
 0x613   : > { %v6098_v11 = vpop.f32.mrf.mxu1  ;;  %v6006_v18 = vadd.f32 %v6005_v13, %v11484_v5  ;;  %v6247_v20 = vpop.f32.mrf.mxu2 }
 0x614   : > { %v6099_v38 = vadd.f32 %v6098_v11, %v6002_v1  ;;  %v6420_v9 = vpop.f32.mrf.mxu3 }
 0x615   : > { %6550 = vmatmul.f32.gmra.mxu0 %v11446_v10 }
 0x616   : > { %v6248_v14 = vadd.f32 %v6247_v20, %v6099_v38  ;;  %6671 = vmatmul.f32.gmra.mxu1 %v12253_v46 }
 0x617   : > { %6907 = vmatmul.f32.gmra.mxu3 %v11435_v24 }
 0x618   : > { %v11604_v50 = vadd.f32 %v6420_v9, %v6248_v14  ;;  %6810 = vmatmul.f32.gmra.mxu2 %v11435_v24 }
 0x61a   : > { %v6009_v58 = vpop.f32.mrf.mxu0 }
 0x61b   : > { %v6102_v49 = vpop.f32.mrf.mxu1  ;;  %v6010_v16 = vadd.f32 %v6009_v58, %v11493_v25  ;;  %v6255_v4 = vpop.f32.mrf.mxu2 }
 0x61c   : > { %v6103_v5 = vadd.f32 %v6102_v49, %v6006_v18  ;;  %v6424_v33 = vpop.f32.mrf.mxu3 }
 0x61d   : > { %6555 = vmatmul.f32.gmra.mxu0 %v11462_v47 }
 0x61e   : > { %v6256_v62 = vadd.f32 %v6255_v4, %v6103_v5  ;;  %6677 = vmatmul.f32.gmra.mxu1 %v12254_v48 }
 0x61f   : > { %6911 = vmatmul.f32.gmra.mxu3 %v11451_v41 }
 0x620   : > { %v11612_v6 = vadd.f32 %v6424_v33, %v6256_v62  ;;  %6814 = vmatmul.f32.gmra.mxu2 %v11451_v41 }
 0x622   : > { %v6013_v24 = vpop.f32.mrf.mxu0 }
 0x623   : > { %v6106_v63 = vpop.f32.mrf.mxu1  ;;  %v6014_v22 = vadd.f32 %v6013_v24, %v11499_v42  ;;  %v6263_v32 = vpop.f32.mrf.mxu2 }
 0x624   : > { %v6107_v25 = vadd.f32 %v6106_v63, %v6010_v16  ;;  %v6428_v2 = vpop.f32.mrf.mxu3 }
 0x625   : > { %6560 = vmatmul.f32.gmra.mxu0 %v11478_v36 }
 0x626   : > { %v6264_v43 = vadd.f32 %v6263_v32, %v6107_v25  ;;  %6683 = vmatmul.f32.gmra.mxu1 %v12255_v12 }
 0x627   : > { %6915 = vmatmul.f32.gmra.mxu3 %v11467_v56 }
 0x628   : > { %v11620_v10 = vadd.f32 %v6428_v2, %v6264_v43  ;;  %6818 = vmatmul.f32.gmra.mxu2 %v11467_v56 }
 0x62a   : > { %v6486_v57 = vpop.f32.mrf.mxu0 }
 0x62b   : > { %v6110_v41 = vpop.f32.mrf.mxu1  ;;  %v6271_v42 = vpop.f32.mrf.mxu2  ;;  %v6487_v47 = vadd.f32 %v6486_v57, %v11507_v60 }
 0x62c   : > { %v6111_v3 = vadd.f32 %v6110_v41, %v6014_v22  ;;  %v6432_v30 = vpop.f32.mrf.mxu3 }
 0x62e   : > { %v6272_v27 = vadd.f32 %v6271_v42, %v6111_v3  ;;  %6689 = vmatmul.f32.gmra.mxu1 %v6267_v53 }
 0x630   : > { %v11626_v39 = vadd.f32 %v6432_v30, %v6272_v27 }
 0x632   : > { %v6491_v45 = vpop.f32.mrf.mxu0 }
 0x633   : > { %v6600_v19 = vpop.f32.mrf.mxu1  ;;  %v6759_v37 = vpop.f32.mrf.mxu2  ;;  %v6492_v36 = vadd.f32 %v6491_v45, %v11515_v29 }
 0x634   : > { %v6601_v54 = vadd.f32 %v6600_v19, %v6487_v47  ;;  %v6856_v17 = vpop.f32.mrf.mxu3 }
 0x636   : > { %v6760_v56 = vadd.f32 %v6759_v37, %v6601_v54 }
 0x638   : > { %v6857_v7 = vadd.f32 %v6856_v17, %v6760_v56 }
 0x63a   : > { %v6919_v53 = vmax.f32 %v6857_v7, 0.0  ;;  %v6496_v61 = vpop.f32.mrf.mxu0 }
 0x63b   : > { %v6606_v60 = vpop.f32.mrf.mxu1  ;;  %v6763_v34 = vpop.f32.mrf.mxu2  ;;  %v6497_v0 = vadd.f32 %v6496_v61, %v11523_v28 }
 0x63c   : > { %6935 = vst [vmem:[%s11634_s23] sm:$0xff] %v6919_v53  ;;  %v6607_v1 = vadd.f32 %v6606_v60, %v6492_v36  ;;  %v6860_v26 = vpop.f32.mrf.mxu3 }
 0x63e   : > { %v6764_v40 = vadd.f32 %v6763_v34, %v6607_v1 }
 0x640   : > { %v6861_v21 = vadd.f32 %v6860_v26, %v6764_v40 }
 0x642   : > { %v6920_v31 = vmax.f32 %v6861_v21, 0.0  ;;  %v6501_v13 = vpop.f32.mrf.mxu0 }
 0x643   : > { %v6612_v11 = vpop.f32.mrf.mxu1  ;;  %v6767_v38 = vpop.f32.mrf.mxu2  ;;  %v6502_v14 = vadd.f32 %v6501_v13, %v11531_v44 }
 0x644   : > { %6936 = vst [vmem:[%s11634_s23 + $0x8] sm:$0xff] %v6920_v31  ;;  %v6613_v18 = vadd.f32 %v6612_v11, %v6497_v0  ;;  %v6864_v20 = vpop.f32.mrf.mxu3 }
 0x646   : > { %v6768_v29 = vadd.f32 %v6767_v38, %v6613_v18 }
 0x648   : > { %v6865_v9 = vadd.f32 %v6864_v20, %v6768_v29 }
 0x64a   : > { %v6921_v46 = vmax.f32 %v6865_v9, 0.0  ;;  %v6506_v58 = vpop.f32.mrf.mxu0 }
 0x64b   : > { %v6618_v49 = vpop.f32.mrf.mxu1  ;;  %v6771_v5 = vpop.f32.mrf.mxu2  ;;  %v6507_v62 = vadd.f32 %v6506_v58, %v11539_v8 }
 0x64c   : > { %6937 = vst [vmem:[%s11634_s23 + $0x10] sm:$0xff] %v6921_v46  ;;  %v6619_v16 = vadd.f32 %v6618_v49, %v6502_v14  ;;  %v6868_v4 = vpop.f32.mrf.mxu3 }
 0x64e   : > { %v6772_v28 = vadd.f32 %v6771_v5, %v6619_v16 }
 0x650   : > { %v6869_v33 = vadd.f32 %v6868_v4, %v6772_v28 }
 0x652   : > { %v6922_v48 = vmax.f32 %v6869_v33, 0.0  ;;  %v6511_v24 = vpop.f32.mrf.mxu0 }
 0x653   : > { %v6624_v63 = vpop.f32.mrf.mxu1  ;;  %v6775_v25 = vpop.f32.mrf.mxu2  ;;  %v6512_v43 = vadd.f32 %v6511_v24, %v11547_v52 }
 0x654   : > { %6938 = vst [vmem:[%s11634_s23 + $0x18] sm:$0xff] %v6922_v48  ;;  %v6625_v22 = vadd.f32 %v6624_v63, %v6507_v62  ;;  %v6872_v32 = vpop.f32.mrf.mxu3 }
 0x656   : > { %v6776_v44 = vadd.f32 %v6775_v25, %v6625_v22 }
 0x658   : > { %v6873_v2 = vadd.f32 %v6872_v32, %v6776_v44 }
 0x65a   : > { %v6923_v12 = vmax.f32 %v6873_v2, 0.0  ;;  %v6516_v41 = vpop.f32.mrf.mxu0 }
 0x65b   : > { %v6630_v57 = vpop.f32.mrf.mxu1  ;;  %v6779_v42 = vpop.f32.mrf.mxu2  ;;  %v6517_v47 = vadd.f32 %v6516_v41, %v11555_v23 }
 0x65c   : > { %6939 = vst [vmem:[%s11634_s23 + $0x20] sm:$0xff] %v6923_v12  ;;  %v6631_v3 = vadd.f32 %v6630_v57, %v6512_v43  ;;  %v6876_v30 = vpop.f32.mrf.mxu3 }
 0x65e   : > { %v6780_v8 = vadd.f32 %v6779_v42, %v6631_v3 }
 0x660   : > { %v6877_v27 = vadd.f32 %v6876_v30, %v6780_v8 }
 0x662   : > { %v6924_v45 = vmax.f32 %v6877_v27, 0.0  ;;  %v6521_v19 = vpop.f32.mrf.mxu0 }
 0x663   : > { %v6636_v54 = vpop.f32.mrf.mxu1  ;;  %v6783_v17 = vpop.f32.mrf.mxu2  ;;  %v6522_v36 = vadd.f32 %v6521_v19, %v11564_v51 }
 0x664   : > { %6940 = vst [vmem:[%s11634_s23 + $0x28] sm:$0xff] %v6924_v45  ;;  %v6637_v37 = vadd.f32 %v6636_v54, %v6517_v47  ;;  %v6880_v56 = vpop.f32.mrf.mxu3 }
 0x666   : > { %v6784_v52 = vadd.f32 %v6783_v17, %v6637_v37 }
 0x668   : > { %v6881_v7 = vadd.f32 %v6880_v56, %v6784_v52 }
 0x66a   : > { %v6925_v53 = vmax.f32 %v6881_v7, 0.0  ;;  %v6526_v61 = vpop.f32.mrf.mxu0 }
 0x66b   : > { %v6642_v60 = vpop.f32.mrf.mxu1  ;;  %v6787_v34 = vpop.f32.mrf.mxu2  ;;  %v6527_v21 = vadd.f32 %v6526_v61, %v11572_v15 }
 0x66c   : > { %6941 = vst [vmem:[%s11634_s23 + $0x30] sm:$0xff] %v6925_v53  ;;  %v6643_v1 = vadd.f32 %v6642_v60, %v6522_v36  ;;  %v6884_v26 = vpop.f32.mrf.mxu3 }
 0x66e   : > { %v6788_v23 = vadd.f32 %v6787_v34, %v6643_v1 }
 0x670   : > { %v6885_v40 = vadd.f32 %v6884_v26, %v6788_v23 }
 0x672   : > { %v6926_v0 = vmax.f32 %v6885_v40, 0.0  ;;  %v6531_v31 = vpop.f32.mrf.mxu0 }
 0x673   : > { %v6648_v13 = vpop.f32.mrf.mxu1  ;;  %v6791_v18 = vpop.f32.mrf.mxu2  ;;  %v6532_v29 = vadd.f32 %v6531_v31, %v11580_v35 }
 0x674   : > { %6942 = vst [vmem:[%s11634_s23 + $0x38] sm:$0xff] %v6926_v0  ;;  %v6649_v11 = vadd.f32 %v6648_v13, %v6527_v21  ;;  %v6888_v38 = vpop.f32.mrf.mxu3 }
 0x676   : > { %v6792_v51 = vadd.f32 %v6791_v18, %v6649_v11 }
 0x678   : > { %v6889_v20 = vadd.f32 %v6888_v38, %v6792_v51 }
 0x67a   : > { %v6927_v9 = vmax.f32 %v6889_v20, 0.0  ;;  %v6536_v14 = vpop.f32.mrf.mxu0 }
 0x67b   : > { %v6654_v46 = vpop.f32.mrf.mxu1  ;;  %v6795_v49 = vpop.f32.mrf.mxu2  ;;  %v6537_v4 = vadd.f32 %v6536_v14, %v11588_v55 }
 0x67c   : > { %6943 = vst [vmem:[%s11634_s23 + $0x40] sm:$0xff] %v6927_v9  ;;  %v6655_v58 = vadd.f32 %v6654_v46, %v6532_v29  ;;  %v6892_v16 = vpop.f32.mrf.mxu3 }
 0x67e   : > { %v6796_v15 = vadd.f32 %v6795_v49, %v6655_v58 }
 0x680   : > { %v6893_v5 = vadd.f32 %v6892_v16, %v6796_v15 }
 0x682   : > { %v6928_v28 = vmax.f32 %v6893_v5, 0.0  ;;  %v6541_v33 = vpop.f32.mrf.mxu0 }
 0x683   : > { %v6660_v62 = vpop.f32.mrf.mxu1  ;;  %v6799_v24 = vpop.f32.mrf.mxu2  ;;  %v6542_v25 = vadd.f32 %v6541_v33, %v11596_v59 }
 0x684   : > { %6944 = vst [vmem:[%s11634_s23 + $0x48] sm:$0xff] %v6928_v28  ;;  %v6661_v48 = vadd.f32 %v6660_v62, %v6537_v4  ;;  %v6896_v63 = vpop.f32.mrf.mxu3 }
 0x686   : > { %v6800_v35 = vadd.f32 %v6799_v24, %v6661_v48 }
 0x688   : > { %v6897_v22 = vadd.f32 %v6896_v63, %v6800_v35 }
 0x68a   : > { %v6929_v32 = vmax.f32 %v6897_v22, 0.0  ;;  %v6546_v44 = vpop.f32.mrf.mxu0 }
 0x68b   : > { %v6666_v2 = vpop.f32.mrf.mxu1  ;;  %v6803_v12 = vpop.f32.mrf.mxu2  ;;  %v6547_v3 = vadd.f32 %v6546_v44, %v11604_v50 }
 0x68c   : > { %6945 = vst [vmem:[%s11634_s23 + $0x50] sm:$0xff] %v6929_v32  ;;  %v6667_v43 = vadd.f32 %v6666_v2, %v6542_v25  ;;  %v6900_v41 = vpop.f32.mrf.mxu3 }
 0x68e   : > { %v6804_v55 = vadd.f32 %v6803_v12, %v6667_v43 }
 0x690   : > { %v6901_v57 = vadd.f32 %v6900_v41, %v6804_v55 }
 0x692   : > { %v6930_v42 = vmax.f32 %v6901_v57, 0.0  ;;  %v6551_v30 = vpop.f32.mrf.mxu0 }
 0x693   : > { %v6672_v8 = vpop.f32.mrf.mxu1  ;;  %v6807_v47 = vpop.f32.mrf.mxu2  ;;  %v6552_v54 = vadd.f32 %v6551_v30, %v11612_v6 }
 0x694   : > { %6946 = vst [vmem:[%s11634_s23 + $0x58] sm:$0xff] %v6930_v42  ;;  %v6673_v27 = vadd.f32 %v6672_v8, %v6547_v3  ;;  %v6904_v45 = vpop.f32.mrf.mxu3 }
 0x696   : > { %v6808_v59 = vadd.f32 %v6807_v47, %v6673_v27 }
 0x698   : > { %v6905_v19 = vadd.f32 %v6904_v45, %v6808_v59 }
 0x69a   : > { %v6931_v37 = vmax.f32 %v6905_v19, 0.0  ;;  %v6556_v36 = vpop.f32.mrf.mxu0 }
 0x69b   : > { %v6678_v17 = vpop.f32.mrf.mxu1  ;;  %v6811_v52 = vpop.f32.mrf.mxu2  ;;  %v6557_v61 = vadd.f32 %v6556_v36, %v11620_v10 }
 0x69c   : > { %6947 = vst [vmem:[%s11634_s23 + $0x60] sm:$0xff] %v6931_v37  ;;  %v6679_v56 = vadd.f32 %v6678_v17, %v6552_v54  ;;  %v6908_v7 = vpop.f32.mrf.mxu3 }
 0x69e   : > { %v6812_v50 = vadd.f32 %v6811_v52, %v6679_v56 }
 0x6a0   : > { %v6909_v53 = vadd.f32 %v6908_v7, %v6812_v50 }
 0x6a2   : > { %v6932_v60 = vmax.f32 %v6909_v53, 0.0  ;;  %v6561_v40 = vpop.f32.mrf.mxu0 }
 0x6a3   : > { %v6684_v1 = vpop.f32.mrf.mxu1  ;;  %v6815_v26 = vpop.f32.mrf.mxu2  ;;  %v6562_v0 = vadd.f32 %v6561_v40, %v11626_v39 }
 0x6a4   : > { %6948 = vst [vmem:[%s11634_s23 + $0x68] sm:$0xff] %v6932_v60  ;;  %v6685_v34 = vadd.f32 %v6684_v1, %v6557_v61  ;;  %v6912_v23 = vpop.f32.mrf.mxu3 }
 0x6a6   : > { %v6816_v6 = vadd.f32 %v6815_v26, %v6685_v34 }
 0x6a8   : > { %v6913_v21 = vadd.f32 %v6912_v23, %v6816_v6 }
 0x6aa   : > { %v6933_v31 = vmax.f32 %v6913_v21, 0.0 }
 0x6ab   : > { %v6690_v13 = vpop.f32.mrf.mxu1  ;;  %v6819_v18 = vpop.f32.mrf.mxu2 }
 0x6ac   : > { %6949 = vst [vmem:[%s11634_s23 + $0x70] sm:$0xff] %v6933_v31  ;;  %v6691_v11 = vadd.f32 %v6690_v13, %v6562_v0  ;;  %v6916_v38 = vpop.f32.mrf.mxu3 }
 0x6ae   : > { %v6820_v51 = vadd.f32 %v6819_v18, %v6691_v11 }
 0x6b0   : > { %v6917_v10 = vadd.f32 %v6916_v38, %v6820_v51 }
 0x6b2   : > { %v6934_v20 = vmax.f32 %v6917_v10, 0.0 }
 0x6b4   : > { %6950 = vst [vmem:[%s11634_s23 + $0x78] sm:$0xff] %v6934_v20 }
 0x6b5 PF: > { %s13_s12 = sadd.s32 1, %s7048_s12  }
 0x6b6   : > { %p10_p4 = scmp.ge.s32.totalorder %s13_s12, 4  }
 0x6b8   :  { %12 = sbr.rel (!%p10_p4) target bundleno = 1 (0x1), region = 65 }

</bundles_post_ra>
